<compile_context>
chip_gen: v6e
topology: v6e:2x2x1
jax: 0.10.0
libtpu: 0.0.40
codegen_flags: <defaults>
</compile_context>

<pallas_src>
import jax
import jax.numpy as jnp
from jax import lax
from jax.experimental import pallas as pl
from jax.experimental.pallas import tpu as pltpu


def _round_up(x, m):
    return (x + m - 1) // m * m


# --------------------------------------------------------------------------
# 1x1 conv as an MXU matmul that also produces partial BN statistics of its
# raw output, optionally fusing the *previous* layer's BN + ReLU6 on the A
# tiles (used by the projection conv to consume the raw depthwise output).
# --------------------------------------------------------------------------

def _stats_tile(out_f32, tn):
    """Pack per-column (sum, sumsq) of a (tm, tn) f32 tile into an (8, tn) tile."""
    s = jnp.sum(out_f32, axis=0, keepdims=True)            # (1, tn)
    q = jnp.sum(out_f32 * out_f32, axis=0, keepdims=True)  # (1, tn)
    rows = lax.broadcasted_iota(jnp.int32, (8, tn), 0)
    return jnp.where(rows == 0, s, jnp.where(rows == 1, q, 0.0))


def _make_mm_single_kernel(fuse_in, mask_rows, m_valid, tm, tn):
    """Single K-block matmul: no accumulator scratch, no pl.when guards."""
    def kernel(*refs):
        if fuse_in:
            a_ref, b_ref, sc_ref, sh_ref, o_ref, st_ref = refs
        else:
            a_ref, b_ref, o_ref, st_ref = refs
        a = a_ref[...]
        if fuse_in:
            a32 = jnp.clip(a.astype(jnp.float32) * sc_ref[...] + sh_ref[...],
                           0.0, 6.0)
            if mask_rows:
                row = (lax.broadcasted_iota(jnp.int32, (tm, 1), 0)
                       + pl.program_id(0) * tm)
                a32 = jnp.where(row < m_valid, a32, 0.0)
            a = a32.astype(jnp.bfloat16)
        out = jnp.dot(a, b_ref[...], preferred_element_type=jnp.float32)
        o_ref[...] = out.astype(o_ref.dtype)
        st_ref[...] = _stats_tile(out, tn)
    return kernel


def _make_mm_multi_kernel(fuse_in, mask_rows, m_valid, tm, tn):
    """General K-tiled matmul with an f32 VMEM accumulator (K on the last,
    'arbitrary' grid axis)."""
    def kernel(*refs):
        if fuse_in:
            a_ref, b_ref, sc_ref, sh_ref, o_ref, st_ref, acc_ref = refs
        else:
            a_ref, b_ref, o_ref, st_ref, acc_ref = refs

        @pl.when(pl.program_id(2) == 0)
        def _():
            acc_ref[...] = jnp.zeros_like(acc_ref)

        a = a_ref[...]
        if fuse_in:
            a32 = jnp.clip(a.astype(jnp.float32) * sc_ref[...] + sh_ref[...],
                           0.0, 6.0)
            if mask_rows:
                row = (lax.broadcasted_iota(jnp.int32, (tm, 1), 0)
                       + pl.program_id(0) * tm)
                a32 = jnp.where(row < m_valid, a32, 0.0)
            a = a32.astype(jnp.bfloat16)
        acc_ref[...] += jnp.dot(a, b_ref[...],
                                preferred_element_type=jnp.float32)

        @pl.when(pl.program_id(2) == pl.num_programs(2) - 1)
        def _():
            out = acc_ref[...]
            o_ref[...] = out.astype(o_ref.dtype)
            st_ref[...] = _stats_tile(out, tn)
    return kernel


def conv1x1_bn_producer(a_bf, w, in_scale=None, in_shift=None):
    """(M, K) @ (K, N) 1x1 conv.

    a_bf is the raw (pre-BN) bf16 activation of the previous layer; if
    in_scale / in_shift are given, that layer's BN + ReLU6 is applied to the
    A tiles in-kernel (f32) before the MXU dot.  Returns the raw bf16 conv
    output plus per-channel (sum, sum-of-squares) of its f32 result so the
    *next* consumer can normalize without a stats re-read.
    """
    M, K = a_bf.shape
    Nc = w.shape[1]
    fuse_in = in_scale is not None

    tm = min(512, _round_up(M, 8))
    Mp = _round_up(M, tm)
    if K <= 1024:                       # every MobileNetV2 1x1 conv hits this
        tk, Kp = K, K
    else:
        tk = 512
        Kp = _round_up(K, tk)
    if Nc <= 1024:
        tn, Np = Nc, Nc                 # full-N block: lane-dense, no padding
    else:
        tn = 256
        Np = _round_up(Nc, tn)

    num_i, num_j, num_k = Mp // tm, Np // tn, Kp // tk
    mask_rows = fuse_in and (Mp != M)   # padded rows would be shifted by BN

    a = a_bf.astype(jnp.bfloat16)
    if (Mp, Kp) != (M, K):
        a = jnp.pad(a, ((0, Mp - M), (0, Kp - K)))
    b = w.astype(jnp.bfloat16)
    if (Kp, Np) != (K, Nc):
        b = jnp.pad(b, ((0, Kp - K), (0, Np - Nc)))

    inputs = [a, b]
    if fuse_in:
        sc = in_scale.reshape(1, K).astype(jnp.float32)
        sh = in_shift.reshape(1, K).astype(jnp.float32)
        if Kp != K:
            sc = jnp.pad(sc, ((0, 0), (0, Kp - K)))
            sh = jnp.pad(sh, ((0, 0), (0, Kp - K)))
        inputs += [sc, sh]

    out_shape = (jax.ShapeDtypeStruct((Mp, Np), jnp.bfloat16),
                 jax.ShapeDtypeStruct((num_i * 8, Np), jnp.float32))

    if num_k == 1:
        grid = (num_i, num_j)
        a_spec = pl.BlockSpec((tm, tk), lambda i, j: (i, 0))
        b_spec = pl.BlockSpec((tk, tn), lambda i, j: (0, j))
        s_spec = pl.BlockSpec((1, tk), lambda i, j: (0, 0))
        o_spec = pl.BlockSpec((tm, tn), lambda i, j: (i, j))
        t_spec = pl.BlockSpec((8, tn), lambda i, j: (i, j))
        kernel = _make_mm_single_kernel(fuse_in, mask_rows, M, tm, tn)
        scratch = []
        dims = ("parallel", "parallel")
    else:
        grid = (num_i, num_j, num_k)
        a_spec = pl.BlockSpec((tm, tk), lambda i, j, k: (i, k))
        b_spec = pl.BlockSpec((tk, tn), lambda i, j, k: (k, j))
        s_spec = pl.BlockSpec((1, tk), lambda i, j, k: (0, k))
        o_spec = pl.BlockSpec((tm, tn), lambda i, j, k: (i, j))
        t_spec = pl.BlockSpec((8, tn), lambda i, j, k: (i, j))
        kernel = _make_mm_multi_kernel(fuse_in, mask_rows, M, tm, tn)
        scratch = [pltpu.VMEM((tm, tn), jnp.float32)]
        dims = ("parallel", "parallel", "arbitrary")

    in_specs = [a_spec, b_spec]
    if fuse_in:
        in_specs += [s_spec, s_spec]

    out, stats = pl.pallas_call(
        kernel,
        out_shape=out_shape,
        grid=grid,
        in_specs=in_specs,
        out_specs=(o_spec, t_spec),
        scratch_shapes=scratch,
        compiler_params=pltpu.CompilerParams(
            dimension_semantics=dims,
            vmem_limit_bytes=32 * 1024 * 1024),
        cost_estimate=pl.CostEstimate(
            flops=2 * Mp * Np * Kp,
            transcendentals=0,
            bytes_accessed=(Mp * Kp + Kp * Np + Mp * Np) * 2
            + num_i * 8 * Np * 4),
    )(*inputs)

    if (Mp, Np) != (M, Nc):
        out = out[:M, :Nc]
    stats = stats.reshape(num_i, 8, Np)
    sums = stats[:, 0, :Nc].sum(axis=0)
    sqs = stats[:, 1, :Nc].sum(axis=0)
    return out, sums, sqs


# --------------------------------------------------------------------------
# Depthwise 3x3 conv (pad=1), with the preceding BN + ReLU6 fused onto the
# input and partial BN statistics of its own raw output emitted per image.
# The 1-pixel zero halo is built in a VMEM scratch (no jnp.pad in HBM).
# --------------------------------------------------------------------------
# TODO(synk): for large spatial sizes on v7x (64 MiB VMEM), tile over output
# rows with a 1-row halo instead of one whole padded image per batch element.

def _make_dw_kernel(stride, H, W, Ho, Wo, fuse_in):
    def kernel(*refs):
        if fuse_in:
            x_ref, w_ref, sc_ref, sh_ref, o_ref, st_ref, pad_ref = refs
        else:
            x_ref, w_ref, o_ref, st_ref, pad_ref = refs
        C = x_ref.shape[-1]

        x = x_ref[...].astype(jnp.float32)                   # (1, H, W, C)
        if fuse_in:                                          # expand BN + ReLU6
            x = jnp.clip(x * sc_ref[...] + sh_ref[...], 0.0, 6.0)

        # zero halo in VMEM, then place the activation in the interior
        pad_ref[...] = jnp.zeros_like(pad_ref)
        pad_ref[:, 1:H + 1, 1:W + 1, :] = x
        xp = pad_ref[...]

        w = w_ref[...].astype(jnp.float32)                   # (3, 3, C)
        acc = jnp.zeros((1, Ho, Wo, C), jnp.float32)
        for di in range(3):
            for dj in range(3):
                if stride == 1:
                    win = xp[:, di:di + Ho, dj:dj + Wo, :]
                else:
                    win = lax.slice(
                        xp, (0, di, dj, 0),
                        (1, di + stride * (Ho - 1) + 1,
                         dj + stride * (Wo - 1) + 1, C),
                        (1, stride, stride, 1))
                acc = acc + win * w[di, dj, :]

        o_ref[...] = acc.astype(o_ref.dtype)

        s = jnp.sum(acc, axis=(0, 1, 2)).reshape(1, C)
        q = jnp.sum(acc * acc, axis=(0, 1, 2)).reshape(1, C)
        rows = lax.broadcasted_iota(jnp.int32, (8, C), 0)
        st_ref[...] = jnp.where(rows == 0, s, jnp.where(rows == 1, q, 0.0))
    return kernel


def depthwise_conv3x3_bn_producer(x, w, stride, in_scale=None, in_shift=None):
    """x: (N,H,W,C) bf16 raw pre-BN activation (or block input), w: (3,3,C).
    Returns raw bf16 depthwise conv output plus per-channel (sum, sumsq)."""
    Nb, H, W, C = x.shape
    Ho = (H + 2 - 3) // stride + 1
    Wo = (W + 2 - 3) // stride + 1
    fuse_in = in_scale is not None

    inputs = [x, w.astype(jnp.float32)]
    in_specs = [pl.BlockSpec((1, H, W, C), lambda n: (n, 0, 0, 0)),
                pl.BlockSpec((3, 3, C), lambda n: (0, 0, 0))]
    if fuse_in:
        inputs += [in_scale.reshape(1, C).astype(jnp.float32),
                   in_shift.reshape(1, C).astype(jnp.float32)]
        in_specs += [pl.BlockSpec((1, C), lambda n: (0, 0)),
                     pl.BlockSpec((1, C), lambda n: (0, 0))]

    out, stats = pl.pallas_call(
        _make_dw_kernel(stride, H, W, Ho, Wo, fuse_in),
        out_shape=(jax.ShapeDtypeStruct((Nb, Ho, Wo, C), jnp.bfloat16),
                   jax.ShapeDtypeStruct((Nb * 8, C), jnp.float32)),
        grid=(Nb,),
        in_specs=in_specs,
        out_specs=(pl.BlockSpec((1, Ho, Wo, C), lambda n: (n, 0, 0, 0)),
                   pl.BlockSpec((8, C), lambda n: (n, 0))),
        scratch_shapes=[pltpu.VMEM((1, H + 2, W + 2, C), jnp.float32)],
        compiler_params=pltpu.CompilerParams(
            dimension_semantics=("parallel",),
            vmem_limit_bytes=32 * 1024 * 1024),
    )(*inputs)

    stats = stats.reshape(Nb, 8, C)
    sums = stats[:, 0, :].sum(axis=0)
    sqs = stats[:, 1, :].sum(axis=0)
    return out, sums, sqs


# --------------------------------------------------------------------------
# Final BN normalize (+ optional residual); the only standalone elementwise
# pass left in the block (nothing downstream to fuse it into).
# --------------------------------------------------------------------------

def _make_bn_out_kernel(has_res):
    def kernel(*refs):
        if has_res:
            x_ref, sc_ref, sh_ref, r_ref, o_ref = refs
        else:
            x_ref, sc_ref, sh_ref, o_ref = refs
        y = x_ref[...].astype(jnp.float32) * sc_ref[...] + sh_ref[...]
        if has_res:
            y = y + r_ref[...].astype(jnp.float32)
        o_ref[...] = y.astype(o_ref.dtype)
    return kernel


def bn_out(x2d, scale, shift, residual=None):
    M, C = x2d.shape
    tm = min(512, _round_up(M, 8))
    Mp = _round_up(M, tm)
    pad = Mp - M

    x = jnp.pad(x2d, ((0, pad), (0, 0))) if pad else x2d
    inputs = [x, scale.reshape(1, C).astype(jnp.float32),
              shift.reshape(1, C).astype(jnp.float32)]
    in_specs = [pl.BlockSpec((tm, C), lambda i: (i, 0)),
                pl.BlockSpec((1, C), lambda i: (0, 0)),
                pl.BlockSpec((1, C), lambda i: (0, 0))]
    if residual is not None:
        r = jnp.pad(residual, ((0, pad), (0, 0))) if pad else residual
        inputs.append(r)
        in_specs.append(pl.BlockSpec((tm, C), lambda i: (i, 0)))

    y = pl.pallas_call(
        _make_bn_out_kernel(residual is not None),
        out_shape=jax.ShapeDtypeStruct((Mp, C), jnp.float32),
        grid=(Mp // tm,),
        in_specs=in_specs,
        out_specs=pl.BlockSpec((tm, C), lambda i: (i, 0)),
        compiler_params=pltpu.CompilerParams(
            dimension_semantics=("parallel",)),
    )(*inputs)
    return y[:M] if pad else y


# --------------------------------------------------------------------------
# BN batch-statistics -> per-channel (scale, shift).  Tiny per-channel math;
# stays in plain XLA (f32 sums come straight from the producers' f32 accs).
# --------------------------------------------------------------------------

def _bn_scale_shift(sums, sqs, count, gamma, beta, eps=1e-5):
    inv = 1.0 / count
    mean = sums * inv
    var = jnp.maximum(sqs * inv - mean * mean, 0.0)   # biased var, clamped >= 0
    scale = gamma * lax.rsqrt(var + eps)
    shift = beta - mean * scale
    return scale, shift


# ------------------------------ block forward -------------------------------

def inverted_residual_forward(p, x_nchw):
    eps = 1e-5
    x_nhwc = jnp.transpose(x_nchw, (0, 2, 3, 1)).astype(jnp.float32)  # NCHW->NHWC
    Nb, H, W, Cin = x_nhwc.shape
    stride, oup = p['stride'], p['oup']
    use_res = (stride == 1) and (Cin == oup)
    x_bf = x_nhwc.astype(jnp.bfloat16)

    if 'expand_w' in p:                                      # 1x1 expansion
        hidden = p['expand_w'].shape[1]
        m1 = Nb * H * W
        h_raw, s1, q1 = conv1x1_bn_producer(x_bf.reshape(m1, Cin),
                                            p['expand_w'])
        sc1, sh1 = _bn_scale_shift(s1, q1, m1, p['expand_g'], p['expand_b'], eps)
        dw_in = h_raw.reshape(Nb, H, W, hidden)
        dw_sc, dw_sh = sc1, sh1
    else:
        hidden = Cin
        dw_in = x_bf
        dw_sc = dw_sh = None

    # 3x3 depthwise conv; expand BN + ReLU6 fused onto its input
    d_raw, s2, q2 = depthwise_conv3x3_bn_producer(dw_in, p['dw_w'], stride,
                                                  dw_sc, dw_sh)
    Ho, Wo = d_raw.shape[1], d_raw.shape[2]
    m2 = Nb * Ho * Wo
    sc2, sh2 = _bn_scale_shift(s2, q2, m2, p['dw_g'], p['dw_b'], eps)

    # 1x1 projection; dw BN + ReLU6 fused onto its A tiles
    p_raw, s3, q3 = conv1x1_bn_producer(d_raw.reshape(m2, hidden), p['proj_w'],
                                        in_scale=sc2, in_shift=sh2)
    sc3, sh3 = _bn_scale_shift(s3, q3, m2, p['proj_g'], p['proj_b'], eps)

    # final BN (+ residual)
    res = x_nhwc.reshape(m2, oup) if use_res else None
    y = bn_out(p_raw, sc3, sh3, residual=res)
    y = y.reshape(Nb, Ho, Wo, oup)
    return jnp.transpose(y, (0, 3, 1, 2))                    # back to NCHW


# --------------------------- deterministic init ------------------------------

def init_inverted_residual_params(key, inp, oup, stride, expand_ratio):
    assert stride in (1, 2)
    hidden = int(round(inp * expand_ratio))
    k_exp, k_dw, k_proj = jax.random.split(key, 3)
    p = {'stride': stride, 'oup': oup}
    if expand_ratio != 1:
        p['expand_w'] = (jax.random.normal(k_exp, (inp, hidden), jnp.float32)
                         * (2.0 / hidden) ** 0.5)
        p['expand_g'] = jnp.ones((hidden,), jnp.float32)
        p['expand_b'] = jnp.zeros((hidden,), jnp.float32)
    p['dw_w'] = (jax.random.normal(k_dw, (3, 3, hidden), jnp.float32)
                 * (2.0 / 9.0) ** 0.5)
    p['dw_g'] = jnp.ones((hidden,), jnp.float32)
    p['dw_b'] = jnp.zeros((hidden,), jnp.float32)
    p['proj_w'] = (jax.random.normal(k_proj, (hidden, oup), jnp.float32)
                   * (2.0 / oup) ** 0.5)
    p['proj_g'] = jnp.ones((oup,), jnp.float32)
    p['proj_b'] = jnp.zeros((oup,), jnp.float32)
    return p


# ---------------------------------- main -------------------------------------

if __name__ == "__main__":
    key = jax.random.PRNGKey(0)
    k_params, k_x = jax.random.split(key)

    # Small config consistent with the module: exercises the expansion conv,
    # the depthwise conv, and the residual connection (stride=1, inp==oup).
    batch, inp, oup, spatial = 2, 32, 32, 16
    stride, expand_ratio = 1, 6

    params = init_inverted_residual_params(k_params, inp, oup, stride,
                                            expand_ratio)
    x = jax.random.normal(k_x, (batch, inp, spatial, spatial), jnp.float32)

    fwd = jax.jit(lambda xx: inverted_residual_forward(params, xx))
    out = jax.block_until_ready(fwd(x))

    assert out.shape == (batch, oup, spatial, spatial), out.shape
    assert bool(jnp.all(jnp.isfinite(out)))
    print("KERNEL_OK")
</pallas_src>

<mosaic_0001>
module attributes {stable_mosaic.version = 11 : i64} {
  func.func @kernel(%arg0: i32, %arg1: memref<1x16x16x192xbf16, #tpu.memory_space<vmem>>, %arg2: memref<3x3x192xf32, #tpu.memory_space<vmem>>, %arg3: memref<1x192xf32, #tpu.memory_space<vmem>>, %arg4: memref<1x192xf32, #tpu.memory_space<vmem>>, %arg5: memref<1x16x16x192xbf16, #tpu.memory_space<vmem>>, %arg6: memref<8x192xf32, #tpu.memory_space<vmem>>, %arg7: memref<1x18x18x192xf32, #tpu.memory_space<vmem>>) attributes {dimension_semantics = [#tpu.dimension_semantics<parallel>], iteration_bounds = array<i64: 2>, scalar_prefetch = 0 : i64, scratch_operands = 1 : i64, tpu.core_type = #tpu.core_type<tc>, window_params = [{transform_indices = @transform_0, window_bounds = array<i64: 1, 16, 16, 192>}, {pipeline_mode = #tpu.pipeline_mode<synchronous>, transform_indices = @transform_1, window_bounds = array<i64: 3, 3, 192>}, {pipeline_mode = #tpu.pipeline_mode<synchronous>, transform_indices = @transform_2, window_bounds = array<i64: 1, 192>}, {pipeline_mode = #tpu.pipeline_mode<synchronous>, transform_indices = @transform_3, window_bounds = array<i64: 1, 192>}, {transform_indices = @transform_4, window_bounds = array<i64: 1, 16, 16, 192>}, {transform_indices = @transform_5, window_bounds = array<i64: 8, 192>}]} {
    %c0 = arith.constant 0 : index
    %c0_0 = arith.constant 0 : index
    %c0_1 = arith.constant 0 : index
    %c0_2 = arith.constant 0 : index
    %0 = vector.load %arg1[%c0, %c0_0, %c0_1, %c0_2] : memref<1x16x16x192xbf16, #tpu.memory_space<vmem>>, vector<1x16x16x192xbf16>
    %1 = arith.extf %0 : vector<1x16x16x192xbf16> to vector<1x16x16x192xf32>
    %c0_3 = arith.constant 0 : index
    %c0_4 = arith.constant 0 : index
    %2 = vector.load %arg3[%c0_3, %c0_4] : memref<1x192xf32, #tpu.memory_space<vmem>>, vector<1x192xf32>
    %3 = vector.shape_cast %2 : vector<1x192xf32> to vector<1x1x1x192xf32>
    %4 = vector.broadcast %3 : vector<1x1x1x192xf32> to vector<1x16x16x192xf32>
    %5 = arith.mulf %1, %4 : vector<1x16x16x192xf32>
    %c0_5 = arith.constant 0 : index
    %c0_6 = arith.constant 0 : index
    %6 = vector.load %arg4[%c0_5, %c0_6] : memref<1x192xf32, #tpu.memory_space<vmem>>, vector<1x192xf32>
    %7 = vector.shape_cast %6 : vector<1x192xf32> to vector<1x1x1x192xf32>
    %8 = vector.broadcast %7 : vector<1x1x1x192xf32> to vector<1x16x16x192xf32>
    %9 = arith.addf %5, %8 : vector<1x16x16x192xf32>
    %cst = arith.constant 0.000000e+00 : f32
    %cst_7 = arith.constant 6.000000e+00 : f32
    %10 = vector.broadcast %cst : f32 to vector<1x16x16x192xf32>
    %11 = arith.maximumf %10, %9 : vector<1x16x16x192xf32>
    %12 = vector.broadcast %cst_7 : f32 to vector<1x16x16x192xf32>
    %13 = arith.minimumf %12, %11 : vector<1x16x16x192xf32>
    %cst_8 = arith.constant 0.000000e+00 : f32
    %14 = vector.broadcast %cst_8 : f32 to vector<1x18x18x192xf32>
    %c0_9 = arith.constant 0 : index
    %c0_10 = arith.constant 0 : index
    %c0_11 = arith.constant 0 : index
    %c0_12 = arith.constant 0 : index
    %15 = vector.load %arg7[%c0_9, %c0_10, %c0_11, %c0_12] : memref<1x18x18x192xf32, #tpu.memory_space<vmem>>, vector<1x18x18x192xf32>
    tpu.vector_store %arg7[%c0_9, %c0_10, %c0_11, %c0_12], %14 {strides = array<i32>} : memref<1x18x18x192xf32, #tpu.memory_space<vmem>>, vector<1x18x18x192xf32>,
    %c0_13 = arith.constant 0 : index
    %c1 = arith.constant 1 : index
    %c1_14 = arith.constant 1 : index
    %c0_15 = arith.constant 0 : index
    %16 = vector.load %arg7[%c0_13, %c1, %c1_14, %c0_15] : memref<1x18x18x192xf32, #tpu.memory_space<vmem>>, vector<1x16x16x192xf32>
    tpu.vector_store %arg7[%c0_13, %c1, %c1_14, %c0_15], %13 {strides = array<i32>} : memref<1x18x18x192xf32, #tpu.memory_space<vmem>>, vector<1x16x16x192xf32>,
    %c0_16 = arith.constant 0 : index
    %c0_17 = arith.constant 0 : index
    %c0_18 = arith.constant 0 : index
    %c0_19 = arith.constant 0 : index
    %17 = vector.load %arg7[%c0_16, %c0_17, %c0_18, %c0_19] : memref<1x18x18x192xf32, #tpu.memory_space<vmem>>, vector<1x18x18x192xf32>
    %c0_20 = arith.constant 0 : index
    %c0_21 = arith.constant 0 : index
    %c0_22 = arith.constant 0 : index
    %18 = vector.load %arg2[%c0_20, %c0_21, %c0_22] : memref<3x3x192xf32, #tpu.memory_space<vmem>>, vector<3x3x192xf32>
    %cst_23 = arith.constant 0.000000e+00 : f32
    %19 = vector.broadcast %cst_23 : f32 to vector<1x16x16x192xf32>
    %20 = vector.extract_strided_slice %17 {offsets = [0, 0, 0, 0], sizes = [1, 16, 16, 192], strides = [1, 1, 1, 1]} : vector<1x18x18x192xf32> to vector<1x16x16x192xf32>
    %21 = vector.extract_strided_slice %18 {offsets = [0, 0, 0], sizes = [1, 1, 192], strides = [1, 1, 1]} : vector<3x3x192xf32> to vector<1x1x192xf32>
    %22 = vector.shape_cast %21 : vector<1x1x192xf32> to vector<192xf32>
    %23 = vector.shape_cast %22 : vector<192xf32> to vector<1x1x1x192xf32>
    %24 = vector.broadcast %23 : vector<1x1x1x192xf32> to vector<1x16x16x192xf32>
    %25 = arith.mulf %20, %24 : vector<1x16x16x192xf32>
    %26 = arith.addf %19, %25 : vector<1x16x16x192xf32>
    %27 = vector.extract_strided_slice %17 {offsets = [0, 0, 1, 0], sizes = [1, 16, 16, 192], strides = [1, 1, 1, 1]} : vector<1x18x18x192xf32> to vector<1x16x16x192xf32>
    %28 = vector.extract_strided_slice %18 {offsets = [0, 1, 0], sizes = [1, 1, 192], strides = [1, 1, 1]} : vector<3x3x192xf32> to vector<1x1x192xf32>
    %29 = vector.shape_cast %28 : vector<1x1x192xf32> to vector<192xf32>
    %30 = vector.shape_cast %29 : vector<192xf32> to vector<1x1x1x192xf32>
    %31 = vector.broadcast %30 : vector<1x1x1x192xf32> to vector<1x16x16x192xf32>
    %32 = arith.mulf %27, %31 : vector<1x16x16x192xf32>
    %33 = arith.addf %26, %32 : vector<1x16x16x192xf32>
    %34 = vector.extract_strided_slice %17 {offsets = [0, 0, 2, 0], sizes = [1, 16, 16, 192], strides = [1, 1, 1, 1]} : vector<1x18x18x192xf32> to vector<1x16x16x192xf32>
    %35 = vector.extract_strided_slice %18 {offsets = [0, 2, 0], sizes = [1, 1, 192], strides = [1, 1, 1]} : vector<3x3x192xf32> to vector<1x1x192xf32>
    %36 = vector.shape_cast %35 : vector<1x1x192xf32> to vector<192xf32>
    %37 = vector.shape_cast %36 : vector<192xf32> to vector<1x1x1x192xf32>
    %38 = vector.broadcast %37 : vector<1x1x1x192xf32> to vector<1x16x16x192xf32>
    %39 = arith.mulf %34, %38 : vector<1x16x16x192xf32>
    %40 = arith.addf %33, %39 : vector<1x16x16x192xf32>
    %41 = vector.extract_strided_slice %17 {offsets = [0, 1, 0, 0], sizes = [1, 16, 16, 192], strides = [1, 1, 1, 1]} : vector<1x18x18x192xf32> to vector<1x16x16x192xf32>
    %42 = vector.extract_strided_slice %18 {offsets = [1, 0, 0], sizes = [1, 1, 192], strides = [1, 1, 1]} : vector<3x3x192xf32> to vector<1x1x192xf32>
    %43 = vector.shape_cast %42 : vector<1x1x192xf32> to vector<192xf32>
    %44 = vector.shape_cast %43 : vector<192xf32> to vector<1x1x1x192xf32>
    %45 = vector.broadcast %44 : vector<1x1x1x192xf32> to vector<1x16x16x192xf32>
    %46 = arith.mulf %41, %45 : vector<1x16x16x192xf32>
    %47 = arith.addf %40, %46 : vector<1x16x16x192xf32>
    %48 = vector.extract_strided_slice %17 {offsets = [0, 1, 1, 0], sizes = [1, 16, 16, 192], strides = [1, 1, 1, 1]} : vector<1x18x18x192xf32> to vector<1x16x16x192xf32>
    %49 = vector.extract_strided_slice %18 {offsets = [1, 1, 0], sizes = [1, 1, 192], strides = [1, 1, 1]} : vector<3x3x192xf32> to vector<1x1x192xf32>
    %50 = vector.shape_cast %49 : vector<1x1x192xf32> to vector<192xf32>
    %51 = vector.shape_cast %50 : vector<192xf32> to vector<1x1x1x192xf32>
    %52 = vector.broadcast %51 : vector<1x1x1x192xf32> to vector<1x16x16x192xf32>
    %53 = arith.mulf %48, %52 : vector<1x16x16x192xf32>
    %54 = arith.addf %47, %53 : vector<1x16x16x192xf32>
    %55 = vector.extract_strided_slice %17 {offsets = [0, 1, 2, 0], sizes = [1, 16, 16, 192], strides = [1, 1, 1, 1]} : vector<1x18x18x192xf32> to vector<1x16x16x192xf32>
    %56 = vector.extract_strided_slice %18 {offsets = [1, 2, 0], sizes = [1, 1, 192], strides = [1, 1, 1]} : vector<3x3x192xf32> to vector<1x1x192xf32>
    %57 = vector.shape_cast %56 : vector<1x1x192xf32> to vector<192xf32>
    %58 = vector.shape_cast %57 : vector<192xf32> to vector<1x1x1x192xf32>
    %59 = vector.broadcast %58 : vector<1x1x1x192xf32> to vector<1x16x16x192xf32>
    %60 = arith.mulf %55, %59 : vector<1x16x16x192xf32>
    %61 = arith.addf %54, %60 : vector<1x16x16x192xf32>
    %62 = vector.extract_strided_slice %17 {offsets = [0, 2, 0, 0], sizes = [1, 16, 16, 192], strides = [1, 1, 1, 1]} : vector<1x18x18x192xf32> to vector<1x16x16x192xf32>
    %63 = vector.extract_strided_slice %18 {offsets = [2, 0, 0], sizes = [1, 1, 192], strides = [1, 1, 1]} : vector<3x3x192xf32> to vector<1x1x192xf32>
    %64 = vector.shape_cast %63 : vector<1x1x192xf32> to vector<192xf32>
    %65 = vector.shape_cast %64 : vector<192xf32> to vector<1x1x1x192xf32>
    %66 = vector.broadcast %65 : vector<1x1x1x192xf32> to vector<1x16x16x192xf32>
    %67 = arith.mulf %62, %66 : vector<1x16x16x192xf32>
    %68 = arith.addf %61, %67 : vector<1x16x16x192xf32>
    %69 = vector.extract_strided_slice %17 {offsets = [0, 2, 1, 0], sizes = [1, 16, 16, 192], strides = [1, 1, 1, 1]} : vector<1x18x18x192xf32> to vector<1x16x16x192xf32>
    %70 = vector.extract_strided_slice %18 {offsets = [2, 1, 0], sizes = [1, 1, 192], strides = [1, 1, 1]} : vector<3x3x192xf32> to vector<1x1x192xf32>
    %71 = vector.shape_cast %70 : vector<1x1x192xf32> to vector<192xf32>
    %72 = vector.shape_cast %71 : vector<192xf32> to vector<1x1x1x192xf32>
    %73 = vector.broadcast %72 : vector<1x1x1x192xf32> to vector<1x16x16x192xf32>
    %74 = arith.mulf %69, %73 : vector<1x16x16x192xf32>
    %75 = arith.addf %68, %74 : vector<1x16x16x192xf32>
    %76 = vector.extract_strided_slice %17 {offsets = [0, 2, 2, 0], sizes = [1, 16, 16, 192], strides = [1, 1, 1, 1]} : vector<1x18x18x192xf32> to vector<1x16x16x192xf32>
    %77 = vector.extract_strided_slice %18 {offsets = [2, 2, 0], sizes = [1, 1, 192], strides = [1, 1, 1]} : vector<3x3x192xf32> to vector<1x1x192xf32>
    %78 = vector.shape_cast %77 : vector<1x1x192xf32> to vector<192xf32>
    %79 = vector.shape_cast %78 : vector<192xf32> to vector<1x1x1x192xf32>
    %80 = vector.broadcast %79 : vector<1x1x1x192xf32> to vector<1x16x16x192xf32>
    %81 = arith.mulf %76, %80 : vector<1x16x16x192xf32>
    %82 = arith.addf %75, %81 : vector<1x16x16x192xf32>
    %83 = arith.truncf %82 : vector<1x16x16x192xf32> to vector<1x16x16x192xbf16>
    %c0_24 = arith.constant 0 : index
    %c0_25 = arith.constant 0 : index
    %c0_26 = arith.constant 0 : index
    %c0_27 = arith.constant 0 : index
    %84 = vector.load %arg5[%c0_24, %c0_25, %c0_26, %c0_27] : memref<1x16x16x192xbf16, #tpu.memory_space<vmem>>, vector<1x16x16x192xbf16>
    tpu.vector_store %arg5[%c0_24, %c0_25, %c0_26, %c0_27], %83 {strides = array<i32>} : memref<1x16x16x192xbf16, #tpu.memory_space<vmem>>, vector<1x16x16x192xbf16>,
    %cst_28 = arith.constant dense<0.000000e+00> : vector<192xf32>
    %85 = vector.multi_reduction <add>, %82, %cst_28 [0, 1, 2] : vector<1x16x16x192xf32> to vector<192xf32>
    %86 = vector.shape_cast %85 : vector<192xf32> to vector<1x192xf32>
    %87 = arith.mulf %82, %82 : vector<1x16x16x192xf32>
    %cst_29 = arith.constant dense<0.000000e+00> : vector<192xf32>
    %88 = vector.multi_reduction <add>, %87, %cst_29 [0, 1, 2] : vector<1x16x16x192xf32> to vector<192xf32>
    %89 = vector.shape_cast %88 : vector<192xf32> to vector<1x192xf32>
    %90 = tpu.iota {dimensions = array<i32: 0>} : vector<8x192xi32>
    %c0_i32 = arith.constant 0 : i32
    %91 = vector.broadcast %c0_i32 : i32 to vector<8x192xi32>
    %92 = arith.cmpi eq, %90, %91 : vector<8x192xi32>
    %c1_i32 = arith.constant 1 : i32
    %93 = vector.broadcast %c1_i32 : i32 to vector<8x192xi32>
    %94 = arith.cmpi eq, %90, %93 : vector<8x192xi32>
    %cst_30 = arith.constant 0.000000e+00 : f32
    %95 = vector.shape_cast %89 : vector<1x192xf32> to vector<1x192xf32>
    %96 = vector.broadcast %95 : vector<1x192xf32> to vector<8x192xf32>
    %97 = vector.broadcast %cst_30 : f32 to vector<8x192xf32>
    %98 = arith.select %94, %96, %97 : vector<8x192xi1>, vector<8x192xf32>
    %99 = vector.shape_cast %86 : vector<1x192xf32> to vector<1x192xf32>
    %100 = vector.broadcast %99 : vector<1x192xf32> to vector<8x192xf32>
    %101 = arith.select %92, %100, %98 : vector<8x192xi1>, vector<8x192xf32>
    %c0_31 = arith.constant 0 : index
    %c0_32 = arith.constant 0 : index
    %102 = vector.load %arg6[%c0_31, %c0_32] : memref<8x192xf32, #tpu.memory_space<vmem>>, vector<8x192xf32>
    tpu.vector_store %arg6[%c0_31, %c0_32], %101 {strides = array<i32>} : memref<8x192xf32, #tpu.memory_space<vmem>>, vector<8x192xf32>,
    return
  }
  func.func @transform_0(%arg0: i32) -> (i32, i32, i32, i32) {
    %c0_i32 = arith.constant 0 : i32
    %c0_i32_0 = arith.constant 0 : i32
    %c0_i32_1 = arith.constant 0 : i32
    %c0_i32_2 = arith.constant 0 : i32
    return %arg0, %c0_i32, %c0_i32_0, %c0_i32_1 : i32, i32, i32, i32
  }
  func.func @transform_1(%arg0: i32) -> (i32, i32, i32) {
    %c0_i32 = arith.constant 0 : i32
    %c0_i32_0 = arith.constant 0 : i32
    %c0_i32_1 = arith.constant 0 : i32
    %c0_i32_2 = arith.constant 0 : i32
    return %c0_i32, %c0_i32_0, %c0_i32_1 : i32, i32, i32
  }
  func.func @transform_2(%arg0: i32) -> (i32, i32) {
    %c0_i32 = arith.constant 0 : i32
    %c0_i32_0 = arith.constant 0 : i32
    %c0_i32_1 = arith.constant 0 : i32
    return %c0_i32, %c0_i32_0 : i32, i32
  }
  func.func @transform_3(%arg0: i32) -> (i32, i32) {
    %c0_i32 = arith.constant 0 : i32
    %c0_i32_0 = arith.constant 0 : i32
    %c0_i32_1 = arith.constant 0 : i32
    return %c0_i32, %c0_i32_0 : i32, i32
  }
  func.func @transform_4(%arg0: i32) -> (i32, i32, i32, i32) {
    %c0_i32 = arith.constant 0 : i32
    %c0_i32_0 = arith.constant 0 : i32
    %c0_i32_1 = arith.constant 0 : i32
    %c0_i32_2 = arith.constant 0 : i32
    return %arg0, %c0_i32, %c0_i32_0, %c0_i32_1 : i32, i32, i32, i32
  }
  func.func @transform_5(%arg0: i32) -> (i32, i32) {
    %c0_i32 = arith.constant 0 : i32
    %c0_i32_0 = arith.constant 0 : i32
    return %arg0, %c0_i32 : i32, i32
  }
}

module attributes {stable_mosaic.version = 11 : i64} {
  func.func @kernel(%arg0: i32, %arg1: i32, %arg2: memref<512x32xbf16, #tpu.memory_space<vmem>>, %arg3: memref<32x192xbf16, #tpu.memory_space<vmem>>, %arg4: memref<512x192xbf16, #tpu.memory_space<vmem>>, %arg5: memref<8x192xf32, #tpu.memory_space<vmem>>) attributes {dimension_semantics = [#tpu.dimension_semantics<parallel>, #tpu.dimension_semantics<parallel>], iteration_bounds = array<i64: 1, 1>, scalar_prefetch = 0 : i64, scratch_operands = 0 : i64, tpu.core_type = #tpu.core_type<tc>, window_params = [{transform_indices = @transform_0, window_bounds = array<i64: 512, 32>}, {transform_indices = @transform_1, window_bounds = array<i64: 32, 192>}, {transform_indices = @transform_2, window_bounds = array<i64: 512, 192>}, {transform_indices = @transform_3, window_bounds = array<i64: 8, 192>}]} {
    %c0 = arith.constant 0 : index
    %c0_0 = arith.constant 0 : index
    %0 = vector.load %arg2[%c0, %c0_0] : memref<512x32xbf16, #tpu.memory_space<vmem>>, vector<512x32xbf16>
    %c0_1 = arith.constant 0 : index
    %c0_2 = arith.constant 0 : index
    %1 = vector.load %arg3[%c0_1, %c0_2] : memref<32x192xbf16, #tpu.memory_space<vmem>>, vector<32x192xbf16>
    %cst = arith.constant dense<0.000000e+00> : vector<512x192xf32>
    %2 = tpu.matmul %0, %1, %cst {dimension_numbers = #tpu.dot_dimension_numbers<[1], [0], [0], [1], [0, 0, 1, 1], [], []>} : vector<512x32xbf16>, vector<32x192xbf16>, vector<512x192xf32> -> vector<512x192xf32>
    %3 = arith.truncf %2 : vector<512x192xf32> to vector<512x192xbf16>
    %c0_3 = arith.constant 0 : index
    %c0_4 = arith.constant 0 : index
    %4 = vector.load %arg4[%c0_3, %c0_4] : memref<512x192xbf16, #tpu.memory_space<vmem>>, vector<512x192xbf16>
    tpu.vector_store %arg4[%c0_3, %c0_4], %3 {strides = array<i32>} : memref<512x192xbf16, #tpu.memory_space<vmem>>, vector<512x192xbf16>,
    %cst_5 = arith.constant dense<0.000000e+00> : vector<192xf32>
    %5 = vector.multi_reduction <add>, %2, %cst_5 [0] : vector<512x192xf32> to vector<192xf32>
    %6 = vector.shape_cast %5 : vector<192xf32> to vector<1x192xf32>
    %7 = arith.mulf %2, %2 : vector<512x192xf32>
    %cst_6 = arith.constant dense<0.000000e+00> : vector<192xf32>
    %8 = vector.multi_reduction <add>, %7, %cst_6 [0] : vector<512x192xf32> to vector<192xf32>
    %9 = vector.shape_cast %8 : vector<192xf32> to vector<1x192xf32>
    %10 = tpu.iota {dimensions = array<i32: 0>} : vector<8x192xi32>
    %c0_i32 = arith.constant 0 : i32
    %11 = vector.broadcast %c0_i32 : i32 to vector<8x192xi32>
    %12 = arith.cmpi eq, %10, %11 : vector<8x192xi32>
    %c1_i32 = arith.constant 1 : i32
    %13 = vector.broadcast %c1_i32 : i32 to vector<8x192xi32>
    %14 = arith.cmpi eq, %10, %13 : vector<8x192xi32>
    %cst_7 = arith.constant 0.000000e+00 : f32
    %15 = vector.shape_cast %9 : vector<1x192xf32> to vector<1x192xf32>
    %16 = vector.broadcast %15 : vector<1x192xf32> to vector<8x192xf32>
    %17 = vector.broadcast %cst_7 : f32 to vector<8x192xf32>
    %18 = arith.select %14, %16, %17 : vector<8x192xi1>, vector<8x192xf32>
    %19 = vector.shape_cast %6 : vector<1x192xf32> to vector<1x192xf32>
    %20 = vector.broadcast %19 : vector<1x192xf32> to vector<8x192xf32>
    %21 = arith.select %12, %20, %18 : vector<8x192xi1>, vector<8x192xf32>
    %c0_8 = arith.constant 0 : index
    %c0_9 = arith.constant 0 : index
    %22 = vector.load %arg5[%c0_8, %c0_9] : memref<8x192xf32, #tpu.memory_space<vmem>>, vector<8x192xf32>
    tpu.vector_store %arg5[%c0_8, %c0_9], %21 {strides = array<i32>} : memref<8x192xf32, #tpu.memory_space<vmem>>, vector<8x192xf32>,
    return
  }
  func.func @transform_0(%arg0: i32, %arg1: i32) -> (i32, i32) {
    %c0_i32 = arith.constant 0 : i32
    %c0_i32_0 = arith.constant 0 : i32
    return %arg0, %c0_i32 : i32, i32
  }
  func.func @transform_1(%arg0: i32, %arg1: i32) -> (i32, i32) {
    %c0_i32 = arith.constant 0 : i32
    %c0_i32_0 = arith.constant 0 : i32
    return %c0_i32, %arg1 : i32, i32
  }
  func.func @transform_2(%arg0: i32, %arg1: i32) -> (i32, i32) {
    %c0_i32 = arith.constant 0 : i32
    return %arg0, %arg1 : i32, i32
  }
  func.func @transform_3(%arg0: i32, %arg1: i32) -> (i32, i32) {
    %c0_i32 = arith.constant 0 : i32
    return %arg0, %arg1 : i32, i32
  }
}

module attributes {stable_mosaic.version = 11 : i64} {
  func.func @kernel(%arg0: i32, %arg1: memref<512x32xbf16, #tpu.memory_space<vmem>>, %arg2: memref<1x32xf32, #tpu.memory_space<vmem>>, %arg3: memref<1x32xf32, #tpu.memory_space<vmem>>, %arg4: memref<512x32xf32, #tpu.memory_space<vmem>>, %arg5: memref<512x32xf32, #tpu.memory_space<vmem>>) attributes {dimension_semantics = [#tpu.dimension_semantics<parallel>], iteration_bounds = array<i64: 1>, scalar_prefetch = 0 : i64, scratch_operands = 0 : i64, tpu.core_type = #tpu.core_type<tc>, window_params = [{transform_indices = @transform_0, window_bounds = array<i64: 512, 32>}, {pipeline_mode = #tpu.pipeline_mode<synchronous>, transform_indices = @transform_1, window_bounds = array<i64: 1, 32>}, {pipeline_mode = #tpu.pipeline_mode<synchronous>, transform_indices = @transform_2, window_bounds = array<i64: 1, 32>}, {transform_indices = @transform_3, window_bounds = array<i64: 512, 32>}, {transform_indices = @transform_4, window_bounds = array<i64: 512, 32>}]} {
    %c0 = arith.constant 0 : index
    %c0_0 = arith.constant 0 : index
    %0 = vector.load %arg1[%c0, %c0_0] : memref<512x32xbf16, #tpu.memory_space<vmem>>, vector<512x32xbf16>
    %1 = arith.extf %0 : vector<512x32xbf16> to vector<512x32xf32>
    %c0_1 = arith.constant 0 : index
    %c0_2 = arith.constant 0 : index
    %2 = vector.load %arg2[%c0_1, %c0_2] : memref<1x32xf32, #tpu.memory_space<vmem>>, vector<1x32xf32>
    %3 = vector.broadcast %2 : vector<1x32xf32> to vector<512x32xf32>
    %4 = arith.mulf %1, %3 : vector<512x32xf32>
    %c0_3 = arith.constant 0 : index
    %c0_4 = arith.constant 0 : index
    %5 = vector.load %arg3[%c0_3, %c0_4] : memref<1x32xf32, #tpu.memory_space<vmem>>, vector<1x32xf32>
    %6 = vector.broadcast %5 : vector<1x32xf32> to vector<512x32xf32>
    %7 = arith.addf %4, %6 : vector<512x32xf32>
    %c0_5 = arith.constant 0 : index
    %c0_6 = arith.constant 0 : index
    %8 = vector.load %arg4[%c0_5, %c0_6] : memref<512x32xf32, #tpu.memory_space<vmem>>, vector<512x32xf32>
    %9 = arith.addf %7, %8 : vector<512x32xf32>
    %c0_7 = arith.constant 0 : index
    %c0_8 = arith.constant 0 : index
    %10 = vector.load %arg5[%c0_7, %c0_8] : memref<512x32xf32, #tpu.memory_space<vmem>>, vector<512x32xf32>
    tpu.vector_store %arg5[%c0_7, %c0_8], %9 {strides = array<i32>} : memref<512x32xf32, #tpu.memory_space<vmem>>, vector<512x32xf32>,
    return
  }
  func.func @transform_0(%arg0: i32) -> (i32, i32) {
    %c0_i32 = arith.constant 0 : i32
    %c0_i32_0 = arith.constant 0 : i32
    return %arg0, %c0_i32 : i32, i32
  }
  func.func @transform_1(%arg0: i32) -> (i32, i32) {
    %c0_i32 = arith.constant 0 : i32
    %c0_i32_0 = arith.constant 0 : i32
    %c0_i32_1 = arith.constant 0 : i32
    return %c0_i32, %c0_i32_0 : i32, i32
  }
  func.func @transform_2(%arg0: i32) -> (i32, i32) {
    %c0_i32 = arith.constant 0 : i32
    %c0_i32_0 = arith.constant 0 : i32
    %c0_i32_1 = arith.constant 0 : i32
    return %c0_i32, %c0_i32_0 : i32, i32
  }
  func.func @transform_3(%arg0: i32) -> (i32, i32) {
    %c0_i32 = arith.constant 0 : i32
    %c0_i32_0 = arith.constant 0 : i32
    return %arg0, %c0_i32 : i32, i32
  }
  func.func @transform_4(%arg0: i32) -> (i32, i32) {
    %c0_i32 = arith.constant 0 : i32
    %c0_i32_0 = arith.constant 0 : i32
    return %arg0, %c0_i32 : i32, i32
  }
}

module attributes {stable_mosaic.version = 11 : i64} {
  func.func @kernel(%arg0: i32, %arg1: i32, %arg2: memref<512x192xbf16, #tpu.memory_space<vmem>>, %arg3: memref<192x32xbf16, #tpu.memory_space<vmem>>, %arg4: memref<1x192xf32, #tpu.memory_space<vmem>>, %arg5: memref<1x192xf32, #tpu.memory_space<vmem>>, %arg6: memref<512x32xbf16, #tpu.memory_space<vmem>>, %arg7: memref<8x32xf32, #tpu.memory_space<vmem>>) attributes {dimension_semantics = [#tpu.dimension_semantics<parallel>, #tpu.dimension_semantics<parallel>], iteration_bounds = array<i64: 1, 1>, scalar_prefetch = 0 : i64, scratch_operands = 0 : i64, tpu.core_type = #tpu.core_type<tc>, window_params = [{transform_indices = @transform_0, window_bounds = array<i64: 512, 192>}, {transform_indices = @transform_1, window_bounds = array<i64: 192, 32>}, {pipeline_mode = #tpu.pipeline_mode<synchronous>, transform_indices = @transform_2, window_bounds = array<i64: 1, 192>}, {pipeline_mode = #tpu.pipeline_mode<synchronous>, transform_indices = @transform_3, window_bounds = array<i64: 1, 192>}, {transform_indices = @transform_4, window_bounds = array<i64: 512, 32>}, {transform_indices = @transform_5, window_bounds = array<i64: 8, 32>}]} {
    %c0 = arith.constant 0 : index
    %c0_0 = arith.constant 0 : index
    %0 = vector.load %arg2[%c0, %c0_0] : memref<512x192xbf16, #tpu.memory_space<vmem>>, vector<512x192xbf16>
    %1 = arith.extf %0 : vector<512x192xbf16> to vector<512x192xf32>
    %c0_1 = arith.constant 0 : index
    %c0_2 = arith.constant 0 : index
    %2 = vector.load %arg4[%c0_1, %c0_2] : memref<1x192xf32, #tpu.memory_space<vmem>>, vector<1x192xf32>
    %3 = vector.broadcast %2 : vector<1x192xf32> to vector<512x192xf32>
    %4 = arith.mulf %1, %3 : vector<512x192xf32>
    %c0_3 = arith.constant 0 : index
    %c0_4 = arith.constant 0 : index
    %5 = vector.load %arg5[%c0_3, %c0_4] : memref<1x192xf32, #tpu.memory_space<vmem>>, vector<1x192xf32>
    %6 = vector.broadcast %5 : vector<1x192xf32> to vector<512x192xf32>
    %7 = arith.addf %4, %6 : vector<512x192xf32>
    %cst = arith.constant 0.000000e+00 : f32
    %cst_5 = arith.constant 6.000000e+00 : f32
    %8 = vector.broadcast %cst : f32 to vector<512x192xf32>
    %9 = arith.maximumf %8, %7 : vector<512x192xf32>
    %10 = vector.broadcast %cst_5 : f32 to vector<512x192xf32>
    %11 = arith.minimumf %10, %9 : vector<512x192xf32>
    %12 = arith.truncf %11 : vector<512x192xf32> to vector<512x192xbf16>
    %c0_6 = arith.constant 0 : index
    %c0_7 = arith.constant 0 : index
    %13 = vector.load %arg3[%c0_6, %c0_7] : memref<192x32xbf16, #tpu.memory_space<vmem>>, vector<192x32xbf16>
    %cst_8 = arith.constant dense<0.000000e+00> : vector<512x32xf32>
    %14 = tpu.matmul %12, %13, %cst_8 {dimension_numbers = #tpu.dot_dimension_numbers<[1], [0], [0], [1], [0, 0, 1, 1], [], []>} : vector<512x192xbf16>, vector<192x32xbf16>, vector<512x32xf32> -> vector<512x32xf32>
    %15 = arith.truncf %14 : vector<512x32xf32> to vector<512x32xbf16>
    %c0_9 = arith.constant 0 : index
    %c0_10 = arith.constant 0 : index
    %16 = vector.load %arg6[%c0_9, %c0_10] : memref<512x32xbf16, #tpu.memory_space<vmem>>, vector<512x32xbf16>
    tpu.vector_store %arg6[%c0_9, %c0_10], %15 {strides = array<i32>} : memref<512x32xbf16, #tpu.memory_space<vmem>>, vector<512x32xbf16>,
    %cst_11 = arith.constant dense<0.000000e+00> : vector<32xf32>
    %17 = vector.multi_reduction <add>, %14, %cst_11 [0] : vector<512x32xf32> to vector<32xf32>
    %18 = vector.shape_cast %17 : vector<32xf32> to vector<1x32xf32>
    %19 = arith.mulf %14, %14 : vector<512x32xf32>
    %cst_12 = arith.constant dense<0.000000e+00> : vector<32xf32>
    %20 = vector.multi_reduction <add>, %19, %cst_12 [0] : vector<512x32xf32> to vector<32xf32>
    %21 = vector.shape_cast %20 : vector<32xf32> to vector<1x32xf32>
    %22 = tpu.iota {dimensions = array<i32: 0>} : vector<8x32xi32>
    %c0_i32 = arith.constant 0 : i32
    %23 = vector.broadcast %c0_i32 : i32 to vector<8x32xi32>
    %24 = arith.cmpi eq, %22, %23 : vector<8x32xi32>
    %c1_i32 = arith.constant 1 : i32
    %25 = vector.broadcast %c1_i32 : i32 to vector<8x32xi32>
    %26 = arith.cmpi eq, %22, %25 : vector<8x32xi32>
    %cst_13 = arith.constant 0.000000e+00 : f32
    %27 = vector.shape_cast %21 : vector<1x32xf32> to vector<1x32xf32>
    %28 = vector.broadcast %27 : vector<1x32xf32> to vector<8x32xf32>
    %29 = vector.broadcast %cst_13 : f32 to vector<8x32xf32>
    %30 = arith.select %26, %28, %29 : vector<8x32xi1>, vector<8x32xf32>
    %31 = vector.shape_cast %18 : vector<1x32xf32> to vector<1x32xf32>
    %32 = vector.broadcast %31 : vector<1x32xf32> to vector<8x32xf32>
    %33 = arith.select %24, %32, %30 : vector<8x32xi1>, vector<8x32xf32>
    %c0_14 = arith.constant 0 : index
    %c0_15 = arith.constant 0 : index
    %34 = vector.load %arg7[%c0_14, %c0_15] : memref<8x32xf32, #tpu.memory_space<vmem>>, vector<8x32xf32>
    tpu.vector_store %arg7[%c0_14, %c0_15], %33 {strides = array<i32>} : memref<8x32xf32, #tpu.memory_space<vmem>>, vector<8x32xf32>,
    return
  }
  func.func @transform_0(%arg0: i32, %arg1: i32) -> (i32, i32) {
    %c0_i32 = arith.constant 0 : i32
    %c0_i32_0 = arith.constant 0 : i32
    return %arg0, %c0_i32 : i32, i32
  }
  func.func @transform_1(%arg0: i32, %arg1: i32) -> (i32, i32) {
    %c0_i32 = arith.constant 0 : i32
    %c0_i32_0 = arith.constant 0 : i32
    return %c0_i32, %arg1 : i32, i32
  }
  func.func @transform_2(%arg0: i32, %arg1: i32) -> (i32, i32) {
    %c0_i32 = arith.constant 0 : i32
    %c0_i32_0 = arith.constant 0 : i32
    %c0_i32_1 = arith.constant 0 : i32
    return %c0_i32, %c0_i32_0 : i32, i32
  }
  func.func @transform_3(%arg0: i32, %arg1: i32) -> (i32, i32) {
    %c0_i32 = arith.constant 0 : i32
    %c0_i32_0 = arith.constant 0 : i32
    %c0_i32_1 = arith.constant 0 : i32
    return %c0_i32, %c0_i32_0 : i32, i32
  }
  func.func @transform_4(%arg0: i32, %arg1: i32) -> (i32, i32) {
    %c0_i32 = arith.constant 0 : i32
    return %arg0, %arg1 : i32, i32
  }
  func.func @transform_5(%arg0: i32, %arg1: i32) -> (i32, i32) {
    %c0_i32 = arith.constant 0 : i32
    return %arg0, %arg1 : i32, i32
  }
}

</mosaic_0001>

<bundles_post_ra>
// kernel: _lambda_.7
= control target key start
LH: loop header
LB: loop body
LE: loop exit
PB: predicated region body
PF: predicated region fallthrough
CT: control target
= control target key end

     0   :  { %vm416_vm0 = vcmask 261120   ;;  %s1204_s0 = inlined_call_operand.vmem [shape: bf16[512,32], index: 0, kind: input, shape index: {}]   ;;  %s1205_s1 = inlined_call_operand.vmem [shape: f32[1,32], index: 1, kind: input, shape index: {}]   ;;  %s1206_s2 = inlined_call_operand.vmem [shape: f32[1,32], index: 2, kind: input, shape index: {}]   ;;  %s1207_s3 = inlined_call_operand.vmem [shape: f32[512,32], index: 3, kind: input, shape index: {}]   ;;  %s1208_s4 = inlined_call_operand.hbm [shape: f32[512,32], index: 4, kind: output, shape index: {}]  }
   0x1   :  { %v500_v0 = vld [vmem:[%s1204_s0] sm:$0xff]   ;;  %v627_v4 = vld [vmem:[%s1204_s0 + $0x8] sm:$0xff]   ;;  %v628_v8 = vld [vmem:[%s1204_s0 + $0x10] sm:$0xff]  }
   0x2   :  { %v717_v1 = vld [vmem:[%s1205_s1] ss:$0 sm:$0xff]  ;;  %v501_v2 = vunpack.c.l.bf16 %v500_v0  ;;  %v502_v3 = vunpack.c.h.bf16 %v500_v0  ;;  %v505_v6 = vunpack.c.l.bf16 %v627_v4  ;;  %v506_v7 = vunpack.c.h.bf16 %v627_v4  ;;  %v629_v13 = vld [vmem:[%s1204_s0 + $0x18] sm:$0xff]   ;;  %v289_v15 = vld [vmem:[%s1207_s3 + $0x8] sm:$0xff] }
   0x3   :  { %v725_v5 = vld [vmem:[%s1206_s2] ss:$0 sm:$0xff]  ;;  %v509_v11 = vunpack.c.l.bf16 %v628_v8  ;;  %v510_v12 = vunpack.c.h.bf16 %v628_v8  ;;  %v513_v18 = vunpack.c.l.bf16 %v629_v13  ;;  %v514_v19 = vunpack.c.h.bf16 %v629_v13  ;;  %v290_v22 = vld [vmem:[%s1207_s3 + $0x10] sm:$0xff]  ;;  %v291_v23 = vld [vmem:[%s1207_s3 + $0x18] sm:$0xff] }
   0x4   :  { %v153_v9 = vmul.f32 %v501_v2, %v717_v1  ;;  %v154_v10 = vmul.f32 %v502_v3, %v717_v1  ;;  %v288_v14 = vld [vmem:[%s1207_s3] sm:$0xff]  ;;  %v155_v16 = vmul.f32 %v505_v6, %v717_v1  ;;  %v156_v17 = vmul.f32 %v506_v7, %v717_v1  ;;  %v293_v29 = vld [vmem:[%s1207_s3 + $0x28] sm:$0xff]  ;;  %v294_v37 = vld [vmem:[%s1207_s3 + $0x30] sm:$0xff] }
   0x5   :  { %v157_v24 = vmul.f32 %v509_v11, %v717_v1  ;;  %v158_v25 = vmul.f32 %v510_v12, %v717_v1  ;;  %v292_v28 = vld [vmem:[%s1207_s3 + $0x20] sm:$0xff]  ;;  %v159_v30 = vmul.f32 %v513_v18, %v717_v1  ;;  %v160_v31 = vmul.f32 %v514_v19, %v717_v1  ;;  %v295_v38 = vld [vmem:[%s1207_s3 + $0x38] sm:$0xff]  ;;  %v631_v39 = vld [vmem:[%s1204_s0 + $0x28] sm:$0xff]  }
   0x6   :  { %v224_v20 = vadd.f32 %v725_v5, %v153_v9  ;;  %v225_v21 = vadd.f32 %v725_v5, %v154_v10  ;;  %v226_v26 = vadd.f32 %v725_v5, %v155_v16  ;;  %v227_v27 = vadd.f32 %v725_v5, %v156_v17  ;;  %v630_v32 = vld [vmem:[%s1204_s0 + $0x20] sm:$0xff]   ;;  %v632_v44 = vld [vmem:[%s1204_s0 + $0x30] sm:$0xff]   ;;  %v633_v49 = vld [vmem:[%s1204_s0 + $0x38] sm:$0xff]  }
   0x7   :  { %v228_v35 = vadd.f32 %v725_v5, %v157_v24  ;;  %v229_v36 = vadd.f32 %v725_v5, %v158_v25  ;;  %v230_v42 = vadd.f32 %v725_v5, %v159_v30  ;;  %v231_v43 = vadd.f32 %v725_v5, %v160_v31  ;;  %v296_v58 = vld [vmem:[%s1207_s3 + $0x40] sm:$0xff]  ;;  %v297_v59 = vld [vmem:[%s1207_s3 + $0x48] sm:$0xff]  ;;  %v298_v3 = vld [vmem:[%s1207_s3 + $0x50] sm:$0xff] }
   0x8   :  { %v352_v33 = vadd.f32 %v288_v14, %v224_v20  ;;  %v353_v34 = vadd.f32 %v289_v15, %v225_v21  ;;  %v354_v40 = vadd.f32 %v290_v22, %v226_v26  ;;  %v355_v41 = vadd.f32 %v291_v23, %v227_v27  ;;  %v299_v4 = vld [vmem:[%s1207_s3 + $0x58] sm:$0xff]  ;;  %v300_v10 = vld [vmem:[%s1207_s3 + $0x60] sm:$0xff]  ;;  %v301_v11 = vld [vmem:[%s1207_s3 + $0x68] sm:$0xff] }
   0x9   :  { %v356_v45 = vadd.f32 %v292_v28, %v228_v35  ;;  %v357_v46 = vadd.f32 %v293_v29, %v229_v36  ;;  %v517_v47 = vunpack.c.l.bf16 %v630_v32  ;;  %v518_v48 = vunpack.c.h.bf16 %v630_v32  ;;  %v634_v14 = vld [vmem:[%s1204_s0 + $0x40] sm:$0xff]   ;;  %v302_v19 = vld [vmem:[%s1207_s3 + $0x70] sm:$0xff]  ;;  %v303_v20 = vld [vmem:[%s1207_s3 + $0x78] sm:$0xff] }
   0xa   :  { %417 = vst.msk [vmem:[#allocation2] sm:$0xff] %vm416_vm0, %v352_v33  ;;  %418 = vst.msk [vmem:[#allocation2 + $0x8] sm:$0xff] %vm416_vm0, %v353_v34  ;;  %v358_v50 = vadd.f32 %v294_v37, %v230_v42  ;;  %v359_v51 = vadd.f32 %v295_v38, %v231_v43  ;;  %v521_v52 = vunpack.c.l.bf16 %v631_v39  ;;  %v522_v53 = vunpack.c.h.bf16 %v631_v39  ;;  %v635_v21 = vld [vmem:[%s1204_s0 + $0x48] sm:$0xff]   ;;  %v636_v26 = vld [vmem:[%s1204_s0 + $0x50] sm:$0xff]  }
   0xb   :  { %419 = vst.msk [vmem:[#allocation2 + $0x10] sm:$0xff] %vm416_vm0, %v354_v40  ;;  %420 = vst.msk [vmem:[#allocation2 + $0x18] sm:$0xff] %vm416_vm0, %v355_v41  ;;  %v161_v54 = vmul.f32 %v517_v47, %v717_v1  ;;  %v162_v55 = vmul.f32 %v518_v48, %v717_v1  ;;  %v525_v56 = vunpack.c.l.bf16 %v632_v44  ;;  %v526_v57 = vunpack.c.h.bf16 %v632_v44  ;;  %v637_v31 = vld [vmem:[%s1204_s0 + $0x58] sm:$0xff]   ;;  %v304_v40 = vld [vmem:[%s1207_s3 + $0x80] sm:$0xff] }
   0xc   :  { %421 = vst.msk [vmem:[#allocation2 + $0x20] sm:$0xff] %vm416_vm0, %v356_v45  ;;  %422 = vst.msk [vmem:[#allocation2 + $0x28] sm:$0xff] %vm416_vm0, %v357_v46  ;;  %v163_v60 = vmul.f32 %v521_v52, %v717_v1  ;;  %v164_v61 = vmul.f32 %v522_v53, %v717_v1  ;;  %v529_v62 = vunpack.c.l.bf16 %v633_v49  ;;  %v530_v63 = vunpack.c.h.bf16 %v633_v49  ;;  %v305_v41 = vld [vmem:[%s1207_s3 + $0x88] sm:$0xff]  ;;  %v306_v48 = vld [vmem:[%s1207_s3 + $0x90] sm:$0xff] }
   0xd   :  { %423 = vst.msk [vmem:[#allocation2 + $0x30] sm:$0xff] %vm416_vm0, %v358_v50  ;;  %424 = vst.msk [vmem:[#allocation2 + $0x38] sm:$0xff] %vm416_vm0, %v359_v51  ;;  %v232_v0 = vadd.f32 %v725_v5, %v161_v54  ;;  %v233_v2 = vadd.f32 %v725_v5, %v162_v55  ;;  %v165_v6 = vmul.f32 %v525_v56, %v717_v1  ;;  %v533_v29 = vunpack.c.l.bf16 %v634_v14  ;;  %v307_v49 = vld [vmem:[%s1207_s3 + $0x98] sm:$0xff]  ;;  %v308_v54 = vld [vmem:[%s1207_s3 + $0xa0] sm:$0xff] }
   0xe   :  { %v166_v7 = vmul.f32 %v526_v57, %v717_v1  ;;  %v234_v8 = vadd.f32 %v725_v5, %v163_v60  ;;  %v235_v9 = vadd.f32 %v725_v5, %v164_v61  ;;  %v167_v12 = vmul.f32 %v529_v62, %v717_v1  ;;  %v309_v55 = vld [vmem:[%s1207_s3 + $0xa8] sm:$0xff] }
   0xf   :  { %v168_v13 = vmul.f32 %v530_v63, %v717_v1  ;;  %v360_v15 = vadd.f32 %v296_v58, %v232_v0  ;;  %v361_v16 = vadd.f32 %v297_v59, %v233_v2  ;;  %v236_v17 = vadd.f32 %v725_v5, %v165_v6  ;;  %v638_v58 = vld [vmem:[%s1204_s0 + $0x60] sm:$0xff]   ;;  %v310_v63 = vld [vmem:[%s1207_s3 + $0xb0] sm:$0xff]  ;;  %v311_v0 = vld [vmem:[%s1207_s3 + $0xb8] sm:$0xff] }
  0x10   :  { %v237_v18 = vadd.f32 %v725_v5, %v166_v7  ;;  %v362_v22 = vadd.f32 %v298_v3, %v234_v8  ;;  %v363_v23 = vadd.f32 %v299_v4, %v235_v9  ;;  %v238_v24 = vadd.f32 %v725_v5, %v167_v12  ;;  %v639_v2 = vld [vmem:[%s1204_s0 + $0x68] sm:$0xff]   ;;  %v640_v8 = vld [vmem:[%s1204_s0 + $0x70] sm:$0xff]  }
  0x11   :  { %v239_v25 = vadd.f32 %v725_v5, %v168_v13  ;;  %425 = vst.msk [vmem:[#allocation2 + $0x40] sm:$0xff] %vm416_vm0, %v360_v15  ;;  %426 = vst.msk [vmem:[#allocation2 + $0x48] sm:$0xff] %vm416_vm0, %v361_v16  ;;  %v364_v27 = vadd.f32 %v300_v10, %v236_v17  ;;  %v534_v30 = vunpack.c.h.bf16 %v634_v14  ;;  %v537_v34 = vunpack.c.l.bf16 %v635_v21  ;;  %v641_v13 = vld [vmem:[%s1204_s0 + $0x78] sm:$0xff]  }
  0x12   :  { %v365_v28 = vadd.f32 %v301_v11, %v237_v18  ;;  %427 = vst.msk [vmem:[#allocation2 + $0x50] sm:$0xff] %vm416_vm0, %v362_v22  ;;  %428 = vst.msk [vmem:[#allocation2 + $0x58] sm:$0xff] %vm416_vm0, %v363_v23  ;;  %v366_v32 = vadd.f32 %v302_v19, %v238_v24  ;;  %v538_v35 = vunpack.c.h.bf16 %v635_v21  ;;  %v169_v36 = vmul.f32 %v533_v29, %v717_v1  ;;  %v312_v22 = vld [vmem:[%s1207_s3 + $0xc0] sm:$0xff]  ;;  %v313_v23 = vld [vmem:[%s1207_s3 + $0xc8] sm:$0xff] }
  0x13   :  { %v367_v33 = vadd.f32 %v303_v20, %v239_v25  ;;  %429 = vst.msk [vmem:[#allocation2 + $0x60] sm:$0xff] %vm416_vm0, %v364_v27  ;;  %v170_v37 = vmul.f32 %v534_v30, %v717_v1  ;;  %v541_v38 = vunpack.c.l.bf16 %v636_v26  ;;  %v542_v39 = vunpack.c.h.bf16 %v636_v26  ;;  %v314_v30 = vld [vmem:[%s1207_s3 + $0xd0] sm:$0xff] }
  0x14   :  { %430 = vst.msk [vmem:[#allocation2 + $0x68] sm:$0xff] %vm416_vm0, %v365_v28  ;;  %431 = vst.msk [vmem:[#allocation2 + $0x70] sm:$0xff] %vm416_vm0, %v366_v32  ;;  %v171_v42 = vmul.f32 %v537_v34, %v717_v1  ;;  %v172_v43 = vmul.f32 %v538_v35, %v717_v1  ;;  %v545_v44 = vunpack.c.l.bf16 %v637_v31  ;;  %v546_v45 = vunpack.c.h.bf16 %v637_v31  ;;  %v315_v31 = vld [vmem:[%s1207_s3 + $0xd8] sm:$0xff] }
  0x15   :  { %432 = vst.msk [vmem:[#allocation2 + $0x78] sm:$0xff] %vm416_vm0, %v367_v33  ;;  %v240_v46 = vadd.f32 %v725_v5, %v169_v36  ;;  %v241_v47 = vadd.f32 %v725_v5, %v170_v37  ;;  %v173_v50 = vmul.f32 %v541_v38, %v717_v1  ;;  %v174_v51 = vmul.f32 %v542_v39, %v717_v1  ;;  %v316_v36 = vld [vmem:[%s1207_s3 + $0xe0] sm:$0xff]  ;;  %v317_v37 = vld [vmem:[%s1207_s3 + $0xe8] sm:$0xff] }
  0x16   :  { %v242_v52 = vadd.f32 %v725_v5, %v171_v42  ;;  %v243_v53 = vadd.f32 %v725_v5, %v172_v43  ;;  %v175_v56 = vmul.f32 %v545_v44, %v717_v1  ;;  %v176_v57 = vmul.f32 %v546_v45, %v717_v1  ;;  %v318_v45 = vld [vmem:[%s1207_s3 + $0xf0] sm:$0xff] }
  0x17   :  { %v368_v59 = vadd.f32 %v304_v40, %v240_v46  ;;  %v369_v60 = vadd.f32 %v305_v41, %v241_v47  ;;  %v244_v61 = vadd.f32 %v725_v5, %v173_v50  ;;  %v245_v62 = vadd.f32 %v725_v5, %v174_v51  ;;  %v642_v40 = vld [vmem:[%s1204_s0 + $0x80] sm:$0xff]   ;;  %v319_v46 = vld [vmem:[%s1207_s3 + $0xf8] sm:$0xff]  ;;  %v643_v47 = vld [vmem:[%s1204_s0 + $0x88] sm:$0xff]  }
  0x18   :  { %v370_v3 = vadd.f32 %v306_v48, %v242_v52  ;;  %v371_v4 = vadd.f32 %v307_v49, %v243_v53  ;;  %v246_v6 = vadd.f32 %v725_v5, %v175_v56  ;;  %v247_v7 = vadd.f32 %v725_v5, %v176_v57  ;;  %v644_v52 = vld [vmem:[%s1204_s0 + $0x90] sm:$0xff]  }
  0x19   :  { %433 = vst.msk [vmem:[#allocation2 + $0x80] sm:$0xff] %vm416_vm0, %v368_v59  ;;  %434 = vst.msk [vmem:[#allocation2 + $0x88] sm:$0xff] %vm416_vm0, %v369_v60  ;;  %v372_v9 = vadd.f32 %v308_v54, %v244_v61  ;;  %v373_v10 = vadd.f32 %v309_v55, %v245_v62  ;;  %v549_v11 = vunpack.c.l.bf16 %v638_v58  ;;  %v550_v12 = vunpack.c.h.bf16 %v638_v58 }
  0x1a   :  { %435 = vst.msk [vmem:[#allocation2 + $0x90] sm:$0xff] %vm416_vm0, %v370_v3  ;;  %436 = vst.msk [vmem:[#allocation2 + $0x98] sm:$0xff] %vm416_vm0, %v371_v4  ;;  %v374_v14 = vadd.f32 %v310_v63, %v246_v6  ;;  %v375_v15 = vadd.f32 %v311_v0, %v247_v7  ;;  %v553_v16 = vunpack.c.l.bf16 %v639_v2  ;;  %v554_v17 = vunpack.c.h.bf16 %v639_v2 }
  0x1b   :  { %437 = vst.msk [vmem:[#allocation2 + $0xa0] sm:$0xff] %vm416_vm0, %v372_v9  ;;  %438 = vst.msk [vmem:[#allocation2 + $0xa8] sm:$0xff] %vm416_vm0, %v373_v10  ;;  %v177_v18 = vmul.f32 %v549_v11, %v717_v1  ;;  %v178_v19 = vmul.f32 %v550_v12, %v717_v1  ;;  %v557_v20 = vunpack.c.l.bf16 %v640_v8  ;;  %v558_v21 = vunpack.c.h.bf16 %v640_v8 }
  0x1c   :  { %439 = vst.msk [vmem:[#allocation2 + $0xb0] sm:$0xff] %vm416_vm0, %v374_v14  ;;  %440 = vst.msk [vmem:[#allocation2 + $0xb8] sm:$0xff] %vm416_vm0, %v375_v15  ;;  %v179_v24 = vmul.f32 %v553_v16, %v717_v1  ;;  %v180_v25 = vmul.f32 %v554_v17, %v717_v1  ;;  %v561_v26 = vunpack.c.l.bf16 %v641_v13  ;;  %v562_v27 = vunpack.c.h.bf16 %v641_v13 }
  0x1d   :  { %v248_v28 = vadd.f32 %v725_v5, %v177_v18  ;;  %v249_v29 = vadd.f32 %v725_v5, %v178_v19  ;;  %v181_v32 = vmul.f32 %v557_v20, %v717_v1  ;;  %v182_v33 = vmul.f32 %v558_v21, %v717_v1 }
  0x1e   :  { %v250_v34 = vadd.f32 %v725_v5, %v179_v24  ;;  %v251_v35 = vadd.f32 %v725_v5, %v180_v25  ;;  %v183_v38 = vmul.f32 %v561_v26, %v717_v1  ;;  %v184_v39 = vmul.f32 %v562_v27, %v717_v1 }
  0x1f   :  { %v376_v41 = vadd.f32 %v312_v22, %v248_v28  ;;  %v377_v42 = vadd.f32 %v313_v23, %v249_v29  ;;  %v252_v43 = vadd.f32 %v725_v5, %v181_v32  ;;  %v253_v44 = vadd.f32 %v725_v5, %v182_v33 }
  0x20   :  { %v378_v48 = vadd.f32 %v314_v30, %v250_v34  ;;  %v379_v49 = vadd.f32 %v315_v31, %v251_v35  ;;  %v254_v50 = vadd.f32 %v725_v5, %v183_v38  ;;  %v255_v51 = vadd.f32 %v725_v5, %v184_v39 }
  0x21   :  { %9 = vsyncpa [#allocation3], 0  ;;  %441 = vst.msk [vmem:[#allocation2 + $0xc0] sm:$0xff] %vm416_vm0, %v376_v41  ;;  %v380_v53 = vadd.f32 %v316_v36, %v252_v43  ;;  %v381_v54 = vadd.f32 %v317_v37, %v253_v44  ;;  %v565_v55 = vunpack.c.l.bf16 %v642_v40  ;;  %v566_v56 = vunpack.c.h.bf16 %v642_v40  ;;  %v645_v57 = vld [vmem:[%s1204_s0 + $0x98] sm:$0xff]   ;;  %v320_v3 = vld [vmem:[%s1207_s3 + $0x100] sm:$0xff]  ;;  %s683_s14 = smov [#allocation2]  }
  0x22   :  { %442 = vst.msk [vmem:[#allocation2 + $0xc8] sm:$0xff] %vm416_vm0, %v377_v42  ;;  %443 = vst.msk [vmem:[#allocation2 + $0xd0] sm:$0xff] %vm416_vm0, %v378_v48  ;;  %v382_v58 = vadd.f32 %v318_v45, %v254_v50  ;;  %v383_v59 = vadd.f32 %v319_v46, %v255_v51  ;;  %v569_v60 = vunpack.c.l.bf16 %v643_v47  ;;  %v570_v61 = vunpack.c.h.bf16 %v643_v47  ;;  %v321_v4 = vld [vmem:[%s1207_s3 + $0x108] sm:$0xff]  ;;  %v322_v12 = vld [vmem:[%s1207_s3 + $0x110] sm:$0xff]  ;;  %s486_s15 = sshll.u32 %s683_s14, 4  ;;  %s487_s15 = int_to_ptr.vmem [resolvable:$true] %s486_s15 }
  0x23   :  { %444 = vst.msk [vmem:[#allocation2 + $0xd8] sm:$0xff] %vm416_vm0, %v379_v49  ;;  %445 = vst.msk [vmem:[#allocation2 + $0xe0] sm:$0xff] %vm416_vm0, %v380_v53  ;;  %v185_v62 = vmul.f32 %v565_v55, %v717_v1  ;;  %v186_v63 = vmul.f32 %v566_v56, %v717_v1  ;;  %v573_v0 = vunpack.c.l.bf16 %v644_v52  ;;  %v574_v2 = vunpack.c.h.bf16 %v644_v52  ;;  %v323_v13 = vld [vmem:[%s1207_s3 + $0x118] sm:$0xff]  ;;  %v324_v18 = vld [vmem:[%s1207_s3 + $0x120] sm:$0xff]  ;;  %p666_p1 = scmp.lt.s32.totalorder %s487_s15, %s487_s15 }
  0x24   :  { %446 = vst.msk [vmem:[#allocation2 + $0xe8] sm:$0xff] %vm416_vm0, %v381_v54  ;;  %447 = vst.msk [vmem:[#allocation2 + $0xf0] sm:$0xff] %vm416_vm0, %v382_v58  ;;  %v187_v6 = vmul.f32 %v569_v60, %v717_v1  ;;  %v188_v7 = vmul.f32 %v570_v61, %v717_v1  ;;  %v577_v8 = vunpack.c.l.bf16 %v645_v57  ;;  %v578_v9 = vunpack.c.h.bf16 %v645_v57  ;;  %v325_v19 = vld [vmem:[%s1207_s3 + $0x128] sm:$0xff]  ;;  %v646_v22 = vld [vmem:[%s1204_s0 + $0xa0] sm:$0xff]  }
  0x25   :  { %448 = vst.msk [vmem:[#allocation2 + $0xf8] sm:$0xff] %vm416_vm0, %v383_v59  ;;  %v256_v10 = vadd.f32 %v725_v5, %v185_v62  ;;  %v257_v11 = vadd.f32 %v725_v5, %v186_v63  ;;  %v189_v14 = vmul.f32 %v573_v0, %v717_v1  ;;  %v190_v15 = vmul.f32 %v574_v2, %v717_v1  ;;  %v326_v27 = vld [vmem:[%s1207_s3 + $0x130] sm:$0xff]  ;;  %v327_v28 = vld [vmem:[%s1207_s3 + $0x138] sm:$0xff]  ;;  %v647_v29 = vld [vmem:[%s1204_s0 + $0xa8] sm:$0xff]  }
  0x26   :  { %v258_v16 = vadd.f32 %v725_v5, %v187_v6  ;;  %v259_v17 = vadd.f32 %v725_v5, %v188_v7  ;;  %v191_v20 = vmul.f32 %v577_v8, %v717_v1  ;;  %v192_v21 = vmul.f32 %v578_v9, %v717_v1  ;;  %v648_v34 = vld [vmem:[%s1204_s0 + $0xb0] sm:$0xff]   ;;  %v649_v39 = vld [vmem:[%s1204_s0 + $0xb8] sm:$0xff]   ;;  %v328_v48 = vld [vmem:[%s1207_s3 + $0x140] sm:$0xff] }
  0x27   :  { %v384_v23 = vadd.f32 %v320_v3, %v256_v10  ;;  %v385_v24 = vadd.f32 %v321_v4, %v257_v11  ;;  %v260_v25 = vadd.f32 %v725_v5, %v189_v14  ;;  %v261_v26 = vadd.f32 %v725_v5, %v190_v15  ;;  %v329_v49 = vld [vmem:[%s1207_s3 + $0x148] sm:$0xff]  ;;  %v330_v56 = vld [vmem:[%s1207_s3 + $0x150] sm:$0xff]  ;;  %v331_v57 = vld [vmem:[%s1207_s3 + $0x158] sm:$0xff] }
  0x28   :  { %v386_v30 = vadd.f32 %v322_v12, %v258_v16  ;;  %v387_v31 = vadd.f32 %v323_v13, %v259_v17  ;;  %v262_v32 = vadd.f32 %v725_v5, %v191_v20  ;;  %v263_v33 = vadd.f32 %v725_v5, %v192_v21  ;;  %v332_v62 = vld [vmem:[%s1207_s3 + $0x160] sm:$0xff]  ;;  %v333_v63 = vld [vmem:[%s1207_s3 + $0x168] sm:$0xff]  ;;  %v334_v9 = vld [vmem:[%s1207_s3 + $0x170] sm:$0xff] }
  0x29   :  { %449 = vst.msk [vmem:[#allocation2 + $0x100] sm:$0xff] %vm416_vm0, %v384_v23  ;;  %450 = vst.msk [vmem:[#allocation2 + $0x108] sm:$0xff] %vm416_vm0, %v385_v24  ;;  %v388_v35 = vadd.f32 %v324_v18, %v260_v25  ;;  %v389_v36 = vadd.f32 %v325_v19, %v261_v26  ;;  %v581_v37 = vunpack.c.l.bf16 %v646_v22  ;;  %v582_v38 = vunpack.c.h.bf16 %v646_v22  ;;  %v650_v3 = vld [vmem:[%s1204_s0 + $0xc0] sm:$0xff]   ;;  %v335_v10 = vld [vmem:[%s1207_s3 + $0x178] sm:$0xff] }
  0x2a   :  { %451 = vst.msk [vmem:[#allocation2 + $0x110] sm:$0xff] %vm416_vm0, %v386_v30  ;;  %452 = vst.msk [vmem:[#allocation2 + $0x118] sm:$0xff] %vm416_vm0, %v387_v31  ;;  %v390_v40 = vadd.f32 %v326_v27, %v262_v32  ;;  %v391_v41 = vadd.f32 %v327_v28, %v263_v33  ;;  %v585_v42 = vunpack.c.l.bf16 %v647_v29  ;;  %v586_v43 = vunpack.c.h.bf16 %v647_v29  ;;  %v651_v11 = vld [vmem:[%s1204_s0 + $0xc8] sm:$0xff]   ;;  %v652_v16 = vld [vmem:[%s1204_s0 + $0xd0] sm:$0xff]  }
  0x2b   :  { %453 = vst.msk [vmem:[#allocation2 + $0x120] sm:$0xff] %vm416_vm0, %v388_v35  ;;  %454 = vst.msk [vmem:[#allocation2 + $0x128] sm:$0xff] %vm416_vm0, %v389_v36  ;;  %v193_v44 = vmul.f32 %v581_v37, %v717_v1  ;;  %v194_v45 = vmul.f32 %v582_v38, %v717_v1  ;;  %v589_v46 = vunpack.c.l.bf16 %v648_v34  ;;  %v590_v47 = vunpack.c.h.bf16 %v648_v34  ;;  %v653_v21 = vld [vmem:[%s1204_s0 + $0xd8] sm:$0xff]   ;;  %v336_v30 = vld [vmem:[%s1207_s3 + $0x180] sm:$0xff] }
  0x2c   :  { %455 = vst.msk [vmem:[#allocation2 + $0x130] sm:$0xff] %vm416_vm0, %v390_v40  ;;  %456 = vst.msk [vmem:[#allocation2 + $0x138] sm:$0xff] %vm416_vm0, %v391_v41  ;;  %v195_v50 = vmul.f32 %v585_v42, %v717_v1  ;;  %v196_v51 = vmul.f32 %v586_v43, %v717_v1  ;;  %v593_v52 = vunpack.c.l.bf16 %v649_v39  ;;  %v594_v53 = vunpack.c.h.bf16 %v649_v39  ;;  %v337_v31 = vld [vmem:[%s1207_s3 + $0x188] sm:$0xff]  ;;  %v338_v38 = vld [vmem:[%s1207_s3 + $0x190] sm:$0xff] }
  0x2d   :  { %v264_v54 = vadd.f32 %v725_v5, %v193_v44  ;;  %v265_v55 = vadd.f32 %v725_v5, %v194_v45  ;;  %v197_v58 = vmul.f32 %v589_v46, %v717_v1  ;;  %v198_v59 = vmul.f32 %v590_v47, %v717_v1  ;;  %v339_v39 = vld [vmem:[%s1207_s3 + $0x198] sm:$0xff]  ;;  %v340_v44 = vld [vmem:[%s1207_s3 + $0x1a0] sm:$0xff]  ;;  %v341_v45 = vld [vmem:[%s1207_s3 + $0x1a8] sm:$0xff] }
  0x2e   :  { %v266_v60 = vadd.f32 %v725_v5, %v195_v50  ;;  %v267_v61 = vadd.f32 %v725_v5, %v196_v51  ;;  %v199_v0 = vmul.f32 %v593_v52, %v717_v1  ;;  %v200_v2 = vmul.f32 %v594_v53, %v717_v1  ;;  %v342_v53 = vld [vmem:[%s1207_s3 + $0x1b0] sm:$0xff] }
  0x2f   :  { %v392_v4 = vadd.f32 %v328_v48, %v264_v54  ;;  %v393_v6 = vadd.f32 %v329_v49, %v265_v55  ;;  %v268_v7 = vadd.f32 %v725_v5, %v197_v58  ;;  %v269_v8 = vadd.f32 %v725_v5, %v198_v59  ;;  %v654_v48 = vld [vmem:[%s1204_s0 + $0xe0] sm:$0xff]   ;;  %v343_v54 = vld [vmem:[%s1207_s3 + $0x1b8] sm:$0xff]  ;;  %v655_v55 = vld [vmem:[%s1204_s0 + $0xe8] sm:$0xff]  }
  0x30   :  { %v394_v12 = vadd.f32 %v330_v56, %v266_v60  ;;  %v395_v13 = vadd.f32 %v331_v57, %v267_v61  ;;  %v270_v14 = vadd.f32 %v725_v5, %v199_v0  ;;  %v271_v15 = vadd.f32 %v725_v5, %v200_v2  ;;  %v656_v60 = vld [vmem:[%s1204_s0 + $0xf0] sm:$0xff]   ;;  %v657_v2 = vld [vmem:[%s1204_s0 + $0xf8] sm:$0xff]  }
  0x31   :  { %457 = vst.msk [vmem:[#allocation2 + $0x140] sm:$0xff] %vm416_vm0, %v392_v4  ;;  %458 = vst.msk [vmem:[#allocation2 + $0x148] sm:$0xff] %vm416_vm0, %v393_v6  ;;  %v396_v17 = vadd.f32 %v332_v62, %v268_v7  ;;  %v397_v18 = vadd.f32 %v333_v63, %v269_v8  ;;  %v597_v19 = vunpack.c.l.bf16 %v650_v3  ;;  %v598_v20 = vunpack.c.h.bf16 %v650_v3 }
  0x32   :  { %459 = vst.msk [vmem:[#allocation2 + $0x150] sm:$0xff] %vm416_vm0, %v394_v12  ;;  %460 = vst.msk [vmem:[#allocation2 + $0x158] sm:$0xff] %vm416_vm0, %v395_v13  ;;  %v398_v22 = vadd.f32 %v334_v9, %v270_v14  ;;  %v399_v23 = vadd.f32 %v335_v10, %v271_v15  ;;  %v601_v24 = vunpack.c.l.bf16 %v651_v11  ;;  %v602_v25 = vunpack.c.h.bf16 %v651_v11  ;;  %v344_v12 = vld [vmem:[%s1207_s3 + $0x1c0] sm:$0xff]  ;;  %v345_v13 = vld [vmem:[%s1207_s3 + $0x1c8] sm:$0xff] }
  0x33   :  { %461 = vst.msk [vmem:[#allocation2 + $0x160] sm:$0xff] %vm416_vm0, %v396_v17  ;;  %462 = vst.msk [vmem:[#allocation2 + $0x168] sm:$0xff] %vm416_vm0, %v397_v18  ;;  %v201_v26 = vmul.f32 %v597_v19, %v717_v1  ;;  %v202_v27 = vmul.f32 %v598_v20, %v717_v1  ;;  %v605_v28 = vunpack.c.l.bf16 %v652_v16  ;;  %v606_v29 = vunpack.c.h.bf16 %v652_v16  ;;  %v346_v20 = vld [vmem:[%s1207_s3 + $0x1d0] sm:$0xff] }
  0x34   :  { %463 = vst.msk [vmem:[#allocation2 + $0x170] sm:$0xff] %vm416_vm0, %v398_v22  ;;  %464 = vst.msk [vmem:[#allocation2 + $0x178] sm:$0xff] %vm416_vm0, %v399_v23  ;;  %v203_v32 = vmul.f32 %v601_v24, %v717_v1  ;;  %v204_v33 = vmul.f32 %v602_v25, %v717_v1  ;;  %v609_v34 = vunpack.c.l.bf16 %v653_v21  ;;  %v610_v35 = vunpack.c.h.bf16 %v653_v21  ;;  %v347_v21 = vld [vmem:[%s1207_s3 + $0x1d8] sm:$0xff] }
  0x35   :  { %v272_v36 = vadd.f32 %v725_v5, %v201_v26  ;;  %v273_v37 = vadd.f32 %v725_v5, %v202_v27  ;;  %v205_v40 = vmul.f32 %v605_v28, %v717_v1  ;;  %v206_v41 = vmul.f32 %v606_v29, %v717_v1  ;;  %v348_v26 = vld [vmem:[%s1207_s3 + $0x1e0] sm:$0xff]  ;;  %v349_v27 = vld [vmem:[%s1207_s3 + $0x1e8] sm:$0xff] }
  0x36   :  { %v274_v42 = vadd.f32 %v725_v5, %v203_v32  ;;  %v275_v43 = vadd.f32 %v725_v5, %v204_v33  ;;  %v207_v46 = vmul.f32 %v609_v34, %v717_v1  ;;  %v208_v47 = vmul.f32 %v610_v35, %v717_v1  ;;  %v350_v34 = vld [vmem:[%s1207_s3 + $0x1f0] sm:$0xff]  ;;  %v351_v35 = vld [vmem:[%s1207_s3 + $0x1f8] sm:$0xff]  ;;  %s661_s3 = scalar_lea.vmem %s487_s15, 8192 }
  0x37   :  { %v400_v49 = vadd.f32 %v336_v30, %v272_v36  ;;  %v401_v50 = vadd.f32 %v337_v31, %v273_v37  ;;  %v276_v51 = vadd.f32 %v725_v5, %v205_v40  ;;  %v277_v52 = vadd.f32 %v725_v5, %v206_v41  ;;  %p662_p0 = scmp.ne.s32.totalorder %s487_s15, %s661_s3  ;;  %p667_p2 = scmp.lt.s32.totalorder %s661_s3, %s661_s3 }
  0x38   :  { %v402_v56 = vadd.f32 %v338_v38, %v274_v42  ;;  %v403_v57 = vadd.f32 %v339_v39, %v275_v43  ;;  %v278_v58 = vadd.f32 %v725_v5, %v207_v46  ;;  %v279_v59 = vadd.f32 %v725_v5, %v208_v47 }
  0x39   :  { %465 = vst.msk [vmem:[#allocation2 + $0x180] sm:$0xff] %vm416_vm0, %v400_v49  ;;  %466 = vst.msk [vmem:[#allocation2 + $0x188] sm:$0xff] %vm416_vm0, %v401_v50  ;;  %v404_v61 = vadd.f32 %v340_v44, %v276_v51  ;;  %v405_v62 = vadd.f32 %v341_v45, %v277_v52  ;;  %v613_v63 = vunpack.c.l.bf16 %v654_v48  ;;  %v614_v0 = vunpack.c.h.bf16 %v654_v48  ;;  %p668_p3 = por %p667_p2, %p666_p1 }
  0x3a   :  { %467 = vst.msk [vmem:[#allocation2 + $0x190] sm:$0xff] %vm416_vm0, %v402_v56  ;;  %468 = vst.msk [vmem:[#allocation2 + $0x198] sm:$0xff] %vm416_vm0, %v403_v57  ;;  %v406_v3 = vadd.f32 %v342_v53, %v278_v58  ;;  %v407_v4 = vadd.f32 %v343_v54, %v279_v59  ;;  %v617_v6 = vunpack.c.l.bf16 %v655_v55  ;;  %v618_v7 = vunpack.c.h.bf16 %v655_v55 }
  0x3b   :  { %469 = vst.msk [vmem:[#allocation2 + $0x1a0] sm:$0xff] %vm416_vm0, %v404_v61  ;;  %470 = vst.msk [vmem:[#allocation2 + $0x1a8] sm:$0xff] %vm416_vm0, %v405_v62  ;;  %v209_v8 = vmul.f32 %v613_v63, %v717_v1  ;;  %v210_v9 = vmul.f32 %v614_v0, %v717_v1  ;;  %v621_v10 = vunpack.c.l.bf16 %v656_v60  ;;  %v622_v11 = vunpack.c.h.bf16 %v656_v60  ;;  %p669_p4 = pnand %p668_p3, %p662_p0 }
  0x3c   :  { %471 = vst.msk [vmem:[#allocation2 + $0x1b0] sm:$0xff] %vm416_vm0, %v406_v3  ;;  %472 = vst.msk [vmem:[#allocation2 + $0x1b8] sm:$0xff] %vm416_vm0, %v407_v4  ;;  %v211_v14 = vmul.f32 %v617_v6, %v717_v1  ;;  %v212_v15 = vmul.f32 %v618_v7, %v717_v1  ;;  %v625_v16 = vunpack.c.l.bf16 %v657_v2  ;;  %v626_v17 = vunpack.c.h.bf16 %v657_v2 }
  0x3d   :  { %v280_v18 = vadd.f32 %v725_v5, %v209_v8  ;;  %v281_v19 = vadd.f32 %v725_v5, %v210_v9  ;;  %v213_v22 = vmul.f32 %v621_v10, %v717_v1  ;;  %v214_v23 = vmul.f32 %v622_v11, %v717_v1 }
  0x3e   :  { %v282_v24 = vadd.f32 %v725_v5, %v211_v14  ;;  %v283_v25 = vadd.f32 %v725_v5, %v212_v15  ;;  %v215_v28 = vmul.f32 %v625_v16, %v717_v1  ;;  %v216_v29 = vmul.f32 %v626_v17, %v717_v1 }
  0x3f   :  { %v408_v30 = vadd.f32 %v344_v12, %v280_v18  ;;  %v409_v31 = vadd.f32 %v345_v13, %v281_v19  ;;  %v284_v32 = vadd.f32 %v725_v5, %v213_v22  ;;  %v285_v33 = vadd.f32 %v725_v5, %v214_v23 }
  0x40   :  { %v410_v36 = vadd.f32 %v346_v20, %v282_v24  ;;  %v411_v37 = vadd.f32 %v347_v21, %v283_v25  ;;  %v286_v1 = vadd.f32 %v725_v5, %v215_v28  ;;  %v287_v38 = vadd.f32 %v725_v5, %v216_v29 }
  0x41   :  { %473 = vst.msk [vmem:[#allocation2 + $0x1c0] sm:$0xff] %vm416_vm0, %v408_v30  ;;  %474 = vst.msk [vmem:[#allocation2 + $0x1c8] sm:$0xff] %vm416_vm0, %v409_v31  ;;  %v412_v39 = vadd.f32 %v348_v26, %v284_v32  ;;  %v413_v40 = vadd.f32 %v349_v27, %v285_v33 }
  0x42   :  { %475 = vst.msk [vmem:[#allocation2 + $0x1d0] sm:$0xff] %vm416_vm0, %v410_v36  ;;  %476 = vst.msk [vmem:[#allocation2 + $0x1d8] sm:$0xff] %vm416_vm0, %v411_v37  ;;  %v414_v41 = vadd.f32 %v350_v34, %v286_v1  ;;  %v415_v42 = vadd.f32 %v351_v35, %v287_v38 }
  0x43   :  { %477 = vst.msk [vmem:[#allocation2 + $0x1e0] sm:$0xff] %vm416_vm0, %v412_v39  ;;  %478 = vst.msk [vmem:[#allocation2 + $0x1e8] sm:$0xff] %vm416_vm0, %v413_v40 }
  0x44   :  { %479 = vst.msk [vmem:[#allocation2 + $0x1f0] sm:$0xff] %vm416_vm0, %v414_v41  ;;  %480 = vst.msk [vmem:[#allocation2 + $0x1f8] sm:$0xff] %vm416_vm0, %v415_v42 }
  0x45   :  { %672 = shalt.err (!%p669_p4)
}
  0x46   :  { %s684_s16 = smov 128   ;;  %s685_s17 = smov 8  }
  0x47   :  { %492 = dma.vmem_to_hbm [thread:$0]  %s487_s15, 8192, %s1208_s4, [#allocation3], %s684_s16, %s684_s16, %s685_s17  }
  0x48   :  { %681 = dma.done.wait [#allocation3], 8192  }
  0x49   :  { %682 = vsyncadd [#allocation3], 4294959104 }
  0x4a   :  { %496 = vsyncpa [#allocation3], 1 }

// kernel: _lambda_.4
= control target key start
LH: loop header
LB: loop body
LE: loop exit
PB: predicated region body
PF: predicated region fallthrough
CT: control target
= control target key end

     0   :  { %v1953_v1 = vmov 0   ;;  %vm262_vm0 = vcmask 261120   ;;  %vm1096_vm1 = vcmask 1043456   ;;  %vm1097_vm2 = vcmask 523268   ;;  %s3286_s1 = inlined_call_operand.vmem [shape: bf16[32,192], index: 1, kind: input, shape index: {}]   ;;  %s3287_s0 = inlined_call_operand.vmem [shape: bf16[512,32], index: 0, kind: input, shape index: {}]   ;;  %s3288_s2 = inlined_call_operand.vmem [shape: bf16[512,192], index: 2, kind: output, shape index: {0}]   ;;  %s3289_s3 = inlined_call_operand.vmem [shape: f32[8,192], index: 3, kind: output, shape index: {1}]  }
   0x1   :  { %v1915_v0 = vld [vmem:[%s3286_s1 + $0x14] ss:$8 sps:$4 sm:$0xff]   ;;  %391 = vmatprep.mubr.bf16.mxu0 %v1953_v1  ;;  %551 = vmatprep.mubr.bf16.mxu1 %v1953_v1  ;;  %v1917_v2 = vld [vmem:[%s3286_s1 + $0x10] ss:$8 sps:$4 sm:$0xff]   ;;  %v1918_v3 = vld [vmem:[%s3286_s1 + $0x4] ss:$8 sps:$4 sm:$0xff]  }
   0x2   :  { %371 = vmatprep.subr.bf16.mxu0 %v1915_v0  ;;  %1910 = vmatprep.subr.bf16.mxu1 %v1915_v0  ;;  %v1920_v4 = vld [vmem:[%s3286_s1] ss:$8 sps:$4 sm:$0xff]   ;;  %v1923_v9 = vld [vmem:[%s3287_s0 + $0x10] sm:$0xff]   ;;  %v1924_v11 = vld [vmem:[%s3287_s0 + $0x18] sm:$0xff]   ;;  %vm1232_vm4 = vcmask 523264  }
   0x3   :  { %372 = vmatpush1.bf16.msra.mxu0 %v1917_v2  ;;  %1912 = vmatpush1.bf16.msra.mxu1 %v1917_v2  ;;  %v1921_v5 = vld [vmem:[%s3287_s0] sm:$0xff]   ;;  %v1922_v7 = vld [vmem:[%s3287_s0 + $0x8] sm:$0xff]   ;;  %v1933_v10 = vld [vmem:[%s3287_s0 + $0x90] sm:$0xff]  }
   0x4   :  { %373 = vmatprep.subr.bf16.mxu0 %v1918_v3  ;;  %1911 = vmatprep.subr.bf16.mxu1 %v1918_v3  ;;  %v1929_v6 = vld [vmem:[%s3287_s0 + $0x80] sm:$0xff]   ;;  %v1931_v8 = vld [vmem:[%s3287_s0 + $0x88] sm:$0xff]   ;;  %v1935_v12 = vld [vmem:[%s3287_s0 + $0x98] sm:$0xff]  }
   0x5   :  { %v1925_v13 = vld [vmem:[%s3287_s0 + $0x20] sm:$0xff]   ;;  %v1926_v15 = vld [vmem:[%s3287_s0 + $0x28] sm:$0xff]   ;;  %v1927_v17 = vld [vmem:[%s3287_s0 + $0x30] sm:$0xff]  }
   0x6   :  { %v1937_v14 = vld [vmem:[%s3287_s0 + $0xa0] sm:$0xff]   ;;  %v1939_v16 = vld [vmem:[%s3287_s0 + $0xa8] sm:$0xff]   ;;  %v1941_v18 = vld [vmem:[%s3287_s0 + $0xb0] sm:$0xff]  }
   0x7   :  { %374 = vmatpush1.bf16.msra.mxu0 %v1920_v4  ;;  %1913 = vmatpush1.bf16.msra.mxu1 %v1920_v4  ;;  %v1928_v19 = vld [vmem:[%s3287_s0 + $0x38] sm:$0xff]   ;;  %v1930_v21 = vld [vmem:[%s3287_s0 + $0x40] sm:$0xff]   ;;  %v1932_v23 = vld [vmem:[%s3287_s0 + $0x48] sm:$0xff]  }
   0x8   :  { %v1943_v20 = vld [vmem:[%s3287_s0 + $0xb8] sm:$0xff]   ;;  %v1945_v22 = vld [vmem:[%s3287_s0 + $0xc0] sm:$0xff]   ;;  %v1946_v24 = vld [vmem:[%s3287_s0 + $0xc8] sm:$0xff]  }
   0x9   :  { %v1934_v25 = vld [vmem:[%s3287_s0 + $0x50] sm:$0xff]   ;;  %v1936_v27 = vld [vmem:[%s3287_s0 + $0x58] sm:$0xff]   ;;  %v1938_v29 = vld [vmem:[%s3287_s0 + $0x60] sm:$0xff]  }
   0xa   :  { %1750 = vmatmul.mubr.msk.bf16.vlgmr.msra.gmra.mxu0 %vm262_vm0, %v1921_v5  ;;  %1766 = vmatmul.mubr.msk.bf16.vlgmr.msra.gmra.mxu1 %vm262_vm0, %v1929_v6  ;;  %v1947_v26 = vld [vmem:[%s3287_s0 + $0xd0] sm:$0xff]   ;;  %v1948_v28 = vld [vmem:[%s3287_s0 + $0xd8] sm:$0xff]   ;;  %v1949_v30 = vld [vmem:[%s3287_s0 + $0xe0] sm:$0xff]  }
   0xb   :  { %401 = vmatprep.mubr.bf16.mxu0 %v1953_v1  ;;  %561 = vmatprep.mubr.bf16.mxu1 %v1953_v1  ;;  %v1940_v31 = vld [vmem:[%s3287_s0 + $0x68] sm:$0xff]   ;;  %v1942_v33 = vld [vmem:[%s3287_s0 + $0x70] sm:$0xff]   ;;  %v1944_v35 = vld [vmem:[%s3287_s0 + $0x78] sm:$0xff]  }
   0xc   :  { %v1950_v32 = vld [vmem:[%s3287_s0 + $0xe8] sm:$0xff]   ;;  %v1951_v34 = vld [vmem:[%s3287_s0 + $0xf0] sm:$0xff]   ;;  %v1952_v36 = vld [vmem:[%s3287_s0 + $0xf8] sm:$0xff]  }
   0xd   :  { %vm2150_vm3 = vmor %vm1097_vm2, %vm1096_vm1 }
  0x12   :  { %1751 = vmatmul.mubr.msk.bf16.gmra.mxu0 %vm262_vm0, %v1922_v7  ;;  %1767 = vmatmul.mubr.msk.bf16.gmra.mxu1 %vm262_vm0, %v1931_v8 }
  0x13   :  { %411 = vmatprep.mubr.bf16.mxu0 %v1953_v1  ;;  %571 = vmatprep.mubr.bf16.mxu1 %v1953_v1 }
  0x1a   :  { %1752 = vmatmul.mubr.msk.bf16.gmra.mxu0 %vm262_vm0, %v1923_v9  ;;  %1768 = vmatmul.mubr.msk.bf16.gmra.mxu1 %vm262_vm0, %v1933_v10 }
  0x1b   :  { %421 = vmatprep.mubr.bf16.mxu0 %v1953_v1  ;;  %581 = vmatprep.mubr.bf16.mxu1 %v1953_v1 }
  0x22   :  { %1753 = vmatmul.mubr.msk.bf16.gmra.mxu0 %vm262_vm0, %v1924_v11  ;;  %1769 = vmatmul.mubr.msk.bf16.gmra.mxu1 %vm262_vm0, %v1935_v12 }
  0x23   :  { %431 = vmatprep.mubr.bf16.mxu0 %v1953_v1  ;;  %591 = vmatprep.mubr.bf16.mxu1 %v1953_v1 }
  0x2a   :  { %1754 = vmatmul.mubr.msk.bf16.gmra.mxu0 %vm262_vm0, %v1925_v13  ;;  %1770 = vmatmul.mubr.msk.bf16.gmra.mxu1 %vm262_vm0, %v1937_v14 }
  0x2b   :  { %441 = vmatprep.mubr.bf16.mxu0 %v1953_v1  ;;  %601 = vmatprep.mubr.bf16.mxu1 %v1953_v1 }
  0x32   :  { %1755 = vmatmul.mubr.msk.bf16.gmra.mxu0 %vm262_vm0, %v1926_v15  ;;  %1771 = vmatmul.mubr.msk.bf16.gmra.mxu1 %vm262_vm0, %v1939_v16 }
  0x33   :  { %451 = vmatprep.mubr.bf16.mxu0 %v1953_v1  ;;  %611 = vmatprep.mubr.bf16.mxu1 %v1953_v1 }
  0x3a   :  { %1756 = vmatmul.mubr.msk.bf16.gmra.mxu0 %vm262_vm0, %v1927_v17  ;;  %1772 = vmatmul.mubr.msk.bf16.gmra.mxu1 %vm262_vm0, %v1941_v18 }
  0x3b   :  { %461 = vmatprep.mubr.bf16.mxu0 %v1953_v1  ;;  %621 = vmatprep.mubr.bf16.mxu1 %v1953_v1 }
  0x42   :  { %1757 = vmatmul.mubr.msk.bf16.gmra.mxu0 %vm262_vm0, %v1928_v19  ;;  %1773 = vmatmul.mubr.msk.bf16.gmra.mxu1 %vm262_vm0, %v1943_v20 }
  0x43   :  { %471 = vmatprep.mubr.bf16.mxu0 %v1953_v1  ;;  %631 = vmatprep.mubr.bf16.mxu1 %v1953_v1 }
  0x4a   :  { %1758 = vmatmul.mubr.msk.bf16.gmra.mxu0 %vm262_vm0, %v1930_v21  ;;  %1774 = vmatmul.mubr.msk.bf16.gmra.mxu1 %vm262_vm0, %v1945_v22 }
  0x4b   :  { %481 = vmatprep.mubr.bf16.mxu0 %v1953_v1  ;;  %641 = vmatprep.mubr.bf16.mxu1 %v1953_v1 }
  0x52   :  { %1759 = vmatmul.mubr.msk.bf16.gmra.mxu0 %vm262_vm0, %v1932_v23  ;;  %1775 = vmatmul.mubr.msk.bf16.gmra.mxu1 %vm262_vm0, %v1946_v24 }
  0x53   :  { %491 = vmatprep.mubr.bf16.mxu0 %v1953_v1  ;;  %651 = vmatprep.mubr.bf16.mxu1 %v1953_v1 }
  0x5a   :  { %1760 = vmatmul.mubr.msk.bf16.gmra.mxu0 %vm262_vm0, %v1934_v25  ;;  %1776 = vmatmul.mubr.msk.bf16.gmra.mxu1 %vm262_vm0, %v1947_v26 }
  0x5b   :  { %501 = vmatprep.mubr.bf16.mxu0 %v1953_v1  ;;  %661 = vmatprep.mubr.bf16.mxu1 %v1953_v1 }
  0x62   :  { %1761 = vmatmul.mubr.msk.bf16.gmra.mxu0 %vm262_vm0, %v1936_v27  ;;  %1777 = vmatmul.mubr.msk.bf16.gmra.mxu1 %vm262_vm0, %v1948_v28 }
  0x63   :  { %511 = vmatprep.mubr.bf16.mxu0 %v1953_v1  ;;  %671 = vmatprep.mubr.bf16.mxu1 %v1953_v1 }
  0x6a   :  { %1762 = vmatmul.mubr.msk.bf16.gmra.mxu0 %vm262_vm0, %v1938_v29  ;;  %1778 = vmatmul.mubr.msk.bf16.gmra.mxu1 %vm262_vm0, %v1949_v30 }
  0x6b   :  { %521 = vmatprep.mubr.bf16.mxu0 %v1953_v1  ;;  %681 = vmatprep.mubr.bf16.mxu1 %v1953_v1 }
  0x72   :  { %1763 = vmatmul.mubr.msk.bf16.gmra.mxu0 %vm262_vm0, %v1940_v31  ;;  %1779 = vmatmul.mubr.msk.bf16.gmra.mxu1 %vm262_vm0, %v1950_v32 }
  0x73   :  { %531 = vmatprep.mubr.bf16.mxu0 %v1953_v1  ;;  %691 = vmatprep.mubr.bf16.mxu1 %v1953_v1 }
  0x7a   :  { %1764 = vmatmul.mubr.msk.bf16.gmra.mxu0 %vm262_vm0, %v1942_v33  ;;  %1780 = vmatmul.mubr.msk.bf16.gmra.mxu1 %vm262_vm0, %v1951_v34 }
  0x7b   :  { %541 = vmatprep.mubr.bf16.mxu0 %v1953_v1  ;;  %701 = vmatprep.mubr.bf16.mxu1 %v1953_v1 }
  0x82   :  { %1765 = vmatmul.mubr.msk.bf16.gmra.mxu0 %vm262_vm0, %v1944_v35  ;;  %1781 = vmatmul.mubr.msk.bf16.gmra.mxu1 %vm262_vm0, %v1952_v36 }
  0xca   :  { %v2146_v37 = vpop.f32.mrf.mxu0  ;;  %v2156_v41 = vpop.f32.mrf.mxu1 }
  0xcc   :  { %v2148_v38 = vpop.f32.mrf.mxu0  ;;  %v2165_v43 = vpop.f32.mrf.mxu1 }
  0xcd   :  { %v1846_v40 = vpack.c.bf16 %v2148_v38, %v2146_v37  ;;  %v1878_v45 = vpack.c.bf16 %v2165_v43, %v2156_v41  ;;  %v1233_v46 = vsel %vm1232_vm4, %v2148_v38, 0.0 }
  0xce   :  { %v2158_v42 = vpop.f32.mrf.mxu0  ;;  %v2177_v49 = vpop.f32.mrf.mxu1 }
  0xcf   :  { %1099 = vst.msk [vmem:[%s3288_s2] sm:$0xff] %vm2150_vm3, %v1846_v40  ;;  %1131 = vst.msk [vmem:[%s3288_s2 + $0x100] sm:$0xff] %vm2150_vm3, %v1878_v45 }
  0xd0   :  { %v2167_v44 = vpop.f32.mrf.mxu0  ;;  %v2193_v52 = vpop.f32.mrf.mxu1 }
  0xd1   :  { %v1847_v47 = vpack.c.bf16 %v2167_v44, %v2158_v42  ;;  %v1234_v48 = vsel %vm1232_vm4, %v2167_v44, 0.0  ;;  %v1879_v54 = vpack.c.bf16 %v2193_v52, %v2177_v49 }
  0xd2   :  { %v2179_v50 = vadd.f32 %v1234_v48, %v1233_v46  ;;  %v2181_v51 = vpop.f32.mrf.mxu0  ;;  %v2201_v56 = vpop.f32.mrf.mxu1 }
  0xd3   :  { %1100 = vst.msk [vmem:[%s3288_s2 + $0x8] sm:$0xff] %vm2150_vm3, %v1847_v47  ;;  %1132 = vst.msk [vmem:[%s3288_s2 + $0x108] sm:$0xff] %vm2150_vm3, %v1879_v54 }
  0xd4   :  { %v2195_v53 = vpop.f32.mrf.mxu0  ;;  %v2215_v58 = vpop.f32.mrf.mxu1 }
  0xd5   :  { %v1848_v55 = vpack.c.bf16 %v2195_v53, %v2181_v51  ;;  %v1880_v60 = vpack.c.bf16 %v2215_v58, %v2201_v56 }
  0xd6   :  { %v2203_v57 = vpop.f32.mrf.mxu0  ;;  %v2223_v62 = vpop.f32.mrf.mxu1 }
  0xd7   :  { %1101 = vst.msk [vmem:[%s3288_s2 + $0x10] sm:$0xff] %vm2150_vm3, %v1848_v55  ;;  %1133 = vst.msk [vmem:[%s3288_s2 + $0x110] sm:$0xff] %vm2150_vm3, %v1880_v60 }
  0xd8   :  { %v2217_v59 = vpop.f32.mrf.mxu0  ;;  %v2237_v0 = vpop.f32.mrf.mxu1 }
  0xd9   :  { %v1849_v61 = vpack.c.bf16 %v2217_v59, %v2203_v57  ;;  %v1881_v2 = vpack.c.bf16 %v2237_v0, %v2223_v62 }
  0xda   :  { %v2225_v63 = vpop.f32.mrf.mxu0  ;;  %v2245_v4 = vpop.f32.mrf.mxu1 }
  0xdb   :  { %1102 = vst.msk [vmem:[%s3288_s2 + $0x18] sm:$0xff] %vm2150_vm3, %v1849_v61  ;;  %1134 = vst.msk [vmem:[%s3288_s2 + $0x118] sm:$0xff] %vm2150_vm3, %v1881_v2 }
  0xdc   :  { %v2239_v1 = vpop.f32.mrf.mxu0  ;;  %v2259_v6 = vpop.f32.mrf.mxu1 }
  0xdd   :  { %v1850_v3 = vpack.c.bf16 %v2239_v1, %v2225_v63  ;;  %v1882_v8 = vpack.c.bf16 %v2259_v6, %v2245_v4 }
  0xde   :  { %v2247_v5 = vpop.f32.mrf.mxu0  ;;  %v2267_v10 = vpop.f32.mrf.mxu1 }
  0xdf   :  { %1103 = vst.msk [vmem:[%s3288_s2 + $0x20] sm:$0xff] %vm2150_vm3, %v1850_v3  ;;  %1135 = vst.msk [vmem:[%s3288_s2 + $0x120] sm:$0xff] %vm2150_vm3, %v1882_v8 }
  0xe0   :  { %v2261_v7 = vpop.f32.mrf.mxu0  ;;  %v2281_v12 = vpop.f32.mrf.mxu1 }
  0xe1   :  { %v1851_v9 = vpack.c.bf16 %v2261_v7, %v2247_v5  ;;  %v1883_v14 = vpack.c.bf16 %v2281_v12, %v2267_v10 }
  0xe2   :  { %v2269_v11 = vpop.f32.mrf.mxu0  ;;  %v2289_v16 = vpop.f32.mrf.mxu1 }
  0xe3   :  { %1104 = vst.msk [vmem:[%s3288_s2 + $0x28] sm:$0xff] %vm2150_vm3, %v1851_v9  ;;  %1136 = vst.msk [vmem:[%s3288_s2 + $0x128] sm:$0xff] %vm2150_vm3, %v1883_v14 }
  0xe4   :  { %v2283_v13 = vpop.f32.mrf.mxu0  ;;  %v2303_v18 = vpop.f32.mrf.mxu1 }
  0xe5   :  { %v1852_v15 = vpack.c.bf16 %v2283_v13, %v2269_v11  ;;  %v1884_v20 = vpack.c.bf16 %v2303_v18, %v2289_v16 }
  0xe6   :  { %v2291_v17 = vpop.f32.mrf.mxu0  ;;  %v2311_v22 = vpop.f32.mrf.mxu1 }
  0xe7   :  { %1105 = vst.msk [vmem:[%s3288_s2 + $0x30] sm:$0xff] %vm2150_vm3, %v1852_v15  ;;  %1137 = vst.msk [vmem:[%s3288_s2 + $0x130] sm:$0xff] %vm2150_vm3, %v1884_v20  ;;  %v1369_v15 = vmul.f32 %v2167_v44, %v2167_v44  ;;  %v1371_v44 = vmul.f32 %v2195_v53, %v2195_v53 }
  0xe8   :  { %v2305_v19 = vpop.f32.mrf.mxu0  ;;  %v2325_v24 = vpop.f32.mrf.mxu1 }
  0xe9   :  { %v1853_v21 = vpack.c.bf16 %v2305_v19, %v2291_v17  ;;  %v1885_v26 = vpack.c.bf16 %v2325_v24, %v2311_v22 }
  0xea   :  { %v2313_v23 = vpop.f32.mrf.mxu0  ;;  %v2333_v28 = vpop.f32.mrf.mxu1 }
  0xeb   :  { %1106 = vst.msk [vmem:[%s3288_s2 + $0x38] sm:$0xff] %vm2150_vm3, %v1853_v21  ;;  %1138 = vst.msk [vmem:[%s3288_s2 + $0x138] sm:$0xff] %vm2150_vm3, %v1885_v26  ;;  %v1367_v26 = vmul.f32 %v2148_v38, %v2148_v38 }
  0xec   :  { %v2327_v25 = vpop.f32.mrf.mxu0  ;;  %v2347_v30 = vpop.f32.mrf.mxu1 }
  0xed   :  { %v1854_v27 = vpack.c.bf16 %v2327_v25, %v2313_v23  ;;  %3336 = vst [vmem:[#allocation2_spill] sm:$0xff] %v2347_v30  ;;  %v1886_v32 = vpack.c.bf16 %v2347_v30, %v2333_v28 }
  0xee   :  { %v2335_v29 = vpop.f32.mrf.mxu0  ;;  %v2355_v34 = vpop.f32.mrf.mxu1 }
  0xef   :  { %1107 = vst.msk [vmem:[%s3288_s2 + $0x40] sm:$0xff] %vm2150_vm3, %v1854_v27  ;;  %3337 = vst [vmem:[#allocation3_spill] sm:$0xff] %v2355_v34 }
  0xf0   :  { %v2349_v31 = vpop.f32.mrf.mxu0  ;;  %1139 = vst.msk [vmem:[%s3288_s2 + $0x140] sm:$0xff] %vm2150_vm3, %v1886_v32  ;;  %v2369_v36 = vpop.f32.mrf.mxu1  ;;  %v1368_v32 = vmul.f32 %v2158_v42, %v2158_v42 }
  0xf1   :  { %v1855_v33 = vpack.c.bf16 %v2349_v31, %v2335_v29  ;;  %3338 = vst [vmem:[#allocation4_spill] sm:$0xff] %v2369_v36  ;;  %v1887_v45 = vpack.c.bf16 %v2369_v36, %v2355_v34  ;;  %v1374_v34 = vmul.f32 %v2225_v63, %v2225_v63 }
  0xf2   :  { %v2357_v35 = vpop.f32.mrf.mxu0  ;;  %v2377_v47 = vpop.f32.mrf.mxu1 }
  0xf3   :  { %1108 = vst.msk [vmem:[%s3288_s2 + $0x48] sm:$0xff] %vm2150_vm3, %v1855_v33  ;;  %3339 = vst [vmem:[#allocation5_spill] sm:$0xff] %v2377_v47  ;;  %v1366_v33 = vmul.f32 %v2146_v37, %v2146_v37 }
  0xf4   :  { %v2371_v40 = vpop.f32.mrf.mxu0  ;;  %1140 = vst.msk [vmem:[%s3288_s2 + $0x148] sm:$0xff] %vm2150_vm3, %v1887_v45  ;;  %v2391_v54 = vpop.f32.mrf.mxu1 }
  0xf5   :  { %v1856_v46 = vpack.c.bf16 %v2371_v40, %v2357_v35  ;;  %3340 = vst [vmem:[#allocation6_spill] sm:$0xff] %v2391_v54  ;;  %v1888_v60 = vpack.c.bf16 %v2391_v54, %v2377_v47  ;;  %v1236_v54 = vsel %vm1232_vm4, %v2195_v53, 0.0 }
  0xf6   :  { %v2379_v48 = vpop.f32.mrf.mxu0  ;;  %v2399_v2 = vpop.f32.mrf.mxu1 }
  0xf7   :  { %1109 = vst.msk [vmem:[%s3288_s2 + $0x50] sm:$0xff] %vm2150_vm3, %v1856_v46  ;;  %3341 = vst [vmem:[#allocation7_spill] sm:$0xff] %v2399_v2 }
  0xf8   :  { %v2393_v55 = vpop.f32.mrf.mxu0  ;;  %1141 = vst.msk [vmem:[%s3288_s2 + $0x150] sm:$0xff] %vm2150_vm3, %v1888_v60  ;;  %v2413_v8 = vpop.f32.mrf.mxu1  ;;  %v1163_v60 = vadd.f32 %v2158_v42, %v2146_v37  ;;  %v1494_v37 = vadd.f32 %v1368_v32, %v1366_v33 }
  0xf9   :  { %v1857_v61 = vpack.c.bf16 %v2393_v55, %v2379_v48  ;;  %3342 = vst [vmem:[#allocation8_spill] sm:$0xff] %v2413_v8  ;;  %v1889_v14 = vpack.c.bf16 %v2413_v8, %v2399_v2  ;;  %v1563_v2 = vsel %vm1232_vm4, %v1367_v26, 0.0  ;;  %v1372_v26 = vmul.f32 %v2203_v57, %v2203_v57 }
  0xfa   :  { %v2401_v3 = vpop.f32.mrf.mxu0  ;;  %v2423_v21 = vpop.f32.mrf.mxu1  ;;  %v1164_v42 = vadd.f32 %v1163_v60, %v2181_v51  ;;  %v1237_v60 = vadd.f32 %v1236_v54, %v2179_v50 }
  0xfb   :  { %1110 = vst.msk [vmem:[%s3288_s2 + $0x58] sm:$0xff] %vm2150_vm3, %v1857_v61  ;;  %3343 = vst [vmem:[#allocation9_spill] sm:$0xff] %v2423_v21  ;;  %v1564_v61 = vsel %vm1232_vm4, %v1369_v15, 0.0  ;;  %v1566_v15 = vsel %vm1232_vm4, %v1371_v44, 0.0 }
  0xfc   :  { %v2415_v9 = vpop.f32.mrf.mxu0  ;;  %1142 = vst.msk [vmem:[%s3288_s2 + $0x158] sm:$0xff] %vm2150_vm3, %v1889_v14  ;;  %v2443_v38 = vpop.f32.mrf.mxu1  ;;  %v1370_v14 = vmul.f32 %v2181_v51, %v2181_v51  ;;  %v1565_v47 = vadd.f32 %v1564_v61, %v1563_v2  ;;  %v1375_v51 = vmul.f32 %v2239_v1, %v2239_v1  ;;  %v1165_v61 = vadd.f32 %v1164_v42, %v2203_v57 }
  0xfd   :  { %v1858_v20 = vpack.c.bf16 %v2415_v9, %v2401_v3  ;;  %3344 = vst [vmem:[#allocation10_spill] sm:$0xff] %v2443_v38  ;;  %v1890_v46 = vpack.c.bf16 %v2443_v38, %v2423_v21  ;;  %v1373_v38 = vmul.f32 %v2217_v59, %v2217_v59  ;;  %v1377_v57 = vmul.f32 %v2261_v7, %v2261_v7 }
  0xfe   :  { %v2427_v27 = vpop.f32.mrf.mxu0  ;;  %v2458_v8 = vpop.f32.mrf.mxu1  ;;  %v1495_v33 = vadd.f32 %v1494_v37, %v1370_v14  ;;  %v1567_v2 = vadd.f32 %v1566_v15, %v1565_v47  ;;  %v1240_v47 = vsel %vm1232_vm4, %v2239_v1, 0.0  ;;  %v1166_v14 = vadd.f32 %v1165_v61, %v2225_v63 }
  0xff   :  { %1111 = vst.msk [vmem:[%s3288_s2 + $0x60] sm:$0xff] %vm2150_vm3, %v1858_v20  ;;  %1143 = vst.msk [vmem:[%s3288_s2 + $0x160] sm:$0xff] %vm2150_vm3, %v1890_v46  ;;  %v1238_v46 = vsel %vm1232_vm4, %v2217_v59, 0.0  ;;  %v1568_v59 = vsel %vm1232_vm4, %v1373_v38, 0.0  ;;  %v1570_v37 = vsel %vm1232_vm4, %v1375_v51, 0.0  ;;  %v1376_v42 = vmul.f32 %v2247_v5, %v2247_v5 }
 0x100   :  { %v2447_v45 = vpop.f32.mrf.mxu0  ;;  %v2481_v53 = vpop.f32.mrf.mxu1  ;;  %v1496_v50 = vadd.f32 %v1495_v33, %v1372_v26  ;;  %v1239_v54 = vadd.f32 %v1238_v46, %v1237_v60  ;;  %v1569_v26 = vadd.f32 %v1568_v59, %v1567_v2  ;;  %v1242_v46 = vsel %vm1232_vm4, %v2261_v7, 0.0 }
 0x101   :  { %v1859_v20 = vpack.c.bf16 %v2447_v45, %v2427_v27  ;;  %v1891_v44 = vpack.c.bf16 %v2481_v53, %v2458_v8  ;;  %v1167_v2 = vadd.f32 %v1166_v14, %v2247_v5  ;;  %v1572_v59 = vsel %vm1232_vm4, %v1377_v57, 0.0 }
 0x102   :  { %v2465_v21 = vpop.f32.mrf.mxu0  ;;  %v2494_v36 = vpop.f32.mrf.mxu1  ;;  %v1497_v51 = vadd.f32 %v1496_v50, %v1374_v34  ;;  %v1241_v60 = vadd.f32 %v1240_v47, %v1239_v54  ;;  %v1571_v7 = vadd.f32 %v1570_v37, %v1569_v26  ;;  %v1381_v34 = vmul.f32 %v2305_v19, %v2305_v19 }
 0x103   :  { %1112 = vst.msk [vmem:[%s3288_s2 + $0x68] sm:$0xff] %vm2150_vm3, %v1859_v20  ;;  %1144 = vst.msk [vmem:[%s3288_s2 + $0x168] sm:$0xff] %vm2150_vm3, %v1891_v44  ;;  %v1379_v44 = vmul.f32 %v2283_v13, %v2283_v13  ;;  %v1244_v37 = vsel %vm1232_vm4, %v2283_v13, 0.0  ;;  %v1168_v57 = vadd.f32 %v1167_v2, %v2269_v11  ;;  %v1380_v26 = vmul.f32 %v2291_v17, %v2291_v17 }
 0x104   :  { %v2487_v32 = vpop.f32.mrf.mxu0  ;;  %v2516_v38 = vpop.f32.mrf.mxu1  ;;  %v1498_v54 = vadd.f32 %v1497_v51, %v1376_v42  ;;  %v1243_v47 = vadd.f32 %v1242_v46, %v1241_v60  ;;  %v1573_v46 = vadd.f32 %v1572_v59, %v1571_v7  ;;  %v1246_v13 = vsel %vm1232_vm4, %v2305_v19, 0.0 }
 0x105   :  { %v1860_v20 = vpack.c.bf16 %v2487_v32, %v2465_v21  ;;  %v1892_v1 = vpack.c.bf16 %v2516_v38, %v2494_v36  ;;  %v1574_v14 = vsel %vm1232_vm4, %v1379_v44, 0.0  ;;  %v1383_v60 = vmul.f32 %v2327_v25, %v2327_v25 }
 0x106   :  { %v2500_v30 = vpop.f32.mrf.mxu0  ;;  %v2532_v33 = vpop.f32.mrf.mxu1  ;;  %v1169_v44 = vadd.f32 %v1168_v57, %v2291_v17  ;;  %v1576_v7 = vsel %vm1232_vm4, %v1381_v34, 0.0  ;;  %v1575_v2 = vadd.f32 %v1574_v14, %v1573_v46  ;;  %v1248_v59 = vsel %vm1232_vm4, %v2327_v25, 0.0 }
 0x107   :  { %1113 = vst.msk [vmem:[%s3288_s2 + $0x70] sm:$0xff] %vm2150_vm3, %v1860_v20  ;;  %3345 = vst [vmem:[#allocation11_spill] sm:$0xff] %v2532_v33  ;;  %v1378_v20 = vmul.f32 %v2269_v11, %v2269_v11  ;;  %v1245_v11 = vadd.f32 %v1244_v37, %v1243_v47  ;;  %v1385_v17 = vmul.f32 %v2349_v31, %v2349_v31  ;;  %v1578_v25 = vsel %vm1232_vm4, %v1383_v60, 0.0 }
 0x108   :  { %v2522_v15 = vpop.f32.mrf.mxu0  ;;  %1145 = vst.msk [vmem:[%s3288_s2 + $0x170] sm:$0xff] %vm2150_vm3, %v1892_v1  ;;  %v2552_v50 = vpop.f32.mrf.mxu1  ;;  %v1170_v14 = vadd.f32 %v1169_v44, %v2313_v23  ;;  %v1384_v46 = vmul.f32 %v2335_v29, %v2335_v29 }
 0x109   :  { %v1861_v63 = vpack.c.bf16 %v2522_v15, %v2500_v30  ;;  %3346 = vst [vmem:[#allocation12_spill] sm:$0xff] %v2552_v50  ;;  %v1893_v5 = vpack.c.bf16 %v2552_v50, %v2532_v33  ;;  %v1499_v51 = vadd.f32 %v1498_v54, %v1378_v20  ;;  %v1382_v20 = vmul.f32 %v2313_v23, %v2313_v23 }
 0x10a   :  { %v2536_v61 = vpop.f32.mrf.mxu0  ;;  %v2566_v42 = vpop.f32.mrf.mxu1  ;;  %v1247_v37 = vadd.f32 %v1246_v13, %v1245_v11  ;;  %v1250_v13 = vsel %vm1232_vm4, %v2349_v31, 0.0  ;;  %v1387_v23 = vmul.f32 %v2371_v40, %v2371_v40  ;;  %v1171_v11 = vadd.f32 %v1170_v14, %v2335_v29 }
 0x10b   :  { %1114 = vst.msk [vmem:[%s3288_s2 + $0x78] sm:$0xff] %vm2150_vm3, %v1861_v63  ;;  %1146 = vst.msk [vmem:[%s3288_s2 + $0x178] sm:$0xff] %vm2150_vm3, %v1893_v5  ;;  %v1500_v47 = vadd.f32 %v1499_v51, %v1380_v26  ;;  %v1580_v44 = vsel %vm1232_vm4, %v1385_v17, 0.0 }
 0x10c   :  { %v2556_v1 = vpop.f32.mrf.mxu0  ;;  %v2588_v19 = vpop.f32.mrf.mxu1  ;;  %v1249_v51 = vadd.f32 %v1248_v59, %v1247_v37  ;;  %v1252_v59 = vsel %vm1232_vm4, %v2371_v40, 0.0 }
 0x10d   :  { %v1862_v63 = vpack.c.bf16 %v2556_v1, %v2536_v61  ;;  %v1894_v34 = vpack.c.bf16 %v2588_v19, %v2566_v42  ;;  %v1501_v26 = vadd.f32 %v1500_v47, %v1382_v20 }
 0x10e   :  { %v2572_v50 = vpop.f32.mrf.mxu0  ;;  %v2600_v57 = vpop.f32.mrf.mxu1  ;;  %v1251_v37 = vadd.f32 %v1250_v13, %v1249_v51 }
 0x10f   :  { %1115 = vst.msk [vmem:[%s3288_s2 + $0x80] sm:$0xff] %vm2150_vm3, %v1862_v63  ;;  %v1577_v63 = vadd.f32 %v1576_v7, %v1575_v2  ;;  %1147 = vst.msk [vmem:[%s3288_s2 + $0x180] sm:$0xff] %vm2150_vm3, %v1894_v34  ;;  %v1386_v7 = vmul.f32 %v2357_v35, %v2357_v35  ;;  %v1389_v34 = vmul.f32 %v2393_v55, %v2393_v55 }
 0x110   :  { %v2594_v54 = vpop.f32.mrf.mxu0  ;;  %v2622_v60 = vpop.f32.mrf.mxu1  ;;  %v1502_v17 = vadd.f32 %v1501_v26, %v1384_v46  ;;  %v1391_v46 = vmul.f32 %v2415_v9, %v2415_v9  ;;  %v1253_v13 = vadd.f32 %v1252_v59, %v1251_v37  ;;  %v1393_v37 = vmul.f32 %v2447_v45, %v2447_v45 }
 0x111   :  { %v1863_v5 = vpack.c.bf16 %v2594_v54, %v2572_v50  ;;  %v1895_v31 = vpack.c.bf16 %v2622_v60, %v2600_v57  ;;  %v1579_v2 = vadd.f32 %v1578_v25, %v1577_v63  ;;  %v1172_v63 = vadd.f32 %v1171_v11, %v2357_v35 }
 0x112   :  { %v2606_v33 = vpop.f32.mrf.mxu0  ;;  %v2638_v47 = vpop.f32.mrf.mxu1  ;;  %v1582_v25 = vsel %vm1232_vm4, %v1387_v23, 0.0  ;;  %v1503_v51 = vadd.f32 %v1502_v17, %v1386_v7  ;;  %v1584_v11 = vsel %vm1232_vm4, %v1389_v34, 0.0 }
 0x113   :  { %1116 = vst.msk [vmem:[%s3288_s2 + $0x88] sm:$0xff] %vm2150_vm3, %v1863_v5  ;;  %3347 = vst [vmem:[#allocation13_spill] sm:$0xff] %v2638_v47  ;;  %v1388_v5 = vmul.f32 %v2379_v48, %v2379_v48  ;;  %v1581_v40 = vadd.f32 %v1580_v44, %v1579_v2  ;;  %v1254_v44 = vsel %vm1232_vm4, %v2393_v55, 0.0  ;;  %v1173_v23 = vadd.f32 %v1172_v63, %v2379_v48 }
 0x114   :  { %v2628_v20 = vpop.f32.mrf.mxu0  ;;  %1148 = vst.msk [vmem:[%s3288_s2 + $0x188] sm:$0xff] %vm2150_vm3, %v1895_v31  ;;  %v2658_v26 = vpop.f32.mrf.mxu1  ;;  %v1390_v2 = vmul.f32 %v2401_v3, %v2401_v3  ;;  %v1256_v55 = vsel %vm1232_vm4, %v2415_v9, 0.0  ;;  %v1255_v48 = vadd.f32 %v1254_v44, %v1253_v13 }
 0x115   :  { %v1864_v29 = vpack.c.bf16 %v2628_v20, %v2606_v33  ;;  %3348 = vst [vmem:[#allocation14_spill] sm:$0xff] %v2658_v26  ;;  %v1896_v35 = vpack.c.bf16 %v2658_v26, %v2638_v47  ;;  %v1583_v59 = vadd.f32 %v1582_v25, %v1581_v40  ;;  %v1504_v17 = vadd.f32 %v1503_v51, %v1388_v5 }
 0x116   :  { %v2642_v14 = vpop.f32.mrf.mxu0  ;;  %v2672_v7 = vpop.f32.mrf.mxu1  ;;  %v1174_v34 = vadd.f32 %v1173_v23, %v2401_v3  ;;  %v1586_v40 = vsel %vm1232_vm4, %v1391_v46, 0.0  ;;  %v1392_v5 = vmul.f32 %v2427_v27, %v2427_v27  ;;  %v1258_v25 = vsel %vm1232_vm4, %v2447_v45, 0.0 }
 0x117   :  { %1117 = vst.msk [vmem:[%s3288_s2 + $0x90] sm:$0xff] %vm2150_vm3, %v1864_v29  ;;  %1149 = vst.msk [vmem:[%s3288_s2 + $0x190] sm:$0xff] %vm2150_vm3, %v1896_v35  ;;  %v1585_v63 = vadd.f32 %v1584_v11, %v1583_v59  ;;  %v1395_v3 = vmul.f32 %v2487_v32, %v2487_v32  ;;  %v1505_v13 = vadd.f32 %v1504_v17, %v1390_v2  ;;  %v1588_v45 = vsel %vm1232_vm4, %v1393_v37, 0.0 }
 0x118   :  { %v2662_v31 = vpop.f32.mrf.mxu0  ;;  %v2694_v9 = vpop.f32.mrf.mxu1  ;;  %v1257_v44 = vadd.f32 %v1256_v55, %v1255_v48  ;;  %v1175_v11 = vadd.f32 %v1174_v34, %v2427_v27  ;;  %v1394_v59 = vmul.f32 %v2465_v21, %v2465_v21  ;;  %v1260_v55 = vsel %vm1232_vm4, %v2487_v32, 0.0 }
 0x119   :  { %v1865_v29 = vpack.c.bf16 %v2662_v31, %v2642_v14  ;;  %v1897_v46 = vpack.c.bf16 %v2694_v9, %v2672_v7  ;;  %v1506_v2 = vadd.f32 %v1505_v13, %v1392_v5  ;;  %v1397_v27 = vmul.f32 %v2522_v15, %v2522_v15 }
 0x11a   :  { %v2678_v26 = vpop.f32.mrf.mxu0  ;;  %v2706_v23 = vpop.f32.mrf.mxu1  ;;  %v1259_v17 = vadd.f32 %v1258_v25, %v1257_v44  ;;  %v1176_v48 = vadd.f32 %v1175_v11, %v2465_v21  ;;  %v1590_v34 = vsel %vm1232_vm4, %v1395_v3, 0.0  ;;  %v1262_v25 = vsel %vm1232_vm4, %v2522_v15, 0.0 }
 0x11b   :  { %1118 = vst.msk [vmem:[%s3288_s2 + $0x98] sm:$0xff] %vm2150_vm3, %v1865_v29  ;;  %v1587_v29 = vadd.f32 %v1586_v40, %v1585_v63  ;;  %1150 = vst.msk [vmem:[%s3288_s2 + $0x198] sm:$0xff] %vm2150_vm3, %v1897_v46  ;;  %v1396_v40 = vmul.f32 %v2500_v30, %v2500_v30  ;;  %v1399_v46 = vmul.f32 %v2556_v1, %v2556_v1 }
 0x11c   :  { %v2700_v51 = vpop.f32.mrf.mxu0  ;;  %v2728_v37 = vpop.f32.mrf.mxu1  ;;  %v1507_v3 = vadd.f32 %v1506_v2, %v1394_v59  ;;  %v1261_v44 = vadd.f32 %v1260_v55, %v1259_v17  ;;  %v1401_v59 = vmul.f32 %v2594_v54, %v2594_v54 }
 0x11d   :  { %v1866_v35 = vpack.c.bf16 %v2700_v51, %v2678_v26  ;;  %v1898_v32 = vpack.c.bf16 %v2728_v37, %v2706_v23  ;;  %v1589_v63 = vadd.f32 %v1588_v45, %v1587_v29  ;;  %v1177_v29 = vadd.f32 %v1176_v48, %v2500_v30 }
 0x11e   :  { %v2712_v47 = vpop.f32.mrf.mxu0  ;;  %v2744_v13 = vpop.f32.mrf.mxu1  ;;  %v1592_v45 = vsel %vm1232_vm4, %v1397_v27, 0.0  ;;  %v1508_v17 = vadd.f32 %v1507_v3, %v1396_v40  ;;  %v1263_v55 = vadd.f32 %v1262_v25, %v1261_v44  ;;  %v1594_v48 = vsel %vm1232_vm4, %v1399_v46, 0.0 }
 0x11f   :  { %1119 = vst.msk [vmem:[%s3288_s2 + $0xa0] sm:$0xff] %vm2150_vm3, %v1866_v35  ;;  %3349 = vst [vmem:[#allocation15_spill] sm:$0xff] %v2744_v13  ;;  %v1398_v35 = vmul.f32 %v2536_v61, %v2536_v61  ;;  %v1591_v15 = vadd.f32 %v1590_v34, %v1589_v63  ;;  %v1264_v34 = vsel %vm1232_vm4, %v2556_v1, 0.0  ;;  %v1178_v27 = vadd.f32 %v1177_v29, %v2536_v61 }
 0x120   :  { %v2734_v5 = vpop.f32.mrf.mxu0  ;;  %1151 = vst.msk [vmem:[%s3288_s2 + $0x1a0] sm:$0xff] %vm2150_vm3, %v1898_v32  ;;  %v2764_v2 = vpop.f32.mrf.mxu1  ;;  %v1400_v63 = vmul.f32 %v2572_v50, %v2572_v50  ;;  %v1266_v1 = vsel %vm1232_vm4, %v2594_v54, 0.0  ;;  %v1403_v44 = vmul.f32 %v2628_v20, %v2628_v20  ;;  %v1265_v61 = vadd.f32 %v1264_v34, %v1263_v55 }
 0x121   :  { %v1867_v21 = vpack.c.bf16 %v2734_v5, %v2712_v47  ;;  %3350 = vst [vmem:[#allocation16_spill] sm:$0xff] %v2764_v2  ;;  %v1899_v30 = vpack.c.bf16 %v2764_v2, %v2744_v13  ;;  %v1593_v25 = vadd.f32 %v1592_v45, %v1591_v15  ;;  %v1509_v3 = vadd.f32 %v1508_v17, %v1398_v35 }
 0x122   :  { %v2748_v11 = vpop.f32.mrf.mxu0  ;;  %v2778_v40 = vpop.f32.mrf.mxu1  ;;  %v1179_v46 = vadd.f32 %v1178_v27, %v2572_v50  ;;  %v1596_v15 = vsel %vm1232_vm4, %v1401_v59, 0.0  ;;  %v1402_v35 = vmul.f32 %v2606_v33, %v2606_v33  ;;  %v1268_v45 = vsel %vm1232_vm4, %v2628_v20, 0.0 }
 0x123   :  { %1120 = vst.msk [vmem:[%s3288_s2 + $0xa8] sm:$0xff] %vm2150_vm3, %v1867_v21  ;;  %1152 = vst.msk [vmem:[%s3288_s2 + $0x1a8] sm:$0xff] %vm2150_vm3, %v1899_v30  ;;  %v1595_v29 = vadd.f32 %v1594_v48, %v1593_v25  ;;  %v1405_v50 = vmul.f32 %v2662_v31, %v2662_v31  ;;  %v1510_v55 = vadd.f32 %v1509_v3, %v1400_v63  ;;  %v1598_v48 = vsel %vm1232_vm4, %v1403_v44, 0.0 }
 0x124   :  { %v2768_v32 = vpop.f32.mrf.mxu0  ;;  %v2800_v54 = vpop.f32.mrf.mxu1  ;;  %v1267_v34 = vadd.f32 %v1266_v1, %v1265_v61  ;;  %v1180_v13 = vadd.f32 %v1179_v46, %v2606_v33  ;;  %v1404_v20 = vmul.f32 %v2642_v14, %v2642_v14  ;;  %v1270_v1 = vsel %vm1232_vm4, %v2662_v31, 0.0 }
 0x125   :  { %v1868_v21 = vpack.c.bf16 %v2768_v32, %v2748_v11  ;;  %v1900_v59 = vpack.c.bf16 %v2800_v54, %v2778_v40  ;;  %v1511_v63 = vadd.f32 %v1510_v55, %v1402_v35  ;;  %v1407_v33 = vmul.f32 %v2700_v51, %v2700_v51 }
 0x126   :  { %v2784_v2 = vpop.f32.mrf.mxu0  ;;  %v2809_v27 = vpop.f32.mrf.mxu1  ;;  %v1269_v3 = vadd.f32 %v1268_v45, %v1267_v34  ;;  %v1181_v61 = vadd.f32 %v1180_v13, %v2642_v14  ;;  %v1600_v46 = vsel %vm1232_vm4, %v1405_v50, 0.0  ;;  %v1272_v45 = vsel %vm1232_vm4, %v2700_v51, 0.0 }
 0x127   :  { %1121 = vst.msk [vmem:[%s3288_s2 + $0xb0] sm:$0xff] %vm2150_vm3, %v1868_v21  ;;  %v1597_v21 = vadd.f32 %v1596_v15, %v1595_v29  ;;  %1153 = vst.msk [vmem:[%s3288_s2 + $0x1b0] sm:$0xff] %vm2150_vm3, %v1900_v59  ;;  %v1406_v15 = vmul.f32 %v2678_v26, %v2678_v26  ;;  %v1409_v59 = vmul.f32 %v2734_v5, %v2734_v5 }
 0x128   :  { %v509_v17 = vpop.f32.mrf.mxu0  ;;  %v2831_v44 = vpop.f32.mrf.mxu1  ;;  %v1512_v14 = vadd.f32 %v1511_v63, %v1404_v20  ;;  %v1271_v13 = vadd.f32 %v1270_v1, %v1269_v3  ;;  %v1408_v50 = vmul.f32 %v2712_v47, %v2712_v47  ;;  %v1411_v20 = vmul.f32 %v2768_v32, %v2768_v32 }
 0x129   :  { %v1869_v30 = vpack.c.bf16 %v509_v17, %v2784_v2  ;;  %3351 = vst [vmem:[#allocation17_spill] sm:$0xff] %v2831_v44  ;;  %v1901_v31 = vpack.c.bf16 %v2831_v44, %v2809_v27  ;;  %v1599_v29 = vadd.f32 %v1598_v48, %v1597_v21  ;;  %v1182_v21 = vadd.f32 %v1181_v61, %v2678_v26 }
 0x12a   :  { %v2815_v25 = vpop.f32.mrf.mxu0  ;;  %v2844_v34 = vpop.f32.mrf.mxu1  ;;  %v1602_v48 = vsel %vm1232_vm4, %v1407_v33, 0.0  ;;  %v1513_v3 = vadd.f32 %v1512_v14, %v1406_v15  ;;  %v1273_v1 = vadd.f32 %v1272_v45, %v1271_v13  ;;  %v1604_v61 = vsel %vm1232_vm4, %v1409_v59, 0.0 }
 0x12b   :  { %1122 = vst.msk [vmem:[%s3288_s2 + $0xb8] sm:$0xff] %vm2150_vm3, %v1869_v30  ;;  %3352 = vst [vmem:[#allocation18_spill] sm:$0xff] %v2844_v34  ;;  %v1601_v51 = vadd.f32 %v1600_v46, %v1599_v29  ;;  %v1274_v46 = vsel %vm1232_vm4, %v2734_v5, 0.0  ;;  %v1183_v33 = vadd.f32 %v1182_v21, %v2712_v47  ;;  %v1410_v29 = vmul.f32 %v2748_v11, %v2748_v11 }
 0x12c   :  { %v515_v35 = vpop.f32.mrf.mxu0  ;;  %1154 = vst.msk [vmem:[%s3288_s2 + $0x1b8] sm:$0xff] %vm2150_vm3, %v1901_v31  ;;  %v2864_v63 = vpop.f32.mrf.mxu1  ;;  %v1514_v45 = vadd.f32 %v1513_v3, %v1408_v50  ;;  %v1276_v5 = vsel %vm1232_vm4, %v2768_v32, 0.0  ;;  %v1413_v14 = vmul.f32 %v509_v17, %v509_v17  ;;  %v1275_v47 = vadd.f32 %v1274_v46, %v1273_v1 }
 0x12d   :  { %v1870_v55 = vpack.c.bf16 %v515_v35, %v2815_v25  ;;  %3353 = vst [vmem:[#allocation19_spill] sm:$0xff] %v2864_v63  ;;  %v1902_v26 = vpack.c.bf16 %v2864_v63, %v2844_v34  ;;  %v1603_v15 = vadd.f32 %v1602_v48, %v1601_v51  ;;  %v1184_v59 = vadd.f32 %v1183_v33, %v2748_v11 }
 0x12e   :  { %v2848_v30 = vpop.f32.mrf.mxu0  ;;  %v2875_v44 = vpop.f32.mrf.mxu1  ;;  %v1606_v21 = vsel %vm1232_vm4, %v1411_v20, 0.0  ;;  %v1412_v51 = vmul.f32 %v2784_v2, %v2784_v2  ;;  %v1278_v48 = vsel %vm1232_vm4, %v509_v17, 0.0  ;;  %v1415_v3 = vmul.f32 %v515_v35, %v515_v35 }
 0x12f   :  { %1123 = vst.msk [vmem:[%s3288_s2 + $0xc0] sm:$0xff] %vm2150_vm3, %v1870_v55  ;;  %3354 = vst [vmem:[#allocation20_spill] sm:$0xff] %v2875_v44  ;;  %v1605_v50 = vadd.f32 %v1604_v61, %v1603_v15  ;;  %v1515_v20 = vadd.f32 %v1514_v45, %v1410_v29  ;;  %v1277_v46 = vadd.f32 %v1276_v5, %v1275_v47  ;;  %v1280_v45 = vsel %vm1232_vm4, %v515_v35, 0.0 }
 0x130   :  { %v519_v31 = vpop.f32.mrf.mxu0  ;;  %1155 = vst.msk [vmem:[%s3288_s2 + $0x1c0] sm:$0xff] %vm2150_vm3, %v1902_v26  ;;  %v2893_v32 = vpop.f32.mrf.mxu1  ;;  %v1185_v34 = vadd.f32 %v1184_v59, %v2784_v2  ;;  %v1414_v61 = vmul.f32 %v2815_v25, %v2815_v25  ;;  %v1610_v47 = vsel %vm1232_vm4, %v1415_v3, 0.0  ;;  %v1416_v59 = vmul.f32 %v2848_v30, %v2848_v30 }
 0x131   :  { %v1871_v55 = vpack.c.bf16 %v519_v31, %v2848_v30  ;;  %3355 = vst [vmem:[#allocation21_spill] sm:$0xff] %v2893_v32  ;;  %v1903_v11 = vpack.c.bf16 %v2893_v32, %v2875_v44  ;;  %v1607_v63 = vadd.f32 %v1606_v21, %v1605_v50  ;;  %v1516_v17 = vadd.f32 %v1515_v20, %v1412_v51 }
 0x132   :  { %v523_v13 = vpop.f32.mrf.mxu0  ;;  %v2898_v33 = vpop.f32.mrf.mxu1  ;;  %v1279_v29 = vadd.f32 %v1278_v48, %v1277_v46  ;;  %v1417_v5 = vmul.f32 %v519_v31, %v519_v31  ;;  %v1282_v50 = vsel %vm1232_vm4, %v519_v31, 0.0 }
 0x133   :  { %1124 = vst.msk [vmem:[%s3288_s2 + $0xc8] sm:$0xff] %vm2150_vm3, %v1871_v55  ;;  %3356 = vst [vmem:[#allocation22_spill] sm:$0xff] %v2898_v33  ;;  %v1608_v55 = vsel %vm1232_vm4, %v1413_v14, 0.0  ;;  %v1186_v14 = vadd.f32 %v1185_v34, %v2815_v25  ;;  %v1517_v46 = vadd.f32 %v1516_v17, %v1414_v61  ;;  %v1418_v34 = vmul.f32 %v523_v13, %v523_v13 }
 0x134   :  { %v525_v1 = vpop.f32.mrf.mxu0  ;;  %1156 = vst.msk [vmem:[%s3288_s2 + $0x1c8] sm:$0xff] %vm2150_vm3, %v1903_v11  ;;  %v2915_v2 = vpop.f32.mrf.mxu1  ;;  %v1609_v51 = vadd.f32 %v1608_v55, %v1607_v63  ;;  %v1612_v63 = vsel %vm1232_vm4, %v1417_v5, 0.0 }
 0x135   :  { %v1872_v26 = vpack.c.bf16 %v525_v1, %v523_v13  ;;  %3357 = vst [vmem:[#allocation23_spill] sm:$0xff] %v2915_v2  ;;  %v1904_v35 = vpack.c.bf16 %v2915_v2, %v2898_v33  ;;  %v1419_v48 = vmul.f32 %v525_v1, %v525_v1  ;;  %v1187_v25 = vadd.f32 %v1186_v14, %v2848_v30 }
 0x136   :  { %v527_v15 = vpop.f32.mrf.mxu0  ;;  %v2924_v20 = vpop.f32.mrf.mxu1  ;;  %v1611_v2 = vadd.f32 %v1610_v47, %v1609_v51  ;;  %v1284_v31 = vsel %vm1232_vm4, %v525_v1, 0.0  ;;  %v1518_v61 = vadd.f32 %v1517_v46, %v1416_v59 }
 0x137   :  { %1125 = vst.msk [vmem:[%s3288_s2 + $0xd0] sm:$0xff] %vm2150_vm3, %v1872_v26  ;;  %v1281_v26 = vadd.f32 %v1280_v45, %v1279_v29  ;;  %1157 = vst.msk [vmem:[%s3288_s2 + $0x1d0] sm:$0xff] %vm2150_vm3, %v1904_v35  ;;  %v1420_v29 = vmul.f32 %v527_v15, %v527_v15  ;;  %v1188_v47 = vadd.f32 %v1187_v25, %v523_v13  ;;  %v1614_v5 = vsel %vm1232_vm4, %v1419_v48, 0.0 }
 0x138   :  { %v529_v21 = vpop.f32.mrf.mxu0  ;;  %v2939_v55 = vpop.f32.mrf.mxu1  ;;  %v1613_v51 = vadd.f32 %v1612_v63, %v1611_v2  ;;  %v1519_v33 = vadd.f32 %v1518_v61, %v1418_v34 }
 0x139   :  { %v1873_v11 = vpack.c.bf16 %v529_v21, %v527_v15  ;;  %v1421_v30 = vmul.f32 %v529_v21, %v529_v21  ;;  %v1283_v17 = vadd.f32 %v1282_v50, %v1281_v26  ;;  %v1905_v14 = vpack.c.bf16 %v2939_v55, %v2924_v20 }
 0x13a   :  { %v533_v3 = vpop.f32.mrf.mxu0  ;;  %v2944_v35 = vpop.f32.mrf.mxu1  ;;  %v1189_v59 = vadd.f32 %v1188_v47, %v527_v15  ;;  %v1286_v50 = vsel %vm1232_vm4, %v529_v21, 0.0  ;;  %v1615_v46 = vadd.f32 %v1614_v5, %v1613_v51  ;;  %v1520_v26 = vadd.f32 %v1519_v33, %v1420_v29 }
 0x13b   :  { %1126 = vst.msk [vmem:[%s3288_s2 + $0xd8] sm:$0xff] %vm2150_vm3, %v1873_v11  ;;  %v1285_v32 = vadd.f32 %v1284_v31, %v1283_v17  ;;  %v1422_v11 = vmul.f32 %v533_v3, %v533_v3  ;;  %1158 = vst.msk [vmem:[%s3288_s2 + $0x1d8] sm:$0xff] %vm2150_vm3, %v1905_v14  ;;  %v1616_v13 = vsel %vm1232_vm4, %v1421_v30, 0.0 }
 0x13c   :  { %v535_v45 = vpop.f32.mrf.mxu0  ;;  %v2958_v48 = vpop.f32.mrf.mxu1  ;;  %v1190_v63 = vadd.f32 %v1189_v59, %v533_v3  ;;  %v1617_v14 = vadd.f32 %v1616_v13, %v1615_v46 }
 0x13d   :  { %v1874_v1 = vpack.c.bf16 %v535_v45, %v533_v3  ;;  %v1423_v2 = vmul.f32 %v535_v45, %v535_v45  ;;  %v1906_v15 = vpack.c.bf16 %v2958_v48, %v2944_v35  ;;  %v1288_v21 = vsel %vm1232_vm4, %v535_v45, 0.0 }
 0x13e   :  { %v537_v44 = vpop.f32.mrf.mxu0  ;;  %v2963_v61 = vpop.f32.mrf.mxu1  ;;  %v1287_v17 = vadd.f32 %v1286_v50, %v1285_v32  ;;  %v1521_v47 = vadd.f32 %v1520_v26, %v1422_v11 }
 0x13f   :  { %1127 = vst.msk [vmem:[%s3288_s2 + $0xe0] sm:$0xff] %vm2150_vm3, %v1874_v1  ;;  %v1424_v25 = vmul.f32 %v537_v44, %v537_v44  ;;  %1159 = vst.msk [vmem:[%s3288_s2 + $0x1e0] sm:$0xff] %vm2150_vm3, %v1906_v15  ;;  %v1618_v33 = vsel %vm1232_vm4, %v1423_v2, 0.0  ;;  %v1191_v29 = vadd.f32 %v1190_v63, %v537_v44 }
 0x140   :  { %v539_v34 = vpop.f32.mrf.mxu0  ;;  %v2977_v45 = vpop.f32.mrf.mxu1  ;;  %v1289_v5 = vadd.f32 %v1288_v21, %v1287_v17  ;;  %v1619_v15 = vadd.f32 %v1618_v33, %v1617_v14 }
 0x141   :  { %v1875_v31 = vpack.c.bf16 %v539_v34, %v537_v44  ;;  %v1425_v30 = vmul.f32 %v539_v34, %v539_v34  ;;  %v1290_v32 = vsel %vm1232_vm4, %v539_v34, 0.0  ;;  %v1522_v51 = vadd.f32 %v1521_v47, %v1424_v25 }
 0x142   :  { %v543_v1 = vpop.f32.mrf.mxu0  ;;  %v1907_v50 = vpack.c.bf16 %v2977_v45, %v2963_v61  ;;  %v2983_v26 = vpop.f32.mrf.mxu1  ;;  %v1430_v34 = vmul.f32 %v2156_v41, %v2156_v41  ;;  %v1291_v63 = vadd.f32 %v1290_v32, %v1289_v5  ;;  %v1296_v25 = vsel %vm1232_vm4, %v2165_v43, 0.0 }
 0x143   :  { %1128 = vst.msk [vmem:[%s3288_s2 + $0xe8] sm:$0xff] %vm2150_vm3, %v1875_v31  ;;  %v1426_v3 = vmul.f32 %v543_v1, %v543_v1  ;;  %v1620_v11 = vsel %vm1232_vm4, %v1425_v30, 0.0  ;;  %v1192_v44 = vadd.f32 %v1191_v29, %v543_v1 }
 0x144   :  { %v545_v59 = vpop.f32.mrf.mxu0  ;;  %1160 = vst.msk [vmem:[%s3288_s2 + $0x1e8] sm:$0xff] %vm2150_vm3, %v1907_v50  ;;  %v2999_v14 = vpop.f32.mrf.mxu1  ;;  %v1621_v47 = vadd.f32 %v1620_v11, %v1619_v15  ;;  %v1432_v11 = vmul.f32 %v2177_v49, %v2177_v49 }
 0x145   :  { %v1876_v13 = vpack.c.bf16 %v545_v59, %v543_v1  ;;  %v1292_v2 = vsel %vm1232_vm4, %v545_v59, 0.0  ;;  %v1427_v46 = vmul.f32 %v545_v59, %v545_v59  ;;  %v1523_v31 = vadd.f32 %v1522_v51, %v1426_v3 }
 0x146   :  { %v547_v21 = vpop.f32.mrf.mxu0  ;;  %v1293_v1 = vadd.f32 %v1292_v2, %v1291_v63  ;;  %v1908_v32 = vpack.c.bf16 %v2999_v14, %v2983_v26  ;;  %v3006_v50 = vpop.f32.mrf.mxu1 }
 0x147   :  { %1129 = vst.msk [vmem:[%s3288_s2 + $0xf0] sm:$0xff] %vm2150_vm3, %v1876_v13  ;;  %v1193_v30 = vadd.f32 %v1192_v44, %v547_v21  ;;  %v1428_v17 = vmul.f32 %v547_v21, %v547_v21  ;;  %v1622_v33 = vsel %vm1232_vm4, %v1427_v46, 0.0  ;;  %v1431_v44 = vmul.f32 %v2165_v43, %v2165_v43 }
 0x148   :  { %v549_v29 = vpop.f32.mrf.mxu0  ;;  %1161 = vst.msk [vmem:[%s3288_s2 + $0x1f0] sm:$0xff] %vm2150_vm3, %v1908_v32  ;;  %v1623_v46 = vadd.f32 %v1622_v33, %v1621_v47  ;;  %v3025_v43 = vpop.f32.mrf.mxu1 }
 0x149   :  { %v1194_v3 = vadd.f32 %v1193_v30, %v2156_v41  ;;  %v1524_v5 = vadd.f32 %v1523_v31, %v1428_v17  ;;  %v1877_v51 = vpack.c.bf16 %v549_v29, %v547_v21  ;;  %v1294_v59 = vsel %vm1232_vm4, %v549_v29, 0.0 }
 0x14a   :  { %v1295_v13 = vadd.f32 %v1294_v59, %v1293_v1  ;;  %v1429_v2 = vmul.f32 %v549_v29, %v549_v29  ;;  %v1298_v41 = vsel %vm1232_vm4, %v2193_v52, 0.0  ;;  %v1433_v21 = vmul.f32 %v2193_v52, %v2193_v52 }
 0x14b   :  { %v1195_v15 = vadd.f32 %v1194_v3, %v2177_v49  ;;  %v1525_v63 = vadd.f32 %v1524_v5, %v1430_v34  ;;  %1130 = vst.msk [vmem:[%s3288_s2 + $0xf8] sm:$0xff] %vm2150_vm3, %v1877_v51  ;;  %v1909_v17 = vpack.c.bf16 %v3025_v43, %v3006_v50  ;;  %v1434_v49 = vmul.f32 %v2201_v56, %v2201_v56 }
 0x14c   :  { %v1297_v31 = vadd.f32 %v1296_v25, %v1295_v13  ;;  %v1624_v30 = vsel %vm1232_vm4, %v1429_v2, 0.0  ;;  %v1626_v33 = vsel %vm1232_vm4, %v1431_v44, 0.0  ;;  %v1300_v29 = vsel %vm1232_vm4, %v2215_v58, 0.0 }
 0x14d   :  { %v1196_v34 = vadd.f32 %v1195_v15, %v2201_v56  ;;  %v1526_v47 = vadd.f32 %v1525_v63, %v1432_v11  ;;  %v1625_v1 = vadd.f32 %v1624_v30, %v1623_v46  ;;  %v1435_v52 = vmul.f32 %v2215_v58, %v2215_v58  ;;  %1162 = vst.msk [vmem:[%s3288_s2 + $0x1f8] sm:$0xff] %vm2150_vm3, %v1909_v17 }
 0x14e   :  { %v1299_v25 = vadd.f32 %v1298_v41, %v1297_v31  ;;  %v1436_v56 = vmul.f32 %v2223_v62, %v2223_v62  ;;  %v1628_v51 = vsel %vm1232_vm4, %v1433_v21, 0.0  ;;  %v1302_v59 = vsel %vm1232_vm4, %v2237_v0, 0.0 }
 0x14f   :  { %v1197_v32 = vadd.f32 %v1196_v34, %v2223_v62  ;;  %v1527_v3 = vadd.f32 %v1526_v47, %v1434_v49  ;;  %v1627_v5 = vadd.f32 %v1626_v33, %v1625_v1  ;;  %v1437_v58 = vmul.f32 %v2237_v0, %v2237_v0 }
 0x150   :  { %v1301_v39 = vadd.f32 %v1300_v29, %v1299_v25  ;;  %v1438_v44 = vmul.f32 %v2245_v4, %v2245_v4  ;;  %v1630_v62 = vsel %vm1232_vm4, %v1435_v52, 0.0  ;;  %v1304_v41 = vsel %vm1232_vm4, %v2259_v6, 0.0 }
 0x151   :  { %v1198_v11 = vadd.f32 %v1197_v32, %v2245_v4  ;;  %v1528_v13 = vadd.f32 %v1527_v3, %v1436_v56  ;;  %v1629_v2 = vadd.f32 %v1628_v51, %v1627_v5  ;;  %v1439_v46 = vmul.f32 %v2259_v6, %v2259_v6 }
 0x152   :  { %v1303_v15 = vadd.f32 %v1302_v59, %v1301_v39  ;;  %v1440_v0 = vmul.f32 %v2267_v10, %v2267_v10  ;;  %v1632_v4 = vsel %vm1232_vm4, %v1437_v58, 0.0  ;;  %v1306_v30 = vsel %vm1232_vm4, %v2281_v12, 0.0 }
 0x153   :  { %v1199_v63 = vadd.f32 %v1198_v11, %v2267_v10  ;;  %v1529_v21 = vadd.f32 %v1528_v13, %v1438_v44  ;;  %v1631_v31 = vadd.f32 %v1630_v62, %v1629_v2  ;;  %v1441_v17 = vmul.f32 %v2281_v12, %v2281_v12  ;;  %v3358_v44 = vld [vmem:[#allocation2_spill] sm:$0xff]  ;;  %v3359_v62 = vld [vmem:[#allocation3_spill] sm:$0xff] }
 0x154   :  { %v1305_v49 = vadd.f32 %v1304_v41, %v1303_v15  ;;  %v1442_v6 = vmul.f32 %v2289_v16, %v2289_v16  ;;  %v1634_v10 = vsel %vm1232_vm4, %v1439_v46, 0.0  ;;  %v1308_v33 = vsel %vm1232_vm4, %v2303_v18, 0.0 }
 0x155   :  { %v1200_v34 = vadd.f32 %v1199_v63, %v2289_v16  ;;  %v1530_v47 = vadd.f32 %v1529_v21, %v1440_v0  ;;  %v1633_v1 = vadd.f32 %v1632_v4, %v1631_v31  ;;  %v1443_v29 = vmul.f32 %v2303_v18, %v2303_v18  ;;  %v3360_v63 = vld [vmem:[#allocation4_spill] sm:$0xff]  ;;  %v3361_v4 = vld [vmem:[#allocation5_spill] sm:$0xff] }
 0x156   :  { %v1307_v52 = vadd.f32 %v1306_v30, %v1305_v49  ;;  %v1444_v12 = vmul.f32 %v2311_v22, %v2311_v22  ;;  %v1636_v16 = vsel %vm1232_vm4, %v1441_v17, 0.0  ;;  %v1310_v3 = vsel %vm1232_vm4, %v2325_v24, 0.0 }
 0x157   :  { %v1201_v25 = vadd.f32 %v1200_v34, %v2311_v22  ;;  %v1531_v56 = vadd.f32 %v1530_v47, %v1442_v6  ;;  %v1635_v32 = vadd.f32 %v1634_v10, %v1633_v1  ;;  %v1445_v5 = vmul.f32 %v2325_v24, %v2325_v24  ;;  %v3362_v47 = vld [vmem:[#allocation6_spill] sm:$0xff] }
 0x158   :  { %v1309_v51 = vadd.f32 %v1308_v33, %v1307_v52  ;;  %v1446_v18 = vmul.f32 %v2333_v28, %v2333_v28  ;;  %v1638_v22 = vsel %vm1232_vm4, %v1443_v29, 0.0  ;;  %v1312_v11 = vsel %vm1232_vm4, %v3358_v44, 0.0  ;;  %v3363_v29 = vld [vmem:[#allocation7_spill] sm:$0xff] }
 0x159   :  { %v1532_v59 = vadd.f32 %v1531_v56, %v1444_v12  ;;  %v1637_v58 = vadd.f32 %v1636_v16, %v1635_v32  ;;  %v1202_v39 = vadd.f32 %v1201_v25, %v2333_v28  ;;  %v1447_v13 = vmul.f32 %v3358_v44, %v3358_v44  ;;  %v3364_v16 = vld [vmem:[#allocation8_spill] sm:$0xff] }
 0x15a   :  { %v1311_v2 = vadd.f32 %v1310_v3, %v1309_v51  ;;  %v1448_v24 = vmul.f32 %v3359_v62, %v3359_v62  ;;  %v1640_v0 = vsel %vm1232_vm4, %v1445_v5, 0.0  ;;  %v1314_v28 = vsel %vm1232_vm4, %v3360_v63, 0.0 }
 0x15b   :  { %v1639_v41 = vadd.f32 %v1638_v22, %v1637_v58  ;;  %v1203_v46 = vadd.f32 %v1202_v39, %v3359_v62  ;;  %v1533_v15 = vadd.f32 %v1532_v59, %v1446_v18  ;;  %v1449_v21 = vmul.f32 %v3360_v63, %v3360_v63  ;;  %v3365_v18 = vld [vmem:[#allocation9_spill] sm:$0xff] }
 0x15c   :  { %v1313_v31 = vadd.f32 %v1312_v11, %v1311_v2  ;;  %v1450_v30 = vmul.f32 %v3361_v4, %v3361_v4  ;;  %v1642_v34 = vsel %vm1232_vm4, %v1447_v13, 0.0  ;;  %v1316_v1 = vsel %vm1232_vm4, %v3362_v47, 0.0  ;;  %v3366_v11 = vld [vmem:[#allocation10_spill] sm:$0xff] }
 0x15d   :  { %v1641_v17 = vadd.f32 %v1640_v0, %v1639_v41  ;;  %v1204_v49 = vadd.f32 %v1203_v46, %v3361_v4  ;;  %v1534_v6 = vadd.f32 %v1533_v15, %v1448_v24  ;;  %v1451_v10 = vmul.f32 %v3362_v47, %v3362_v47  ;;  %v3367_v47 = vld [vmem:[#allocation11_spill] sm:$0xff] }
 0x15e   :  { %v1315_v33 = vadd.f32 %v1314_v28, %v1313_v31  ;;  %v1452_v52 = vmul.f32 %v3363_v29, %v3363_v29  ;;  %v1644_v32 = vsel %vm1232_vm4, %v1449_v21, 0.0  ;;  %v1318_v3 = vsel %vm1232_vm4, %v3364_v16, 0.0 }
 0x15f   :  { %v1643_v12 = vadd.f32 %v1642_v34, %v1641_v17  ;;  %v1205_v25 = vadd.f32 %v1204_v49, %v3363_v29  ;;  %v1535_v56 = vadd.f32 %v1534_v6, %v1450_v30  ;;  %v1453_v5 = vmul.f32 %v3364_v16, %v3364_v16  ;;  %v3368_v29 = vld [vmem:[#allocation12_spill] sm:$0xff] }
 0x160   :  { %v1317_v51 = vadd.f32 %v1316_v1, %v1315_v33  ;;  %v1454_v59 = vmul.f32 %v3365_v18, %v3365_v18  ;;  %v1646_v44 = vsel %vm1232_vm4, %v1451_v10, 0.0  ;;  %v1320_v13 = vsel %vm1232_vm4, %v3366_v11, 0.0 }
 0x161   :  { %v1206_v58 = vadd.f32 %v1205_v25, %v3365_v18  ;;  %v1536_v39 = vadd.f32 %v1535_v56, %v1452_v52  ;;  %v1645_v22 = vadd.f32 %v1644_v32, %v1643_v12  ;;  %v1455_v2 = vmul.f32 %v3366_v11, %v3366_v11 }
 0x162   :  { %v1319_v62 = vadd.f32 %v1318_v3, %v1317_v51  ;;  %v1456_v24 = vmul.f32 %v2458_v8, %v2458_v8  ;;  %v1648_v0 = vsel %vm1232_vm4, %v1453_v5, 0.0  ;;  %v1322_v63 = vsel %vm1232_vm4, %v2481_v53, 0.0 }
 0x163   :  { %v1207_v41 = vadd.f32 %v1206_v58, %v2458_v8  ;;  %v1537_v46 = vadd.f32 %v1536_v39, %v1454_v59  ;;  %v1647_v15 = vadd.f32 %v1646_v44, %v1645_v22  ;;  %v1457_v28 = vmul.f32 %v2481_v53, %v2481_v53 }
 0x164   :  { %v1321_v21 = vadd.f32 %v1320_v13, %v1319_v62  ;;  %v1458_v31 = vmul.f32 %v2494_v36, %v2494_v36  ;;  %v1650_v8 = vsel %vm1232_vm4, %v1455_v2, 0.0  ;;  %v1324_v49 = vsel %vm1232_vm4, %v2516_v38, 0.0 }
 0x165   :  { %v1208_v4 = vadd.f32 %v1207_v41, %v2494_v36  ;;  %v1538_v30 = vadd.f32 %v1537_v46, %v1456_v24  ;;  %v1649_v17 = vadd.f32 %v1648_v0, %v1647_v15  ;;  %v1459_v6 = vmul.f32 %v2516_v38, %v2516_v38  ;;  %v3370_v15 = vld [vmem:[#allocation14_spill] sm:$0xff] }
 0x166   :  { %v1323_v34 = vadd.f32 %v1322_v63, %v1321_v21  ;;  %v1460_v53 = vmul.f32 %v3367_v47, %v3367_v47  ;;  %v1652_v36 = vsel %vm1232_vm4, %v1457_v28, 0.0  ;;  %v1326_v52 = vsel %vm1232_vm4, %v3368_v29, 0.0 }
 0x167   :  { %v1209_v1 = vadd.f32 %v1208_v4, %v3367_v47  ;;  %v1539_v10 = vadd.f32 %v1538_v30, %v1458_v31  ;;  %v1651_v33 = vadd.f32 %v1650_v8, %v1649_v17  ;;  %v1461_v12 = vmul.f32 %v3368_v29, %v3368_v29  ;;  %v3371_v29 = vld [vmem:[#allocation15_spill] sm:$0xff] }
 0x168   :  { %v1325_v25 = vadd.f32 %v1324_v49, %v1323_v34  ;;  %v1462_v38 = vmul.f32 %v2566_v42, %v2566_v42  ;;  %v1654_v3 = vsel %vm1232_vm4, %v1459_v6, 0.0  ;;  %v1328_v5 = vsel %vm1232_vm4, %v2588_v19, 0.0 }
 0x169   :  { %v1210_v56 = vadd.f32 %v1209_v1, %v2566_v42  ;;  %v1540_v32 = vadd.f32 %v1539_v10, %v1460_v53  ;;  %v1653_v16 = vadd.f32 %v1652_v36, %v1651_v33  ;;  %v1463_v51 = vmul.f32 %v2588_v19, %v2588_v19  ;;  %v3369_v19 = vld [vmem:[#allocation13_spill] sm:$0xff] }
 0x16a   :  { %v1327_v18 = vadd.f32 %v1326_v52, %v1325_v25  ;;  %v1464_v58 = vmul.f32 %v2600_v57, %v2600_v57  ;;  %v1656_v42 = vsel %vm1232_vm4, %v1461_v12, 0.0  ;;  %v1330_v11 = vsel %vm1232_vm4, %v2622_v60, 0.0 }
 0x16b   :  { %v1211_v59 = vadd.f32 %v1210_v56, %v2600_v57  ;;  %v1541_v39 = vadd.f32 %v1540_v32, %v1462_v38  ;;  %v1655_v22 = vadd.f32 %v1654_v3, %v1653_v16  ;;  %v1465_v13 = vmul.f32 %v2622_v60, %v2622_v60 }
 0x16c   :  { %v1329_v44 = vadd.f32 %v1328_v5, %v1327_v18  ;;  %v1466_v41 = vmul.f32 %v3369_v19, %v3369_v19  ;;  %v1658_v57 = vsel %vm1232_vm4, %v1463_v51, 0.0  ;;  %v1332_v0 = vsel %vm1232_vm4, %v3370_v15, 0.0 }
 0x16d   :  { %v1542_v2 = vadd.f32 %v1541_v39, %v1464_v58  ;;  %v1657_v62 = vadd.f32 %v1656_v42, %v1655_v22  ;;  %v1212_v24 = vadd.f32 %v1211_v59, %v3369_v19  ;;  %v1467_v63 = vmul.f32 %v3370_v15, %v3370_v15 }
 0x16e   :  { %v1331_v46 = vadd.f32 %v1330_v11, %v1329_v44  ;;  %v1468_v31 = vmul.f32 %v2672_v7, %v2672_v7  ;;  %v1660_v4 = vsel %vm1232_vm4, %v1465_v13, 0.0  ;;  %v1334_v17 = vsel %vm1232_vm4, %v2694_v9, 0.0 }
 0x16f   :  { %v1659_v28 = vadd.f32 %v1658_v57, %v1657_v62  ;;  %v1543_v21 = vadd.f32 %v1542_v2, %v1466_v41  ;;  %v1213_v60 = vadd.f32 %v1212_v24, %v2672_v7  ;;  %v1469_v8 = vmul.f32 %v2694_v9, %v2694_v9  ;;  %v3374_v24 = vld [vmem:[#allocation18_spill] sm:$0xff] }
 0x170   :  { %v1333_v30 = vadd.f32 %v1332_v0, %v1331_v46  ;;  %v1470_v47 = vmul.f32 %v2706_v23, %v2706_v23  ;;  %v1662_v53 = vsel %vm1232_vm4, %v1467_v63, 0.0  ;;  %v1336_v7 = vsel %vm1232_vm4, %v2728_v37, 0.0 }
 0x171   :  { %v1661_v49 = vadd.f32 %v1660_v4, %v1659_v28  ;;  %v1544_v6 = vadd.f32 %v1543_v21, %v1468_v31  ;;  %v1214_v34 = vadd.f32 %v1213_v60, %v2706_v23  ;;  %v1471_v10 = vmul.f32 %v2728_v37, %v2728_v37  ;;  %v3372_v23 = vld [vmem:[#allocation16_spill] sm:$0xff] }
 0x172   :  { %v1335_v1 = vadd.f32 %v1334_v17, %v1333_v30  ;;  %v1472_v52 = vmul.f32 %v3371_v29, %v3371_v29  ;;  %v1664_v12 = vsel %vm1232_vm4, %v1469_v8, 0.0  ;;  %v1338_v38 = vsel %vm1232_vm4, %v3372_v23, 0.0  ;;  %v3376_v21 = vld [vmem:[#allocation20_spill] sm:$0xff]  ;;  %v3377_v17 = vld [vmem:[#allocation21_spill] sm:$0xff] }
 0x173   :  { %v1663_v33 = vadd.f32 %v1662_v53, %v1661_v49  ;;  %v1545_v36 = vadd.f32 %v1544_v6, %v1470_v47  ;;  %v1215_v9 = vadd.f32 %v1214_v34, %v3371_v29  ;;  %v1473_v56 = vmul.f32 %v3372_v23, %v3372_v23  ;;  %v3378_v47 = vld [vmem:[#allocation22_spill] sm:$0xff] }
 0x174   :  { %v1337_v25 = vadd.f32 %v1336_v7, %v1335_v1  ;;  %v1474_v3 = vmul.f32 %v2778_v40, %v2778_v40  ;;  %v1666_v5 = vsel %vm1232_vm4, %v1471_v10, 0.0  ;;  %v1340_v18 = vsel %vm1232_vm4, %v2800_v54, 0.0 }
 0x175   :  { %v1665_v32 = vadd.f32 %v1664_v12, %v1663_v33  ;;  %v1546_v16 = vadd.f32 %v1545_v36, %v1472_v52  ;;  %v1216_v37 = vadd.f32 %v1215_v9, %v2778_v40  ;;  %v1475_v59 = vmul.f32 %v2800_v54, %v2800_v54  ;;  %v3373_v40 = vld [vmem:[#allocation17_spill] sm:$0xff]  ;;  %v3379_v33 = vld [vmem:[#allocation23_spill] sm:$0xff] }
 0x176   :  { %v1339_v51 = vadd.f32 %v1338_v38, %v1337_v25  ;;  %v1476_v42 = vmul.f32 %v2809_v27, %v2809_v27  ;;  %v1668_v44 = vsel %vm1232_vm4, %v1473_v56, 0.0  ;;  %v1342_v13 = vsel %vm1232_vm4, %v3373_v40, 0.0 }
 0x177   :  { %v1667_v58 = vadd.f32 %v1666_v5, %v1665_v32  ;;  %v1547_v39 = vadd.f32 %v1546_v16, %v1474_v3  ;;  %v1217_v22 = vadd.f32 %v1216_v37, %v2809_v27  ;;  %v1477_v2 = vmul.f32 %v3373_v40, %v3373_v40  ;;  %v3375_v27 = vld [vmem:[#allocation19_spill] sm:$0xff] }
 0x178   :  { %v1341_v11 = vadd.f32 %v1340_v18, %v1339_v51  ;;  %v1478_v41 = vmul.f32 %v3374_v24, %v3374_v24  ;;  %v1670_v57 = vsel %vm1232_vm4, %v1475_v59, 0.0  ;;  %v1344_v15 = vsel %vm1232_vm4, %v3375_v27, 0.0 }
 0x179   :  { %v1669_v62 = vadd.f32 %v1668_v44, %v1667_v58  ;;  %v1548_v19 = vadd.f32 %v1547_v39, %v1476_v42  ;;  %v1218_v54 = vadd.f32 %v1217_v22, %v3374_v24  ;;  %v1479_v0 = vmul.f32 %v3375_v27, %v3375_v27 }
 0x17a   :  { %v1343_v46 = vadd.f32 %v1342_v13, %v1341_v11  ;;  %v1480_v31 = vmul.f32 %v3376_v21, %v3376_v21  ;;  %v1672_v4 = vsel %vm1232_vm4, %v1477_v2, 0.0  ;;  %v1346_v8 = vsel %vm1232_vm4, %v3377_v17, 0.0 }
 0x17b   :  { %v1671_v63 = vadd.f32 %v1670_v57, %v1669_v62  ;;  %v1549_v28 = vadd.f32 %v1548_v19, %v1478_v41  ;;  %v1219_v60 = vadd.f32 %v1218_v54, %v3376_v21  ;;  %v1481_v49 = vmul.f32 %v3377_v17, %v3377_v17 }
 0x17c   :  { %v1345_v30 = vadd.f32 %v1344_v15, %v1343_v46  ;;  %v1482_v1 = vmul.f32 %v3378_v47, %v3378_v47  ;;  %v1674_v7 = vsel %vm1232_vm4, %v1479_v0, 0.0  ;;  %v1348_v36 = vsel %vm1232_vm4, %v3379_v33, 0.0 }
 0x17d   :  { %v1673_v6 = vadd.f32 %v1672_v4, %v1671_v63  ;;  %v1550_v34 = vadd.f32 %v1549_v28, %v1480_v31  ;;  %v1220_v53 = vadd.f32 %v1219_v60, %v3378_v47  ;;  %v1483_v29 = vmul.f32 %v3379_v33, %v3379_v33 }
 0x17e   :  { %v1347_v10 = vadd.f32 %v1346_v8, %v1345_v30  ;;  %v1484_v25 = vmul.f32 %v2924_v20, %v2924_v20  ;;  %v1676_v23 = vsel %vm1232_vm4, %v1481_v49, 0.0  ;;  %v1350_v56 = vsel %vm1232_vm4, %v2939_v55, 0.0 }
 0x17f   :  { %v1675_v9 = vadd.f32 %v1674_v7, %v1673_v6  ;;  %v1551_v52 = vadd.f32 %v1550_v34, %v1482_v1  ;;  %v1221_v12 = vadd.f32 %v1220_v53, %v2924_v20  ;;  %v1485_v32 = vmul.f32 %v2939_v55, %v2939_v55 }
 0x180   :  { %v1349_v38 = vadd.f32 %v1348_v36, %v1347_v10  ;;  %v1486_v5 = vmul.f32 %v2944_v35, %v2944_v35  ;;  %v1678_v51 = vsel %vm1232_vm4, %v1483_v29, 0.0  ;;  %v1352_v20 = vsel %vm1232_vm4, %v2958_v48, 0.0 }
 0x181   :  { %v1677_v16 = vadd.f32 %v1676_v23, %v1675_v9  ;;  %v1552_v37 = vadd.f32 %v1551_v52, %v1484_v25  ;;  %v1222_v3 = vadd.f32 %v1221_v12, %v2944_v35  ;;  %v1487_v59 = vmul.f32 %v2958_v48, %v2958_v48 }
 0x182   :  { %v1351_v18 = vadd.f32 %v1350_v56, %v1349_v38  ;;  %v1488_v22 = vmul.f32 %v2963_v61, %v2963_v61  ;;  %v1680_v42 = vsel %vm1232_vm4, %v1485_v32, 0.0  ;;  %v1354_v35 = vsel %vm1232_vm4, %v2977_v45, 0.0 }
 0x183   :  { %v1679_v58 = vadd.f32 %v1678_v51, %v1677_v16  ;;  %v1553_v39 = vadd.f32 %v1552_v37, %v1486_v5  ;;  %v1223_v55 = vadd.f32 %v1222_v3, %v2963_v61  ;;  %v1489_v11 = vmul.f32 %v2977_v45, %v2977_v45 }
 0x184   :  { %v1353_v44 = vadd.f32 %v1352_v20, %v1351_v18  ;;  %v1490_v2 = vmul.f32 %v2983_v26, %v2983_v26  ;;  %v1682_v62 = vsel %vm1232_vm4, %v1487_v59, 0.0  ;;  %v1356_v61 = vsel %vm1232_vm4, %v2999_v14, 0.0 }
 0x185   :  { %v1681_v40 = vadd.f32 %v1680_v42, %v1679_v58  ;;  %v1554_v13 = vadd.f32 %v1553_v39, %v1488_v22  ;;  %v1224_v48 = vadd.f32 %v1223_v55, %v2983_v26  ;;  %v1491_v24 = vmul.f32 %v2999_v14, %v2999_v14 }
 0x186   :  { %v1355_v19 = vadd.f32 %v1354_v35, %v1353_v44  ;;  %v1492_v57 = vmul.f32 %v3006_v50, %v3006_v50  ;;  %v1684_v46 = vsel %vm1232_vm4, %v1489_v11, 0.0  ;;  %v1493_v26 = vmul.f32 %v3025_v43, %v3025_v43 }
 0x187   :  { %v1683_v54 = vadd.f32 %v1682_v62, %v1681_v40  ;;  %v1555_v41 = vadd.f32 %v1554_v13, %v1490_v2  ;;  %v1225_v45 = vadd.f32 %v1224_v48, %v3006_v50  ;;  %v1358_v28 = vsel %vm1232_vm4, %v3025_v43, 0.0 }
 0x188   :  { %v1357_v27 = vadd.f32 %v1356_v61, %v1355_v19  ;;  %v1686_v14 = vsel %vm1232_vm4, %v1491_v24, 0.0  ;;  %v1696_v30 = vlaneseq  ;;  %v1688_v17 = vsel %vm1232_vm4, %v1493_v26, 0.0 }
 0x189   :  { %v1685_v15 = vadd.f32 %v1684_v46, %v1683_v54  ;;  %v1226_v0 = vrot.slane %v1225_v45, 4  ;;  %v1556_v63 = vadd.f32 %v1555_v41, %v1492_v57 }
 0x18a   :  { %v1359_v21 = vadd.f32 %v1358_v28, %v1357_v27  ;;  %v1697_v7 = vshrl.u32 %v1696_v30, 7 }
 0x18b   :  { %v1687_v60 = vadd.f32 %v1686_v14, %v1685_v15  ;;  %v1227_v31 = vadd.f32 %v1226_v0, %v1225_v45  ;;  %v1557_v4 = vrot.slane %v1556_v63, 4 }
 0x18c   :  { %v1360_v50 = vrot.slane %v1359_v21, 4  ;;  %vm1699_vm5 = vcmp.eq.s32.totalorder %v1697_v7, 1  ;;  %vm1698_vm6 = vcmp.eq.s32.totalorder %v1697_v7, 0 }
 0x18d   :  { %v1228_v8 = vrot.slane %v1227_v31, 2  ;;  %v1558_v49 = vadd.f32 %v1557_v4, %v1556_v63  ;;  %v1689_v6 = vadd.f32 %v1688_v17, %v1687_v60 }
 0x18e   :  { %v1361_v34 = vadd.f32 %v1360_v50, %v1359_v21 }
 0x18f   :  { %v1229_v47 = vadd.f32 %v1228_v8, %v1227_v31  ;;  %v1559_v53 = vrot.slane %v1558_v49, 2  ;;  %v1690_v1 = vrot.slane %v1689_v6, 4 }
 0x190   :  { %v1362_v10 = vrot.slane %v1361_v34, 2 }
 0x191   :  { %v1560_v43 = vadd.f32 %v1559_v53, %v1558_v49  ;;  %v1691_v33 = vadd.f32 %v1690_v1, %v1689_v6  ;;  %v1230_v36 = vrot.slane %v1229_v47, 1 }
 0x192   :  { %v1363_v29 = vadd.f32 %v1362_v10, %v1361_v34 }
 0x193   :  { %v1561_v9 = vrot.slane %v1560_v43, 1  ;;  %v1692_v52 = vrot.slane %v1691_v33, 2  ;;  %v1231_v23 = vadd.f32 %v1230_v36, %v1229_v47 }
 0x194   :  { %v1364_v38 = vrot.slane %v1363_v29, 1 }
 0x195   :  { %v1562_v12 = vadd.f32 %v1561_v9, %v1560_v43  ;;  %v1693_v25 = vadd.f32 %v1692_v52, %v1691_v33 }
 0x196   :  { %v1365_v3 = vadd.f32 %v1364_v38, %v1363_v29 }
 0x197   :  { %v1700_v56 = vsel %vm1699_vm5, %v1562_v12, 0.0  ;;  %v1694_v32 = vrot.slane %v1693_v25, 1 }
 0x198   :  { %v1702_v16 = vsel %vm1698_vm6, %v1231_v23, %v1700_v56 }
 0x199   :  { %1704 = vst [vmem:[%s3289_s3] sm:$0xff] %v1702_v16  ;;  %v1695_v37 = vadd.f32 %v1694_v32, %v1693_v25 }
 0x19b   :  { %v1701_v5 = vsel %vm1699_vm5, %v1695_v37, 0.0 }
 0x19c   :  { %v1703_v51 = vsel %vm1698_vm6, %v1365_v3, %v1701_v5 }
 0x19d   :  { %1705 = vst.msk [vmem:[%s3289_s3 + $0x8] sm:$0xff] %vm1232_vm4, %v1703_v51 }

// kernel: _lambda_.6
= control target key start
LH: loop header
LB: loop body
LE: loop exit
PB: predicated region body
PF: predicated region fallthrough
CT: control target
= control target key end

     0   :  { %v2170_v0 = vmov 0   ;;  %v214_v3 = vlaneseq  ;;  %vm908_vm0 = vcmask 523264   ;;  %vm1550_vm1 = vcmask 257024   ;;  %s3796_s1 = inlined_call_operand.vmem [shape: bf16[192,32], index: 1, kind: input, shape index: {}]   ;;  %s3797_s0 = inlined_call_operand.vmem [shape: bf16[512,192], index: 0, kind: input, shape index: {}]   ;;  %s3798_s2 = inlined_call_operand.vmem [shape: f32[1,192], index: 2, kind: input, shape index: {}]   ;;  %s3799_s3 = inlined_call_operand.vmem [shape: f32[1,192], index: 3, kind: input, shape index: {}]   ;;  %s3800_s4 = inlined_call_operand.vmem [shape: bf16[512,32], index: 4, kind: output, shape index: {0}]   ;;  %s3801_s5 = inlined_call_operand.vmem [shape: f32[8,32], index: 5, kind: output, shape index: {1}]  }
   0x1   :  { %1005 = vmatprep.subr.bf16.mxu0 %v2170_v0  ;;  %v2158_v1 = vld [vmem:[%s3796_s1 + $0x38] sm:$0xff]   ;;  %2133 = vmatprep.subr.bf16.mxu1 %v2170_v0  ;;  %v2159_v2 = vld [vmem:[%s3796_s1 + $0x30] sm:$0xff]   ;;  %v2160_v4 = vld [vmem:[%s3796_s1 + $0x28] sm:$0xff]   ;;  %vm1615_vm2 = vcmask 261120  }
   0x2   :  { %1006 = vmatpush1.bf16.msra.mxu0 %v2158_v1  ;;  %2145 = vmatpush1.bf16.msra.mxu1 %v2158_v1  ;;  %v2214_v5 = vshrl.u32 %v214_v3, 7  ;;  %v2161_v6 = vld [vmem:[%s3796_s1 + $0x20] sm:$0xff]   ;;  %v21_v10 = vld [vmem:[%s3797_s0 + $0x8] sm:$0xff]  ;;  %v22_v17 = vld [vmem:[%s3797_s0 + $0x10] sm:$0xff] }
   0x3   :  { %1007 = vmatprep.subr.bf16.mxu0 %v2170_v0  ;;  %2134 = vmatprep.subr.bf16.mxu1 %v2170_v0  ;;  %v20_v9 = vld [vmem:[%s3797_s0] sm:$0xff]  ;;  %v86_v14 = vunpack.c.l.bf16 %v21_v10  ;;  %v87_v15 = vunpack.c.h.bf16 %v21_v10  ;;  %v23_v18 = vld [vmem:[%s3797_s0 + $0x18] sm:$0xff]  ;;  %v89_v24 = vunpack.c.h.bf16 %v22_v17  ;;  %v88_v26 = vunpack.c.l.bf16 %v22_v17  ;;  %v2163_v36 = vld [vmem:[%s3796_s1 + $0x10] sm:$0xff]  }
   0x4   :  { %v216_v7 = vsub.s32 0, %v2214_v5  ;;  %v220_v8 = vsub.s32 1, %v2214_v5  ;;  %v212_v11 = vld [vmem:[%s3798_s2] sm:$0x3]  ;;  %v84_v12 = vunpack.c.l.bf16 %v20_v9  ;;  %v85_v13 = vunpack.c.h.bf16 %v20_v9  ;;  %v2162_v19 = vld [vmem:[%s3796_s1 + $0x18] sm:$0xff]   ;;  %v25_v54 = vld [vmem:[%s3797_s0 + $0x28] sm:$0xff] }
   0x5   :  { %v352_v16 = vld [vmem:[%s3799_s3] sm:$0x3]  ;;  %v91_v25 = vunpack.c.h.bf16 %v23_v18  ;;  %v90_v27 = vunpack.c.l.bf16 %v23_v18  ;;  %v2164_v55 = vld [vmem:[%s3796_s1 + $0x8] sm:$0xff]   ;;  %v26_v63 = vld [vmem:[%s3797_s0 + $0x30] sm:$0xff]  ;;  %v94_v10 = vunpack.c.l.bf16 %v25_v54  ;;  %vm1949_vm3 = vcmp.eq.s32.totalorder %v2214_v5, 1 }
   0x6   :  { %1008 = vmatpush1.bf16.msra.mxu0 %v2159_v2  ;;  %2146 = vmatpush1.bf16.msra.mxu1 %v2159_v2  ;;  %v2246_v20 = vrot.slane %v212_v11, %v216_v7  ;;  %v2248_v21 = vrot.slane %v212_v11, %v220_v8  ;;  %v2250_v22 = vrot.slane %v352_v16, %v216_v7  ;;  %v24_v53 = vld [vmem:[%s3797_s0 + $0x20] sm:$0xff]  ;;  %v27_v1 = vld [vmem:[%s3797_s0 + $0x38] sm:$0xff]  ;;  %v96_v18 = vunpack.c.l.bf16 %v26_v63 }
   0x7   :  { %1009 = vmatprep.subr.bf16.mxu0 %v2170_v0  ;;  %2135 = vmatprep.subr.bf16.mxu1 %v2170_v0  ;;  %v2252_v23 = vrot.slane %v352_v16, %v220_v8  ;;  %v92_v9 = vunpack.c.l.bf16 %v24_v53  ;;  %v2165_v11 = vld [vmem:[%s3796_s1] sm:$0xff]   ;;  %vm1948_vm4 = vcmp.eq.s32.totalorder %v2214_v5, 0 }
   0x8   :  { %v225_v28 = vmul.f32 %v2248_v21, %v85_v13  ;;  %v227_v29 = vmul.f32 %v2248_v21, %v87_v15  ;;  %v224_v30 = vmul.f32 %v2246_v20, %v84_v12  ;;  %v226_v31 = vmul.f32 %v2246_v20, %v86_v14 }
   0x9   :  { %v229_v32 = vmul.f32 %v2248_v21, %v89_v24  ;;  %v231_v33 = vmul.f32 %v2248_v21, %v91_v25  ;;  %v228_v34 = vmul.f32 %v2246_v20, %v88_v26  ;;  %v230_v35 = vmul.f32 %v2246_v20, %v90_v27 }
   0xa   :  { %1010 = vmatpush1.bf16.msra.mxu0 %v2160_v4  ;;  %2147 = vmatpush1.bf16.msra.mxu1 %v2160_v4  ;;  %v365_v37 = vadd.f32 %v2252_v23, %v225_v28  ;;  %v367_v38 = vadd.f32 %v2252_v23, %v227_v29  ;;  %v364_v39 = vadd.f32 %v2250_v22, %v224_v30  ;;  %v93_v4 = vunpack.c.h.bf16 %v24_v53 }
   0xb   :  { %1011 = vmatprep.subr.bf16.mxu0 %v2170_v0  ;;  %2136 = vmatprep.subr.bf16.mxu1 %v2170_v0  ;;  %v366_v40 = vadd.f32 %v2250_v22, %v226_v31  ;;  %v369_v41 = vadd.f32 %v2252_v23, %v229_v32  ;;  %v371_v42 = vadd.f32 %v2252_v23, %v231_v33  ;;  %v97_v14 = vunpack.c.h.bf16 %v26_v63  ;;  %v2166_v32 = vld [vmem:[%s3796_s1 + $0x58] sm:$0xff]  }
   0xc   :  { %v368_v43 = vadd.f32 %v2250_v22, %v228_v34  ;;  %v370_v44 = vadd.f32 %v2250_v22, %v230_v35  ;;  %v493_v45 = vmax.f32 %v365_v37, 0.0  ;;  %v495_v46 = vmax.f32 %v367_v38, 0.0 }
   0xd   :  { %v492_v47 = vmax.f32 %v364_v39, 0.0  ;;  %v494_v48 = vmax.f32 %v366_v40, 0.0  ;;  %v497_v49 = vmax.f32 %v369_v41, 0.0  ;;  %v499_v50 = vmax.f32 %v371_v42, 0.0  ;;  %v28_v41 = vld [vmem:[%s3797_s0 + $0x40] sm:$0xff] }
   0xe   :  { %1012 = vmatpush1.bf16.msra.mxu0 %v2161_v6  ;;  %2148 = vmatpush1.bf16.msra.mxu1 %v2161_v6  ;;  %v496_v51 = vmax.f32 %v368_v43, 0.0  ;;  %v498_v52 = vmax.f32 %v370_v44, 0.0  ;;  %v621_v56 = vmin.f32 %v493_v45, 6.0  ;;  %v623_v57 = vmin.f32 %v495_v46, 6.0  ;;  %v29_v46 = vld [vmem:[%s3797_s0 + $0x48] sm:$0xff] }
   0xf   :  { %1013 = vmatprep.subr.bf16.mxu0 %v2170_v0  ;;  %2137 = vmatprep.subr.bf16.mxu1 %v2170_v0  ;;  %v2286_v58 = vmin.f32 %v492_v47, 6.0  ;;  %v2288_v59 = vmin.f32 %v494_v48, 6.0  ;;  %v2291_v60 = vmin.f32 %v497_v49, 6.0  ;;  %v2293_v61 = vmin.f32 %v499_v50, 6.0 }
  0x10   :  { %v2295_v62 = vmin.f32 %v496_v51, 6.0  ;;  %v749_v2 = vpack.c.bf16 %v623_v57, %v621_v56  ;;  %v2303_v3 = vmin.f32 %v498_v52, 6.0  ;;  %v95_v6 = vunpack.c.h.bf16 %v25_v54  ;;  %v2167_v51 = vld [vmem:[%s3796_s1 + $0x50] sm:$0xff]   ;;  %v31_v57 = vld [vmem:[%s3797_s0 + $0x58] sm:$0xff] }
  0x11   :  { %v748_v7 = vpack.c.bf16 %v2288_v59, %v2286_v58  ;;  %v751_v8 = vpack.c.bf16 %v2293_v61, %v2291_v60  ;;  %v233_v12 = vmul.f32 %v2248_v21, %v93_v4  ;;  %v99_v15 = vunpack.c.h.bf16 %v27_v1  ;;  %v30_v56 = vld [vmem:[%s3797_s0 + $0x50] sm:$0xff]  ;;  %v52_v60 = vld [vmem:[%s3797_s0 + $0x100] sm:$0xff] }
  0x12   :  { %1014 = vmatpush1.bf16.msra.mxu0 %v2162_v19  ;;  %2149 = vmatpush1.bf16.msra.mxu1 %v2162_v19  ;;  %v235_v13 = vmul.f32 %v2248_v21, %v95_v6  ;;  %v232_v16 = vmul.f32 %v2246_v20, %v92_v9  ;;  %v234_v17 = vmul.f32 %v2246_v20, %v94_v10  ;;  %v98_v19 = vunpack.c.l.bf16 %v27_v1 }
  0x13   :  { %1015 = vmatprep.subr.bf16.mxu0 %v2170_v0  ;;  %2138 = vmatprep.subr.bf16.mxu1 %v2170_v0  ;;  %v373_v24 = vadd.f32 %v2252_v23, %v233_v12  ;;  %v237_v26 = vmul.f32 %v2248_v21, %v97_v14  ;;  %v239_v27 = vmul.f32 %v2248_v21, %v99_v15  ;;  %v103_v4 = vunpack.c.h.bf16 %v29_v46 }
  0x14   :  { %1973 = vmatprep.mubr.msk.bf16.mxu0 %vm908_vm0, %v749_v2  ;;  %v375_v25 = vadd.f32 %v2252_v23, %v235_v13  ;;  %v372_v28 = vadd.f32 %v2250_v22, %v232_v16  ;;  %v374_v29 = vadd.f32 %v2250_v22, %v234_v17  ;;  %v236_v30 = vmul.f32 %v2246_v20, %v96_v18  ;;  %v2168_v16 = vld [vmem:[%s3796_s1 + $0x48] sm:$0xff]  }
  0x15   :  { %v238_v31 = vmul.f32 %v2246_v20, %v98_v19  ;;  %v501_v33 = vmax.f32 %v373_v24, 0.0  ;;  %v377_v35 = vadd.f32 %v2252_v23, %v237_v26  ;;  %v750_v52 = vpack.c.bf16 %v2303_v3, %v2295_v62 }
  0x16   :  { %1016 = vmatpush1.bf16.msra.mxu0 %v2163_v36  ;;  %2150 = vmatpush1.bf16.msra.mxu1 %v2163_v36  ;;  %v503_v34 = vmax.f32 %v375_v25, 0.0  ;;  %v379_v36 = vadd.f32 %v2252_v23, %v239_v27  ;;  %v500_v37 = vmax.f32 %v372_v28, 0.0  ;;  %v502_v38 = vmax.f32 %v374_v29, 0.0 }
  0x17   :  { %1017 = vmatprep.subr.bf16.mxu0 %v2170_v0  ;;  %2139 = vmatprep.subr.bf16.mxu1 %v2170_v0  ;;  %v376_v39 = vadd.f32 %v2250_v22, %v236_v30  ;;  %v378_v40 = vadd.f32 %v2250_v22, %v238_v31  ;;  %v2339_v42 = vmin.f32 %v501_v33, 6.0  ;;  %v505_v44 = vmax.f32 %v377_v35, 0.0 }
  0x18   :  { %v2341_v43 = vmin.f32 %v503_v34, 6.0  ;;  %v507_v45 = vmax.f32 %v379_v36, 0.0  ;;  %v2346_v47 = vmin.f32 %v500_v37, 6.0  ;;  %v2348_v48 = vmin.f32 %v502_v38, 6.0  ;;  %v32_v37 = vld [vmem:[%s3797_s0 + $0x60] sm:$0xff] }
  0x19   :  { %v504_v49 = vmax.f32 %v376_v39, 0.0  ;;  %v506_v50 = vmax.f32 %v378_v40, 0.0  ;;  %v2356_v53 = vmin.f32 %v505_v44, 6.0  ;;  %v100_v10 = vunpack.c.l.bf16 %v28_v41  ;;  %v2169_v38 = vld [vmem:[%s3796_s1 + $0x40] sm:$0xff]  }
  0x1a   :  { %1018 = vmatpush1.bf16.msra.mxu0 %v2164_v55  ;;  %2151 = vmatpush1.bf16.msra.mxu1 %v2164_v55  ;;  %v2358_v54 = vmin.f32 %v507_v45, 6.0  ;;  %v101_v55 = vunpack.c.h.bf16 %v28_v41  ;;  %v753_v63 = vpack.c.bf16 %v2341_v43, %v2339_v42  ;;  %v752_v1 = vpack.c.bf16 %v2348_v48, %v2346_v47 }
  0x1b   :  { %1019 = vmatprep.subr.bf16.mxu0 %v2170_v0  ;;  %2140 = vmatprep.subr.bf16.mxu1 %v2170_v0  ;;  %v2371_v2 = vmin.f32 %v504_v49, 6.0  ;;  %v2373_v6 = vmin.f32 %v506_v50, 6.0  ;;  %v243_v13 = vmul.f32 %v2248_v21, %v103_v4  ;;  %v105_v14 = vunpack.c.h.bf16 %v30_v56 }
  0x1c   :  { %v241_v9 = vmul.f32 %v2248_v21, %v101_v55  ;;  %v755_v12 = vpack.c.bf16 %v2358_v54, %v2356_v53  ;;  %v107_v15 = vunpack.c.h.bf16 %v31_v57  ;;  %v240_v18 = vmul.f32 %v2246_v20, %v100_v10 }
  0x1d   :  { %v104_v24 = vunpack.c.l.bf16 %v30_v56  ;;  %v383_v25 = vadd.f32 %v2252_v23, %v243_v13  ;;  %v245_v26 = vmul.f32 %v2248_v21, %v105_v14  ;;  %v106_v28 = vunpack.c.l.bf16 %v31_v57  ;;  %v34_v14 = vld [vmem:[%s3797_s0 + $0x70] sm:$0xff] }
  0x1e   :  { %1020 = vmatpush1.bf16.msra.mxu0 %v2165_v11  ;;  %2152 = vmatpush1.bf16.msra.mxu1 %v2165_v11  ;;  %v102_v11 = vunpack.c.l.bf16 %v29_v46  ;;  %v381_v17 = vadd.f32 %v2252_v23, %v241_v9  ;;  %v247_v27 = vmul.f32 %v2248_v21, %v107_v15  ;;  %v380_v30 = vadd.f32 %v2250_v22, %v240_v18  ;;  %v35_v15 = vld [vmem:[%s3797_s0 + $0x78] sm:$0xff] }
  0x1f   :  { %1029 = vmatprep.subr.bf16.mxu0 %v2170_v0  ;;  %2141 = vmatprep.subr.bf16.mxu1 %v2170_v0  ;;  %v511_v33 = vmax.f32 %v383_v25, 0.0  ;;  %v385_v34 = vadd.f32 %v2252_v23, %v245_v26  ;;  %v246_v36 = vmul.f32 %v2246_v20, %v106_v28  ;;  %v109_v4 = vunpack.c.h.bf16 %v32_v37 }
  0x20   :  { %v242_v19 = vmul.f32 %v2246_v20, %v102_v11  ;;  %v509_v29 = vmax.f32 %v381_v17, 0.0  ;;  %v387_v35 = vadd.f32 %v2252_v23, %v247_v27  ;;  %v508_v40 = vmax.f32 %v380_v30, 0.0 }
  0x21   :  { %v2407_v45 = vmin.f32 %v511_v33, 6.0  ;;  %v513_v46 = vmax.f32 %v385_v34, 0.0  ;;  %v386_v50 = vadd.f32 %v2250_v22, %v246_v36  ;;  %v754_v9 = vpack.c.bf16 %v2373_v6, %v2371_v2 }
  0x22   :  { %1030 = vmatpush2.bf16.msra.mxu0 %v2166_v32  ;;  %2153 = vmatpush2.bf16.msra.mxu1 %v2166_v32  ;;  %v382_v31 = vadd.f32 %v2250_v22, %v242_v19  ;;  %v244_v32 = vmul.f32 %v2246_v20, %v104_v24  ;;  %v2403_v39 = vmin.f32 %v509_v29, 6.0  ;;  %v515_v49 = vmax.f32 %v387_v35, 0.0 }
  0x23   :  { %1031 = vmatprep.subr.bf16.mxu0 %v2170_v0  ;;  %2142 = vmatprep.subr.bf16.mxu1 %v2170_v0  ;;  %v2413_v55 = vmin.f32 %v508_v40, 6.0  ;;  %v2419_v10 = vmin.f32 %v513_v46, 6.0  ;;  %v514_v13 = vmax.f32 %v386_v50, 0.0  ;;  %v249_v19 = vmul.f32 %v2248_v21, %v109_v4 }
  0x24   :  { %v510_v41 = vmax.f32 %v382_v31, 0.0  ;;  %v384_v44 = vadd.f32 %v2250_v22, %v244_v32  ;;  %v2421_v11 = vmin.f32 %v515_v49, 6.0  ;;  %v108_v25 = vunpack.c.l.bf16 %v32_v37 }
  0x25   :  { %v389_v28 = vadd.f32 %v2252_v23, %v249_v19  ;;  %v113_v29 = vunpack.c.h.bf16 %v34_v14  ;;  %v115_v30 = vunpack.c.h.bf16 %v35_v15  ;;  %v2444_v31 = vmin.f32 %v514_v13, 6.0 }
  0x26   :  { %1032 = vmatpush2.bf16.msra.mxu0 %v2167_v51  ;;  %2154 = vmatpush2.bf16.msra.mxu1 %v2167_v51  ;;  %v33_v51 = vld [vmem:[%s3797_s0 + $0x68] sm:$0xff]  ;;  %v2415_v56 = vmin.f32 %v510_v41, 6.0  ;;  %v512_v57 = vmax.f32 %v384_v44, 0.0  ;;  %v248_v32 = vmul.f32 %v2246_v20, %v108_v25  ;;  %v112_v34 = vunpack.c.l.bf16 %v34_v14 }
  0x27   :  { %1033 = vmatprep.subr.bf16.mxu0 %v2170_v0  ;;  %2143 = vmatprep.subr.bf16.mxu1 %v2170_v0  ;;  %v111_v18 = vunpack.c.h.bf16 %v33_v51  ;;  %v110_v26 = vunpack.c.l.bf16 %v33_v51  ;;  %v517_v36 = vmax.f32 %v389_v28, 0.0  ;;  %v253_v37 = vmul.f32 %v2248_v21, %v113_v29  ;;  %v53_v14 = vld [vmem:[%s3797_s0 + $0x108] sm:$0xff] }
  0x28   :  { %v756_v17 = vpack.c.bf16 %v2415_v56, %v2413_v55  ;;  %v2437_v24 = vmin.f32 %v512_v57, 6.0  ;;  %v255_v58 = vmul.f32 %v2248_v21, %v115_v30  ;;  %v388_v59 = vadd.f32 %v2250_v22, %v248_v32  ;;  %v36_v32 = vld [vmem:[%s3797_s0 + $0x80] sm:$0xff] }
  0x29   :  { %v251_v27 = vmul.f32 %v2248_v21, %v111_v18  ;;  %v250_v33 = vmul.f32 %v2246_v20, %v110_v26  ;;  %v252_v40 = vmul.f32 %v2246_v20, %v112_v34  ;;  %v393_v41 = vadd.f32 %v2252_v23, %v253_v37 }
  0x2a   :  { %1034 = vmatpush2.bf16.msra.mxu0 %v2168_v16  ;;  %2155 = vmatpush2.bf16.msra.mxu1 %v2168_v16  ;;  %v757_v16 = vpack.c.bf16 %v2407_v45, %v2403_v39  ;;  %v395_v44 = vadd.f32 %v2252_v23, %v255_v58  ;;  %v516_v46 = vmax.f32 %v388_v59, 0.0  ;;  %v149_v30 = vunpack.c.h.bf16 %v52_v60 }
  0x2b   :  { %1035 = vmatprep.subr.bf16.mxu0 %v2170_v0  ;;  %2144 = vmatprep.subr.bf16.mxu1 %v2170_v0  ;;  %v759_v0 = vpack.c.bf16 %v2421_v11, %v2419_v10  ;;  %v391_v35 = vadd.f32 %v2252_v23, %v251_v27  ;;  %v392_v51 = vadd.f32 %v2250_v22, %v252_v40  ;;  %v521_v4 = vmax.f32 %v393_v41, 0.0 }
  0x2c   :  { %v523_v13 = vmax.f32 %v395_v44, 0.0  ;;  %v2472_v18 = vmin.f32 %v516_v46, 6.0  ;;  %v758_v27 = vpack.c.bf16 %v2444_v31, %v2437_v24  ;;  %v150_v37 = vunpack.c.l.bf16 %v53_v14 }
  0x2d   :  { %v519_v61 = vmax.f32 %v391_v35, 0.0  ;;  %v520_v26 = vmax.f32 %v392_v51, 0.0  ;;  %v2479_v28 = vmin.f32 %v521_v4, 6.0  ;;  %v151_v59 = vunpack.c.h.bf16 %v53_v14 }
  0x2e   :  { %1036 = vmatpush2.bf16.msra.mxu0 %v2169_v38  ;;  %2156 = vmatpush2.bf16.msra.mxu1 %v2169_v38  ;;  %v114_v38 = vunpack.c.l.bf16 %v35_v15  ;;  %v148_v15 = vunpack.c.l.bf16 %v52_v60  ;;  %v2481_v29 = vmin.f32 %v523_v13, 6.0 }
  0x2f   :  { %v2467_v57 = vmin.f32 %v519_v61, 6.0  ;;  %v2500_v58 = vmin.f32 %v520_v26, 6.0  ;;  %v291_v60 = vmul.f32 %v2248_v21, %v151_v59  ;;  %v54_v26 = vld [vmem:[%s3797_s0 + $0x110] sm:$0xff] }
  0x30   :  { %v254_v50 = vmul.f32 %v2246_v20, %v114_v38  ;;  %v288_v62 = vmul.f32 %v2246_v20, %v148_v15  ;;  %v763_v3 = vpack.c.bf16 %v2481_v29, %v2479_v28  ;;  %v117_v38 = vunpack.c.h.bf16 %v36_v32 }
  0x31   :  { %1038 = vmatmul.mubr.bf16.vlgmr.msra.gmra.mxu0 %v748_v7  ;;  %v390_v7 = vadd.f32 %v2250_v22, %v250_v33  ;;  %v37_v33 = vld [vmem:[%s3797_s0 + $0x88] sm:$0xff] }
  0x32   :  { %1974 = vmatprep.mubr.msk.bf16.mxu0 %vm908_vm0, %v751_v8  ;;  %v2461_v8 = vmin.f32 %v517_v36, 6.0  ;;  %v394_v25 = vadd.f32 %v2250_v22, %v254_v50  ;;  %v119_v40 = vunpack.c.h.bf16 %v37_v33  ;;  %v428_v43 = vadd.f32 %v2250_v22, %v288_v62 }
  0x33   :  { %v518_v49 = vmax.f32 %v390_v7, 0.0  ;;  %v289_v7 = vmul.f32 %v2248_v21, %v149_v30  ;;  %v257_v44 = vmul.f32 %v2248_v21, %v117_v38  ;;  %v118_v4 = vunpack.c.l.bf16 %v37_v33  ;;  %v55_v30 = vld [vmem:[%s3797_s0 + $0x118] sm:$0xff] }
  0x34   :  { %v761_v34 = vpack.c.bf16 %v2467_v57, %v2461_v8  ;;  %v522_v36 = vmax.f32 %v394_v25, 0.0  ;;  %v259_v46 = vmul.f32 %v2248_v21, %v119_v40  ;;  %v556_v51 = vmax.f32 %v428_v43, 0.0 }
  0x35   :  { %v2474_v19 = vmin.f32 %v518_v49, 6.0  ;;  %v429_v42 = vadd.f32 %v2252_v23, %v289_v7  ;;  %v431_v49 = vadd.f32 %v2252_v23, %v291_v60  ;;  %v397_v14 = vadd.f32 %v2252_v23, %v257_v44 }
  0x36   :  { %v2510_v61 = vmin.f32 %v522_v36, 6.0  ;;  %v399_v15 = vadd.f32 %v2252_v23, %v259_v46  ;;  %v258_v33 = vmul.f32 %v2246_v20, %v118_v4  ;;  %v153_v60 = vunpack.c.h.bf16 %v54_v26 }
  0x37   :  { %v760_v35 = vpack.c.bf16 %v2474_v19, %v2472_v18  ;;  %v557_v50 = vmax.f32 %v429_v42, 0.0  ;;  %v525_v7 = vmax.f32 %v397_v14, 0.0  ;;  %v155_v42 = vunpack.c.h.bf16 %v55_v30 }
  0x38   :  { %v527_v62 = vmax.f32 %v399_v15, 0.0  ;;  %v398_v40 = vadd.f32 %v2250_v22, %v258_v33  ;;  %v293_v53 = vmul.f32 %v2248_v21, %v153_v60  ;;  %v762_v46 = vpack.c.bf16 %v2510_v61, %v2500_v58 }
  0x39   :  { %1046 = vmatmul.mubr.bf16.gmra.mxu0 %v750_v52  ;;  %v290_v52 = vmul.f32 %v2246_v20, %v150_v37  ;;  %v685_v36 = vmin.f32 %v557_v50, 6.0  ;;  %v684_v37 = vmin.f32 %v556_v51, 6.0  ;;  %v295_v54 = vmul.f32 %v2248_v21, %v155_v42 }
  0x3a   :  { %1975 = vmatprep.mubr.msk.bf16.mxu0 %vm908_vm0, %v753_v63  ;;  %v116_v63 = vunpack.c.l.bf16 %v36_v32  ;;  %v559_v32 = vmax.f32 %v431_v49, 0.0  ;;  %v2537_v47 = vmin.f32 %v527_v62, 6.0  ;;  %v526_v44 = vmax.f32 %v398_v40, 0.0  ;;  %v56_v40 = vld [vmem:[%s3797_s0 + $0x120] sm:$0xff] }
  0x3b   :  { %v430_v41 = vadd.f32 %v2250_v22, %v290_v52  ;;  %v152_v50 = vunpack.c.l.bf16 %v54_v26  ;;  %v154_v51 = vunpack.c.l.bf16 %v55_v30  ;;  %v435_v14 = vadd.f32 %v2252_v23, %v295_v54 }
  0x3c   :  { %v256_v25 = vmul.f32 %v2246_v20, %v116_v63  ;;  %v687_v38 = vmin.f32 %v559_v32, 6.0  ;;  %v2535_v63 = vmin.f32 %v525_v7, 6.0  ;;  %v2558_v33 = vmin.f32 %v526_v44, 6.0 }
  0x3d   :  { %v558_v13 = vmax.f32 %v430_v41, 0.0  ;;  %v294_v32 = vmul.f32 %v2246_v20, %v154_v51  ;;  %v563_v30 = vmax.f32 %v435_v14, 0.0 }
  0x3e   :  { %v396_v52 = vadd.f32 %v2250_v22, %v256_v25  ;;  %v781_v41 = vpack.c.bf16 %v687_v38, %v685_v36  ;;  %v765_v49 = vpack.c.bf16 %v2537_v47, %v2535_v63  ;;  %v292_v25 = vmul.f32 %v2246_v20, %v152_v50 }
  0x3f   :  { %v686_v59 = vmin.f32 %v558_v13, 6.0  ;;  %v433_v13 = vadd.f32 %v2252_v23, %v293_v53  ;;  %v434_v62 = vadd.f32 %v2250_v22, %v294_v32  ;;  %v691_v42 = vmin.f32 %v563_v30, 6.0  ;;  %v41_v30 = vld [vmem:[%s3797_s0 + $0xa8] sm:$0xff] }
  0x40   :  { %v524_v48 = vmax.f32 %v396_v52, 0.0  ;;  %1989 = vmatprep.mubr.msk.bf16.mxu1 %vm908_vm0, %v781_v41  ;;  %v432_v7 = vadd.f32 %v2250_v22, %v292_v25  ;;  %v57_v41 = vld [vmem:[%s3797_s0 + $0x128] sm:$0xff]  ;;  %v40_v25 = vld [vmem:[%s3797_s0 + $0xa0] sm:$0xff]  ;;  %v127_v56 = vunpack.c.h.bf16 %v41_v30 }
  0x41   :  { %1054 = vmatmul.mubr.bf16.gmra.mxu0 %v752_v1  ;;  %v780_v43 = vpack.c.bf16 %v686_v59, %v684_v37  ;;  %v38_v1 = vld [vmem:[%s3797_s0 + $0x90] sm:$0xff]  ;;  %v561_v26 = vmax.f32 %v433_v13, 0.0  ;;  %v159_v14 = vunpack.c.h.bf16 %v57_v41 }
  0x42   :  { %1976 = vmatprep.mubr.msk.bf16.mxu0 %vm908_vm0, %v755_v12  ;;  %v39_v12 = vld [vmem:[%s3797_s0 + $0x98] sm:$0xff]  ;;  %v2552_v4 = vmin.f32 %v524_v48, 6.0  ;;  %v121_v15 = vunpack.c.h.bf16 %v38_v1  ;;  %v120_v37 = vunpack.c.l.bf16 %v38_v1 }
  0x43   :  { %1166 = vmatmul.mubr.bf16.vlgmr.msra.gmra.mxu1 %v780_v43  ;;  %v123_v36 = vunpack.c.h.bf16 %v39_v12  ;;  %v122_v38 = vunpack.c.l.bf16 %v39_v12  ;;  %v689_v60 = vmin.f32 %v561_v26, 6.0  ;;  %v562_v43 = vmax.f32 %v434_v62, 0.0 }
  0x44   :  { %v261_v59 = vmul.f32 %v2248_v21, %v121_v15  ;;  %v260_v6 = vmul.f32 %v2246_v20, %v120_v37  ;;  %v156_v26 = vunpack.c.l.bf16 %v56_v40 }
  0x45   :  { %v263_v52 = vmul.f32 %v2248_v21, %v123_v36  ;;  %v262_v1 = vmul.f32 %v2246_v20, %v122_v38  ;;  %v783_v44 = vpack.c.bf16 %v691_v42, %v689_v60  ;;  %v690_v54 = vmin.f32 %v562_v43, 6.0 }
  0x46   :  { %v401_v2 = vadd.f32 %v2252_v23, %v261_v59  ;;  %v400_v45 = vadd.f32 %v2250_v22, %v260_v6  ;;  %v764_v59 = vpack.c.bf16 %v2558_v33, %v2552_v4  ;;  %v296_v60 = vmul.f32 %v2246_v20, %v156_v26 }
  0x47   :  { %v403_v48 = vadd.f32 %v2252_v23, %v263_v52  ;;  %v402_v50 = vadd.f32 %v2250_v22, %v262_v1  ;;  %1990 = vmatprep.mubr.msk.bf16.mxu1 %vm908_vm0, %v783_v44  ;;  %v158_v52 = vunpack.c.l.bf16 %v57_v41  ;;  %v125_v42 = vunpack.c.h.bf16 %v40_v25  ;;  %v58_v1 = vld [vmem:[%s3797_s0 + $0x130] sm:$0xff] }
  0x48   :  { %v529_v39 = vmax.f32 %v401_v2, 0.0  ;;  %v528_v13 = vmax.f32 %v400_v45, 0.0  ;;  %v267_v41 = vmul.f32 %v2248_v21, %v127_v56  ;;  %v126_v45 = vunpack.c.l.bf16 %v41_v30 }
  0x49   :  { %1062 = vmatmul.mubr.bf16.gmra.mxu0 %v754_v9  ;;  %v560_v9 = vmax.f32 %v432_v7, 0.0  ;;  %v531_v12 = vmax.f32 %v403_v48, 0.0  ;;  %v530_v37 = vmax.f32 %v402_v50, 0.0  ;;  %v299_v7 = vmul.f32 %v2248_v21, %v159_v14 }
  0x4a   :  { %1977 = vmatprep.mubr.msk.bf16.mxu0 %vm908_vm0, %v757_v16  ;;  %v157_v16 = vunpack.c.h.bf16 %v56_v40  ;;  %v2584_v51 = vmin.f32 %v529_v39, 6.0  ;;  %v2604_v40 = vmin.f32 %v528_v13, 6.0  ;;  %v298_v55 = vmul.f32 %v2246_v20, %v158_v52 }
  0x4b   :  { %v688_v53 = vmin.f32 %v560_v9, 6.0  ;;  %v2590_v36 = vmin.f32 %v531_v12, 6.0  ;;  %v439_v2 = vadd.f32 %v2252_v23, %v299_v7  ;;  %v436_v9 = vadd.f32 %v2250_v22, %v296_v60 }
  0x4c   :  { %v297_v15 = vmul.f32 %v2248_v21, %v157_v16  ;;  %v265_v43 = vmul.f32 %v2248_v21, %v125_v42  ;;  %v124_v48 = vunpack.c.l.bf16 %v40_v25  ;;  %v407_v50 = vadd.f32 %v2252_v23, %v267_v41 }
  0x4d   :  { %v782_v32 = vpack.c.bf16 %v690_v54, %v688_v53  ;;  %v767_v38 = vpack.c.bf16 %v2590_v36, %v2584_v51  ;;  %v567_v10 = vmax.f32 %v439_v2, 0.0  ;;  %v564_v44 = vmax.f32 %v436_v9, 0.0  ;;  %v59_v53 = vld [vmem:[%s3797_s0 + $0x138] sm:$0xff]  ;;  %v42_v2 = vld [vmem:[%s3797_s0 + $0xb0] sm:$0xff] }
  0x4e   :  { %v437_v62 = vadd.f32 %v2252_v23, %v297_v15  ;;  %v405_v39 = vadd.f32 %v2252_v23, %v265_v43  ;;  %v264_v16 = vmul.f32 %v2246_v20, %v124_v48  ;;  %v161_v13 = vunpack.c.h.bf16 %v58_v1 }
  0x4f   :  { %1174 = vmatmul.mubr.bf16.gmra.mxu1 %v782_v32  ;;  %v695_v54 = vmin.f32 %v567_v10, 6.0  ;;  %v692_v14 = vmin.f32 %v564_v44, 6.0  ;;  %v266_v25 = vmul.f32 %v2246_v20, %v126_v45  ;;  %v535_v30 = vmax.f32 %v407_v50, 0.0 }
  0x50   :  { %v565_v6 = vmax.f32 %v437_v62, 0.0  ;;  %v533_v15 = vmax.f32 %v405_v39, 0.0  ;;  %v404_v32 = vadd.f32 %v2250_v22, %v264_v16  ;;  %v163_v7 = vunpack.c.h.bf16 %v59_v53 }
  0x51   :  { %1070 = vmatmul.mubr.bf16.gmra.mxu0 %v756_v17  ;;  %v2613_v17 = vmin.f32 %v530_v37, 6.0  ;;  %v406_v52 = vadd.f32 %v2250_v22, %v266_v25  ;;  %v301_v42 = vmul.f32 %v2248_v21, %v161_v13  ;;  %v2645_v31 = vmin.f32 %v535_v30, 6.0 }
  0x52   :  { %1978 = vmatprep.mubr.msk.bf16.mxu0 %vm908_vm0, %v759_v0  ;;  %v693_v11 = vmin.f32 %v565_v6, 6.0  ;;  %v438_v0 = vadd.f32 %v2250_v22, %v298_v55  ;;  %v2633_v62 = vmin.f32 %v533_v15, 6.0  ;;  %v532_v60 = vmax.f32 %v404_v32, 0.0  ;;  %v43_v55 = vld [vmem:[%s3797_s0 + $0xb8] sm:$0xff] }
  0x53   :  { %v160_v6 = vunpack.c.l.bf16 %v58_v1  ;;  %v766_v56 = vpack.c.bf16 %v2613_v17, %v2604_v40  ;;  %v534_v9 = vmax.f32 %v406_v52, 0.0  ;;  %v441_v8 = vadd.f32 %v2252_v23, %v301_v42  ;;  %v48_v17 = vld [vmem:[%s3797_s0 + $0xe0] sm:$0xff] }
  0x54   :  { %v566_v12 = vmax.f32 %v438_v0, 0.0  ;;  %v785_v37 = vpack.c.bf16 %v695_v54, %v693_v11  ;;  %v162_v57 = vunpack.c.l.bf16 %v59_v53  ;;  %v129_v10 = vunpack.c.h.bf16 %v42_v2  ;;  %v60_v53 = vld [vmem:[%s3797_s0 + $0x140] sm:$0xff] }
  0x55   :  { %v300_v48 = vmul.f32 %v2246_v20, %v160_v6  ;;  %v769_v1 = vpack.c.bf16 %v2645_v31, %v2633_v62  ;;  %v569_v11 = vmax.f32 %v441_v8, 0.0  ;;  %v131_v41 = vunpack.c.h.bf16 %v43_v55 }
  0x56   :  { %v694_v26 = vmin.f32 %v566_v12, 6.0  ;;  %1991 = vmatprep.mubr.msk.bf16.mxu1 %vm908_vm0, %v785_v37  ;;  %v302_v0 = vmul.f32 %v2246_v20, %v162_v57  ;;  %v269_v45 = vmul.f32 %v2248_v21, %v129_v10  ;;  %v128_v16 = vunpack.c.l.bf16 %v42_v2  ;;  %v61_v37 = vld [vmem:[%s3797_s0 + $0x148] sm:$0xff] }
  0x57   :  { %v440_v39 = vadd.f32 %v2250_v22, %v300_v48  ;;  %v2666_v54 = vmin.f32 %v534_v9, 6.0  ;;  %v697_v12 = vmin.f32 %v569_v11, 6.0  ;;  %v271_v13 = vmul.f32 %v2248_v21, %v131_v41  ;;  %v45_v41 = vld [vmem:[%s3797_s0 + $0xc8] sm:$0xff] }
  0x58   :  { %v784_v24 = vpack.c.bf16 %v694_v26, %v692_v14  ;;  %v442_v50 = vadd.f32 %v2250_v22, %v302_v0  ;;  %v409_v25 = vadd.f32 %v2252_v23, %v269_v45  ;;  %v130_v32 = vunpack.c.l.bf16 %v43_v55 }
  0x59   :  { %1078 = vmatmul.mubr.bf16.gmra.mxu0 %v758_v27  ;;  %v303_v27 = vmul.f32 %v2248_v21, %v163_v7  ;;  %v568_v15 = vmax.f32 %v440_v39, 0.0  ;;  %v411_v30 = vadd.f32 %v2252_v23, %v271_v13  ;;  %v268_v7 = vmul.f32 %v2246_v20, %v128_v16 }
  0x5a   :  { %1979 = vmatprep.mubr.msk.bf16.mxu0 %vm908_vm0, %v761_v34  ;;  %1182 = vmatmul.mubr.bf16.gmra.mxu1 %v784_v24  ;;  %v2654_v34 = vmin.f32 %v532_v60, 6.0  ;;  %v570_v26 = vmax.f32 %v442_v50, 0.0  ;;  %v165_v52 = vunpack.c.h.bf16 %v60_v53  ;;  %v537_v2 = vmax.f32 %v409_v25, 0.0 }
  0x5b   :  { %v443_v43 = vadd.f32 %v2252_v23, %v303_v27  ;;  %v696_v42 = vmin.f32 %v568_v15, 6.0  ;;  %v270_v24 = vmul.f32 %v2246_v20, %v130_v32  ;;  %v539_v6 = vmax.f32 %v411_v30, 0.0 }
  0x5c   :  { %v698_v27 = vmin.f32 %v570_v26, 6.0  ;;  %v408_v18 = vadd.f32 %v2250_v22, %v268_v7  ;;  %v167_v19 = vunpack.c.h.bf16 %v61_v37  ;;  %v305_v28 = vmul.f32 %v2248_v21, %v165_v52 }
  0x5d   :  { %v571_v44 = vmax.f32 %v443_v43, 0.0  ;;  %v410_v55 = vadd.f32 %v2250_v22, %v270_v24  ;;  %v164_v29 = vunpack.c.l.bf16 %v60_v53  ;;  %v2693_v8 = vmin.f32 %v539_v6, 6.0 }
  0x5e   :  { %v786_v9 = vpack.c.bf16 %v698_v27, %v696_v42  ;;  %v536_v57 = vmax.f32 %v408_v18, 0.0  ;;  %v307_v43 = vmul.f32 %v2248_v21, %v167_v19  ;;  %v445_v10 = vadd.f32 %v2252_v23, %v305_v28  ;;  %v63_v42 = vld [vmem:[%s3797_s0 + $0x158] sm:$0xff] }
  0x5f   :  { %v699_v14 = vmin.f32 %v571_v44, 6.0  ;;  %v538_v48 = vmax.f32 %v410_v55, 0.0  ;;  %v166_v11 = vunpack.c.l.bf16 %v61_v37  ;;  %v304_v0 = vmul.f32 %v2246_v20, %v164_v29  ;;  %v62_v37 = vld [vmem:[%s3797_s0 + $0x150] sm:$0xff] }
  0x60   :  { %v768_v44 = vpack.c.bf16 %v2666_v54, %v2654_v34  ;;  %v447_v45 = vadd.f32 %v2252_v23, %v307_v43  ;;  %v2706_v53 = vmin.f32 %v536_v57, 6.0  ;;  %v135_v15 = vunpack.c.h.bf16 %v45_v41 }
  0x61   :  { %1086 = vmatmul.mubr.bf16.gmra.mxu0 %v760_v35  ;;  %v787_v60 = vpack.c.bf16 %v699_v14, %v697_v12  ;;  %v2686_v35 = vmin.f32 %v537_v2, 6.0  ;;  %v573_v12 = vmax.f32 %v445_v10, 0.0  ;;  %v306_v50 = vmul.f32 %v2246_v20, %v166_v11 }
  0x62   :  { %1980 = vmatprep.mubr.msk.bf16.mxu0 %vm908_vm0, %v763_v3  ;;  %v44_v3 = vld [vmem:[%s3797_s0 + $0xc0] sm:$0xff]  ;;  %v444_v13 = vadd.f32 %v2250_v22, %v304_v0  ;;  %v575_v14 = vmax.f32 %v447_v45, 0.0  ;;  %v2721_v26 = vmin.f32 %v538_v48, 6.0  ;;  %v275_v7 = vmul.f32 %v2248_v21, %v135_v15  ;;  %v46_v48 = vld [vmem:[%s3797_s0 + $0xd0] sm:$0xff] }
  0x63   :  { %1992 = vmatprep.mubr.msk.bf16.mxu1 %vm908_vm0, %v787_v60  ;;  %v771_v39 = vpack.c.bf16 %v2693_v8, %v2686_v35  ;;  %v133_v16 = vunpack.c.h.bf16 %v44_v3  ;;  %v132_v32 = vunpack.c.l.bf16 %v44_v3  ;;  %v701_v30 = vmin.f32 %v573_v12, 6.0 }
  0x64   :  { %1190 = vmatmul.mubr.bf16.gmra.mxu1 %v786_v9  ;;  %v446_v58 = vadd.f32 %v2250_v22, %v306_v50  ;;  %v572_v61 = vmax.f32 %v444_v13, 0.0  ;;  %v134_v60 = vunpack.c.l.bf16 %v45_v41  ;;  %v415_v27 = vadd.f32 %v2252_v23, %v275_v7  ;;  %v47_v13 = vld [vmem:[%s3797_s0 + $0xd8] sm:$0xff] }
  0x65   :  { %v273_v25 = vmul.f32 %v2248_v21, %v133_v16  ;;  %v272_v47 = vmul.f32 %v2246_v20, %v132_v32  ;;  %v171_v28 = vunpack.c.h.bf16 %v63_v42  ;;  %v168_v43 = vunpack.c.l.bf16 %v62_v37 }
  0x66   :  { %v574_v2 = vmax.f32 %v446_v58, 0.0  ;;  %v700_v63 = vmin.f32 %v572_v61, 6.0  ;;  %v274_v18 = vmul.f32 %v2246_v20, %v134_v60  ;;  %v543_v3 = vmax.f32 %v415_v27, 0.0  ;;  %v64_v58 = vld [vmem:[%s3797_s0 + $0x160] sm:$0xff] }
  0x67   :  { %v413_v52 = vadd.f32 %v2252_v23, %v273_v25  ;;  %v412_v55 = vadd.f32 %v2250_v22, %v272_v47  ;;  %v311_v0 = vmul.f32 %v2248_v21, %v171_v28  ;;  %v170_v12 = vunpack.c.l.bf16 %v63_v42  ;;  %v65_v47 = vld [vmem:[%s3797_s0 + $0x168] sm:$0xff] }
  0x68   :  { %v702_v19 = vmin.f32 %v574_v2, 6.0  ;;  %v414_v57 = vadd.f32 %v2250_v22, %v274_v18  ;;  %v2746_v45 = vmin.f32 %v543_v3, 6.0  ;;  %v308_v50 = vmul.f32 %v2246_v20, %v168_v43 }
  0x69   :  { %1094 = vmatmul.mubr.bf16.gmra.mxu0 %v762_v46  ;;  %v703_v46 = vmin.f32 %v575_v14, 6.0  ;;  %v541_v6 = vmax.f32 %v413_v52, 0.0  ;;  %v540_v11 = vmax.f32 %v412_v55, 0.0  ;;  %v770_v14 = vpack.c.bf16 %v2721_v26, %v2706_v53  ;;  %v68_v26 = vld [vmem:[%s3797_s0 + $0x180] sm:$0xff] }
  0x6a   :  { %1981 = vmatprep.mubr.msk.bf16.mxu0 %vm908_vm0, %v765_v49  ;;  %v169_v49 = vunpack.c.h.bf16 %v62_v37  ;;  %v788_v10 = vpack.c.bf16 %v702_v19, %v700_v63  ;;  %v542_v16 = vmax.f32 %v414_v57, 0.0  ;;  %v451_v4 = vadd.f32 %v2252_v23, %v311_v0 }
  0x6b   :  { %v789_v24 = vpack.c.bf16 %v703_v46, %v701_v30  ;;  %v2735_v9 = vmin.f32 %v541_v6, 6.0  ;;  %v2761_v25 = vmin.f32 %v540_v11, 6.0  ;;  %v310_v32 = vmul.f32 %v2246_v20, %v170_v12 }
  0x6c   :  { %v309_v29 = vmul.f32 %v2248_v21, %v169_v49  ;;  %v448_v37 = vadd.f32 %v2250_v22, %v308_v50  ;;  %v579_v51 = vmax.f32 %v451_v4, 0.0  ;;  %v2769_v61 = vmin.f32 %v542_v16, 6.0  ;;  %v49_v50 = vld [vmem:[%s3797_s0 + $0xe8] sm:$0xff] }
  0x6d   :  { %1993 = vmatprep.mubr.msk.bf16.mxu1 %vm908_vm0, %v789_v24  ;;  %v773_v15 = vpack.c.bf16 %v2746_v45, %v2735_v9  ;;  %v450_v46 = vadd.f32 %v2250_v22, %v310_v32  ;;  %v136_v52 = vunpack.c.l.bf16 %v46_v48  ;;  %v138_v63 = vunpack.c.l.bf16 %v47_v13 }
  0x6e   :  { %v449_v41 = vadd.f32 %v2252_v23, %v309_v29  ;;  %1198 = vmatmul.mubr.bf16.gmra.mxu1 %v788_v10  ;;  %v576_v7 = vmax.f32 %v448_v37, 0.0  ;;  %v707_v60 = vmin.f32 %v579_v51, 6.0  ;;  %v173_v6 = vunpack.c.h.bf16 %v64_v58 }
  0x6f   :  { %v578_v49 = vmax.f32 %v450_v46, 0.0  ;;  %v276_v27 = vmul.f32 %v2246_v20, %v136_v52  ;;  %v278_v28 = vmul.f32 %v2246_v20, %v138_v63  ;;  %v175_v57 = vunpack.c.h.bf16 %v65_v47 }
  0x70   :  { %v577_v33 = vmax.f32 %v449_v41, 0.0  ;;  %v704_v24 = vmin.f32 %v576_v7, 6.0  ;;  %v313_v43 = vmul.f32 %v2248_v21, %v173_v6  ;;  %v172_v40 = vunpack.c.l.bf16 %v64_v58  ;;  %v66_v7 = vld [vmem:[%s3797_s0 + $0x170] sm:$0xff] }
  0x71   :  { %1102 = vmatmul.mubr.bf16.gmra.mxu0 %v764_v59  ;;  %v137_v59 = vunpack.c.h.bf16 %v46_v48  ;;  %v706_v29 = vmin.f32 %v578_v49, 6.0  ;;  %v416_v3 = vadd.f32 %v2250_v22, %v276_v27  ;;  %v418_v11 = vadd.f32 %v2250_v22, %v278_v28  ;;  %v67_v27 = vld [vmem:[%s3797_s0 + $0x178] sm:$0xff] }
  0x72   :  { %1982 = vmatprep.mubr.msk.bf16.mxu0 %vm908_vm0, %v767_v38  ;;  %v705_v36 = vmin.f32 %v577_v33, 6.0  ;;  %v139_v38 = vunpack.c.h.bf16 %v47_v13  ;;  %v315_v41 = vmul.f32 %v2248_v21, %v175_v57  ;;  %v453_v62 = vadd.f32 %v2252_v23, %v313_v43 }
  0x73   :  { %v277_v30 = vmul.f32 %v2248_v21, %v137_v59  ;;  %v544_v0 = vmax.f32 %v416_v3, 0.0  ;;  %v174_v16 = vunpack.c.l.bf16 %v65_v47  ;;  %v312_v12 = vmul.f32 %v2246_v20, %v172_v40 }
  0x74   :  { %v279_v42 = vmul.f32 %v2248_v21, %v139_v38  ;;  %v791_v18 = vpack.c.bf16 %v707_v60, %v705_v36  ;;  %v772_v13 = vpack.c.bf16 %v2769_v61, %v2761_v25  ;;  %v455_v4 = vadd.f32 %v2252_v23, %v315_v41  ;;  %v71_v25 = vld [vmem:[%s3797_s0 + $0x198] sm:$0xff] }
  0x75   :  { %v417_v2 = vadd.f32 %v2252_v23, %v277_v30  ;;  %v581_v33 = vmax.f32 %v453_v62, 0.0  ;;  %v141_v59 = vunpack.c.h.bf16 %v48_v17  ;;  %v2809_v37 = vmin.f32 %v544_v0, 6.0 }
  0x76   :  { %v419_v19 = vadd.f32 %v2252_v23, %v279_v42  ;;  %1994 = vmatprep.mubr.msk.bf16.mxu1 %vm908_vm0, %v791_v18  ;;  %v314_v51 = vmul.f32 %v2246_v20, %v174_v16  ;;  %v452_v36 = vadd.f32 %v2250_v22, %v312_v12  ;;  %v583_v38 = vmax.f32 %v455_v4, 0.0  ;;  %v51_v12 = vld [vmem:[%s3797_s0 + $0xf8] sm:$0xff] }
  0x77   :  { %v545_v55 = vmax.f32 %v417_v2, 0.0  ;;  %v709_v30 = vmin.f32 %v581_v33, 6.0  ;;  %v143_v58 = vunpack.c.h.bf16 %v49_v50  ;;  %v281_v46 = vmul.f32 %v2248_v21, %v141_v59 }
  0x78   :  { %v547_v48 = vmax.f32 %v419_v19, 0.0  ;;  %v454_v60 = vadd.f32 %v2250_v22, %v314_v51  ;;  %v580_v42 = vmax.f32 %v452_v36, 0.0  ;;  %v140_v2 = vunpack.c.l.bf16 %v48_v17 }
  0x79   :  { %1110 = vmatmul.mubr.bf16.gmra.mxu0 %v766_v56  ;;  %v2790_v10 = vmin.f32 %v545_v55, 6.0  ;;  %v790_v56 = vpack.c.bf16 %v706_v29, %v704_v24  ;;  %v711_v63 = vmin.f32 %v583_v38, 6.0  ;;  %v283_v47 = vmul.f32 %v2248_v21, %v143_v58 }
  0x7a   :  { %1983 = vmatprep.mubr.msk.bf16.mxu0 %vm908_vm0, %v769_v1  ;;  %v2798_v31 = vmin.f32 %v547_v48, 6.0  ;;  %v546_v1 = vmax.f32 %v418_v11, 0.0  ;;  %v421_v49 = vadd.f32 %v2252_v23, %v281_v46  ;;  %v142_v24 = vunpack.c.l.bf16 %v49_v50  ;;  %v50_v11 = vld [vmem:[%s3797_s0 + $0xf0] sm:$0xff] }
  0x7b   :  { %1206 = vmatmul.mubr.bf16.gmra.mxu1 %v790_v56  ;;  %v582_v6 = vmax.f32 %v454_v60, 0.0  ;;  %v708_v18 = vmin.f32 %v580_v42, 6.0  ;;  %v280_v34 = vmul.f32 %v2246_v20, %v140_v2  ;;  %v177_v54 = vunpack.c.h.bf16 %v66_v7 }
  0x7c   :  { %v775_v32 = vpack.c.bf16 %v2798_v31, %v2790_v10  ;;  %v2817_v52 = vmin.f32 %v546_v1, 6.0  ;;  %v423_v19 = vadd.f32 %v2252_v23, %v283_v47  ;;  %v549_v55 = vmax.f32 %v421_v49, 0.0  ;;  %v69_v47 = vld [vmem:[%s3797_s0 + $0x188] sm:$0xff] }
  0x7d   :  { %v282_v28 = vmul.f32 %v2246_v20, %v142_v24  ;;  %v710_v29 = vmin.f32 %v582_v6, 6.0  ;;  %v420_v3 = vadd.f32 %v2250_v22, %v280_v34  ;;  %v179_v57 = vunpack.c.h.bf16 %v67_v27 }
  0x7e   :  { %v317_v43 = vmul.f32 %v2248_v21, %v177_v54  ;;  %v551_v35 = vmax.f32 %v423_v19, 0.0  ;;  %v2838_v8 = vmin.f32 %v549_v55, 6.0  ;;  %v176_v48 = vunpack.c.l.bf16 %v66_v7 }
  0x7f   :  { %v792_v40 = vpack.c.bf16 %v710_v29, %v708_v18  ;;  %v548_v17 = vmax.f32 %v420_v3, 0.0  ;;  %v319_v56 = vmul.f32 %v2248_v21, %v179_v57  ;;  %v178_v1 = vunpack.c.l.bf16 %v67_v27 }
  0x80   :  { %v457_v0 = vadd.f32 %v2252_v23, %v317_v43  ;;  %v2846_v41 = vmin.f32 %v551_v35, 6.0  ;;  %v316_v16 = vmul.f32 %v2246_v20, %v176_v48  ;;  %v774_v50 = vpack.c.bf16 %v2817_v52, %v2809_v37 }
  0x81   :  { %1118 = vmatmul.mubr.bf16.gmra.mxu0 %v768_v44  ;;  %v793_v44 = vpack.c.bf16 %v711_v63, %v709_v30  ;;  %v459_v4 = vadd.f32 %v2252_v23, %v319_v56  ;;  %v145_v59 = vunpack.c.h.bf16 %v50_v11  ;;  %v2860_v36 = vmin.f32 %v548_v17, 6.0 }
  0x82   :  { %1984 = vmatprep.mubr.msk.bf16.mxu0 %vm908_vm0, %v771_v39  ;;  %v422_v39 = vadd.f32 %v2250_v22, %v282_v28  ;;  %v585_v33 = vmax.f32 %v457_v0, 0.0  ;;  %v777_v51 = vpack.c.bf16 %v2846_v41, %v2838_v8  ;;  %v318_v38 = vmul.f32 %v2246_v20, %v178_v1 }
  0x83   :  { %1995 = vmatprep.mubr.msk.bf16.mxu1 %vm908_vm0, %v793_v44  ;;  %v456_v30 = vadd.f32 %v2250_v22, %v316_v16  ;;  %v587_v58 = vmax.f32 %v459_v4, 0.0  ;;  %v147_v7 = vunpack.c.h.bf16 %v51_v12  ;;  %v285_v53 = vmul.f32 %v2248_v21, %v145_v59 }
  0x84   :  { %v550_v62 = vmax.f32 %v422_v39, 0.0  ;;  %1214 = vmatmul.mubr.bf16.gmra.mxu1 %v792_v40  ;;  %v713_v46 = vmin.f32 %v585_v33, 6.0  ;;  %v458_v60 = vadd.f32 %v2250_v22, %v318_v38  ;;  %v144_v2 = vunpack.c.l.bf16 %v50_v11  ;;  %v70_v39 = vld [vmem:[%s3797_s0 + $0x190] sm:$0xff] }
  0x85   :  { %v584_v42 = vmax.f32 %v456_v30, 0.0  ;;  %v715_v63 = vmin.f32 %v587_v58, 6.0  ;;  %v287_v9 = vmul.f32 %v2248_v21, %v147_v7  ;;  %v425_v45 = vadd.f32 %v2252_v23, %v285_v53  ;;  %v72_v58 = vld [vmem:[%s3797_s0 + $0x1a0] sm:$0xff] }
  0x86   :  { %v586_v49 = vmax.f32 %v458_v60, 0.0  ;;  %v284_v27 = vmul.f32 %v2246_v20, %v144_v2  ;;  %v181_v6 = vunpack.c.h.bf16 %v68_v26  ;;  %v183_v28 = vunpack.c.h.bf16 %v69_v47 }
  0x87   :  { %v712_v24 = vmin.f32 %v584_v42, 6.0  ;;  %v795_v18 = vpack.c.bf16 %v715_v63, %v713_v46  ;;  %v427_v34 = vadd.f32 %v2252_v23, %v287_v9  ;;  %v553_v54 = vmax.f32 %v425_v45, 0.0  ;;  %v73_v9 = vld [vmem:[%s3797_s0 + $0x1a8] sm:$0xff] }
  0x88   :  { %v714_v19 = vmin.f32 %v586_v49, 6.0  ;;  %v424_v55 = vadd.f32 %v2250_v22, %v284_v27  ;;  %v321_v29 = vmul.f32 %v2248_v21, %v181_v6  ;;  %v180_v35 = vunpack.c.l.bf16 %v68_v26 }
  0x89   :  { %1126 = vmatmul.mubr.bf16.gmra.mxu0 %v770_v14  ;;  %v2872_v14 = vmin.f32 %v550_v62, 6.0  ;;  %1996 = vmatprep.mubr.msk.bf16.mxu1 %vm908_vm0, %v795_v18  ;;  %v555_v3 = vmax.f32 %v427_v34, 0.0  ;;  %v2886_v57 = vmin.f32 %v553_v54, 6.0  ;;  %v323_v40 = vmul.f32 %v2248_v21, %v183_v28  ;;  %v74_v28 = vld [vmem:[%s3797_s0 + $0x1b0] sm:$0xff] }
  0x8a   :  { %1985 = vmatprep.mubr.msk.bf16.mxu0 %vm908_vm0, %v773_v15  ;;  %v146_v15 = vunpack.c.l.bf16 %v51_v12  ;;  %v794_v48 = vpack.c.bf16 %v714_v19, %v712_v24  ;;  %v552_v11 = vmax.f32 %v424_v55, 0.0  ;;  %v461_v17 = vadd.f32 %v2252_v23, %v321_v29 }
  0x8b   :  { %v2901_v56 = vmin.f32 %v555_v3, 6.0  ;;  %v182_v62 = vunpack.c.l.bf16 %v69_v47  ;;  %v320_v1 = vmul.f32 %v2246_v20, %v180_v35  ;;  %v776_v61 = vpack.c.bf16 %v2872_v14, %v2860_v36  ;;  %v77_v36 = vld [vmem:[%s3797_s0 + $0x1c8] sm:$0xff] }
  0x8c   :  { %v286_v44 = vmul.f32 %v2246_v20, %v146_v15  ;;  %1222 = vmatmul.mubr.bf16.gmra.mxu1 %v794_v48  ;;  %v589_v16 = vmax.f32 %v461_v17, 0.0  ;;  %v185_v10 = vunpack.c.h.bf16 %v70_v39  ;;  %v187_v38 = vunpack.c.h.bf16 %v71_v25  ;;  %v75_v48 = vld [vmem:[%s3797_s0 + $0x1b8] sm:$0xff] }
  0x8d   :  { %v779_v31 = vpack.c.bf16 %v2901_v56, %v2886_v57  ;;  %v322_v12 = vmul.f32 %v2246_v20, %v182_v62  ;;  %v460_v4 = vadd.f32 %v2250_v22, %v320_v1  ;;  %v184_v26 = vunpack.c.l.bf16 %v70_v39 }
  0x8e   :  { %v426_v43 = vadd.f32 %v2250_v22, %v286_v44  ;;  %v717_v59 = vmin.f32 %v589_v16, 6.0  ;;  %v325_v30 = vmul.f32 %v2248_v21, %v185_v10  ;;  %v327_v42 = vmul.f32 %v2248_v21, %v187_v38 }
  0x8f   :  { %v462_v7 = vadd.f32 %v2250_v22, %v322_v12  ;;  %v588_v53 = vmax.f32 %v460_v4, 0.0  ;;  %v186_v63 = vunpack.c.l.bf16 %v71_v25  ;;  %v324_v47 = vmul.f32 %v2246_v20, %v184_v26 }
  0x90   :  { %v554_v0 = vmax.f32 %v426_v43, 0.0  ;;  %v465_v2 = vadd.f32 %v2252_v23, %v325_v30  ;;  %v189_v49 = vunpack.c.h.bf16 %v72_v58  ;;  %v467_v27 = vadd.f32 %v2252_v23, %v327_v42 }
  0x91   :  { %1134 = vmatmul.mubr.bf16.gmra.mxu0 %v772_v13  ;;  %v463_v13 = vadd.f32 %v2252_v23, %v323_v40  ;;  %v590_v45 = vmax.f32 %v462_v7, 0.0  ;;  %v716_v15 = vmin.f32 %v588_v53, 6.0  ;;  %v326_v18 = vmul.f32 %v2246_v20, %v186_v63 }
  0x92   :  { %1986 = vmatprep.mubr.msk.bf16.mxu0 %vm908_vm0, %v775_v32  ;;  %v2912_v32 = vmin.f32 %v552_v11, 6.0  ;;  %v2920_v46 = vmin.f32 %v554_v0, 6.0  ;;  %v593_v6 = vmax.f32 %v465_v2, 0.0  ;;  %v464_v54 = vadd.f32 %v2250_v22, %v324_v47 }
  0x93   :  { %v591_v33 = vmax.f32 %v463_v13, 0.0  ;;  %v718_v34 = vmin.f32 %v590_v45, 6.0  ;;  %v191_v44 = vunpack.c.h.bf16 %v73_v9  ;;  %v329_v19 = vmul.f32 %v2248_v21, %v189_v49 }
  0x94   :  { %v595_v37 = vmax.f32 %v467_v27, 0.0  ;;  %v721_v52 = vmin.f32 %v593_v6, 6.0  ;;  %v188_v55 = vunpack.c.l.bf16 %v72_v58  ;;  %v592_v41 = vmax.f32 %v464_v54, 0.0  ;;  %v78_v27 = vld [vmem:[%s3797_s0 + $0x1d0] sm:$0xff] }
  0x95   :  { %v719_v60 = vmin.f32 %v591_v33, 6.0  ;;  %v796_v8 = vpack.c.bf16 %v718_v34, %v716_v15  ;;  %v469_v29 = vadd.f32 %v2252_v23, %v329_v19  ;;  %v190_v35 = vunpack.c.l.bf16 %v73_v9  ;;  %v76_v33 = vld [vmem:[%s3797_s0 + $0x1c0] sm:$0xff] }
  0x96   :  { %v723_v3 = vmin.f32 %v595_v37, 6.0  ;;  %v328_v39 = vmul.f32 %v2246_v20, %v188_v55  ;;  %v720_v11 = vmin.f32 %v592_v41, 6.0  ;;  %v193_v0 = vunpack.c.h.bf16 %v74_v28  ;;  %v79_v37 = vld [vmem:[%s3797_s0 + $0x1d8] sm:$0xff] }
  0x97   :  { %v797_v24 = vpack.c.bf16 %v719_v60, %v717_v59  ;;  %v597_v17 = vmax.f32 %v469_v29, 0.0  ;;  %v330_v25 = vmul.f32 %v2246_v20, %v190_v35  ;;  %v195_v12 = vunpack.c.h.bf16 %v75_v48 }
  0x98   :  { %v799_v62 = vpack.c.bf16 %v723_v3, %v721_v52  ;;  %v468_v13 = vadd.f32 %v2250_v22, %v328_v39  ;;  %v333_v4 = vmul.f32 %v2248_v21, %v193_v0  ;;  %v192_v58 = vunpack.c.l.bf16 %v74_v28  ;;  %v80_v39 = vld [vmem:[%s3797_s0 + $0x1e0] sm:$0xff] }
  0x99   :  { %1142 = vmatmul.mubr.bf16.gmra.mxu0 %v774_v50  ;;  %1997 = vmatprep.mubr.msk.bf16.mxu1 %vm908_vm0, %v797_v24  ;;  %v466_v50 = vadd.f32 %v2250_v22, %v326_v18  ;;  %v725_v10 = vmin.f32 %v597_v17, 6.0  ;;  %v470_v38 = vadd.f32 %v2250_v22, %v330_v25  ;;  %v335_v53 = vmul.f32 %v2248_v21, %v195_v12 }
  0x9a   :  { %1987 = vmatprep.mubr.msk.bf16.mxu0 %vm908_vm0, %v777_v51  ;;  %v331_v51 = vmul.f32 %v2248_v21, %v191_v44  ;;  %1230 = vmatmul.mubr.bf16.gmra.mxu1 %v796_v8  ;;  %v596_v30 = vmax.f32 %v468_v13, 0.0  ;;  %v473_v26 = vadd.f32 %v2252_v23, %v333_v4  ;;  %v194_v60 = vunpack.c.l.bf16 %v75_v48 }
  0x9b   :  { %v594_v43 = vmax.f32 %v466_v50, 0.0  ;;  %1998 = vmatprep.mubr.msk.bf16.mxu1 %vm908_vm0, %v799_v62  ;;  %v778_v14 = vpack.c.bf16 %v2920_v46, %v2912_v32  ;;  %v332_v42 = vmul.f32 %v2246_v20, %v192_v58  ;;  %v197_v2 = vunpack.c.h.bf16 %v76_v33  ;;  %v81_v62 = vld [vmem:[%s3797_s0 + $0x1e8] sm:$0xff] }
  0x9c   :  { %v471_v40 = vadd.f32 %v2252_v23, %v331_v51  ;;  %v475_v56 = vadd.f32 %v2252_v23, %v335_v53  ;;  %v334_v63 = vmul.f32 %v2246_v20, %v194_v60  ;;  %v724_v9 = vmin.f32 %v596_v30, 6.0 }
  0x9d   :  { %v722_v1 = vmin.f32 %v594_v43, 6.0  ;;  %v199_v15 = vunpack.c.h.bf16 %v77_v36  ;;  %v337_v47 = vmul.f32 %v2248_v21, %v197_v2  ;;  %v472_v24 = vadd.f32 %v2250_v22, %v332_v42  ;;  %v83_v42 = vld [vmem:[%s3797_s0 + $0x1f8] sm:$0xff] }
  0x9e   :  { %v599_v16 = vmax.f32 %v471_v40, 0.0  ;;  %v603_v49 = vmax.f32 %v475_v56, 0.0  ;;  %v474_v32 = vadd.f32 %v2250_v22, %v334_v63  ;;  %v196_v46 = vunpack.c.l.bf16 %v76_v33 }
  0x9f   :  { %v798_v59 = vpack.c.bf16 %v722_v1, %v720_v11  ;;  %v339_v18 = vmul.f32 %v2248_v21, %v199_v15  ;;  %v477_v34 = vadd.f32 %v2252_v23, %v337_v47  ;;  %v198_v44 = vunpack.c.l.bf16 %v77_v36 }
  0xa0   :  { %v727_v7 = vmin.f32 %v599_v16, 6.0  ;;  %v731_v54 = vmin.f32 %v603_v49, 6.0  ;;  %v336_v19 = vmul.f32 %v2246_v20, %v196_v46  ;;  %v201_v55 = vunpack.c.h.bf16 %v78_v27 }
  0xa1   :  { %1150 = vmatmul.mubr.bf16.gmra.mxu0 %v776_v61  ;;  %v598_v61 = vmax.f32 %v470_v38, 0.0  ;;  %v479_v50 = vadd.f32 %v2252_v23, %v339_v18  ;;  %v600_v28 = vmax.f32 %v472_v24, 0.0  ;;  %v602_v8 = vmax.f32 %v474_v32, 0.0 }
  0xa2   :  { %1988 = vmatprep.mubr.msk.bf16.mxu0 %vm908_vm0, %v779_v31  ;;  %v801_v57 = vpack.c.bf16 %v727_v7, %v725_v10  ;;  %v601_v31 = vmax.f32 %v473_v26, 0.0  ;;  %1238 = vmatmul.mubr.bf16.gmra.mxu1 %v798_v59  ;;  %v605_v41 = vmax.f32 %v477_v34, 0.0  ;;  %v338_v51 = vmul.f32 %v2246_v20, %v198_v44 }
  0xa3   :  { %v726_v45 = vmin.f32 %v598_v61, 6.0  ;;  %v607_v3 = vmax.f32 %v479_v50, 0.0  ;;  %v203_v43 = vunpack.c.h.bf16 %v79_v37  ;;  %v341_v35 = vmul.f32 %v2248_v21, %v201_v55  ;;  %v82_v61 = vld [vmem:[%s3797_s0 + $0x1f0] sm:$0xff] }
  0xa4   :  { %1999 = vmatprep.mubr.msk.bf16.mxu1 %vm908_vm0, %v801_v57  ;;  %v729_v6 = vmin.f32 %v601_v31, 6.0  ;;  %v476_v48 = vadd.f32 %v2250_v22, %v336_v19  ;;  %v478_v11 = vadd.f32 %v2250_v22, %v338_v51  ;;  %v200_v17 = vunpack.c.l.bf16 %v78_v27 }
  0xa5   :  { %v800_v52 = vpack.c.bf16 %v726_v45, %v724_v9  ;;  %v343_v40 = vmul.f32 %v2248_v21, %v203_v43  ;;  %v202_v0 = vunpack.c.l.bf16 %v79_v37  ;;  %v728_v1 = vmin.f32 %v600_v28, 6.0 }
  0xa6   :  { %v803_v29 = vpack.c.bf16 %v731_v54, %v729_v6  ;;  %v730_v25 = vmin.f32 %v602_v8, 6.0  ;;  %v481_v13 = vadd.f32 %v2252_v23, %v341_v35  ;;  %v205_v16 = vunpack.c.h.bf16 %v80_v39 }
  0xa7   :  { %v733_v10 = vmin.f32 %v605_v41, 6.0  ;;  %v735_v12 = vmin.f32 %v607_v3, 6.0  ;;  %v483_v4 = vadd.f32 %v2252_v23, %v343_v40  ;;  %v207_v33 = vunpack.c.h.bf16 %v81_v62 }
  0xa8   :  { %v604_v59 = vmax.f32 %v476_v48, 0.0  ;;  %v606_v38 = vmax.f32 %v478_v11, 0.0  ;;  %v340_v30 = vmul.f32 %v2246_v20, %v200_v17  ;;  %v342_v58 = vmul.f32 %v2246_v20, %v202_v0 }
  0xa9   :  { %1158 = vmatmul.mubr.bf16.gmra.mxu0 %v778_v14  ;;  %v802_v7 = vpack.c.bf16 %v730_v25, %v728_v1  ;;  %v609_v53 = vmax.f32 %v481_v13, 0.0  ;;  %v345_v26 = vmul.f32 %v2248_v21, %v205_v16  ;;  %v805_v60 = vpack.c.bf16 %v735_v12, %v733_v10 }
  0xaa   :  { %1246 = vmatmul.mubr.bf16.gmra.mxu1 %v800_v52  ;;  %v611_v36 = vmax.f32 %v483_v4, 0.0  ;;  %v347_v14 = vmul.f32 %v2248_v21, %v207_v33  ;;  %v732_v2 = vmin.f32 %v604_v59, 6.0  ;;  %v734_v57 = vmin.f32 %v606_v38, 6.0 }
  0xab   :  { %2000 = vmatprep.mubr.msk.bf16.mxu1 %vm908_vm0, %v803_v29  ;;  %v480_v56 = vadd.f32 %v2250_v22, %v340_v30  ;;  %v482_v31 = vadd.f32 %v2250_v22, %v342_v58  ;;  %v737_v63 = vmin.f32 %v609_v53, 6.0  ;;  %v485_v9 = vadd.f32 %v2252_v23, %v345_v26 }
  0xac   :  { %v204_v45 = vunpack.c.l.bf16 %v80_v39  ;;  %v206_v15 = vunpack.c.l.bf16 %v81_v62  ;;  %v739_v47 = vmin.f32 %v611_v36, 6.0  ;;  %v487_v49 = vadd.f32 %v2252_v23, %v347_v14 }
  0xad   :  { %v209_v24 = vunpack.c.h.bf16 %v82_v61  ;;  %v211_v32 = vunpack.c.h.bf16 %v83_v42  ;;  %v608_v46 = vmax.f32 %v480_v56, 0.0  ;;  %v610_v27 = vmax.f32 %v482_v31, 0.0 }
  0xae   :  { %v804_v6 = vpack.c.bf16 %v734_v57, %v732_v2  ;;  %v613_v18 = vmax.f32 %v485_v9, 0.0  ;;  %v344_v34 = vmul.f32 %v2246_v20, %v204_v45  ;;  %v346_v54 = vmul.f32 %v2246_v20, %v206_v15 }
  0xaf   :  { %v807_v44 = vpack.c.bf16 %v739_v47, %v737_v63  ;;  %v615_v19 = vmax.f32 %v487_v49, 0.0  ;;  %v349_v37 = vmul.f32 %v2248_v21, %v209_v24  ;;  %v351_v52 = vmul.f32 %v2248_v21, %v211_v32 }
  0xb0   :  { %v736_v50 = vmin.f32 %v608_v46, 6.0  ;;  %v738_v55 = vmin.f32 %v610_v27, 6.0  ;;  %v484_v28 = vadd.f32 %v2250_v22, %v344_v34  ;;  %v486_v8 = vadd.f32 %v2250_v22, %v346_v54 }
  0xb1   :  { %v208_v41 = vunpack.c.l.bf16 %v82_v61  ;;  %v210_v51 = vunpack.c.l.bf16 %v83_v42  ;;  %v741_v29 = vmin.f32 %v613_v18, 6.0  ;;  %v743_v3 = vmin.f32 %v615_v19, 6.0 }
  0xb2   :  { %1254 = vmatmul.mubr.bf16.gmra.mxu1 %v802_v7  ;;  %v489_v43 = vadd.f32 %v2252_v23, %v349_v37  ;;  %v491_v35 = vadd.f32 %v2252_v23, %v351_v52  ;;  %v806_v39 = vpack.c.bf16 %v738_v55, %v736_v50  ;;  %v612_v48 = vmax.f32 %v484_v28, 0.0 }
  0xb3   :  { %2001 = vmatprep.mubr.msk.bf16.mxu1 %vm908_vm0, %v805_v60  ;;  %v614_v21 = vmax.f32 %v486_v8, 0.0  ;;  %v348_v11 = vmul.f32 %v2246_v20, %v208_v41  ;;  %v350_v40 = vmul.f32 %v2246_v20, %v210_v51  ;;  %v809_v17 = vpack.c.bf16 %v743_v3, %v741_v29 }
  0xb4   :  { %v617_v0 = vmax.f32 %v489_v43, 0.0  ;;  %v619_v62 = vmax.f32 %v491_v35, 0.0  ;;  %v740_v1 = vmin.f32 %v612_v48, 6.0 }
  0xb5   :  { %v742_v25 = vmin.f32 %v614_v21, 6.0  ;;  %v488_v13 = vadd.f32 %v2250_v22, %v348_v11  ;;  %v490_v16 = vadd.f32 %v2250_v22, %v350_v40 }
  0xb6   :  { %v745_v23 = vmin.f32 %v617_v0, 6.0  ;;  %v747_v10 = vmin.f32 %v619_v62, 6.0 }
  0xb7   :  { %v808_v12 = vpack.c.bf16 %v742_v25, %v740_v1  ;;  %v616_v4 = vmax.f32 %v488_v13, 0.0  ;;  %v618_v33 = vmax.f32 %v490_v16, 0.0 }
  0xb8   :  { %v811_v59 = vpack.c.bf16 %v747_v10, %v745_v23 }
  0xb9   :  { %v744_v20 = vmin.f32 %v616_v4, 6.0  ;;  %v746_v38 = vmin.f32 %v618_v33, 6.0 }
  0xba   :  { %1262 = vmatmul.mubr.bf16.gmra.mxu1 %v804_v6 }
  0xbb   :  { %2002 = vmatprep.mubr.msk.bf16.mxu1 %vm908_vm0, %v807_v44  ;;  %v810_v30 = vpack.c.bf16 %v746_v38, %v744_v20 }
  0xc2   :  { %1270 = vmatmul.mubr.bf16.gmra.mxu1 %v806_v39 }
  0xc3   :  { %2003 = vmatprep.mubr.msk.bf16.mxu1 %vm908_vm0, %v809_v17 }
  0xca   :  { %1278 = vmatmul.mubr.bf16.gmra.mxu1 %v808_v12 }
  0xcb   :  { %2004 = vmatprep.mubr.msk.bf16.mxu1 %vm908_vm0, %v811_v59 }
  0xd2   :  { %1286 = vmatmul.mubr.bf16.gmra.mxu1 %v810_v30 }
  0xf1   :  { %v3035_v58 = vpop.f32.mrf.mxu0 }
  0xf2   :  { %v2069_v22 = vpack.c.bf16 %v3035_v58, %v3035_v58 }
  0xf3   :  { %v1041_v7 = vpop.f32.mrf.mxu0 }
  0xf4   :  { %1551 = vst.msk [vmem:[%s3800_s4] sm:$0xf] %vm1550_vm1, %v2069_v22 }
  0xf5   :  { %v3043_v53 = vpop.f32.mrf.mxu0 }
  0xf6   :  { %v2070_v26 = vpack.c.bf16 %v3043_v53, %v3043_v53 }
  0xf7   :  { %v1044_v60 = vpop.f32.mrf.mxu0 }
  0xf8   :  { %1552 = vst.msk [vmem:[%s3800_s4 + $0x4] sm:$0xf] %vm1550_vm1, %v2070_v26 }
  0xf9   :  { %v3051_v36 = vpop.f32.mrf.mxu0 }
  0xfa   :  { %v2071_v14 = vpack.c.bf16 %v3051_v36, %v3051_v36 }
  0xfb   :  { %v1049_v61 = vpop.f32.mrf.mxu0 }
  0xfc   :  { %1553 = vst.msk [vmem:[%s3800_s4 + $0x8] sm:$0xf] %vm1550_vm1, %v2071_v14 }
  0xfd   :  { %v3059_v42 = vpop.f32.mrf.mxu0 }
  0xfe   :  { %v2072_v2 = vpack.c.bf16 %v3059_v42, %v3059_v42 }
  0xff   :  { %v1052_v57 = vpop.f32.mrf.mxu0 }
 0x100   :  { %1554 = vst.msk [vmem:[%s3800_s4 + $0xc] sm:$0xf] %vm1550_vm1, %v2072_v2  ;;  %v1750_v57 = vmul.f32 %v3043_v53, %v3043_v53 }
 0x101   :  { %v3067_v56 = vpop.f32.mrf.mxu0 }
 0x102   :  { %v2073_v31 = vpack.c.bf16 %v3067_v56, %v3067_v56 }
 0x103   :  { %v1057_v63 = vpop.f32.mrf.mxu0  ;;  %v3079_v47 = vpop.f32.mrf.mxu1 }
 0x104   :  { %1555 = vst.msk [vmem:[%s3800_s4 + $0x10] sm:$0xf] %vm1550_vm1, %v2073_v31  ;;  %v2101_v49 = vpack.c.bf16 %v3079_v47, %v3079_v47 }
 0x105   :  { %v3075_v9 = vpop.f32.mrf.mxu0  ;;  %v1169_v32 = vpop.f32.mrf.mxu1 }
 0x106   :  { %v2074_v45 = vpack.c.bf16 %v3075_v9, %v3075_v9  ;;  %1583 = vst.msk [vmem:[%s3800_s4 + $0x80] sm:$0xf] %vm1550_vm1, %v2101_v49  ;;  %v1751_v49 = vmul.f32 %v3051_v36, %v3051_v36  ;;  %v1616_v32 = vsel %vm1615_vm2, %v3035_v58, 0.0 }
 0x107   :  { %v1060_v15 = vpop.f32.mrf.mxu0  ;;  %v3095_v6 = vpop.f32.mrf.mxu1 }
 0x108   :  { %1556 = vst.msk [vmem:[%s3800_s4 + $0x14] sm:$0xf] %vm1550_vm1, %v2074_v45  ;;  %v2102_v18 = vpack.c.bf16 %v3095_v6, %v3095_v6  ;;  %v1749_v45 = vmul.f32 %v3035_v58, %v3035_v58  ;;  %v1617_v15 = vsel %vm1615_vm2, %v3043_v53, 0.0  ;;  %v1752_v53 = vmul.f32 %v3059_v42, %v3059_v42 }
 0x109   :  { %v3087_v24 = vpop.f32.mrf.mxu0  ;;  %v1172_v54 = vpop.f32.mrf.mxu1 }
 0x10a   :  { %v2075_v46 = vpack.c.bf16 %v3087_v24, %v3087_v24  ;;  %1584 = vst.msk [vmem:[%s3800_s4 + $0x84] sm:$0xf] %vm1550_vm1, %v2102_v18  ;;  %v1619_v18 = vsel %vm1615_vm2, %v3051_v36, 0.0  ;;  %v1621_v36 = vsel %vm1615_vm2, %v3059_v42, 0.0  ;;  %v1818_v42 = vsel %vm1615_vm2, %v1752_v53, 0.0 }
 0x10b   :  { %v1065_v27 = vpop.f32.mrf.mxu0 }
 0x10c   :  { %1557 = vst.msk [vmem:[%s3800_s4 + $0x18] sm:$0xf] %vm1550_vm1, %v2075_v46  ;;  %v1814_v27 = vsel %vm1615_vm2, %v1750_v57, 0.0 }
 0x10d   :  { %v3103_v34 = vpop.f32.mrf.mxu0 }
 0x10e   :  { %v2076_v44 = vpack.c.bf16 %v3103_v34, %v3103_v34 }
 0x10f   :  { %v1068_v19 = vpop.f32.mrf.mxu0  ;;  %v3117_v52 = vpop.f32.mrf.mxu1 }
 0x110   :  { %1558 = vst.msk [vmem:[%s3800_s4 + $0x1c] sm:$0xf] %vm1550_vm1, %v2076_v44  ;;  %v2103_v55 = vpack.c.bf16 %v3117_v52, %v3117_v52  ;;  %v1618_v19 = vadd.f32 %v1617_v15, %v1616_v32 }
 0x111   :  { %v3115_v37 = vpop.f32.mrf.mxu0  ;;  %v1177_v8 = vpop.f32.mrf.mxu1 }
 0x112   :  { %v2077_v50 = vpack.c.bf16 %v3115_v37, %v3115_v37  ;;  %1585 = vst.msk [vmem:[%s3800_s4 + $0x88] sm:$0xf] %vm1550_vm1, %v2103_v55  ;;  %v1813_v55 = vsel %vm1615_vm2, %v1749_v45, 0.0  ;;  %v1753_v8 = vmul.f32 %v3067_v56, %v3067_v56  ;;  %v1629_v45 = vsel %vm1615_vm2, %v3103_v34, 0.0 }
 0x113   :  { %v1073_v28 = vpop.f32.mrf.mxu0  ;;  %v3133_v51 = vpop.f32.mrf.mxu1  ;;  %v1757_v15 = vmul.f32 %v3115_v37, %v3115_v37 }
 0x114   :  { %1559 = vst.msk [vmem:[%s3800_s4 + $0x20] sm:$0xf] %vm1550_vm1, %v2077_v50  ;;  %v2104_v3 = vpack.c.bf16 %v3133_v51, %v3133_v51  ;;  %v1816_v28 = vsel %vm1615_vm2, %v1751_v49, 0.0 }
 0x115   :  { %v3131_v41 = vpop.f32.mrf.mxu0  ;;  %v1180_v35 = vpop.f32.mrf.mxu1 }
 0x116   :  { %v2078_v29 = vpack.c.bf16 %v3131_v41, %v3131_v41  ;;  %1586 = vst.msk [vmem:[%s3800_s4 + $0x8c] sm:$0xf] %vm1550_vm1, %v2104_v3  ;;  %v1815_v3 = vadd.f32 %v1814_v27, %v1813_v55  ;;  %v1758_v32 = vmul.f32 %v3131_v41, %v3131_v41 }
 0x117   :  { %v1076_v43 = vpop.f32.mrf.mxu0 }
 0x118   :  { %1560 = vst.msk [vmem:[%s3800_s4 + $0x24] sm:$0xf] %vm1550_vm1, %v2078_v29  ;;  %v1620_v43 = vadd.f32 %v1619_v18, %v1618_v19 }
 0x119   :  { %v3147_v39 = vpop.f32.mrf.mxu0 }
 0x11a   :  { %v2079_v48 = vpack.c.bf16 %v3147_v39, %v3147_v39  ;;  %v3155_v11 = vpop.f32.mrf.mxu1 }
 0x11b   :  { %v1081_v21 = vpop.f32.mrf.mxu0  ;;  %v2105_v17 = vpack.c.bf16 %v3155_v11, %v3155_v11 }
 0x11c   :  { %1561 = vst.msk [vmem:[%s3800_s4 + $0x28] sm:$0xf] %vm1550_vm1, %v2079_v48  ;;  %v1185_v62 = vpop.f32.mrf.mxu1  ;;  %v1623_v48 = vsel %vm1615_vm2, %v3067_v56, 0.0  ;;  %v1754_v21 = vmul.f32 %v3075_v9, %v3075_v9  ;;  %v1755_v56 = vmul.f32 %v3087_v24, %v3087_v24 }
 0x11d   :  { %v3157_v40 = vpop.f32.mrf.mxu0  ;;  %1587 = vst.msk [vmem:[%s3800_s4 + $0x90] sm:$0xf] %vm1550_vm1, %v2105_v17  ;;  %v1817_v62 = vadd.f32 %v1816_v28, %v1815_v3 }
 0x11e   :  { %v2080_v0 = vpack.c.bf16 %v3157_v40, %v3157_v40  ;;  %v3171_v25 = vpop.f32.mrf.mxu1 }
 0x11f   :  { %v1084_v1 = vpop.f32.mrf.mxu0  ;;  %v2106_v16 = vpack.c.bf16 %v3171_v25, %v3171_v25 }
 0x120   :  { %1562 = vst.msk [vmem:[%s3800_s4 + $0x2c] sm:$0xf] %vm1550_vm1, %v2080_v0  ;;  %v1188_v10 = vpop.f32.mrf.mxu1  ;;  %v1622_v1 = vadd.f32 %v1621_v36, %v1620_v43  ;;  %v1828_v36 = vsel %vm1615_vm2, %v1757_v15, 0.0  ;;  %v1830_v43 = vsel %vm1615_vm2, %v1758_v32, 0.0 }
 0x121   :  { %v3173_v13 = vpop.f32.mrf.mxu0  ;;  %1588 = vst.msk [vmem:[%s3800_s4 + $0x94] sm:$0xf] %vm1550_vm1, %v2106_v16  ;;  %v1820_v10 = vsel %vm1615_vm2, %v1753_v8, 0.0  ;;  %v1633_v8 = vsel %vm1615_vm2, %v3131_v41, 0.0 }
 0x122   :  { %v2081_v23 = vpack.c.bf16 %v3173_v13, %v3173_v13 }
 0x123   :  { %v1089_v12 = vpop.f32.mrf.mxu0 }
 0x124   :  { %1563 = vst.msk [vmem:[%s3800_s4 + $0x30] sm:$0xf] %vm1550_vm1, %v2081_v23  ;;  %v3191_v20 = vpop.f32.mrf.mxu1  ;;  %v1625_v12 = vsel %vm1615_vm2, %v3075_v9, 0.0  ;;  %v1822_v9 = vsel %vm1615_vm2, %v1754_v21, 0.0  ;;  %v1760_v21 = vmul.f32 %v3157_v40, %v3157_v40 }
 0x125   :  { %v3187_v4 = vpop.f32.mrf.mxu0  ;;  %v2107_v38 = vpack.c.bf16 %v3191_v20, %v3191_v20 }
 0x126   :  { %v2082_v33 = vpack.c.bf16 %v3187_v4, %v3187_v4  ;;  %v1193_v22 = vpop.f32.mrf.mxu1 }
 0x127   :  { %v1092_v59 = vpop.f32.mrf.mxu0  ;;  %1589 = vst.msk [vmem:[%s3800_s4 + $0x98] sm:$0xf] %vm1550_vm1, %v2107_v38  ;;  %v1624_v38 = vadd.f32 %v1623_v48, %v1622_v1  ;;  %v1635_v48 = vsel %vm1615_vm2, %v3147_v39, 0.0 }
 0x128   :  { %1564 = vst.msk [vmem:[%s3800_s4 + $0x34] sm:$0xf] %vm1550_vm1, %v2082_v33  ;;  %v3207_v60 = vpop.f32.mrf.mxu1  ;;  %v1819_v59 = vadd.f32 %v1818_v42, %v1817_v62 }
 0x129   :  { %v3199_v30 = vpop.f32.mrf.mxu0  ;;  %v2108_v14 = vpack.c.bf16 %v3207_v60, %v3207_v60  ;;  %v1626_v57 = vadd.f32 %v1625_v12, %v1624_v38 }
 0x12a   :  { %v2083_v7 = vpack.c.bf16 %v3199_v30, %v3199_v30  ;;  %v1196_v2 = vpop.f32.mrf.mxu1 }
 0x12b   :  { %v1097_v26 = vpop.f32.mrf.mxu0  ;;  %1590 = vst.msk [vmem:[%s3800_s4 + $0x9c] sm:$0xf] %vm1550_vm1, %v2108_v14  ;;  %v1821_v2 = vadd.f32 %v1820_v10, %v1819_v59 }
 0x12c   :  { %1565 = vst.msk [vmem:[%s3800_s4 + $0x38] sm:$0xf] %vm1550_vm1, %v2083_v7  ;;  %v1627_v7 = vsel %vm1615_vm2, %v3087_v24, 0.0  ;;  %v1756_v26 = vmul.f32 %v3103_v34, %v3103_v34  ;;  %v1631_v34 = vsel %vm1615_vm2, %v3115_v37, 0.0 }
 0x12d   :  { %v3215_v61 = vpop.f32.mrf.mxu0  ;;  %v1823_v24 = vadd.f32 %v1822_v9, %v1821_v2  ;;  %v1628_v49 = vadd.f32 %v1627_v7, %v1626_v57  ;;  %v1834_v9 = vsel %vm1615_vm2, %v1760_v21, 0.0  ;;  %v1762_v7 = vmul.f32 %v3187_v4, %v3187_v4 }
 0x12e   :  { %v2084_v31 = vpack.c.bf16 %v3215_v61, %v3215_v61  ;;  %v3246_v44 = vpop.f32.mrf.mxu1  ;;  %v1826_v53 = vsel %vm1615_vm2, %v1756_v26, 0.0 }
 0x12f   :  { %v1100_v63 = vpop.f32.mrf.mxu0  ;;  %v2109_v58 = vpack.c.bf16 %v3246_v44, %v3246_v44 }
 0x130   :  { %1566 = vst.msk [vmem:[%s3800_s4 + $0x3c] sm:$0xf] %vm1550_vm1, %v2084_v31  ;;  %v1201_v29 = vpop.f32.mrf.mxu1  ;;  %v1824_v63 = vsel %vm1615_vm2, %v1755_v56, 0.0  ;;  %v1637_v56 = vsel %vm1615_vm2, %v3157_v40, 0.0  ;;  %v1639_v40 = vsel %vm1615_vm2, %v3173_v13, 0.0 }
 0x131   :  { %v3237_v46 = vpop.f32.mrf.mxu0  ;;  %1591 = vst.msk [vmem:[%s3800_s4 + $0xa0] sm:$0xf] %vm1550_vm1, %v2109_v58  ;;  %v1630_v58 = vadd.f32 %v1629_v45, %v1628_v49  ;;  %v1759_v29 = vmul.f32 %v3147_v39, %v3147_v39  ;;  %v1761_v39 = vmul.f32 %v3173_v13, %v3173_v13  ;;  %v1763_v45 = vmul.f32 %v3199_v30, %v3199_v30 }
 0x132   :  { %v2085_v54 = vpack.c.bf16 %v3237_v46, %v3237_v46  ;;  %v3273_v0 = vpop.f32.mrf.mxu1 }
 0x133   :  { %v1105_v50 = vpop.f32.mrf.mxu0  ;;  %v2110_v23 = vpack.c.bf16 %v3273_v0, %v3273_v0  ;;  %v1632_v3 = vadd.f32 %v1631_v34, %v1630_v58  ;;  %v1832_v12 = vsel %vm1615_vm2, %v1759_v29, 0.0  ;;  %v1764_v34 = vmul.f32 %v3215_v61, %v3215_v61 }
 0x134   :  { %1567 = vst.msk [vmem:[%s3800_s4 + $0x40] sm:$0xf] %vm1550_vm1, %v2085_v54  ;;  %v1204_v33 = vpop.f32.mrf.mxu1  ;;  %v1825_v50 = vadd.f32 %v1824_v63, %v1823_v24  ;;  %v1641_v63 = vsel %vm1615_vm2, %v3187_v4, 0.0  ;;  %v1643_v4 = vsel %vm1615_vm2, %v3199_v30, 0.0  ;;  %v1645_v30 = vsel %vm1615_vm2, %v3215_v61, 0.0 }
 0x135   :  { %v3260_v35 = vpop.f32.mrf.mxu0  ;;  %1592 = vst.msk [vmem:[%s3800_s4 + $0xa4] sm:$0xf] %vm1550_vm1, %v2110_v23  ;;  %v1647_v61 = vsel %vm1615_vm2, %v3237_v46, 0.0 }
 0x136   :  { %v2086_v17 = vpack.c.bf16 %v3260_v35, %v3260_v35  ;;  %v1827_v37 = vadd.f32 %v1826_v53, %v1825_v50  ;;  %v1838_v53 = vsel %vm1615_vm2, %v1762_v7, 0.0  ;;  %v1766_v21 = vmul.f32 %v3260_v35, %v3260_v35 }
 0x137   :  { %v1108_v16 = vpop.f32.mrf.mxu0 }
 0x138   :  { %1568 = vst.msk [vmem:[%s3800_s4 + $0x44] sm:$0xf] %vm1550_vm1, %v2086_v17  ;;  %v1829_v1 = vadd.f32 %v1828_v36, %v1827_v37  ;;  %v1634_v16 = vadd.f32 %v1633_v8, %v1632_v3  ;;  %v1765_v36 = vmul.f32 %v3237_v46, %v3237_v46 }
 0x139   :  { %v3286_v22 = vpop.f32.mrf.mxu0 }
 0x13a   :  { %v2087_v14 = vpack.c.bf16 %v3286_v22, %v3286_v22  ;;  %v1831_v33 = vadd.f32 %v1830_v43, %v1829_v1  ;;  %v1636_v59 = vadd.f32 %v1635_v48, %v1634_v16  ;;  %v1842_v48 = vsel %vm1615_vm2, %v1764_v34, 0.0 }
 0x13b   :  { %v1113_v31 = vpop.f32.mrf.mxu0  ;;  %v3312_v18 = vpop.f32.mrf.mxu1  ;;  %v1767_v46 = vmul.f32 %v3286_v22, %v3286_v22 }
 0x13c   :  { %1569 = vst.msk [vmem:[%s3800_s4 + $0x48] sm:$0xf] %vm1550_vm1, %v2087_v14  ;;  %v2111_v19 = vpack.c.bf16 %v3312_v18, %v3312_v18  ;;  %v1833_v14 = vadd.f32 %v1832_v12, %v1831_v33  ;;  %v1638_v2 = vadd.f32 %v1637_v56, %v1636_v59  ;;  %v1836_v31 = vsel %vm1615_vm2, %v1761_v39, 0.0 }
 0x13d   :  { %v3310_v27 = vpop.f32.mrf.mxu0  ;;  %v1209_v28 = vpop.f32.mrf.mxu1  ;;  %v1649_v12 = vsel %vm1615_vm2, %v3260_v35, 0.0  ;;  %v1846_v59 = vsel %vm1615_vm2, %v1766_v21, 0.0 }
 0x13e   :  { %v2088_v54 = vpack.c.bf16 %v3310_v27, %v3310_v27  ;;  %1593 = vst.msk [vmem:[%s3800_s4 + $0xa8] sm:$0xf] %vm1550_vm1, %v2111_v19  ;;  %v1835_v15 = vadd.f32 %v1834_v9, %v1833_v14  ;;  %v1640_v24 = vadd.f32 %v1639_v40, %v1638_v2  ;;  %v1840_v28 = vsel %vm1615_vm2, %v1763_v45, 0.0 }
 0x13f   :  { %v1116_v55 = vpop.f32.mrf.mxu0  ;;  %v3337_v41 = vpop.f32.mrf.mxu1  ;;  %v1651_v9 = vsel %vm1615_vm2, %v3286_v22, 0.0  ;;  %v1768_v40 = vmul.f32 %v3310_v27, %v3310_v27 }
 0x140   :  { %1570 = vst.msk [vmem:[%s3800_s4 + $0x4c] sm:$0xf] %vm1550_vm1, %v2088_v54  ;;  %v2112_v62 = vpack.c.bf16 %v3337_v41, %v3337_v41  ;;  %v1837_v50 = vadd.f32 %v1836_v31, %v1835_v15  ;;  %v1642_v58 = vadd.f32 %v1641_v63, %v1640_v24  ;;  %v1653_v31 = vsel %vm1615_vm2, %v3310_v27, 0.0 }
 0x141   :  { %v3335_v42 = vpop.f32.mrf.mxu0  ;;  %v1212_v10 = vpop.f32.mrf.mxu1 }
 0x142   :  { %v2089_v17 = vpack.c.bf16 %v3335_v42, %v3335_v42  ;;  %1594 = vst.msk [vmem:[%s3800_s4 + $0xac] sm:$0xf] %vm1550_vm1, %v2112_v62  ;;  %v1839_v29 = vadd.f32 %v1838_v53, %v1837_v50  ;;  %v1644_v37 = vadd.f32 %v1643_v4, %v1642_v58  ;;  %v1844_v10 = vsel %vm1615_vm2, %v1765_v36, 0.0 }
 0x143   :  { %v1121_v23 = vpop.f32.mrf.mxu0  ;;  %v1769_v63 = vmul.f32 %v3335_v42, %v3335_v42  ;;  %v1850_v53 = vsel %vm1615_vm2, %v1768_v40, 0.0  ;;  %v1655_v27 = vsel %vm1615_vm2, %v3335_v42, 0.0 }
 0x144   :  { %1571 = vst.msk [vmem:[%s3800_s4 + $0x50] sm:$0xf] %vm1550_vm1, %v2089_v17  ;;  %v3378_v13 = vpop.f32.mrf.mxu1  ;;  %v1841_v1 = vadd.f32 %v1840_v28, %v1839_v29  ;;  %v1646_v16 = vadd.f32 %v1645_v30, %v1644_v37 }
 0x145   :  { %v3360_v38 = vpop.f32.mrf.mxu0  ;;  %v2113_v32 = vpack.c.bf16 %v3378_v13, %v3378_v13 }
 0x146   :  { %v2090_v26 = vpack.c.bf16 %v3360_v38, %v3360_v38  ;;  %v1217_v19 = vpop.f32.mrf.mxu1  ;;  %v1843_v56 = vadd.f32 %v1842_v48, %v1841_v1  ;;  %v1648_v39 = vadd.f32 %v1647_v61, %v1646_v16  ;;  %v1770_v4 = vmul.f32 %v3360_v38, %v3360_v38 }
 0x147   :  { %v1124_v57 = vpop.f32.mrf.mxu0  ;;  %1595 = vst.msk [vmem:[%s3800_s4 + $0xb0] sm:$0xf] %vm1550_vm1, %v2113_v32  ;;  %v1657_v28 = vsel %vm1615_vm2, %v3360_v38, 0.0 }
 0x148   :  { %1572 = vst.msk [vmem:[%s3800_s4 + $0x54] sm:$0xf] %vm1550_vm1, %v2090_v26  ;;  %v3404_v8 = vpop.f32.mrf.mxu1  ;;  %v1845_v7 = vadd.f32 %v1844_v10, %v1843_v56  ;;  %v1650_v26 = vadd.f32 %v1649_v12, %v1648_v39  ;;  %v1848_v57 = vsel %vm1615_vm2, %v1767_v46, 0.0  ;;  %v1854_v48 = vsel %vm1615_vm2, %v1770_v4, 0.0 }
 0x149   :  { %v3380_v49 = vpop.f32.mrf.mxu0  ;;  %v2114_v43 = vpack.c.bf16 %v3404_v8, %v3404_v8 }
 0x14a   :  { %v2091_v54 = vpack.c.bf16 %v3380_v49, %v3380_v49  ;;  %v1220_v62 = vpop.f32.mrf.mxu1  ;;  %v1847_v45 = vadd.f32 %v1846_v59, %v1845_v7  ;;  %v1652_v15 = vadd.f32 %v1651_v9, %v1650_v26  ;;  %v1771_v42 = vmul.f32 %v3380_v49, %v3380_v49 }
 0x14b   :  { %v1129_v55 = vpop.f32.mrf.mxu0  ;;  %1596 = vst.msk [vmem:[%s3800_s4 + $0xb4] sm:$0xf] %vm1550_vm1, %v2114_v43  ;;  %v1659_v38 = vsel %vm1615_vm2, %v3380_v49, 0.0 }
 0x14c   :  { %1573 = vst.msk [vmem:[%s3800_s4 + $0x58] sm:$0xf] %vm1550_vm1, %v2091_v54  ;;  %v3431_v2 = vpop.f32.mrf.mxu1  ;;  %v1849_v54 = vadd.f32 %v1848_v57, %v1847_v45  ;;  %v1654_v19 = vadd.f32 %v1653_v31, %v1652_v15  ;;  %v1852_v55 = vsel %vm1615_vm2, %v1769_v63, 0.0  ;;  %v1856_v16 = vsel %vm1615_vm2, %v1771_v42, 0.0 }
 0x14d   :  { %v1130_v3 = vpop.f32.mrf.mxu0  ;;  %v2115_v22 = vpack.c.bf16 %v3431_v2, %v3431_v2 }
 0x14e   :  { %v2092_v17 = vpack.c.bf16 %v1130_v3, %v1130_v3  ;;  %v1225_v32 = vpop.f32.mrf.mxu1  ;;  %v1851_v36 = vadd.f32 %v1850_v53, %v1849_v54  ;;  %v1656_v29 = vadd.f32 %v1655_v27, %v1654_v19  ;;  %v1772_v61 = vmul.f32 %v1130_v3, %v1130_v3 }
 0x14f   :  { %v1132_v23 = vpop.f32.mrf.mxu0  ;;  %1597 = vst.msk [vmem:[%s3800_s4 + $0xb8] sm:$0xf] %vm1550_vm1, %v2115_v22 }
 0x150   :  { %1574 = vst.msk [vmem:[%s3800_s4 + $0x5c] sm:$0xf] %vm1550_vm1, %v2092_v17  ;;  %v3453_v58 = vpop.f32.mrf.mxu1  ;;  %v1853_v17 = vadd.f32 %v1852_v55, %v1851_v36  ;;  %v1658_v62 = vadd.f32 %v1657_v28, %v1656_v29  ;;  %v1661_v23 = vsel %vm1615_vm2, %v1130_v3, 0.0  ;;  %v1858_v56 = vsel %vm1615_vm2, %v1772_v61, 0.0 }
 0x151   :  { %v1135_v33 = vpop.f32.mrf.mxu0  ;;  %v2116_v30 = vpack.c.bf16 %v3453_v58, %v3453_v58 }
 0x152   :  { %v2093_v35 = vpack.c.bf16 %v1135_v33, %v1135_v33  ;;  %v1228_v43 = vpop.f32.mrf.mxu1  ;;  %v1773_v10 = vmul.f32 %v1135_v33, %v1135_v33  ;;  %v1855_v49 = vadd.f32 %v1854_v48, %v1853_v17  ;;  %v1660_v12 = vadd.f32 %v1659_v38, %v1658_v62 }
 0x153   :  { %v1137_v14 = vpop.f32.mrf.mxu0  ;;  %1598 = vst.msk [vmem:[%s3800_s4 + $0xbc] sm:$0xf] %vm1550_vm1, %v2116_v30  ;;  %v1663_v39 = vsel %vm1615_vm2, %v1135_v33, 0.0 }
 0x154   :  { %1575 = vst.msk [vmem:[%s3800_s4 + $0x60] sm:$0xf] %vm1550_vm1, %v2093_v35  ;;  %v1857_v35 = vadd.f32 %v1856_v16, %v1855_v49  ;;  %v1662_v7 = vadd.f32 %v1661_v23, %v1660_v12  ;;  %v1860_v14 = vsel %vm1615_vm2, %v1773_v10, 0.0 }
 0x155   :  { %v1138_v24 = vpop.f32.mrf.mxu0 }
 0x156   :  { %v2094_v34 = vpack.c.bf16 %v1138_v24, %v1138_v24  ;;  %v1774_v59 = vmul.f32 %v1138_v24, %v1138_v24  ;;  %v1665_v57 = vsel %vm1615_vm2, %v1138_v24, 0.0  ;;  %v1859_v63 = vadd.f32 %v1858_v56, %v1857_v35 }
 0x157   :  { %v1140_v50 = vpop.f32.mrf.mxu0  ;;  %v1664_v22 = vadd.f32 %v1663_v39, %v1662_v7 }
 0x158   :  { %1576 = vst.msk [vmem:[%s3800_s4 + $0x64] sm:$0xf] %vm1550_vm1, %v2094_v34  ;;  %v1862_v15 = vsel %vm1615_vm2, %v1774_v59, 0.0  ;;  %v1861_v4 = vadd.f32 %v1860_v14, %v1859_v63 }
 0x159   :  { %v1143_v37 = vpop.f32.mrf.mxu0  ;;  %v1666_v34 = vadd.f32 %v1665_v57, %v1664_v22 }
 0x15a   :  { %v2095_v21 = vpack.c.bf16 %v1143_v37, %v1143_v37  ;;  %v3481_v40 = vpop.f32.mrf.mxu1  ;;  %v1775_v31 = vmul.f32 %v1143_v37, %v1143_v37  ;;  %v1667_v32 = vsel %vm1615_vm2, %v1143_v37, 0.0  ;;  %v1863_v30 = vadd.f32 %v1862_v15, %v1861_v4 }
 0x15b   :  { %v1145_v1 = vpop.f32.mrf.mxu0  ;;  %v2117_v26 = vpack.c.bf16 %v3481_v40, %v3481_v40  ;;  %v1668_v36 = vadd.f32 %v1667_v32, %v1666_v34 }
 0x15c   :  { %1577 = vst.msk [vmem:[%s3800_s4 + $0x68] sm:$0xf] %vm1550_vm1, %v2095_v21  ;;  %v1233_v33 = vpop.f32.mrf.mxu1  ;;  %v1864_v50 = vsel %vm1615_vm2, %v1775_v31, 0.0 }
 0x15d   :  { %v1146_v46 = vpop.f32.mrf.mxu0  ;;  %1599 = vst.msk [vmem:[%s3800_s4 + $0xc0] sm:$0xf] %vm1550_vm1, %v2117_v26  ;;  %v1865_v21 = vadd.f32 %v1864_v50, %v1863_v30  ;;  %v1679_v50 = vsel %vm1615_vm2, %v3079_v47, 0.0 }
 0x15e   :  { %v2096_v9 = vpack.c.bf16 %v1146_v46, %v1146_v46  ;;  %v1776_v24 = vmul.f32 %v1146_v46, %v1146_v46  ;;  %v3497_v27 = vpop.f32.mrf.mxu1  ;;  %v1669_v55 = vsel %vm1615_vm2, %v1146_v46, 0.0 }
 0x15f   :  { %v1148_v3 = vpop.f32.mrf.mxu0  ;;  %v2118_v19 = vpack.c.bf16 %v3497_v27, %v3497_v27  ;;  %v1670_v17 = vadd.f32 %v1669_v55, %v1668_v36  ;;  %v1782_v55 = vmul.f32 %v3095_v6, %v3095_v6 }
 0x160   :  { %1578 = vst.msk [vmem:[%s3800_s4 + $0x6c] sm:$0xf] %vm1550_vm1, %v2096_v9  ;;  %v1236_v42 = vpop.f32.mrf.mxu1  ;;  %v1866_v37 = vsel %vm1615_vm2, %v1776_v24, 0.0 }
 0x161   :  { %v1151_v45 = vpop.f32.mrf.mxu0  ;;  %1600 = vst.msk [vmem:[%s3800_s4 + $0xc4] sm:$0xf] %vm1550_vm1, %v2118_v19  ;;  %v1867_v49 = vadd.f32 %v1866_v37, %v1865_v21  ;;  %v1783_v37 = vmul.f32 %v3117_v52, %v3117_v52 }
 0x162   :  { %v2097_v53 = vpack.c.bf16 %v1151_v45, %v1151_v45  ;;  %v1777_v28 = vmul.f32 %v1151_v45, %v1151_v45  ;;  %v1671_v43 = vsel %vm1615_vm2, %v1151_v45, 0.0  ;;  %v3513_v61 = vpop.f32.mrf.mxu1  ;;  %v1781_v45 = vmul.f32 %v3079_v47, %v3079_v47 }
 0x163   :  { %v1153_v54 = vpop.f32.mrf.mxu0  ;;  %v2119_v1 = vpack.c.bf16 %v3513_v61, %v3513_v61  ;;  %v1672_v12 = vadd.f32 %v1671_v43, %v1670_v17  ;;  %v1878_v17 = vsel %vm1615_vm2, %v1782_v55, 0.0 }
 0x164   :  { %1579 = vst.msk [vmem:[%s3800_s4 + $0x70] sm:$0xf] %vm1550_vm1, %v2097_v53  ;;  %v1868_v16 = vsel %vm1615_vm2, %v1777_v28, 0.0  ;;  %v1241_v10 = vpop.f32.mrf.mxu1  ;;  %v1876_v47 = vsel %vm1615_vm2, %v1781_v45, 0.0 }
 0x165   :  { %v1154_v29 = vpop.f32.mrf.mxu0  ;;  %1601 = vst.msk [vmem:[%s3800_s4 + $0xc8] sm:$0xf] %vm1550_vm1, %v2119_v1  ;;  %v1869_v7 = vadd.f32 %v1868_v16, %v1867_v49  ;;  %v1784_v1 = vmul.f32 %v3133_v51, %v3133_v51  ;;  %v1880_v10 = vsel %vm1615_vm2, %v1783_v37, 0.0  ;;  %v1685_v49 = vsel %vm1615_vm2, %v3133_v51, 0.0 }
 0x166   :  { %v2098_v48 = vpack.c.bf16 %v1154_v29, %v1154_v29  ;;  %v1778_v38 = vmul.f32 %v1154_v29, %v1154_v29  ;;  %v1673_v23 = vsel %vm1615_vm2, %v1154_v29, 0.0  ;;  %v3529_v35 = vpop.f32.mrf.mxu1  ;;  %v1681_v29 = vsel %vm1615_vm2, %v3095_v6, 0.0 }
 0x167   :  { %v1156_v62 = vpop.f32.mrf.mxu0  ;;  %v1674_v3 = vadd.f32 %v1673_v23, %v1672_v12  ;;  %v2120_v14 = vpack.c.bf16 %v3529_v35, %v3529_v35  ;;  %v1785_v12 = vmul.f32 %v3155_v11, %v3155_v11 }
 0x168   :  { %1580 = vst.msk [vmem:[%s3800_s4 + $0x74] sm:$0xf] %vm1550_vm1, %v2098_v48  ;;  %v1870_v56 = vsel %vm1615_vm2, %v1778_v38, 0.0  ;;  %v1244_v31 = vpop.f32.mrf.mxu1  ;;  %v1683_v62 = vsel %vm1615_vm2, %v3117_v52, 0.0 }
 0x169   :  { %v1159_v46 = vpop.f32.mrf.mxu0  ;;  %v1871_v33 = vadd.f32 %v1870_v56, %v1869_v7  ;;  %1602 = vst.msk [vmem:[%s3800_s4 + $0xcc] sm:$0xf] %vm1550_vm1, %v2120_v14  ;;  %v1786_v7 = vmul.f32 %v3171_v25, %v3171_v25  ;;  %v1884_v14 = vsel %vm1615_vm2, %v1785_v12, 0.0  ;;  %v1787_v31 = vmul.f32 %v3191_v20, %v3191_v20 }
 0x16a   :  { %v2099_v39 = vpack.c.bf16 %v1159_v46, %v1159_v46  ;;  %v1675_v59 = vsel %vm1615_vm2, %v1159_v46, 0.0  ;;  %v1779_v9 = vmul.f32 %v1159_v46, %v1159_v46  ;;  %v3545_v53 = vpop.f32.mrf.mxu1  ;;  %v1701_v12 = vsel %vm1615_vm2, %v3337_v41, 0.0 }
 0x16b   :  { %v1161_v26 = vpop.f32.mrf.mxu0  ;;  %v1676_v63 = vadd.f32 %v1675_v59, %v1674_v3  ;;  %v2121_v19 = vpack.c.bf16 %v3545_v53, %v3545_v53  ;;  %v1882_v59 = vsel %vm1615_vm2, %v1784_v1, 0.0  ;;  %v1886_v45 = vsel %vm1615_vm2, %v1786_v7, 0.0 }
 0x16c   :  { %1581 = vst.msk [vmem:[%s3800_s4 + $0x78] sm:$0xf] %vm1550_vm1, %v2099_v39  ;;  %v1872_v57 = vsel %vm1615_vm2, %v1779_v9, 0.0  ;;  %v1249_v42 = vpop.f32.mrf.mxu1  ;;  %v1687_v9 = vsel %vm1615_vm2, %v3155_v11, 0.0  ;;  %v1703_v7 = vsel %vm1615_vm2, %v3378_v13, 0.0 }
 0x16d   :  { %v1162_v22 = vpop.f32.mrf.mxu0  ;;  %v1873_v4 = vadd.f32 %v1872_v57, %v1871_v33  ;;  %1603 = vst.msk [vmem:[%s3800_s4 + $0xd0] sm:$0xf] %vm1550_vm1, %v2121_v19  ;;  %v1689_v57 = vsel %vm1615_vm2, %v3171_v25, 0.0  ;;  %v1789_v19 = vmul.f32 %v3246_v44, %v3246_v44 }
 0x16e   :  { %v2100_v15 = vpack.c.bf16 %v1162_v22, %v1162_v22  ;;  %v1677_v32 = vsel %vm1615_vm2, %v1162_v22, 0.0  ;;  %v1780_v24 = vmul.f32 %v1162_v22, %v1162_v22  ;;  %v3567_v43 = vpop.f32.mrf.mxu1 }
 0x16f   :  { %v1678_v34 = vadd.f32 %v1677_v32, %v1676_v63  ;;  %v1164_v54 = vpop.f32.mrf.mxu0  ;;  %v2122_v21 = vpack.c.bf16 %v3567_v43, %v3567_v43  ;;  %v1788_v32 = vmul.f32 %v3207_v60, %v3207_v60  ;;  %v1892_v37 = vsel %vm1615_vm2, %v1789_v19, 0.0 }
 0x170   :  { %1582 = vst.msk [vmem:[%s3800_s4 + $0x7c] sm:$0xf] %vm1550_vm1, %v2100_v15  ;;  %v1874_v28 = vsel %vm1615_vm2, %v1780_v24, 0.0  ;;  %v1252_v16 = vpop.f32.mrf.mxu1  ;;  %v1691_v15 = vsel %vm1615_vm2, %v3191_v20, 0.0  ;;  %v1693_v54 = vsel %vm1615_vm2, %v3207_v60, 0.0 }
 0x171   :  { %v1680_v30 = vadd.f32 %v1679_v50, %v1678_v34  ;;  %v1875_v36 = vadd.f32 %v1874_v28, %v1873_v4  ;;  %1604 = vst.msk [vmem:[%s3800_s4 + $0xd4] sm:$0xf] %vm1550_vm1, %v2122_v21  ;;  %v1888_v34 = vsel %vm1615_vm2, %v1787_v31, 0.0  ;;  %v1890_v42 = vsel %vm1615_vm2, %v1788_v32, 0.0 }
 0x172   :  { %v3585_v52 = vpop.f32.mrf.mxu1  ;;  %v1699_v16 = vsel %vm1615_vm2, %v3312_v18, 0.0  ;;  %v1795_v31 = vmul.f32 %v3431_v2, %v3431_v2  ;;  %v1796_v32 = vmul.f32 %v3453_v58, %v3453_v58 }
 0x173   :  { %v1682_v48 = vadd.f32 %v1681_v29, %v1680_v30  ;;  %v1877_v38 = vadd.f32 %v1876_v47, %v1875_v36  ;;  %v2123_v39 = vpack.c.bf16 %v3585_v52, %v3585_v52  ;;  %v1695_v30 = vsel %vm1615_vm2, %v3246_v44, 0.0 }
 0x174   :  { %v1257_v3 = vpop.f32.mrf.mxu1  ;;  %v1790_v36 = vmul.f32 %v3273_v0, %v3273_v0 }
 0x175   :  { %v1684_v6 = vadd.f32 %v1683_v62, %v1682_v48  ;;  %v1879_v23 = vadd.f32 %v1878_v17, %v1877_v38  ;;  %1605 = vst.msk [vmem:[%s3800_s4 + $0xd8] sm:$0xf] %vm1550_vm1, %v2123_v39  ;;  %v1697_v48 = vsel %vm1615_vm2, %v3273_v0, 0.0  ;;  %v1791_v38 = vmul.f32 %v3312_v18, %v3312_v18 }
 0x176   :  { %v3603_v11 = vpop.f32.mrf.mxu1  ;;  %v1894_v1 = vsel %vm1615_vm2, %v1790_v36, 0.0  ;;  %v1794_v3 = vmul.f32 %v3404_v8, %v3404_v8 }
 0x177   :  { %v1686_v46 = vadd.f32 %v1685_v49, %v1684_v6  ;;  %v1881_v56 = vadd.f32 %v1880_v10, %v1879_v23  ;;  %v2124_v22 = vpack.c.bf16 %v3603_v11, %v3603_v11  ;;  %v1792_v6 = vmul.f32 %v3337_v41, %v3337_v41 }
 0x178   :  { %v1260_v24 = vpop.f32.mrf.mxu1  ;;  %v1896_v49 = vsel %vm1615_vm2, %v1791_v38, 0.0 }
 0x179   :  { %v1688_v51 = vadd.f32 %v1687_v9, %v1686_v46  ;;  %v1883_v26 = vadd.f32 %v1882_v59, %v1881_v56  ;;  %1606 = vst.msk [vmem:[%s3800_s4 + $0xdc] sm:$0xf] %vm1550_vm1, %v2124_v22  ;;  %v1793_v46 = vmul.f32 %v3378_v13, %v3378_v13  ;;  %v1898_v9 = vsel %vm1615_vm2, %v1792_v6, 0.0 }
 0x17a   :  { %v3621_v20 = vpop.f32.mrf.mxu1 }
 0x17b   :  { %v1690_v33 = vadd.f32 %v1689_v57, %v1688_v51  ;;  %v1885_v63 = vadd.f32 %v1884_v14, %v1883_v26  ;;  %v2125_v28 = vpack.c.bf16 %v3621_v20, %v3621_v20  ;;  %v1900_v14 = vsel %vm1615_vm2, %v1793_v46, 0.0 }
 0x17c   :  { %v1265_v47 = vpop.f32.mrf.mxu1  ;;  %v1705_v57 = vsel %vm1615_vm2, %v3404_v8, 0.0 }
 0x17d   :  { %v1692_v25 = vadd.f32 %v1691_v15, %v1690_v33  ;;  %v1887_v4 = vadd.f32 %v1886_v45, %v1885_v63  ;;  %1607 = vst.msk [vmem:[%s3800_s4 + $0xe0] sm:$0xf] %vm1550_vm1, %v2125_v28  ;;  %v1902_v45 = vsel %vm1615_vm2, %v1794_v3, 0.0  ;;  %v1707_v15 = vsel %vm1615_vm2, %v3431_v2, 0.0 }
 0x17e   :  { %v3639_v44 = vpop.f32.mrf.mxu1  ;;  %v1906_v28 = vsel %vm1615_vm2, %v1796_v32, 0.0  ;;  %v1725_v32 = vsel %vm1615_vm2, %v3603_v11, 0.0 }
 0x17f   :  { %v1694_v50 = vadd.f32 %v1693_v54, %v1692_v25  ;;  %v1889_v55 = vadd.f32 %v1888_v34, %v1887_v4  ;;  %v2126_v62 = vpack.c.bf16 %v3639_v44, %v3639_v44  ;;  %v1904_v4 = vsel %vm1615_vm2, %v1795_v31, 0.0 }
 0x180   :  { %v1268_v23 = vpop.f32.mrf.mxu1  ;;  %v1709_v34 = vsel %vm1615_vm2, %v3453_v58, 0.0  ;;  %v1797_v54 = vmul.f32 %v3481_v40, %v3481_v40 }
 0x181   :  { %v1891_v60 = vadd.f32 %v1890_v42, %v1889_v55  ;;  %v1696_v29 = vadd.f32 %v1695_v30, %v1694_v50  ;;  %1608 = vst.msk [vmem:[%s3800_s4 + $0xe4] sm:$0xf] %vm1550_vm1, %v2126_v62  ;;  %v1711_v42 = vsel %vm1615_vm2, %v3481_v40, 0.0  ;;  %v1798_v30 = vmul.f32 %v3497_v27, %v3497_v27 }
 0x182   :  { %v3657_v18 = vpop.f32.mrf.mxu1  ;;  %v1715_v62 = vsel %vm1615_vm2, %v3513_v61, 0.0 }
 0x183   :  { %v1698_v21 = vadd.f32 %v1697_v48, %v1696_v29  ;;  %v1893_v17 = vadd.f32 %v1892_v37, %v1891_v60  ;;  %v2127_v59 = vpack.c.bf16 %v3657_v18, %v3657_v18  ;;  %v1908_v60 = vsel %vm1615_vm2, %v1797_v54, 0.0 }
 0x184   :  { %v1273_v51 = vpop.f32.mrf.mxu1  ;;  %v1713_v29 = vsel %vm1615_vm2, %v3497_v27, 0.0  ;;  %v1799_v37 = vmul.f32 %v3513_v61, %v3513_v61 }
 0x185   :  { %v1700_v0 = vadd.f32 %v1699_v16, %v1698_v21  ;;  %v1895_v10 = vadd.f32 %v1894_v1, %v1893_v17  ;;  %1609 = vst.msk [vmem:[%s3800_s4 + $0xe8] sm:$0xf] %vm1550_vm1, %v2127_v59  ;;  %v1910_v17 = vsel %vm1615_vm2, %v1798_v30, 0.0  ;;  %v1800_v1 = vmul.f32 %v3529_v35, %v3529_v35 }
 0x186   :  { %v3675_v13 = vpop.f32.mrf.mxu1  ;;  %v1912_v23 = vsel %vm1615_vm2, %v1799_v37, 0.0  ;;  %v1802_v59 = vmul.f32 %v3567_v43, %v3567_v43  ;;  %v1721_v51 = vsel %vm1615_vm2, %v3567_v43, 0.0 }
 0x187   :  { %v1702_v56 = vadd.f32 %v1701_v12, %v1700_v0  ;;  %v1897_v39 = vadd.f32 %v1896_v49, %v1895_v10  ;;  %v2128_v22 = vpack.c.bf16 %v3675_v13, %v3675_v13  ;;  %v1717_v0 = vsel %vm1615_vm2, %v3529_v35, 0.0 }
 0x188   :  { %v1276_v24 = vpop.f32.mrf.mxu1  ;;  %v1801_v10 = vmul.f32 %v3545_v53, %v3545_v53  ;;  %v1918_v31 = vsel %vm1615_vm2, %v1802_v59, 0.0 }
 0x189   :  { %v1704_v41 = vadd.f32 %v1703_v7, %v1702_v56  ;;  %v1899_v26 = vadd.f32 %v1898_v9, %v1897_v39  ;;  %1610 = vst.msk [vmem:[%s3800_s4 + $0xec] sm:$0xf] %vm1550_vm1, %v2128_v22  ;;  %v1914_v56 = vsel %vm1615_vm2, %v1800_v1, 0.0  ;;  %v1719_v39 = vsel %vm1615_vm2, %v3545_v53, 0.0 }
 0x18a   :  { %v3693_v2 = vpop.f32.mrf.mxu1  ;;  %v1916_v35 = vsel %vm1615_vm2, %v1801_v10, 0.0  ;;  %v1805_v24 = vmul.f32 %v3621_v20, %v3621_v20 }
 0x18b   :  { %v1706_v33 = vadd.f32 %v1705_v57, %v1704_v41  ;;  %v1901_v63 = vadd.f32 %v1900_v14, %v1899_v26  ;;  %v2129_v55 = vpack.c.bf16 %v3693_v2, %v3693_v2  ;;  %v1803_v41 = vmul.f32 %v3585_v52, %v3585_v52 }
 0x18c   :  { %v1281_v36 = vpop.f32.mrf.mxu1 }
 0x18d   :  { %v1708_v8 = vadd.f32 %v1707_v15, %v1706_v33  ;;  %v1903_v25 = vadd.f32 %v1902_v45, %v1901_v63  ;;  %1611 = vst.msk [vmem:[%s3800_s4 + $0xf0] sm:$0xf] %vm1550_vm1, %v2129_v55  ;;  %v1723_v33 = vsel %vm1615_vm2, %v3585_v52, 0.0  ;;  %v1804_v63 = vmul.f32 %v3603_v11, %v3603_v11 }
 0x18e   :  { %v3711_v40 = vpop.f32.mrf.mxu1  ;;  %v1920_v43 = vsel %vm1615_vm2, %v1803_v41, 0.0  ;;  %v1729_v11 = vsel %vm1615_vm2, %v3639_v44, 0.0  ;;  %v1807_v55 = vmul.f32 %v3657_v18, %v3657_v18  ;;  %v1808_v36 = vmul.f32 %v3675_v13, %v3675_v13 }
 0x18f   :  { %v1710_v19 = vadd.f32 %v1709_v34, %v1708_v8  ;;  %v1905_v50 = vadd.f32 %v1904_v4, %v1903_v25  ;;  %v2130_v21 = vpack.c.bf16 %v3711_v40, %v3711_v40  ;;  %v1922_v25 = vsel %vm1615_vm2, %v1804_v63, 0.0 }
 0x190   :  { %v1284_v16 = vpop.f32.mrf.mxu1  ;;  %v1727_v4 = vsel %vm1615_vm2, %v3621_v20, 0.0  ;;  %v1806_v34 = vmul.f32 %v3639_v44, %v3639_v44  ;;  %v1731_v20 = vsel %vm1615_vm2, %v3657_v18, 0.0  ;;  %v1733_v44 = vsel %vm1615_vm2, %v3675_v13, 0.0 }
 0x191   :  { %v1712_v58 = vadd.f32 %v1711_v42, %v1710_v19  ;;  %v1907_v47 = vadd.f32 %v1906_v28, %v1905_v50  ;;  %1612 = vst.msk [vmem:[%s3800_s4 + $0xf4] sm:$0xf] %vm1550_vm1, %v2130_v21  ;;  %v1924_v50 = vsel %vm1615_vm2, %v1805_v24, 0.0  ;;  %v1735_v18 = vsel %vm1615_vm2, %v3693_v2, 0.0 }
 0x192   :  { %v1287_v61 = vpop.f32.mrf.mxu1  ;;  %v1926_v30 = vsel %vm1615_vm2, %v1806_v34, 0.0  ;;  %v1810_v21 = vmul.f32 %v3711_v40, %v3711_v40  ;;  %v1737_v13 = vsel %vm1615_vm2, %v3711_v40, 0.0 }
 0x193   :  { %v1714_v48 = vadd.f32 %v1713_v29, %v1712_v58  ;;  %v1909_v38 = vadd.f32 %v1908_v60, %v1907_v47  ;;  %v2131_v46 = vpack.c.bf16 %v1287_v61, %v1287_v61  ;;  %v1928_v60 = vsel %vm1615_vm2, %v1807_v55, 0.0 }
 0x194   :  { %v1289_v9 = vpop.f32.mrf.mxu1  ;;  %v1809_v29 = vmul.f32 %v3693_v2, %v3693_v2  ;;  %v1811_v16 = vmul.f32 %v1287_v61, %v1287_v61 }
 0x195   :  { %v1911_v27 = vadd.f32 %v1910_v17, %v1909_v38  ;;  %v1716_v6 = vadd.f32 %v1715_v62, %v1714_v48  ;;  %1613 = vst.msk [vmem:[%s3800_s4 + $0xf8] sm:$0xf] %vm1550_vm1, %v2131_v46  ;;  %v1930_v38 = vsel %vm1615_vm2, %v1808_v36, 0.0 }
 0x196   :  { %v1290_v53 = vpop.f32.mrf.mxu1  ;;  %v1932_v1 = vsel %vm1615_vm2, %v1809_v29, 0.0 }
 0x197   :  { %v1913_v49 = vadd.f32 %v1912_v23, %v1911_v27  ;;  %v1718_v12 = vadd.f32 %v1717_v0, %v1716_v6  ;;  %v2132_v57 = vpack.c.bf16 %v1290_v53, %v1290_v53  ;;  %v1934_v23 = vsel %vm1615_vm2, %v1810_v21, 0.0 }
 0x198   :  { %v1292_v22 = vpop.f32.mrf.mxu1  ;;  %v1739_v0 = vsel %vm1615_vm2, %v1287_v61, 0.0  ;;  %v1812_v10 = vmul.f32 %v1290_v53, %v1290_v53  ;;  %v1741_v46 = vsel %vm1615_vm2, %v1290_v53, 0.0 }
 0x199   :  { %v1915_v7 = vadd.f32 %v1914_v56, %v1913_v49  ;;  %v1720_v3 = vadd.f32 %v1719_v39, %v1718_v12  ;;  %1614 = vst.msk [vmem:[%s3800_s4 + $0xfc] sm:$0xf] %vm1550_vm1, %v2132_v57  ;;  %v1936_v12 = vsel %vm1615_vm2, %v1811_v16, 0.0 }
 0x19a   :  { %v1938_v59 = vsel %vm1615_vm2, %v1812_v10, 0.0 }
 0x19b   :  { %v1917_v26 = vadd.f32 %v1916_v35, %v1915_v7  ;;  %v1722_v14 = vadd.f32 %v1721_v51, %v1720_v3 }
 0x19d   :  { %v1919_v45 = vadd.f32 %v1918_v31, %v1917_v26  ;;  %v1724_v15 = vadd.f32 %v1723_v33, %v1722_v14 }
 0x19f   :  { %v1921_v52 = vadd.f32 %v1920_v43, %v1919_v45  ;;  %v1726_v8 = vadd.f32 %v1725_v32, %v1724_v15 }
 0x1a1   :  { %v1923_v54 = vadd.f32 %v1922_v25, %v1921_v52  ;;  %v1728_v19 = vadd.f32 %v1727_v4, %v1726_v8 }
 0x1a3   :  { %v1925_v28 = vadd.f32 %v1924_v50, %v1923_v54  ;;  %v1730_v42 = vadd.f32 %v1729_v11, %v1728_v19 }
 0x1a5   :  { %v1927_v58 = vadd.f32 %v1926_v30, %v1925_v28  ;;  %v1732_v47 = vadd.f32 %v1731_v20, %v1730_v42 }
 0x1a7   :  { %v1929_v37 = vadd.f32 %v1928_v60, %v1927_v58  ;;  %v1734_v48 = vadd.f32 %v1733_v44, %v1732_v47 }
 0x1a9   :  { %v1931_v17 = vadd.f32 %v1930_v38, %v1929_v37  ;;  %v1736_v62 = vadd.f32 %v1735_v18, %v1734_v48 }
 0x1ab   :  { %v1933_v27 = vadd.f32 %v1932_v1, %v1931_v17  ;;  %v1738_v6 = vadd.f32 %v1737_v13, %v1736_v62 }
 0x1ad   :  { %v1935_v49 = vadd.f32 %v1934_v23, %v1933_v27  ;;  %v1740_v2 = vadd.f32 %v1739_v0, %v1738_v6 }
 0x1af   :  { %v1937_v56 = vadd.f32 %v1936_v12, %v1935_v49  ;;  %v1742_v39 = vadd.f32 %v1741_v46, %v1740_v2 }
 0x1b1   :  { %v1743_v9 = vrot.slane %v1742_v39, 4  ;;  %v1939_v40 = vadd.f32 %v1938_v59, %v1937_v56 }
 0x1b3   :  { %v1744_v7 = vadd.f32 %v1743_v9, %v1742_v39  ;;  %v1940_v3 = vrot.slane %v1939_v40, 4 }
 0x1b5   :  { %v1745_v35 = vrot.slane %v1744_v7, 2  ;;  %v1941_v51 = vadd.f32 %v1940_v3, %v1939_v40 }
 0x1b7   :  { %v1746_v41 = vadd.f32 %v1745_v35, %v1744_v7  ;;  %v1942_v26 = vrot.slane %v1941_v51, 2 }
 0x1b9   :  { %v1943_v61 = vadd.f32 %v1942_v26, %v1941_v51  ;;  %v1747_v14 = vrot.slane %v1746_v41, 1 }
 0x1bb   :  { %v1944_v57 = vrot.slane %v1943_v61, 1  ;;  %v1748_v53 = vadd.f32 %v1747_v14, %v1746_v41 }
 0x1bd   :  { %v1945_v31 = vadd.f32 %v1944_v57, %v1943_v61 }
 0x1bf   :  { %v1950_v33 = vsel %vm1949_vm3, %v1945_v31, 0.0 }
 0x1c0   :  { %v1951_v63 = vsel %vm1948_vm4, %v1748_v53, %v1950_v33 }
 0x1c1   :  { %1952 = vst.msk [vmem:[%s3801_s5] sm:$0xff] %vm1615_vm2, %v1951_v63 }

// kernel: _lambda_.5
= control target key start
LH: loop header
LB: loop body
LE: loop exit
PB: predicated region body
PF: predicated region fallthrough
CT: control target
= control target key end

     0   :  { %s5367_s18 = smov 0   ;;  %s9913_s0 = inlined_call_operand.vmem [shape: bf16[2,16,16,192], index: 0, kind: input, shape index: {}]   ;;  %s9914_s1 = inlined_call_operand.vmem [shape: f32[3,3,192], index: 1, kind: input, shape index: {}]   ;;  %s9915_s2 = inlined_call_operand.vmem [shape: f32[1,192], index: 2, kind: input, shape index: {}]   ;;  %s9916_s3 = inlined_call_operand.vmem [shape: f32[1,192], index: 3, kind: input, shape index: {}]   ;;  %s9917_s4 = inlined_call_operand.vmem [shape: bf16[2,16,16,192], index: 4, kind: output, shape index: {0}]   ;;  %s9918_s5 = inlined_call_operand.vmem [shape: f32[16,192], index: 5, kind: output, shape index: {1}]  }
   0x1 LB: > { %s5223_s19 = sadd.s32 4294967295, %s5334_s18   ;;  %p5227_p0 = scmp.ge.s32.totalorder %s5334_s18, 1  ;;  %s5334_s18 = sphi %s5367_s18, %s16_s18  }
   0x2   : > { %p190_p1 = scmp.lt.s32.totalorder %s5334_s18, 3 }
   0x4   : > { %p191_p2 = pnand %p5227_p0, %p190_p1 }
   0x6   : > { %194 = sbr.rel (%p191_p2) target bundleno = 839 (0x347), region = 36 }
   0xb   : > { %vm615_vm0 = vcmask 523264   ;;  %vm620_vm1 = vcmask 517120   ;;  %p5377_p3 = scmp.lt.s32.totalorder %s5223_s19, 1  ;;  %v336_v0 = vlaneseq  ;;  %v5336_v1 = vmov 0.0   ;;  %v334_v3 = vld [vmem:[%s9915_s2] sm:$0x3] }
   0xc   : > { %616 = vst.msk [vmem:[#allocation2 + $0x8] sm:$0xff] %vm615_vm0, %v5336_v1  ;;  %614 = vst [vmem:[#allocation2] sm:$0xff] %v5336_v1  ;;  %v410_v4 = vld [vmem:[%s9916_s3] sm:$0x3]  ;;  %vm983_vm2 = vcmask 523265   ;;  %vm788_vm3 = vcmask 1040384  }
   0xd   : > { %618 = vst.msk [vmem:[#allocation2 + $0x18] sm:$0xff] %vm615_vm0, %v5336_v1  ;;  %619 = vst [vmem:[#allocation2 + $0x20] sm:$0x3] %v5336_v1  ;;  %s10555_s19 = smov (!%p5377_p3, %s5223_s19), 1  ;;  %v5531_v2 = vshrl.u32 %v336_v0, 7  ;;  %vm988_vm4 = vcmask 516096  }
   0xe   : > { %622 = vst [vmem:[#allocation2 + $0x30] sm:$0xff] %v5336_v1  ;;  %623 = vst.msk [vmem:[#allocation2 + $0x38] sm:$0xff] %vm615_vm0, %v5336_v1  ;;  %s5268_s25 = sshll.u32 %s10555_s19, 8  ;;  %vm1548_vm5 = vcmask 1046528   ;;  %vm2047_vm6 = vcmask 1045504   ;;  %vm4814_vm7 = vcmask 1043456  }
   0xf   : > { %625 = vst.msk [vmem:[#allocation2 + $0x48] sm:$0xff] %vm615_vm0, %v5336_v1  ;;  %626 = vst [vmem:[#allocation2 + $0x50] sm:$0x3] %v5336_v1  ;;  %v5541_v5 = vsub.s32 1, %v5531_v2  ;;  %v5544_v6 = vsub.s32 0, %v5531_v2  ;;  %s5551_s28 = scalar_lea.vmem %s9913_s0, %s5268_s25  ;;  %v5554_v7 = vsub.s32 4, %v5531_v2  ;;  %s5981_s12 = scalar_lea.vmem %s9917_s4, %s5268_s25 }
  0x10   : > { %628 = vst [vmem:[#allocation2 + $0x60] sm:$0xff] %v5336_v1  ;;  %629 = vst.msk [vmem:[#allocation2 + $0x68] sm:$0xff] %vm615_vm0, %v5336_v1  ;;  %v5557_v8 = vsub.s32 5, %v5531_v2  ;;  %v5560_v9 = vsub.s32 2, %v5531_v2  ;;  %v5563_v10 = vsub.s32 6, %v5531_v2  ;;  %v238_v11 = vld [vmem:[%s5551_s28] sm:$0xff] }
  0x11   : > { %631 = vst.msk [vmem:[#allocation2 + $0x78] sm:$0xff] %vm615_vm0, %v5336_v1  ;;  %632 = vst [vmem:[#allocation2 + $0x80] sm:$0x3] %v5336_v1  ;;  %v5567_v12 = vrot.slane %v334_v3, %v5541_v5  ;;  %v5570_v13 = vrot.slane %v410_v4, %v5541_v5  ;;  %v5573_v14 = vrot.slane %v334_v3, %v5544_v6  ;;  %v239_v16 = vld [vmem:[%s5551_s28 + $0x8] sm:$0xff]  ;;  %v240_v17 = vld [vmem:[%s5551_s28 + $0x10] sm:$0xff]  ;;  %v271_v18 = vunpack.c.h.bf16 %v238_v11  ;;  %s5270_s13 = sshll.u32 %s10555_s19, 4 }
  0x12   : > { %634 = vst [vmem:[#allocation2 + $0x90] sm:$0xff] %v5336_v1  ;;  %635 = vst.msk [vmem:[#allocation2 + $0x98] sm:$0xff] %vm615_vm0, %v5336_v1  ;;  %v5576_v15 = vrot.slane %v410_v4, %v5544_v6  ;;  %v270_v19 = vunpack.c.l.bf16 %v238_v11  ;;  %v272_v20 = vunpack.c.l.bf16 %v239_v16  ;;  %v273_v21 = vunpack.c.h.bf16 %v239_v16  ;;  %v241_v22 = vld [vmem:[%s5551_s28 + $0x18] sm:$0xff]  ;;  %v242_v59 = vld [vmem:[%s5551_s28 + $0x20] sm:$0xff]  ;;  %s237_s16 = scalar_lea.vmem %s9918_s5, %s5270_s13 }
  0x13   : > { %637 = vst.msk [vmem:[#allocation2 + $0xa8] sm:$0xff] %vm615_vm0, %v5336_v1  ;;  %638 = vst [vmem:[#allocation2 + $0xb0] sm:$0x3] %v5336_v1  ;;  %v274_v23 = vunpack.c.l.bf16 %v240_v17  ;;  %v275_v24 = vunpack.c.h.bf16 %v240_v17  ;;  %v276_v25 = vunpack.c.l.bf16 %v241_v22  ;;  %v277_v26 = vunpack.c.h.bf16 %v241_v22  ;;  %v243_v0 = vld [vmem:[%s5551_s28 + $0x28] sm:$0xff]  ;;  %v244_v16 = vld [vmem:[%s5551_s28 + $0x30] sm:$0xff] }
  0x14   : > { %640 = vst [vmem:[#allocation2 + $0xc0] sm:$0xff] %v5336_v1  ;;  %641 = vst.msk [vmem:[#allocation2 + $0xc8] sm:$0xff] %vm615_vm0, %v5336_v1  ;;  %v347_v27 = vmul.f32 %v5567_v12, %v271_v18  ;;  %v346_v28 = vmul.f32 %v5573_v14, %v270_v19  ;;  %v348_v29 = vmul.f32 %v5573_v14, %v272_v20  ;;  %v278_v19 = vunpack.c.l.bf16 %v242_v59 }
  0x15   : > { %643 = vst.msk [vmem:[#allocation2 + $0xd8] sm:$0xff] %vm615_vm0, %v5336_v1  ;;  %644 = vst [vmem:[#allocation2 + $0xe0] sm:$0x3] %v5336_v1  ;;  %v349_v30 = vmul.f32 %v5567_v12, %v273_v21  ;;  %v350_v31 = vmul.f32 %v5573_v14, %v274_v23  ;;  %v351_v32 = vmul.f32 %v5567_v12, %v275_v24  ;;  %v279_v20 = vunpack.c.h.bf16 %v242_v59  ;;  %v245_v21 = vld [vmem:[%s5551_s28 + $0x38] sm:$0xff] }
  0x16   : > { %646 = vst [vmem:[#allocation2 + $0xf0] sm:$0xff] %v5336_v1  ;;  %647 = vst.msk [vmem:[#allocation2 + $0xf8] sm:$0xff] %vm615_vm0, %v5336_v1  ;;  %v352_v33 = vmul.f32 %v5573_v14, %v276_v25  ;;  %v353_v34 = vmul.f32 %v5567_v12, %v277_v26  ;;  %v423_v35 = vadd.f32 %v5570_v13, %v347_v27  ;;  %v280_v24 = vunpack.c.l.bf16 %v243_v0 }
  0x17   : > { %649 = vst.msk [vmem:[#allocation2 + $0x108] sm:$0xff] %vm615_vm0, %v5336_v1  ;;  %650 = vst [vmem:[#allocation2 + $0x110] sm:$0x3] %v5336_v1  ;;  %v422_v36 = vadd.f32 %v5576_v15, %v346_v28  ;;  %v424_v37 = vadd.f32 %v5576_v15, %v348_v29  ;;  %v425_v38 = vadd.f32 %v5570_v13, %v349_v30  ;;  %v281_v25 = vunpack.c.h.bf16 %v243_v0 }
  0x18   : > { %652 = vst [vmem:[#allocation2 + $0x120] sm:$0xff] %v5336_v1  ;;  %653 = vst.msk [vmem:[#allocation2 + $0x128] sm:$0xff] %vm615_vm0, %v5336_v1  ;;  %v426_v39 = vadd.f32 %v5576_v15, %v350_v31  ;;  %v427_v40 = vadd.f32 %v5570_v13, %v351_v32  ;;  %v428_v41 = vadd.f32 %v5576_v15, %v352_v33  ;;  %v487_v43 = vmax.f32 %v423_v35, 0.0 }
  0x19   : > { %655 = vst.msk [vmem:[#allocation2 + $0x138] sm:$0xff] %vm615_vm0, %v5336_v1  ;;  %656 = vst [vmem:[#allocation2 + $0x140] sm:$0x3] %v5336_v1  ;;  %v429_v42 = vadd.f32 %v5570_v13, %v353_v34  ;;  %v486_v44 = vmax.f32 %v422_v36, 0.0  ;;  %v488_v45 = vmax.f32 %v424_v37, 0.0  ;;  %v489_v46 = vmax.f32 %v425_v38, 0.0 }
  0x1a   : > { %658 = vst [vmem:[#allocation2 + $0x150] sm:$0xff] %v5336_v1  ;;  %659 = vst.msk [vmem:[#allocation2 + $0x158] sm:$0xff] %vm615_vm0, %v5336_v1  ;;  %v490_v47 = vmax.f32 %v426_v39, 0.0  ;;  %v491_v48 = vmax.f32 %v427_v40, 0.0  ;;  %v492_v49 = vmax.f32 %v428_v41, 0.0  ;;  %v551_v51 = vmin.f32 %v487_v43, 6.0 }
  0x1b   : > { %661 = vst.msk [vmem:[#allocation2 + $0x168] sm:$0xff] %vm615_vm0, %v5336_v1  ;;  %662 = vst [vmem:[#allocation2 + $0x170] sm:$0x3] %v5336_v1  ;;  %v493_v50 = vmax.f32 %v429_v42, 0.0  ;;  %v550_v52 = vmin.f32 %v486_v44, 6.0  ;;  %v552_v53 = vmin.f32 %v488_v45, 6.0  ;;  %v354_v26 = vmul.f32 %v5573_v14, %v278_v19 }
  0x1c   : > { %664 = vst [vmem:[#allocation2 + $0x180] sm:$0xff] %v5336_v1  ;;  %665 = vst.msk [vmem:[#allocation2 + $0x188] sm:$0xff] %vm615_vm0, %v5336_v1  ;;  %v553_v54 = vmin.f32 %v489_v46, 6.0  ;;  %v554_v55 = vmin.f32 %v490_v47, 6.0  ;;  %v555_v56 = vmin.f32 %v491_v48, 6.0  ;;  %v556_v57 = vmin.f32 %v492_v49, 6.0 }
  0x1d   : > { %667 = vst.msk [vmem:[#allocation2 + $0x198] sm:$0xff] %vm615_vm0, %v5336_v1  ;;  %668 = vst [vmem:[#allocation2 + $0x1a0] sm:$0x3] %v5336_v1  ;;  %v557_v58 = vmin.f32 %v493_v50, 6.0  ;;  %v790_v60 = vrot.slane %v551_v51, 7  ;;  %v789_v61 = vrot.slane %v550_v52, 7  ;;  %v355_v27 = vmul.f32 %v5567_v12, %v279_v20 }
  0x1e   : > { %670 = vst [vmem:[#allocation2 + $0x1b0] sm:$0xff] %v5336_v1  ;;  %671 = vst.msk [vmem:[#allocation2 + $0x1b8] sm:$0xff] %vm615_vm0, %v5336_v1  ;;  %v791_v62 = vrot.slane %v552_v53, 7  ;;  %v793_v63 = vrot.slane %v553_v54, 7  ;;  %v796_v3 = vrot.slane %v555_v56, 7  ;;  %v797_v4 = vrot.slane %v556_v57, 7 }
  0x1f   : > { %673 = vst.msk [vmem:[#allocation2 + $0x1c8] sm:$0xff] %vm615_vm0, %v5336_v1  ;;  %674 = vst [vmem:[#allocation2 + $0x1d0] sm:$0x3] %v5336_v1  ;;  %v799_v11 = vrot.slane %v557_v58, 7  ;;  %v282_v28 = vunpack.c.l.bf16 %v244_v16  ;;  %v283_v29 = vunpack.c.h.bf16 %v244_v16  ;;  %v356_v30 = vmul.f32 %v5573_v14, %v280_v24  ;;  %v246_v58 = vld [vmem:[%s5551_s28 + $0x40] sm:$0xff]  ;;  %v248_v20 = vld [vmem:[%s5551_s28 + $0x50] sm:$0xff] }
  0x20   : > { %676 = vst [vmem:[#allocation2 + $0x1e0] sm:$0xff] %v5336_v1  ;;  %677 = vst.msk [vmem:[#allocation2 + $0x1e8] sm:$0xff] %vm615_vm0, %v5336_v1  ;;  %v5602_v17 = vsel %vm788_vm3, %v789_v61, %v791_v62  ;;  %v794_v18 = vsel %vm788_vm3, %v790_v60, %v793_v63  ;;  %v357_v31 = vmul.f32 %v5567_v12, %v281_v25  ;;  %v284_v32 = vunpack.c.l.bf16 %v245_v21 }
  0x21   : > { %679 = vst.msk [vmem:[#allocation2 + $0x1f8] sm:$0xff] %vm615_vm0, %v5336_v1  ;;  %680 = vst [vmem:[#allocation2 + $0x200] sm:$0x3] %v5336_v1  ;;  %v800_v23 = vsel %vm788_vm3, %v796_v3, %v799_v11  ;;  %v285_v33 = vunpack.c.h.bf16 %v245_v21  ;;  %v430_v34 = vadd.f32 %v5576_v15, %v354_v26  ;;  %v431_v35 = vadd.f32 %v5570_v13, %v355_v27 }
  0x22   : > { %682 = vst [vmem:[#allocation2 + $0x210] sm:$0xff] %v5336_v1  ;;  %683 = vst.msk [vmem:[#allocation2 + $0x218] sm:$0xff] %vm615_vm0, %v5336_v1  ;;  %v358_v36 = vmul.f32 %v5573_v14, %v282_v28  ;;  %v359_v37 = vmul.f32 %v5567_v12, %v283_v29  ;;  %v432_v38 = vadd.f32 %v5576_v15, %v356_v30  ;;  %v287_v19 = vunpack.c.h.bf16 %v246_v58  ;;  %v249_v30 = vld [vmem:[%s5551_s28 + $0x58] sm:$0xff] }
  0x23   : > { %685 = vst.msk [vmem:[#allocation2 + $0x228] sm:$0xff] %vm615_vm0, %v5336_v1  ;;  %686 = vst [vmem:[#allocation2 + $0x230] sm:$0x3] %v5336_v1  ;;  %v433_v39 = vadd.f32 %v5570_v13, %v357_v31  ;;  %v360_v40 = vmul.f32 %v5573_v14, %v284_v32  ;;  %v361_v41 = vmul.f32 %v5567_v12, %v285_v33  ;;  %v494_v42 = vmax.f32 %v430_v34, 0.0 }
  0x24   : > { %688 = vst [vmem:[#allocation2 + $0x240] sm:$0xff] %v5336_v1  ;;  %689 = vst.msk [vmem:[#allocation2 + $0x248] sm:$0xff] %vm615_vm0, %v5336_v1  ;;  %v495_v43 = vmax.f32 %v431_v35, 0.0  ;;  %v434_v44 = vadd.f32 %v5576_v15, %v358_v36  ;;  %v435_v45 = vadd.f32 %v5570_v13, %v359_v37  ;;  %v496_v46 = vmax.f32 %v432_v38, 0.0 }
  0x25   : > { %691 = vst.msk [vmem:[#allocation2 + $0x258] sm:$0xff] %vm615_vm0, %v5336_v1  ;;  %692 = vst [vmem:[#allocation2 + $0x260] sm:$0x3] %v5336_v1  ;;  %v497_v47 = vmax.f32 %v433_v39, 0.0  ;;  %v436_v48 = vadd.f32 %v5576_v15, %v360_v40  ;;  %v437_v49 = vadd.f32 %v5570_v13, %v361_v41  ;;  %v558_v50 = vmin.f32 %v494_v42, 6.0 }
  0x26   : > { %694 = vst [vmem:[#allocation2 + $0x270] sm:$0xff] %v5336_v1  ;;  %695 = vst.msk [vmem:[#allocation2 + $0x278] sm:$0xff] %vm615_vm0, %v5336_v1  ;;  %v559_v51 = vmin.f32 %v495_v43, 6.0  ;;  %v498_v52 = vmax.f32 %v434_v44, 0.0  ;;  %v499_v53 = vmax.f32 %v435_v45, 0.0  ;;  %v560_v54 = vmin.f32 %v496_v46, 6.0 }
  0x27   : > { %697 = vst.msk [vmem:[#allocation2 + $0x288] sm:$0xff] %vm615_vm0, %v5336_v1  ;;  %698 = vst [vmem:[#allocation2 + $0x290] sm:$0x3] %v5336_v1  ;;  %v500_v56 = vmax.f32 %v436_v48, 0.0  ;;  %v501_v57 = vmax.f32 %v437_v49, 0.0  ;;  %v801_v59 = vrot.slane %v558_v50, 7  ;;  %v363_v27 = vmul.f32 %v5567_v12, %v287_v19 }
  0x28   : > { %700 = vst [vmem:[#allocation2 + $0x2a0] sm:$0xff] %v5336_v1  ;;  %701 = vst.msk [vmem:[#allocation2 + $0x2a8] sm:$0xff] %vm615_vm0, %v5336_v1  ;;  %v290_v33 = vunpack.c.l.bf16 %v248_v20  ;;  %v291_v34 = vunpack.c.h.bf16 %v248_v20  ;;  %v292_v41 = vunpack.c.l.bf16 %v249_v30  ;;  %v293_v42 = vunpack.c.h.bf16 %v249_v30  ;;  %v251_v20 = vld [vmem:[%s5551_s28 + $0x68] sm:$0xff] }
  0x29   : > { %703 = vst.msk [vmem:[#allocation2 + $0x2b8] sm:$0xff] %vm615_vm0, %v5336_v1  ;;  %704 = vst [vmem:[#allocation2 + $0x2c0] sm:$0x3] %v5336_v1  ;;  %v439_v36 = vadd.f32 %v5570_v13, %v363_v27  ;;  %v252_v27 = vld [vmem:[%s5551_s28 + $0x70] sm:$0xff]  ;;  %vm4815_vm8 = vcmask 523268  }
  0x2a   : > { %706 = vst [vmem:[#allocation2 + $0x2d0] sm:$0xff] %v5336_v1  ;;  %707 = vst.msk [vmem:[#allocation2 + $0x2d8] sm:$0xff] %vm615_vm0, %v5336_v1  ;;  %v366_v39 = vmul.f32 %v5573_v14, %v290_v33  ;;  %v367_v40 = vmul.f32 %v5567_v12, %v291_v34  ;;  %v368_v49 = vmul.f32 %v5573_v14, %v292_v41  ;;  %v296_v34 = vunpack.c.l.bf16 %v251_v20 }
  0x2b   : > { %709 = vst.msk [vmem:[#allocation2 + $0x2e8] sm:$0xff] %vm615_vm0, %v5336_v1  ;;  %710 = vst [vmem:[#allocation2 + $0x2f0] sm:$0x3] %v5336_v1  ;;  %v503_v44 = vmax.f32 %v439_v36, 0.0  ;;  %v369_v50 = vmul.f32 %v5567_v12, %v293_v42 }
  0x2c   : > { %712 = vst [vmem:[#allocation2 + $0x300] sm:$0xff] %v5336_v1  ;;  %713 = vst.msk [vmem:[#allocation2 + $0x308] sm:$0xff] %vm615_vm0, %v5336_v1  ;;  %v443_v48 = vadd.f32 %v5570_v13, %v367_v40  ;;  %v253_v40 = vld [vmem:[%s5551_s28 + $0x78] sm:$0xff] }
  0x2d   : > { %715 = vst.msk [vmem:[#allocation2 + $0x318] sm:$0xff] %vm615_vm0, %v5336_v1  ;;  %716 = vst [vmem:[#allocation2 + $0x320] sm:$0x3] %v5336_v1 }
  0x2e   : > { %719 = vst.msk [vmem:[#allocation2 + $0x338] sm:$0xff] %vm615_vm0, %v5336_v1  ;;  %721 = vst.msk [vmem:[#allocation2 + $0x348] sm:$0xff] %vm615_vm0, %v5336_v1 }
  0x2f   : > { %722 = vst [vmem:[#allocation2 + $0x350] sm:$0x3] %v5336_v1  ;;  %621 = vst.msk [vmem:[#allocation2 + $0x28] sm:$0x3] %vm620_vm1, %v5336_v1 }
  0x30   : > { %627 = vst.msk [vmem:[#allocation2 + $0x58] sm:$0x3] %vm620_vm1, %v5336_v1  ;;  %633 = vst.msk [vmem:[#allocation2 + $0x88] sm:$0x3] %vm620_vm1, %v5336_v1 }
  0x31   : > { %639 = vst.msk [vmem:[#allocation2 + $0xb8] sm:$0x3] %vm620_vm1, %v5336_v1  ;;  %645 = vst.msk [vmem:[#allocation2 + $0xe8] sm:$0x3] %vm620_vm1, %v5336_v1 }
  0x32   : > { %651 = vst.msk [vmem:[#allocation2 + $0x118] sm:$0x3] %vm620_vm1, %v5336_v1  ;;  %657 = vst.msk [vmem:[#allocation2 + $0x148] sm:$0x3] %vm620_vm1, %v5336_v1 }
  0x33   : > { %663 = vst.msk [vmem:[#allocation2 + $0x178] sm:$0x3] %vm620_vm1, %v5336_v1  ;;  %669 = vst.msk [vmem:[#allocation2 + $0x1a8] sm:$0x3] %vm620_vm1, %v5336_v1 }
  0x34   : > { %675 = vst.msk [vmem:[#allocation2 + $0x1d8] sm:$0x3] %vm620_vm1, %v5336_v1  ;;  %681 = vst.msk [vmem:[#allocation2 + $0x208] sm:$0x3] %vm620_vm1, %v5336_v1 }
  0x35   : > { %687 = vst.msk [vmem:[#allocation2 + $0x238] sm:$0x3] %vm620_vm1, %v5336_v1  ;;  %693 = vst.msk [vmem:[#allocation2 + $0x268] sm:$0x3] %vm620_vm1, %v5336_v1 }
  0x36   : > { %699 = vst.msk [vmem:[#allocation2 + $0x298] sm:$0x3] %vm620_vm1, %v5336_v1  ;;  %705 = vst.msk [vmem:[#allocation2 + $0x2c8] sm:$0x3] %vm620_vm1, %v5336_v1 }
  0x37   : > { %711 = vst.msk [vmem:[#allocation2 + $0x2f8] sm:$0x3] %vm620_vm1, %v5336_v1  ;;  %717 = vst.msk [vmem:[#allocation2 + $0x328] sm:$0x3] %vm620_vm1, %v5336_v1 }
  0x38   : > { %723 = vst.msk [vmem:[#allocation2 + $0x358] sm:$0x3] %vm620_vm1, %v5336_v1  ;;  %10228 = vst [vmem:[#allocation3_spill] sm:$0xff] %v5531_v2  ;;  %v795_v1 = vrot.slane %v554_v55, 7  ;;  %v561_v55 = vmin.f32 %v497_v47, 6.0  ;;  %v442_v47 = vadd.f32 %v5576_v15, %v366_v39  ;;  %v299_v39 = vunpack.c.h.bf16 %v252_v27 }
  0x39   : > { %10229 = vst [vmem:[#allocation4_spill] sm:$0xff] %v5567_v12  ;;  %10230 = vst [vmem:[#allocation5_spill] sm:$0xff] %v5570_v13 }
  0x3a   : > { %10231 = vst [vmem:[#allocation6_spill] sm:$0xff] %v5573_v14  ;;  %10232 = vst [vmem:[#allocation7_spill] sm:$0xff] %v5576_v15  ;;  %v5611_v22 = vsel %vm788_vm3, %v795_v1, %v797_v4  ;;  %v805_v0 = vrot.slane %v561_v55, 7  ;;  %v506_v55 = vmax.f32 %v442_v47, 0.0 }
  0x3b   : > { %984 = vst.msk [vmem:[#allocation2 + $0x38] sm:$0xfe] %vm983_vm2, %v790_v60  ;;  %982 = vst [vmem:[#allocation2 + $0x30] sm:$0xfe] %v789_v61  ;;  %v802_v60 = vrot.slane %v559_v51, 7  ;;  %v562_v61 = vmin.f32 %v498_v52, 6.0 }
  0x3c   : > { %987 = vst [vmem:[#allocation2 + $0x50] sm:$0x1] %v791_v62  ;;  %989 = vst.msk [vmem:[#allocation2 + $0x58] sm:$0x1] %vm988_vm4, %v793_v63  ;;  %v563_v62 = vmin.f32 %v499_v53, 6.0  ;;  %v803_v63 = vrot.slane %v560_v54, 7 }
  0x3d   : > { %985 = vst [vmem:[#allocation2 + $0x40] sm:$0xff] %v5602_v17  ;;  %986 = vst.msk [vmem:[#allocation2 + $0x48] sm:$0xff] %vm615_vm0, %v794_v18  ;;  %v286_v18 = vunpack.c.l.bf16 %v246_v58  ;;  %v567_v52 = vmin.f32 %v503_v44, 6.0  ;;  %v445_v58 = vadd.f32 %v5570_v13, %v369_v50 }
  0x3e   : > { %990 = vst [vmem:[#allocation2 + $0x60] sm:$0xfe] %v795_v1  ;;  %991 = vst.msk [vmem:[#allocation2 + $0x68] sm:$0xfe] %vm983_vm2, %v796_v3  ;;  %v564_v1 = vmin.f32 %v500_v56, 6.0  ;;  %v565_v3 = vmin.f32 %v501_v57, 6.0  ;;  %v5638_v21 = vsel %vm788_vm3, %v801_v59, %v803_v63  ;;  %v444_v57 = vadd.f32 %v5576_v15, %v368_v49 }
  0x3f   : > { %994 = vst [vmem:[#allocation2 + $0x80] sm:$0x1] %v797_v4  ;;  %995 = vst.msk [vmem:[#allocation2 + $0x88] sm:$0x1] %vm988_vm4, %v799_v11  ;;  %v247_v4 = vld [vmem:[%s5551_s28 + $0x48] sm:$0xff]  ;;  %v807_v11 = vrot.slane %v562_v61, 7  ;;  %v362_v26 = vmul.f32 %v5573_v14, %v286_v18 }
  0x40   : > { %992 = vst [vmem:[#allocation2 + $0x70] sm:$0xff] %v5611_v22  ;;  %993 = vst.msk [vmem:[#allocation2 + $0x78] sm:$0xff] %vm615_vm0, %v800_v23  ;;  %v808_v16 = vrot.slane %v563_v62, 7  ;;  %v806_v23 = vsel %vm788_vm3, %v802_v60, %v805_v0  ;;  %v809_v24 = vrot.slane %v564_v1, 7  ;;  %v811_v25 = vrot.slane %v565_v3, 7 }
  0x41   : > { %996 = vst [vmem:[#allocation2 + $0x90] sm:$0xfe] %v801_v59  ;;  %997 = vst.msk [vmem:[#allocation2 + $0x98] sm:$0xfe] %vm983_vm2, %v802_v60  ;;  %v288_v28 = vunpack.c.l.bf16 %v247_v4  ;;  %v289_v29 = vunpack.c.h.bf16 %v247_v4  ;;  %v438_v35 = vadd.f32 %v5576_v15, %v362_v26  ;;  %v507_v56 = vmax.f32 %v443_v48, 0.0  ;;  %v250_v59 = vld [vmem:[%s5551_s28 + $0x60] sm:$0xff] }
  0x42   : > { %10233 = vst [vmem:[#allocation8_spill] sm:$0xff] %v5638_v21  ;;  %1000 = vst [vmem:[#allocation2 + $0xb0] sm:$0x1] %v803_v63  ;;  %v810_v31 = vsel %vm788_vm3, %v807_v11, %v809_v24  ;;  %v812_v32 = vsel %vm788_vm3, %v808_v16, %v811_v25  ;;  %v814_v61 = vrot.slane %v567_v52, 7  ;;  %v508_v3 = vmax.f32 %v444_v57, 0.0 }
  0x43   : > { %1001 = vst.msk [vmem:[#allocation2 + $0xb8] sm:$0x1] %vm988_vm4, %v805_v0  ;;  %998 = vst [vmem:[#allocation2 + $0xa0] sm:$0xff] %v5638_v21  ;;  %v364_v37 = vmul.f32 %v5573_v14, %v288_v28  ;;  %v365_v38 = vmul.f32 %v5567_v12, %v289_v29  ;;  %v502_v43 = vmax.f32 %v438_v35, 0.0  ;;  %v570_v0 = vmin.f32 %v506_v55, 6.0 }
  0x44   : > { %999 = vst.msk [vmem:[#allocation2 + $0xa8] sm:$0xff] %vm615_vm0, %v806_v23  ;;  %1002 = vst [vmem:[#allocation2 + $0xc0] sm:$0xfe] %v807_v11  ;;  %v571_v1 = vmin.f32 %v507_v56, 6.0  ;;  %v509_v4 = vmax.f32 %v445_v58, 0.0  ;;  %v294_v18 = vunpack.c.l.bf16 %v250_v59  ;;  %v295_v19 = vunpack.c.h.bf16 %v250_v59 }
  0x45   : > { %1003 = vst.msk [vmem:[#allocation2 + $0xc8] sm:$0xfe] %vm983_vm2, %v808_v16  ;;  %1006 = vst [vmem:[#allocation2 + $0xe0] sm:$0x1] %v809_v24  ;;  %v440_v45 = vadd.f32 %v5576_v15, %v364_v37  ;;  %v441_v46 = vadd.f32 %v5570_v13, %v365_v38  ;;  %v566_v51 = vmin.f32 %v502_v43, 6.0  ;;  %v819_v23 = vrot.slane %v570_v0, 7 }
  0x46   : > { %1007 = vst.msk [vmem:[#allocation2 + $0xe8] sm:$0x1] %vm988_vm4, %v811_v25  ;;  %1004 = vst [vmem:[#allocation2 + $0xd0] sm:$0xff] %v810_v31  ;;  %v820_v24 = vrot.slane %v571_v1, 7  ;;  %v572_v25 = vmin.f32 %v508_v3, 6.0  ;;  %v573_v26 = vmin.f32 %v509_v4, 6.0  ;;  %v370_v30 = vmul.f32 %v5573_v14, %v294_v18 }
  0x47   : > { %1005 = vst.msk [vmem:[#allocation2 + $0xd8] sm:$0xff] %vm615_vm0, %v812_v32  ;;  %v504_v53 = vmax.f32 %v440_v45, 0.0  ;;  %v505_v54 = vmax.f32 %v441_v46, 0.0  ;;  %v813_v60 = vrot.slane %v566_v51, 7  ;;  %v371_v31 = vmul.f32 %v5567_v12, %v295_v19  ;;  %1014 = vst [vmem:[#allocation2 + $0x120] sm:$0xfe] %v819_v23 }
  0x48   : > { %1009 = vst.msk [vmem:[#allocation2 + $0xf8] sm:$0xfe] %vm983_vm2, %v814_v61  ;;  %1015 = vst.msk [vmem:[#allocation2 + $0x128] sm:$0xfe] %vm983_vm2, %v820_v24  ;;  %v821_v32 = vrot.slane %v572_v25, 7  ;;  %v823_v33 = vrot.slane %v573_v26, 7  ;;  %v297_v35 = vunpack.c.h.bf16 %v251_v20  ;;  %v446_v36 = vadd.f32 %v5576_v15, %v370_v30 }
  0x49   : > { %v568_v62 = vmin.f32 %v504_v53, 6.0  ;;  %v569_v63 = vmin.f32 %v505_v54, 6.0  ;;  %1008 = vst [vmem:[#allocation2 + $0xf0] sm:$0xfe] %v813_v60  ;;  %v447_v37 = vadd.f32 %v5570_v13, %v371_v31  ;;  %v298_v38 = vunpack.c.l.bf16 %v252_v27  ;;  %v254_v53 = vld [vmem:[%s5551_s28 + $0x80] sm:$0xff]  ;;  %vm5985_vm9 = vmor %vm4815_vm8, %vm4814_vm7 }
  0x4a   : > { %v822_v41 = vsel %vm788_vm3, %v819_v23, %v821_v32  ;;  %1018 = vst [vmem:[#allocation2 + $0x140] sm:$0x1] %v821_v32  ;;  %v824_v42 = vsel %vm788_vm3, %v820_v24, %v823_v33  ;;  %1019 = vst.msk [vmem:[#allocation2 + $0x148] sm:$0x1] %vm988_vm4, %v823_v33  ;;  %v372_v43 = vmul.f32 %v5573_v14, %v296_v34  ;;  %v510_v45 = vmax.f32 %v446_v36, 0.0  ;;  %v255_v32 = vld [vmem:[%s5551_s28 + $0x88] sm:$0xff] }
  0x4b   : > { %v815_v11 = vrot.slane %v568_v62, 7  ;;  %v817_v16 = vrot.slane %v569_v63, 7  ;;  %v373_v44 = vmul.f32 %v5567_v12, %v297_v35  ;;  %1016 = vst [vmem:[#allocation2 + $0x130] sm:$0xff] %v822_v41  ;;  %1017 = vst.msk [vmem:[#allocation2 + $0x138] sm:$0xff] %vm615_vm0, %v824_v42  ;;  %v511_v46 = vmax.f32 %v447_v37, 0.0 }
  0x4c   : > { %v374_v47 = vmul.f32 %v5573_v14, %v298_v38  ;;  %v375_v48 = vmul.f32 %v5567_v12, %v299_v39  ;;  %v448_v49 = vadd.f32 %v5576_v15, %v372_v43  ;;  %v300_v51 = vunpack.c.l.bf16 %v253_v40  ;;  %v1188_v41 = vld [vmem:[%s9914_s1] sm:$0x77] }
  0x4d   : > { %v816_v28 = vsel %vm788_vm3, %v813_v60, %v815_v11  ;;  %1012 = vst [vmem:[#allocation2 + $0x110] sm:$0x1] %v815_v11  ;;  %v818_v29 = vsel %vm788_vm3, %v814_v61, %v817_v16  ;;  %1013 = vst.msk [vmem:[#allocation2 + $0x118] sm:$0x1] %vm988_vm4, %v817_v16  ;;  %v449_v50 = vadd.f32 %v5570_v13, %v373_v44  ;;  %v301_v52 = vunpack.c.h.bf16 %v253_v40 }
  0x4e   : > { %1010 = vst [vmem:[#allocation2 + $0x100] sm:$0xff] %v816_v28  ;;  %1011 = vst.msk [vmem:[#allocation2 + $0x108] sm:$0xff] %vm615_vm0, %v818_v29  ;;  %v574_v54 = vmin.f32 %v510_v45, 6.0  ;;  %v575_v55 = vmin.f32 %v511_v46, 6.0  ;;  %v450_v56 = vadd.f32 %v5576_v15, %v374_v47  ;;  %v451_v57 = vadd.f32 %v5570_v13, %v375_v48 }
  0x4f   : > { %v512_v58 = vmax.f32 %v448_v49, 0.0  ;;  %v513_v59 = vmax.f32 %v449_v50, 0.0  ;;  %v376_v60 = vmul.f32 %v5573_v14, %v300_v51  ;;  %v377_v61 = vmul.f32 %v5567_v12, %v301_v52 }
  0x50   : > { %v825_v62 = vrot.slane %v574_v54, 7  ;;  %v826_v63 = vrot.slane %v575_v55, 7  ;;  %v514_v0 = vmax.f32 %v450_v56, 0.0  ;;  %v302_v1 = vunpack.c.l.bf16 %v254_v53 }
  0x51   : > { %v576_v3 = vmin.f32 %v512_v58, 6.0  ;;  %v577_v4 = vmin.f32 %v513_v59, 6.0  ;;  %v515_v11 = vmax.f32 %v451_v57, 0.0  ;;  %v452_v16 = vadd.f32 %v5576_v15, %v376_v60  ;;  %v1081_v58 = vld [vmem:[#allocation2 + $0x8] sm:$0xff] }
  0x52   : > { %1020 = vst [vmem:[#allocation2 + $0x150] sm:$0xfe] %v825_v62  ;;  %1021 = vst.msk [vmem:[#allocation2 + $0x158] sm:$0xfe] %vm983_vm2, %v826_v63  ;;  %v578_v18 = vmin.f32 %v514_v0, 6.0  ;;  %v453_v19 = vadd.f32 %v5570_v13, %v377_v61  ;;  %v303_v20 = vunpack.c.h.bf16 %v254_v53  ;;  %v378_v23 = vmul.f32 %v5573_v14, %v302_v1 }
  0x53   : > { %v827_v24 = vrot.slane %v576_v3, 7  ;;  %v829_v25 = vrot.slane %v577_v4, 7  ;;  %v579_v26 = vmin.f32 %v515_v11, 6.0  ;;  %v516_v27 = vmax.f32 %v452_v16, 0.0  ;;  %v5728_v59 = vld [vmem:[%s9914_s1 + $0x8] sm:$0x77] }
  0x54   : > { %v831_v28 = vrot.slane %v578_v18, 7  ;;  %v517_v29 = vmax.f32 %v453_v19, 0.0  ;;  %v454_v30 = vadd.f32 %v5576_v15, %v378_v23  ;;  %v379_v31 = vmul.f32 %v5567_v12, %v303_v20  ;;  %v5739_v16 = vld [vmem:[#allocation2 + $0x18] sm:$0xff] }
  0x55   : > { %v828_v33 = vsel %vm788_vm3, %v825_v62, %v827_v24  ;;  %1024 = vst [vmem:[#allocation2 + $0x170] sm:$0x1] %v827_v24  ;;  %v830_v34 = vsel %vm788_vm3, %v826_v63, %v829_v25  ;;  %1025 = vst.msk [vmem:[#allocation2 + $0x178] sm:$0x1] %vm988_vm4, %v829_v25  ;;  %v832_v35 = vrot.slane %v579_v26, 7  ;;  %v580_v36 = vmin.f32 %v516_v27, 6.0 }
  0x56   : > { %1022 = vst [vmem:[#allocation2 + $0x160] sm:$0xff] %v828_v33  ;;  %1023 = vst.msk [vmem:[#allocation2 + $0x168] sm:$0xff] %vm615_vm0, %v830_v34  ;;  %v581_v37 = vmin.f32 %v517_v29, 6.0  ;;  %v518_v38 = vmax.f32 %v454_v30, 0.0  ;;  %v455_v39 = vadd.f32 %v5570_v13, %v379_v31  ;;  %v304_v40 = vunpack.c.l.bf16 %v255_v32 }
  0x57   : > { %1026 = vst [vmem:[#allocation2 + $0x180] sm:$0xfe] %v831_v28  ;;  %1027 = vst.msk [vmem:[#allocation2 + $0x188] sm:$0xfe] %vm983_vm2, %v832_v35  ;;  %v833_v42 = vrot.slane %v580_v36, 7  ;;  %v305_v43 = vunpack.c.h.bf16 %v255_v32  ;;  %v1195_v44 = vrot.slane %v1188_v41, %v5544_v6  ;;  %v1199_v45 = vrot.slane %v1188_v41, %v5554_v7 }
  0x58   : > { %v835_v46 = vrot.slane %v581_v37, 7  ;;  %v582_v47 = vmin.f32 %v518_v38, 6.0  ;;  %v519_v48 = vmax.f32 %v455_v39, 0.0  ;;  %v380_v49 = vmul.f32 %v5573_v14, %v304_v40  ;;  %v5780_v40 = vld [vmem:[#allocation2 + $0x30] sm:$0xff] }
  0x59   : > { %v834_v50 = vsel %vm788_vm3, %v831_v28, %v833_v42  ;;  %1030 = vst [vmem:[#allocation2 + $0x1a0] sm:$0x1] %v833_v42  ;;  %v381_v51 = vmul.f32 %v5567_v12, %v305_v43  ;;  %v5717_v52 = vrot.slane %v1195_v44, %v5544_v6  ;;  %v5720_v53 = vrot.slane %v1199_v45, %v5544_v6  ;;  %v5786_v45 = vld [vmem:[#allocation2 + $0x38] sm:$0xff] }
  0x5a   : > { %1028 = vst [vmem:[#allocation2 + $0x190] sm:$0xff] %v834_v50  ;;  %v836_v54 = vsel %vm788_vm3, %v832_v35, %v835_v46  ;;  %1031 = vst.msk [vmem:[#allocation2 + $0x1a8] sm:$0x1] %vm988_vm4, %v835_v46  ;;  %v837_v55 = vrot.slane %v582_v47, 7  ;;  %v583_v56 = vmin.f32 %v519_v48, 6.0  ;;  %v456_v57 = vadd.f32 %v5576_v15, %v380_v49 }
  0x5b   : > { %1029 = vst.msk [vmem:[#allocation2 + $0x198] sm:$0xff] %vm615_vm0, %v836_v54  ;;  %v457_v60 = vadd.f32 %v5570_v13, %v381_v51  ;;  %v5733_v61 = vmul.f32 0.0, %v5717_v52  ;;  %v1211_v62 = vmul.f32 %v5720_v53, %v1081_v58  ;;  %v1341_v63 = vrot.slane %v1188_v41, %v5541_v5  ;;  %v5793_v48 = vld [vmem:[%s9914_s1 + $0x10] sm:$0x77] }
  0x5c   : > { %1032 = vst [vmem:[#allocation2 + $0x1b0] sm:$0xfe] %v837_v55  ;;  %v838_v0 = vrot.slane %v583_v56, 7  ;;  %v520_v1 = vmax.f32 %v456_v57, 0.0  ;;  %v1345_v3 = vrot.slane %v1188_v41, %v5557_v8  ;;  %v1840_v4 = vrot.slane %v1188_v41, %v5560_v9 }
  0x5d   : > { %v521_v11 = vmax.f32 %v457_v60, 0.0  ;;  %v5742_v18 = vrot.slane %v1341_v63, %v5541_v5  ;;  %v1844_v19 = vrot.slane %v1188_v41, %v5563_v10  ;;  %v2340_v20 = vrot.slane %v5728_v59, %v5544_v6 }
  0x5e   : > { %1033 = vst.msk [vmem:[#allocation2 + $0x1b8] sm:$0xfe] %vm983_vm2, %v838_v0  ;;  %v584_v23 = vmin.f32 %v520_v1, 6.0  ;;  %v5749_v24 = vrot.slane %v1345_v3, %v5541_v5  ;;  %v5752_v25 = vrot.slane %v1840_v4, %v5560_v9  ;;  %v2344_v26 = vrot.slane %v5728_v59, %v5554_v7 }
  0x5f   : > { %v585_v27 = vmin.f32 %v521_v11, 6.0  ;;  %v5757_v28 = vmul.f32 0.0, %v5742_v18  ;;  %v5760_v29 = vrot.slane %v1844_v19, %v5560_v9  ;;  %v5763_v30 = vrot.slane %v2340_v20, %v5544_v6 }
  0x60   : > { %10234 = vst [vmem:[#allocation9_spill] sm:$0xff] %v5749_v24  ;;  %v839_v31 = vrot.slane %v584_v23, 7  ;;  %v1357_v32 = vmul.f32 %v5749_v24, %v1081_v58  ;;  %v5768_v33 = vmul.f32 %v5749_v24, %v5739_v16  ;;  %v5771_v34 = vmul.f32 0.0, %v5752_v25 }
  0x61   : > { %10235 = vst [vmem:[#allocation10_spill] sm:$0xff] %v5763_v30  ;;  %v841_v35 = vrot.slane %v585_v27, 7  ;;  %v9926_v36 = vrot.slane %v5757_v28, 1  ;;  %v1856_v37 = vmul.f32 %v5760_v29, %v1081_v58  ;;  %v5777_v38 = vmul.f32 %v5760_v29, %v5739_v16 }
  0x62   : > { %v840_v39 = vsel %vm788_vm3, %v837_v55, %v839_v31  ;;  %1036 = vst [vmem:[#allocation2 + $0x1d0] sm:$0x1] %v839_v31  ;;  %v1552_v41 = vrot.slane %v1357_v32, 1  ;;  %v9925_v42 = vrot.slane %v5768_v33, 1  ;;  %v9924_v43 = vrot.slane %v5771_v34, 2 }
  0x63   : > { %1034 = vst [vmem:[#allocation2 + $0x1c0] sm:$0xff] %v840_v39  ;;  %v842_v44 = vsel %vm788_vm3, %v838_v0, %v841_v35  ;;  %1037 = vst.msk [vmem:[#allocation2 + $0x1d8] sm:$0x1] %vm988_vm4, %v841_v35  ;;  %v2051_v46 = vrot.slane %v1856_v37, 2  ;;  %v9923_v47 = vrot.slane %v5777_v38, 2  ;;  %v1773_v50 = vadd.f32 %v9926_v36, %v5733_v61  ;;  %v5819_v0 = vld [vmem:[#allocation2 + $0x48] sm:$0xff] }
  0x64   : > { %1035 = vst.msk [vmem:[#allocation2 + $0x1c8] sm:$0xff] %vm615_vm0, %v842_v44  ;;  %v1554_v49 = vsel %vm1548_vm5, %v1552_v41, %v9925_v42  ;;  %v5802_v51 = vrot.slane %v2344_v26, %v5544_v6  ;;  %v2355_v56 = vmul.f32 %v5763_v30, %v5780_v40  ;;  %v2486_v57 = vrot.slane %v5728_v59, %v5541_v5 }
  0x65   : > { %v1774_v54 = vadd.f32 %v1554_v49, %v1211_v62  ;;  %v2053_v55 = vsel %vm2047_vm6, %v2051_v46, %v9923_v47  ;;  %v2272_v58 = vadd.f32 %v9924_v43, %v1773_v50  ;;  %v2490_v63 = vrot.slane %v5728_v59, %v5557_v8 }
  0x66   : > { %v2356_v60 = vmul.f32 %v5802_v51, %v5786_v45  ;;  %v2984_v62 = vrot.slane %v5728_v59, %v5560_v9  ;;  %v5822_v3 = vrot.slane %v2486_v57, %v5541_v5  ;;  %v2988_v4 = vrot.slane %v5728_v59, %v5563_v10 }
  0x67   : > { %v2273_v1 = vadd.f32 %v2053_v55, %v1774_v54  ;;  %v3483_v11 = vrot.slane %v5793_v48, %v5544_v6  ;;  %v2419_v19 = vadd.f32 %v2355_v56, %v2272_v58  ;;  %v5829_v20 = vrot.slane %v2490_v63, %v5541_v5 }
  0x68   : > { %v5832_v23 = vrot.slane %v2984_v62, %v5560_v9  ;;  %v3487_v26 = vrot.slane %v5793_v48, %v5554_v7  ;;  %v2501_v31 = vmul.f32 %v5822_v3, %v5780_v40  ;;  %v5840_v59 = vmul.f32 %v5822_v3, %v5602_v17  ;;  %v5873_v62 = vld [vmem:[#allocation2 + $0x60] sm:$0xff] }
  0x69   : > { %v2420_v27 = vadd.f32 %v2356_v60, %v2273_v1  ;;  %v5843_v32 = vrot.slane %v2988_v4, %v5560_v9  ;;  %v2502_v35 = vmul.f32 %v5829_v20, %v5786_v45  ;;  %v5849_v37 = vmul.f32 %v5829_v20, %v5819_v0  ;;  %10236 = vst [vmem:[#allocation11_spill] sm:$0xff] %v5873_v62 }
  0x6a   : > { %v2999_v7 = vmul.f32 %v5832_v23, %v5780_v40  ;;  %v5855_v39 = vmul.f32 %v5832_v23, %v5602_v17  ;;  %v2693_v41 = vrot.slane %v2501_v31, 1  ;;  %v9922_v44 = vrot.slane %v5840_v59, 1 }
  0x6b   : > { %v3000_v46 = vmul.f32 %v5843_v32, %v5786_v45  ;;  %v5862_v49 = vmul.f32 %v5843_v32, %v5819_v0  ;;  %v2696_v50 = vrot.slane %v2502_v35, 1  ;;  %v9921_v54 = vrot.slane %v5849_v37, 1 }
  0x6c   : > { %v3191_v55 = vrot.slane %v2999_v7, 2  ;;  %v9920_v56 = vrot.slane %v5855_v39, 2  ;;  %v2695_v57 = vsel %vm1548_vm5, %v2693_v41, %v9922_v44  ;;  %v5871_v63 = vrot.slane %v3483_v11, %v5544_v6  ;;  %v5884_v7 = vld [vmem:[#allocation2 + $0x68] sm:$0xff] }
  0x6d   : > { %v3194_v58 = vrot.slane %v3000_v46, 2  ;;  %v9919_v60 = vrot.slane %v5862_v49, 2  ;;  %v2698_v1 = vsel %vm1548_vm5, %v2696_v50, %v9921_v54  ;;  %v2917_v4 = vadd.f32 %v2695_v57, %v2419_v19  ;;  %10237 = vst [vmem:[#allocation12_spill] sm:$0xff] %v5884_v7  ;;  %v1084_v50 = vld [vmem:[#allocation2 + $0x20] sm:$0x3] }
  0x6e   : > { %v3193_v31 = vsel %vm2047_vm6, %v3191_v55, %v9920_v56  ;;  %v5882_v35 = vrot.slane %v3487_v26, %v5544_v6  ;;  %v2918_v41 = vadd.f32 %v2698_v1, %v2420_v27  ;;  %v3498_v46 = vmul.f32 %v5871_v63, %v5873_v62 }
  0x6f   : > { %v3196_v11 = vsel %vm2047_vm6, %v3194_v58, %v9919_v60  ;;  %v3629_v19 = vrot.slane %v5793_v48, %v5541_v5  ;;  %v3415_v57 = vadd.f32 %v3193_v31, %v2917_v4  ;;  %v3633_v6 = vrot.slane %v5793_v48, %v5557_v8 }
  0x70   : > { %v3499_v55 = vmul.f32 %v5882_v35, %v5884_v7  ;;  %v4127_v26 = vrot.slane %v5793_v48, %v5560_v9  ;;  %v3416_v27 = vadd.f32 %v3196_v11, %v2918_v41  ;;  %v4131_v1 = vrot.slane %v5793_v48, %v5563_v10  ;;  %v5913_v11 = vld [vmem:[#allocation2 + $0x78] sm:$0xff] }
  0x71   : > { %v5900_v58 = vrot.slane %v3629_v19, %v5541_v5  ;;  %v1213_v4 = vmul.f32 %v5720_v53, %v5739_v16  ;;  %v3562_v31 = vadd.f32 %v3498_v46, %v3415_v57  ;;  %v5907_v60 = vrot.slane %v3633_v6, %v5541_v5  ;;  %v1085_v6 = vld [vmem:[#allocation2 + $0x28] sm:$0x3] }
  0x72   : > { %v5910_v8 = vrot.slane %v4127_v26, %v5560_v9  ;;  %v1360_v41 = vmul.f32 %v5742_v18, %v1084_v50  ;;  %v3563_v19 = vadd.f32 %v3499_v55, %v3416_v27  ;;  %v5922_v16 = vrot.slane %v4131_v1, %v5560_v9 }
  0x73   : > { %10238 = vst [vmem:[#allocation13_spill] sm:$0xff] %v5907_v60  ;;  %v3644_v10 = vmul.f32 %v5900_v58, %v5873_v62  ;;  %v5919_v48 = vmul.f32 %v5900_v58, %v5611_v22  ;;  %v3645_v5 = vmul.f32 %v5907_v60, %v5884_v7  ;;  %v5928_v46 = vmul.f32 %v5907_v60, %v5913_v11 }
  0x74   : > { %v4142_v57 = vmul.f32 %v5910_v8, %v5873_v62  ;;  %v5934_v55 = vmul.f32 %v5910_v8, %v5611_v22  ;;  %v4143_v9 = vmul.f32 %v5922_v16, %v5884_v7  ;;  %v5941_v1 = vmul.f32 %v5922_v16, %v5913_v11 }
  0x75   : > { %v3836_v26 = vrot.slane %v3644_v10, 1  ;;  %v9933_v27 = vrot.slane %v5919_v48, 1  ;;  %v3839_v56 = vrot.slane %v3645_v5, 1  ;;  %v9940_v54 = vrot.slane %v5928_v46, 1 }
  0x76   : > { %v4334_v44 = vrot.slane %v4142_v57, 2  ;;  %v9939_v47 = vrot.slane %v5934_v55, 2  ;;  %v4337_v10 = vrot.slane %v4143_v9, 2  ;;  %v9938_v42 = vrot.slane %v5941_v1, 2 }
  0x77   : > { %v3838_v43 = vsel %vm1548_vm5, %v3836_v26, %v9933_v27  ;;  %v1361_v36 = vmul.f32 %v5749_v24, %v1085_v6  ;;  %v3841_v2 = vsel %vm1548_vm5, %v3839_v56, %v9940_v54  ;;  %v1555_v57 = vrot.slane %v1360_v41, 1  ;;  %v5970_v41 = vld [vmem:[#allocation2 + $0x58] sm:$0x3] }
  0x78   : > { %v4060_v21 = vadd.f32 %v3838_v43, %v3562_v31  ;;  %v4336_v5 = vsel %vm2047_vm6, %v4334_v44, %v9939_v47  ;;  %v4061_v7 = vadd.f32 %v3841_v2, %v3563_v19  ;;  %v4339_v26 = vsel %vm2047_vm6, %v4337_v10, %v9938_v42  ;;  %v5968_v2 = vld [vmem:[#allocation2 + $0x50] sm:$0x3]  ;;  %10240 = vst [vmem:[#allocation14_spill] sm:$0xff] %v5970_v41 }
  0x79   : > { %v1557_v9 = vrot.slane %v1361_v36, 1  ;;  %v1859_v27 = vmul.f32 %v5752_v25, %v1084_v50  ;;  %v10239_v24 = vrot.slane %v5757_v28, 1  ;;  %v1860_v56 = vmul.f32 %v5760_v29, %v1085_v6 }
  0x7a   : > { %v5960_v62 = vadd.f32 %v4336_v5, %v4060_v21  ;;  %v2357_v44 = vmul.f32 %v5763_v30, %v5602_v17  ;;  %v4559_v31 = vadd.f32 %v4339_v26, %v4061_v7  ;;  %v10241_v36 = vrot.slane %v5768_v33, 1 }
  0x7b   : > { %v1556_v43 = vsel %vm1548_vm5, %v10239_v24, %v1555_v57  ;;  %v2054_v19 = vrot.slane %v1859_v27, 2  ;;  %v2358_v7 = vmul.f32 %v5802_v51, %v5819_v0  ;;  %v10244_v5 = vrot.slane %v5771_v34, 2 }
  0x7c   : > { %v1558_v50 = vsel %vm1548_vm5, %v10241_v36, %v1557_v9  ;;  %v1775_v21 = vadd.f32 %v1556_v43, %v5733_v61  ;;  %v5991_v28 = vmul.f32 %v5960_v62, %v5960_v62  ;;  %v2056_v61 = vrot.slane %v1860_v56, 2 }
  0x7d   : > { %v1776_v33 = vadd.f32 %v1558_v50, %v1213_v4  ;;  %v5271_v6 = vpack.c.bf16 %v4559_v31, %v5960_v62  ;;  %v5997_v27 = vsel %vm615_vm0, %v4559_v31, 0.0  ;;  %v4956_v10 = vmul.f32 %v4559_v31, %v4559_v31 }
  0x7e   : > { %v2055_v57 = vsel %vm2047_vm6, %v10244_v5, %v2054_v19  ;;  %v10245_v26 = vrot.slane %v5777_v38, 2  ;;  %v2505_v4 = vmul.f32 %v5822_v3, %v5968_v2  ;;  %v2506_v56 = vmul.f32 %v5829_v20, %v5970_v41  ;;  %v6021_v5 = vld [vmem:[#allocation2 + $0x80] sm:$0x3] }
  0x7f   : > { %v2274_v43 = vadd.f32 %v2055_v57, %v1775_v21  ;;  %4817 = vst.msk [vmem:[%s5981_s12] sm:$0xff] %vm5985_vm9, %v5271_v6  ;;  %v6013_v31 = vsel %vm615_vm0, %v4956_v10, 0.0  ;;  %v3003_v36 = vmul.f32 %v5832_v23, %v5968_v2  ;;  %v3004_v38 = vmul.f32 %v5843_v32, %v5970_v41  ;;  %v6023_v6 = vld [vmem:[#allocation2 + $0x88] sm:$0x3] }
  0x80   : > { %v2057_v9 = vsel %vm2047_vm6, %v10245_v26, %v2056_v61  ;;  %v2699_v21 = vrot.slane %v2505_v4, 1  ;;  %v2701_v19 = vrot.slane %v2506_v56, 1  ;;  %v3500_v61 = vmul.f32 %v5871_v63, %v5611_v22  ;;  %v256_v56 = vld [vmem:[%s5551_s28 + $0x90] sm:$0xff] }
  0x81   : > { %v2275_v34 = vadd.f32 %v2057_v9, %v1776_v33  ;;  %v2421_v50 = vadd.f32 %v2357_v44, %v2274_v43  ;;  %v3197_v57 = vrot.slane %v3003_v36, 2  ;;  %v3199_v33 = vrot.slane %v3004_v38, 2 }
  0x82   : > { %v3501_v26 = vmul.f32 %v5882_v35, %v5913_v11  ;;  %v10246_v9 = vrot.slane %v5840_v59, 1  ;;  %v10247_v44 = vrot.slane %v5849_v37, 1  ;;  %v3648_v4 = vmul.f32 %v5900_v58, %v6021_v5 }
  0x83   : > { %v2422_v10 = vadd.f32 %v2358_v7, %v2275_v34  ;;  %v3649_v7 = vmul.f32 %v5907_v60, %v6023_v6  ;;  %v10248_v38 = vrot.slane %v5855_v39, 2  ;;  %v4147_v47 = vmul.f32 %v5922_v16, %v6023_v6 }
  0x84   : > { %v2700_v42 = vsel %vm1548_vm5, %v10246_v9, %v2699_v21  ;;  %v2702_v43 = vsel %vm1548_vm5, %v10247_v44, %v2701_v19  ;;  %v10249_v21 = vrot.slane %v5862_v49, 2  ;;  %v3842_v9 = vrot.slane %v3648_v4, 1 }
  0x85   : > { %v2919_v34 = vadd.f32 %v2700_v42, %v2421_v50  ;;  %v2920_v36 = vadd.f32 %v2702_v43, %v2422_v10  ;;  %v3198_v59 = vsel %vm2047_vm6, %v10248_v38, %v3197_v57  ;;  %v3844_v19 = vrot.slane %v3649_v7, 1  ;;  %v257_v10 = vld [vmem:[%s5551_s28 + $0x98] sm:$0xff] }
  0x86   : > { %v3200_v37 = vsel %vm2047_vm6, %v10249_v21, %v3199_v33  ;;  %v4146_v44 = vmul.f32 %v5910_v8, %v6021_v5  ;;  %v306_v42 = vunpack.c.l.bf16 %v256_v56  ;;  %v307_v50 = vunpack.c.h.bf16 %v256_v56 }
  0x87   : > { %v3417_v54 = vadd.f32 %v3198_v59, %v2919_v34  ;;  %v3418_v41 = vadd.f32 %v3200_v37, %v2920_v36  ;;  %v10250_v39 = vrot.slane %v5919_v48, 1  ;;  %v10251_v49 = vrot.slane %v5928_v46, 1 }
  0x88   : > { %v4340_v43 = vrot.slane %v4146_v44, 2  ;;  %v4342_v4 = vrot.slane %v4147_v47, 2  ;;  %v382_v21 = vmul.f32 %v5573_v14, %v306_v42  ;;  %v383_v34 = vmul.f32 %v5567_v12, %v307_v50 }
  0x89   : > { %v3843_v57 = vsel %vm1548_vm5, %v10250_v39, %v3842_v9  ;;  %v3845_v33 = vsel %vm1548_vm5, %v10251_v49, %v3844_v19  ;;  %v3564_v7 = vadd.f32 %v3500_v61, %v3417_v54  ;;  %v3565_v38 = vadd.f32 %v3501_v26, %v3418_v41  ;;  %v10254_v49 = vld [vmem:[#allocation9_spill] sm:$0xff] }
  0x8a   : > { %v10252_v36 = vrot.slane %v5934_v55, 2  ;;  %v10253_v48 = vrot.slane %v5941_v1, 2  ;;  %v308_v37 = vunpack.c.l.bf16 %v257_v10  ;;  %v309_v46 = vunpack.c.h.bf16 %v257_v10 }
  0x8b   : > { %v4062_v9 = vadd.f32 %v3843_v57, %v3564_v7  ;;  %v4063_v19 = vadd.f32 %v3845_v33, %v3565_v38  ;;  %v458_v47 = vadd.f32 %v5576_v15, %v382_v21  ;;  %v459_v54 = vadd.f32 %v5570_v13, %v383_v34 }
  0x8c   : > { %v4341_v56 = vsel %vm2047_vm6, %v10252_v36, %v4340_v43  ;;  %v4343_v59 = vsel %vm2047_vm6, %v10253_v48, %v4342_v4  ;;  %v384_v41 = vmul.f32 %v5573_v14, %v308_v37  ;;  %v385_v61 = vmul.f32 %v5567_v12, %v309_v46 }
  0x8d   : > { %v1214_v55 = vmul.f32 %v5717_v52, %v5780_v40  ;;  %v1215_v1 = vmul.f32 %v5720_v53, %v5786_v45  ;;  %v4560_v26 = vadd.f32 %v4341_v56, %v4062_v9  ;;  %v4561_v44 = vadd.f32 %v4343_v59, %v4063_v19 }
  0x8e   : > { %v522_v42 = vmax.f32 %v458_v47, 0.0  ;;  %v523_v50 = vmax.f32 %v459_v54, 0.0  ;;  %v460_v10 = vadd.f32 %v5576_v15, %v384_v41  ;;  %v461_v39 = vadd.f32 %v5570_v13, %v385_v61 }
  0x8f   : > { %v1362_v57 = vmul.f32 %v5742_v18, %v5780_v40  ;;  %v1363_v33 = vmul.f32 %v10254_v49, %v5786_v45  ;;  %v5272_v43 = vpack.c.bf16 %v4561_v44, %v4560_v26  ;;  %v6078_v4 = vadd.f32 %v4560_v26, %v5960_v62 }
  0x90   : > { %v4887_v7 = vsel %vm615_vm0, %v4561_v44, 0.0  ;;  %v4957_v38 = vmul.f32 %v4560_v26, %v4560_v26  ;;  %v4958_v34 = vmul.f32 %v4561_v44, %v4561_v44  ;;  %v586_v36 = vmin.f32 %v522_v42, 6.0 }
  0x91   : > { %v6082_v21 = vadd.f32 %v4887_v7, %v5997_v27  ;;  %v587_v56 = vmin.f32 %v523_v50, 6.0  ;;  %4818 = vst.msk [vmem:[%s5981_s12 + $0x8] sm:$0xff] %vm5985_vm9, %v5272_v43  ;;  %v524_v59 = vmax.f32 %v460_v10, 0.0  ;;  %v525_v37 = vmax.f32 %v461_v39, 0.0 }
  0x92   : > { %v6088_v48 = vadd.f32 %v4957_v38, %v5991_v28  ;;  %v6092_v62 = vmul.f32 %v5742_v18, %v5602_v17  ;;  %v5057_v46 = vsel %vm615_vm0, %v4958_v34, 0.0  ;;  %v843_v9 = vrot.slane %v586_v36, 7 }
  0x93   : > { %v844_v27 = vrot.slane %v587_v56, 7  ;;  %v6097_v19 = vmul.f32 %v10254_v49, %v5819_v0  ;;  %v6100_v47 = vadd.f32 %v5057_v46, %v6013_v31  ;;  %v588_v54 = vmin.f32 %v524_v59, 6.0  ;;  %v10255_v59 = vld [vmem:[#allocation11_spill] sm:$0xff]  ;;  %v10256_v46 = vld [vmem:[#allocation12_spill] sm:$0xff] }
  0x94   : > { %v589_v28 = vmin.f32 %v525_v37, 6.0  ;;  %v1559_v41 = vrot.slane %v1362_v57, 1  ;;  %1038 = vst [vmem:[#allocation2 + $0x1e0] sm:$0xfe] %v843_v9  ;;  %v9949_v61 = vrot.slane %v6092_v62, 1  ;;  %v1562_v26 = vrot.slane %v1363_v33, 1 }
  0x95   : > { %1039 = vst.msk [vmem:[#allocation2 + $0x1e8] sm:$0xfe] %vm983_vm2, %v844_v27  ;;  %v9948_v44 = vrot.slane %v6097_v19, 1  ;;  %v1861_v42 = vmul.f32 %v5752_v25, %v5780_v40  ;;  %v845_v50 = vrot.slane %v588_v54, 7  ;;  %v1862_v31 = vmul.f32 %v5760_v29, %v5786_v45 }
  0x96   : > { %v847_v10 = vrot.slane %v589_v28, 7  ;;  %v6111_v39 = vmul.f32 %v5752_v25, %v5602_v17  ;;  %v1561_v57 = vsel %vm1548_vm5, %v1559_v41, %v9949_v61  ;;  %v6121_v40 = vmul.f32 %v5760_v29, %v5819_v0 }
  0x97   : > { %v1564_v33 = vsel %vm1548_vm5, %v1562_v26, %v9948_v44  ;;  %v2058_v43 = vrot.slane %v1861_v42, 2  ;;  %v846_v7 = vsel %vm788_vm3, %v843_v9, %v845_v50  ;;  %1042 = vst [vmem:[#allocation2 + $0x200] sm:$0x1] %v845_v50  ;;  %v1777_v17 = vadd.f32 %v1561_v57, %v1214_v55 }
  0x98   : > { %v848_v45 = vsel %vm788_vm3, %v844_v27, %v847_v10  ;;  %1043 = vst.msk [vmem:[#allocation2 + $0x208] sm:$0x1] %vm988_vm4, %v847_v10  ;;  %v1778_v38 = vadd.f32 %v1564_v33, %v1215_v1  ;;  %1040 = vst [vmem:[#allocation2 + $0x1f0] sm:$0xff] %v846_v7  ;;  %v9945_v34 = vrot.slane %v6111_v39, 2  ;;  %v2061_v36 = vrot.slane %v1862_v31, 2 }
  0x99   : > { %1041 = vst.msk [vmem:[#allocation2 + $0x1f8] sm:$0xff] %vm615_vm0, %v848_v45  ;;  %v9943_v56 = vrot.slane %v6121_v40, 2  ;;  %v2359_v37 = vmul.f32 %v5763_v30, %v10255_v59  ;;  %v2360_v9 = vmul.f32 %v5802_v51, %v10256_v46  ;;  %v2507_v27 = vmul.f32 %v5822_v3, %v10255_v59 }
  0x9a   : > { %v2508_v55 = vmul.f32 %v5829_v20, %v10256_v46  ;;  %v6139_v1 = vmul.f32 %v5822_v3, %v5611_v22  ;;  %v2060_v54 = vsel %vm2047_vm6, %v2058_v43, %v9945_v34  ;;  %v6149_v41 = vmul.f32 %v5829_v20, %v5913_v11  ;;  %v6157_v43 = vld [vmem:[#allocation2 + $0x70] sm:$0xff] }
  0x9b   : > { %v2063_v28 = vsel %vm2047_vm6, %v2061_v36, %v9943_v56  ;;  %v3005_v26 = vmul.f32 %v5832_v23, %v10255_v59  ;;  %v2276_v42 = vadd.f32 %v2060_v54, %v1777_v17  ;;  %v2703_v10 = vrot.slane %v2507_v27, 1  ;;  %v6170_v27 = vld [vmem:[#allocation2 + $0x90] sm:$0xff] }
  0x9c   : > { %v2277_v50 = vadd.f32 %v2063_v28, %v1778_v38  ;;  %v9944_v22 = vrot.slane %v6139_v1, 1  ;;  %v2706_v31 = vrot.slane %v2508_v55, 1  ;;  %v9947_v57 = vrot.slane %v6149_v41, 1  ;;  %10257 = vst [vmem:[#allocation9_spill] sm:$0xff] %v6170_v27 }
  0x9d   : > { %v3006_v33 = vmul.f32 %v5843_v32, %v10256_v46  ;;  %v6161_v7 = vmul.f32 %v6157_v43, %v5832_v23  ;;  %v2423_v45 = vadd.f32 %v2359_v37, %v2276_v42  ;;  %v6168_v38 = vmul.f32 %v5843_v32, %v5913_v11  ;;  %v6176_v37 = vld [vmem:[#allocation2 + $0x98] sm:$0xff] }
  0x9e   : > { %v2424_v36 = vadd.f32 %v2360_v9, %v2277_v50  ;;  %v2705_v17 = vsel %vm1548_vm5, %v2703_v10, %v9944_v22  ;;  %v2708_v55 = vsel %vm1548_vm5, %v2706_v31, %v9947_v57  ;;  %v3201_v54 = vrot.slane %v3005_v26, 2  ;;  %10258 = vst [vmem:[#allocation11_spill] sm:$0xff] %v6176_v37  ;;  %v6181_v22 = vld [vmem:[#allocation2 + $0xa8] sm:$0xff] }
  0x9f   : > { %v9946_v28 = vrot.slane %v6161_v7, 2  ;;  %v3204_v56 = vrot.slane %v3006_v33, 2  ;;  %v2921_v9 = vadd.f32 %v2705_v17, %v2423_v45  ;;  %v9954_v50 = vrot.slane %v6168_v38, 2  ;;  %v10259_v17 = vld [vmem:[#allocation8_spill] sm:$0xff] }
  0xa0   : > { %v2922_v42 = vadd.f32 %v2708_v55, %v2424_v36  ;;  %v3502_v10 = vmul.f32 %v5871_v63, %v6170_v27  ;;  %v3503_v26 = vmul.f32 %v5882_v35, %v6176_v37  ;;  %v3650_v31 = vmul.f32 %v5900_v58, %v6170_v27 }
  0xa1   : > { %v3203_v34 = vsel %vm2047_vm6, %v3201_v54, %v9946_v28  ;;  %v3651_v33 = vmul.f32 %v5907_v60, %v6176_v37  ;;  %v3206_v45 = vsel %vm2047_vm6, %v3204_v56, %v9954_v50  ;;  %v6197_v55 = vmul.f32 %v5900_v58, %v10259_v17 }
  0xa2   : > { %v3419_v36 = vadd.f32 %v3203_v34, %v2921_v9  ;;  %v6201_v54 = vmul.f32 %v5907_v60, %v6181_v22  ;;  %v3420_v28 = vadd.f32 %v3206_v45, %v2922_v42  ;;  %v3846_v57 = vrot.slane %v3650_v31, 1 }
  0xa3   : > { %v3849_v44 = vrot.slane %v3651_v33, 1  ;;  %v4148_v61 = vmul.f32 %v5910_v8, %v6170_v27  ;;  %v9959_v15 = vrot.slane %v6197_v55, 1  ;;  %v4149_v34 = vmul.f32 %v5922_v16, %v6176_v37 }
  0xa4   : > { %v3566_v13 = vadd.f32 %v3502_v10, %v3419_v36  ;;  %v9962_v56 = vrot.slane %v6201_v54, 1  ;;  %v3567_v9 = vadd.f32 %v3503_v26, %v3420_v28  ;;  %v6211_v50 = vmul.f32 %v5910_v8, %v10259_v17  ;;  %v5313_v36 = vld [vmem:[#allocation2 + $0x40] sm:$0xff] }
  0xa5   : > { %v6215_v42 = vmul.f32 %v5922_v16, %v6181_v22  ;;  %v4344_v31 = vrot.slane %v4148_v61, 2  ;;  %v3848_v10 = vsel %vm1548_vm5, %v3846_v57, %v9959_v15  ;;  %v4347_v45 = vrot.slane %v4149_v34, 2  ;;  %v10260_v15 = vld [vmem:[#allocation14_spill] sm:$0xff] }
  0xa6   : > { %v3851_v33 = vsel %vm1548_vm5, %v3849_v44, %v9962_v56  ;;  %v1216_v28 = vmul.f32 %v5313_v36, %v5717_v52  ;;  %v4064_v26 = vadd.f32 %v3848_v10, %v3566_v13  ;;  %v9965_v12 = vrot.slane %v6211_v50, 2 }
  0xa7   : > { %v4065_v17 = vadd.f32 %v3851_v33, %v3567_v9  ;;  %v9966_v14 = vrot.slane %v6215_v42, 2  ;;  %v1217_v61 = vmul.f32 %v5720_v53, %v5819_v0  ;;  %v1366_v57 = vmul.f32 %v5742_v18, %v5968_v2 }
  0xa8   : > { %v1367_v37 = vmul.f32 %v10254_v49, %v10260_v15  ;;  %v1865_v44 = vmul.f32 %v5752_v25, %v5968_v2  ;;  %v4346_v13 = vsel %vm2047_vm6, %v4344_v31, %v9965_v12  ;;  %v1866_v0 = vmul.f32 %v5760_v29, %v10260_v15 }
  0xa9   : > { %v4349_v34 = vsel %vm2047_vm6, %v4347_v45, %v9966_v14  ;;  %v2361_v9 = vmul.f32 %v6157_v43, %v5763_v30  ;;  %v4562_v10 = vadd.f32 %v4346_v13, %v4064_v26  ;;  %v1565_v36 = vrot.slane %v1366_v57, 1 }
  0xaa   : > { %v4563_v33 = vadd.f32 %v4349_v34, %v4065_v17  ;;  %v1567_v56 = vrot.slane %v1367_v37, 1  ;;  %v2064_v2 = vrot.slane %v1865_v44, 2  ;;  %v2066_v27 = vrot.slane %v1866_v0, 2 }
  0xab   : > { %v2362_v31 = vmul.f32 %v5802_v51, %v5913_v11  ;;  %v2511_v12 = vmul.f32 %v5822_v3, %v6021_v5  ;;  %v6249_v14 = vadd.f32 %v6078_v4, %v4562_v10  ;;  %v4959_v30 = vmul.f32 %v4562_v10, %v4562_v10 }
  0xac   : > { %v5273_v45 = vpack.c.bf16 %v4563_v33, %v4562_v10  ;;  %v4889_v15 = vsel %vm615_vm0, %v4563_v33, 0.0  ;;  %v4960_v17 = vmul.f32 %v4563_v33, %v4563_v33  ;;  %v10261_v37 = vrot.slane %v6092_v62, 1 }
  0xad   : > { %v6253_v26 = vadd.f32 %v4889_v15, %v6082_v21  ;;  %v10262_v44 = vrot.slane %v6097_v19, 1  ;;  %v6265_v4 = vadd.f32 %v6088_v48, %v4959_v30  ;;  %v10263_v21 = vrot.slane %v6111_v39, 2  ;;  %v6292_v15 = vld [vmem:[#allocation2 + $0xb8] sm:$0x3] }
  0xae   : > { %v1566_v57 = vsel %vm1548_vm5, %v10261_v37, %v1565_v36  ;;  %4819 = vst.msk [vmem:[%s5981_s12 + $0x10] sm:$0xff] %vm5985_vm9, %v5273_v45  ;;  %v5059_v62 = vsel %vm615_vm0, %v4960_v17, 0.0  ;;  %v10264_v33 = vrot.slane %v6121_v40, 2  ;;  %v2709_v36 = vrot.slane %v2511_v12, 1 }
  0xaf   : > { %v1568_v13 = vsel %vm1548_vm5, %v10262_v44, %v1567_v56  ;;  %v1779_v34 = vadd.f32 %v1566_v57, %v1216_v28  ;;  %v2065_v10 = vsel %vm2047_vm6, %v10263_v21, %v2064_v2  ;;  %v2512_v56 = vmul.f32 %v5829_v20, %v6023_v6 }
  0xb0   : > { %v1780_v0 = vadd.f32 %v1568_v13, %v1217_v61  ;;  %v2067_v19 = vsel %vm2047_vm6, %v10264_v33, %v2066_v27  ;;  %v6277_v45 = vadd.f32 %v5059_v62, %v6100_v47  ;;  %v3009_v39 = vmul.f32 %v5832_v23, %v6021_v5  ;;  %v6286_v27 = vld [vmem:[#allocation2 + $0xa0] sm:$0xff]  ;;  %v6290_v47 = vld [vmem:[#allocation2 + $0xb0] sm:$0x3] }
  0xb1   : > { %v2278_v30 = vadd.f32 %v2065_v10, %v1779_v34  ;;  %v10265_v28 = vrot.slane %v6139_v1, 1  ;;  %v2711_v2 = vrot.slane %v2512_v56, 1  ;;  %v3010_v40 = vmul.f32 %v5843_v32, %v6023_v6 }
  0xb2   : > { %v2279_v48 = vadd.f32 %v2067_v19, %v1780_v0  ;;  %v3504_v12 = vmul.f32 %v6286_v27, %v5871_v63  ;;  %v3207_v57 = vrot.slane %v3009_v39, 2  ;;  %v3505_v1 = vmul.f32 %v5882_v35, %v6181_v22 }
  0xb3   : > { %v2710_v61 = vsel %vm1548_vm5, %v10265_v28, %v2709_v36  ;;  %v2425_v17 = vadd.f32 %v2361_v9, %v2278_v30  ;;  %v10266_v44 = vrot.slane %v6149_v41, 1  ;;  %v3209_v34 = vrot.slane %v3010_v40, 2 }
  0xb4   : > { %v2426_v37 = vadd.f32 %v2362_v31, %v2279_v48  ;;  %v3654_v0 = vmul.f32 %v5900_v58, %v6290_v47  ;;  %v3655_v21 = vmul.f32 %v5907_v60, %v6292_v15  ;;  %v10267_v9 = vrot.slane %v6161_v7, 2 }
  0xb5   : > { %v2712_v13 = vsel %vm1548_vm5, %v10266_v44, %v2711_v2  ;;  %v2923_v10 = vadd.f32 %v2710_v61, %v2425_v17  ;;  %v4152_v33 = vmul.f32 %v5910_v8, %v6290_v47  ;;  %v10268_v41 = vrot.slane %v6168_v38, 2 }
  0xb6   : > { %v2924_v62 = vadd.f32 %v2712_v13, %v2426_v37  ;;  %v3208_v31 = vsel %vm2047_vm6, %v10267_v9, %v3207_v57  ;;  %v3852_v56 = vrot.slane %v3654_v0, 1  ;;  %v3854_v36 = vrot.slane %v3655_v21, 1 }
  0xb7   : > { %v3210_v19 = vsel %vm2047_vm6, %v10268_v41, %v3209_v34  ;;  %v4153_v30 = vmul.f32 %v5922_v16, %v6292_v15  ;;  %v3421_v48 = vadd.f32 %v3208_v31, %v2923_v10  ;;  %v4350_v28 = vrot.slane %v4152_v33, 2 }
  0xb8   : > { %v3422_v39 = vadd.f32 %v3210_v19, %v2924_v62  ;;  %v1218_v7 = vmul.f32 %v5717_v52, %v10255_v59  ;;  %v10269_v61 = vrot.slane %v6197_v55, 1  ;;  %v10270_v40 = vrot.slane %v6201_v54, 1 }
  0xb9   : > { %v4352_v17 = vrot.slane %v4153_v30, 2  ;;  %v1219_v37 = vmul.f32 %v5720_v53, %v10256_v46  ;;  %v3568_v57 = vadd.f32 %v3504_v12, %v3421_v48  ;;  %v10271_v13 = vrot.slane %v6211_v50, 2 }
  0xba   : > { %v3853_v2 = vsel %vm1548_vm5, %v10269_v61, %v3852_v56  ;;  %v3855_v38 = vsel %vm1548_vm5, %v10270_v40, %v3854_v36  ;;  %v3569_v44 = vadd.f32 %v3505_v1, %v3422_v39  ;;  %v1368_v0 = vmul.f32 %v5742_v18, %v10255_v59 }
  0xbb   : > { %v4351_v34 = vsel %vm2047_vm6, %v10271_v13, %v4350_v28  ;;  %v10272_v55 = vrot.slane %v6215_v42, 2  ;;  %v1369_v54 = vmul.f32 %v10254_v49, %v10256_v46  ;;  %v6335_v10 = vmul.f32 %v6157_v43, %v5742_v18 }
  0xbc   : > { %v6339_v12 = vmul.f32 %v10254_v49, %v5913_v11  ;;  %v4066_v50 = vadd.f32 %v3853_v2, %v3568_v57  ;;  %v4067_v1 = vadd.f32 %v3855_v38, %v3569_v44  ;;  %v1569_v62 = vrot.slane %v1368_v0, 1  ;;  %v10273_v0 = vld [vmem:[#allocation9_spill] sm:$0xff] }
  0xbd   : > { %v4353_v21 = vsel %vm2047_vm6, %v10272_v55, %v4352_v17  ;;  %v1867_v9 = vmul.f32 %v5752_v25, %v10255_v59  ;;  %v9975_v42 = vrot.slane %v6335_v10, 1  ;;  %v1572_v31 = vrot.slane %v1369_v54, 1  ;;  %v10274_v55 = vld [vmem:[#allocation10_spill] sm:$0xff] }
  0xbe   : > { %v9974_v33 = vrot.slane %v6339_v12, 1  ;;  %v1868_v41 = vmul.f32 %v5760_v29, %v10256_v46  ;;  %v4564_v19 = vadd.f32 %v4351_v34, %v4066_v50  ;;  %v4565_v56 = vadd.f32 %v4353_v21, %v4067_v1 }
  0xbf   : > { %v6349_v36 = vmul.f32 %v6157_v43, %v5752_v25  ;;  %v6353_v30 = vmul.f32 %v5760_v29, %v5913_v11  ;;  %v1571_v59 = vsel %vm1548_vm5, %v1569_v62, %v9975_v42  ;;  %v2068_v46 = vrot.slane %v1867_v9, 2 }
  0xc0   : > { %v1574_v48 = vsel %vm1548_vm5, %v1572_v31, %v9974_v33  ;;  %v2071_v39 = vrot.slane %v1868_v41, 2  ;;  %v5274_v28 = vpack.c.bf16 %v4565_v56, %v4564_v19  ;;  %v6362_v61 = vadd.f32 %v6249_v14, %v4564_v19 }
  0xc1   : > { %v4891_v2 = vsel %vm615_vm0, %v4565_v56, 0.0  ;;  %v4961_v40 = vmul.f32 %v4564_v19, %v4564_v19  ;;  %v4962_v17 = vmul.f32 %v4565_v56, %v4565_v56  ;;  %v1781_v57 = vadd.f32 %v1571_v59, %v1218_v7 }
  0xc2   : > { %v6366_v38 = vadd.f32 %v4891_v2, %v6253_v26  ;;  %v1782_v44 = vadd.f32 %v1574_v48, %v1219_v37  ;;  %4820 = vst.msk [vmem:[%s5981_s12 + $0x18] sm:$0xff] %vm5985_vm9, %v5274_v28  ;;  %v9973_v34 = vrot.slane %v6349_v36, 2  ;;  %v9971_v14 = vrot.slane %v6353_v30, 2  ;;  %v10275_v26 = vld [vmem:[#allocation11_spill] sm:$0xff] }
  0xc3   : > { %v6372_v13 = vadd.f32 %v6265_v4, %v4961_v40  ;;  %v2363_v21 = vmul.f32 %v10274_v55, %v10273_v0  ;;  %v5061_v54 = vsel %vm615_vm0, %v4962_v17, 0.0  ;;  %v2364_v50 = vmul.f32 %v5802_v51, %v10275_v26  ;;  %v6412_v17 = vld [vmem:[#allocation2 + $0xc0] sm:$0xff] }
  0xc4   : > { %v2513_v7 = vmul.f32 %v5822_v3, %v10273_v0  ;;  %v2514_v37 = vmul.f32 %v5829_v20, %v10275_v26  ;;  %v6386_v4 = vadd.f32 %v5061_v54, %v6277_v45  ;;  %v2070_v1 = vsel %vm2047_vm6, %v2068_v46, %v9973_v34  ;;  %10276 = vst [vmem:[#allocation12_spill] sm:$0xff] %v6412_v17 }
  0xc5   : > { %v2073_v62 = vsel %vm2047_vm6, %v2071_v39, %v9971_v14  ;;  %v6396_v9 = vmul.f32 %v6286_v27, %v5822_v3  ;;  %v2280_v31 = vadd.f32 %v2070_v1, %v1781_v57  ;;  %v6400_v19 = vmul.f32 %v5829_v20, %v6181_v22 }
  0xc6   : > { %v2281_v41 = vadd.f32 %v2073_v62, %v1782_v44  ;;  %v2713_v45 = vrot.slane %v2513_v7, 1  ;;  %v2716_v59 = vrot.slane %v2514_v37, 1  ;;  %v3011_v48 = vmul.f32 %v5832_v23, %v10273_v0 }
  0xc7   : > { %v9970_v56 = vrot.slane %v6396_v9, 1  ;;  %v3012_v46 = vmul.f32 %v5843_v32, %v10275_v26  ;;  %v2427_v39 = vadd.f32 %v2363_v21, %v2280_v31  ;;  %v9969_v2 = vrot.slane %v6400_v19, 1  ;;  %v6421_v21 = vld [vmem:[#allocation2 + $0xc8] sm:$0xff]  ;;  %v6429_v31 = vld [vmem:[#allocation2 + $0xd8] sm:$0xff] }
  0xc8   : > { %v2428_v28 = vadd.f32 %v2364_v50, %v2281_v41  ;;  %v6410_v40 = vmul.f32 %v6286_v27, %v5832_v23  ;;  %v6419_v44 = vmul.f32 %v5843_v32, %v6181_v22  ;;  %v3211_v54 = vrot.slane %v3011_v48, 2  ;;  %10277 = vst [vmem:[#allocation8_spill] sm:$0xff] %v6421_v21 }
  0xc9   : > { %v2715_v57 = vsel %vm1548_vm5, %v2713_v45, %v9970_v56  ;;  %v3214_v7 = vrot.slane %v3012_v46, 2  ;;  %v2718_v50 = vsel %vm1548_vm5, %v2716_v59, %v9969_v2  ;;  %v3506_v62 = vmul.f32 %v5871_v63, %v6412_v17 }
  0xca   : > { %v2925_v37 = vadd.f32 %v2715_v57, %v2427_v39  ;;  %v9972_v1 = vrot.slane %v6410_v40, 2  ;;  %v2926_v41 = vadd.f32 %v2718_v50, %v2428_v28  ;;  %v9980_v45 = vrot.slane %v6419_v44, 2  ;;  %v6441_v57 = vld [vmem:[#allocation2 + $0xd0] sm:$0xff] }
  0xcb   : > { %v3507_v48 = vmul.f32 %v5882_v35, %v6421_v21  ;;  %v3656_v46 = vmul.f32 %v5900_v58, %v6412_v17  ;;  %v3657_v39 = vmul.f32 %v5907_v60, %v6421_v21  ;;  %v6445_v28 = vmul.f32 %v6441_v57, %v5900_v58 }
  0xcc   : > { %v3213_v59 = vsel %vm2047_vm6, %v3211_v54, %v9972_v1  ;;  %v6449_v50 = vmul.f32 %v5907_v60, %v6429_v31  ;;  %v3216_v2 = vsel %vm2047_vm6, %v3214_v7, %v9980_v45  ;;  %v4154_v54 = vmul.f32 %v5910_v8, %v6412_v17 }
  0xcd   : > { %v3423_v56 = vadd.f32 %v3213_v59, %v2925_v37  ;;  %v3856_v14 = vrot.slane %v3656_v46, 1  ;;  %v3424_v1 = vadd.f32 %v3216_v2, %v2926_v41  ;;  %v3857_v34 = vrot.slane %v6445_v28, 1 }
  0xce   : > { %v3859_v33 = vrot.slane %v3657_v39, 1  ;;  %v3860_v42 = vrot.slane %v6449_v50, 1  ;;  %v4155_v0 = vmul.f32 %v5922_v16, %v6421_v21  ;;  %v6462_v60 = vmul.f32 %v6441_v57, %v5910_v8 }
  0xcf   : > { %v3570_v26 = vadd.f32 %v3506_v62, %v3423_v56  ;;  %v6466_v7 = vmul.f32 %v5922_v16, %v6429_v31  ;;  %v3571_v37 = vadd.f32 %v3507_v48, %v3424_v1  ;;  %v3858_v2 = vsel %vm1548_vm5, %v3856_v14, %v3857_v34 }
  0xd0   : > { %v3861_v56 = vsel %vm1548_vm5, %v3859_v33, %v3860_v42  ;;  %v4354_v62 = vrot.slane %v4154_v54, 2  ;;  %v9984_v46 = vrot.slane %v6462_v60, 2  ;;  %v4357_v59 = vrot.slane %v4155_v0, 2 }
  0xd1   : > { %v4068_v41 = vadd.f32 %v3858_v2, %v3570_v26  ;;  %v9983_v39 = vrot.slane %v6466_v7, 2  ;;  %v4069_v45 = vadd.f32 %v3861_v56, %v3571_v37  ;;  %v1220_v21 = vmul.f32 %v6157_v43, %v5717_v52 }
  0xd2   : > { %v1221_v1 = vmul.f32 %v5720_v53, %v5913_v11  ;;  %v1372_v14 = vmul.f32 %v5742_v18, %v6021_v5  ;;  %v4356_v33 = vsel %vm2047_vm6, %v4354_v62, %v9984_v46  ;;  %v1373_v26 = vmul.f32 %v10254_v49, %v6023_v6 }
  0xd3   : > { %v4359_v0 = vsel %vm2047_vm6, %v4357_v59, %v9983_v39  ;;  %v1871_v43 = vmul.f32 %v5752_v25, %v6021_v5  ;;  %v4566_v48 = vadd.f32 %v4356_v33, %v4068_v41  ;;  %v1872_v37 = vmul.f32 %v5760_v29, %v6023_v6 }
  0xd4   : > { %v4567_v11 = vadd.f32 %v4359_v0, %v4069_v45  ;;  %v1575_v54 = vrot.slane %v1372_v14, 1  ;;  %v1577_v2 = vrot.slane %v1373_v26, 1  ;;  %v2365_v62 = vmul.f32 %v6286_v27, %v10274_v55 }
  0xd5   : > { %v2074_v56 = vrot.slane %v1871_v43, 2  ;;  %v2366_v59 = vmul.f32 %v5802_v51, %v6181_v22  ;;  %v6499_v46 = vadd.f32 %v6362_v61, %v4566_v48  ;;  %v4963_v41 = vmul.f32 %v4566_v48, %v4566_v48 }
  0xd6   : > { %v5275_v39 = vpack.c.bf16 %v4567_v11, %v4566_v48  ;;  %v4893_v5 = vsel %vm615_vm0, %v4567_v11, 0.0  ;;  %v4964_v14 = vmul.f32 %v4567_v11, %v4567_v11  ;;  %v10278_v6 = vrot.slane %v6335_v10, 1 }
  0xd7   : > { %v6503_v45 = vadd.f32 %v4893_v5, %v6366_v38  ;;  %v10279_v0 = vrot.slane %v6339_v12, 1  ;;  %v6515_v61 = vadd.f32 %v6372_v13, %v4963_v41  ;;  %v10280_v38 = vrot.slane %v6349_v36, 2 }
  0xd8   : > { %v1576_v33 = vsel %vm1548_vm5, %v10278_v6, %v1575_v54  ;;  %4821 = vst.msk [vmem:[%s5981_s12 + $0x20] sm:$0xff] %vm5985_vm9, %v5275_v39  ;;  %v5063_v10 = vsel %vm615_vm0, %v4964_v14, 0.0  ;;  %v2076_v5 = vrot.slane %v1872_v37, 2  ;;  %v2517_v12 = vmul.f32 %v5822_v3, %v6290_v47  ;;  %v6537_v14 = vld [vmem:[#allocation2 + $0xe0] sm:$0x3] }
  0xd9   : > { %v1578_v26 = vsel %vm1548_vm5, %v10279_v0, %v1577_v2  ;;  %v1783_v43 = vadd.f32 %v1576_v33, %v1220_v21  ;;  %v2075_v11 = vsel %vm2047_vm6, %v10280_v38, %v2074_v56  ;;  %v2518_v54 = vmul.f32 %v5829_v20, %v6292_v15 }
  0xda   : > { %v1784_v48 = vadd.f32 %v1578_v26, %v1221_v1  ;;  %v6526_v39 = vadd.f32 %v5063_v10, %v6386_v4  ;;  %v3015_v21 = vmul.f32 %v5832_v23, %v6290_v47  ;;  %v3016_v36 = vmul.f32 %v5843_v32, %v6292_v15 }
  0xdb   : > { %v2282_v13 = vadd.f32 %v2075_v11, %v1783_v43  ;;  %v10281_v1 = vrot.slane %v6353_v30, 2  ;;  %v2719_v2 = vrot.slane %v2517_v12, 1  ;;  %v2721_v56 = vrot.slane %v2518_v54, 1 }
  0xdc   : > { %v3508_v41 = vmul.f32 %v6441_v57, %v5871_v63  ;;  %v3217_v33 = vrot.slane %v3015_v21, 2  ;;  %v3219_v0 = vrot.slane %v3016_v36, 2  ;;  %v10282_v26 = vrot.slane %v6396_v9, 1 }
  0xdd   : > { %v2077_v37 = vsel %vm2047_vm6, %v10281_v1, %v2076_v5  ;;  %v2429_v6 = vadd.f32 %v2365_v62, %v2282_v13  ;;  %v10283_v38 = vrot.slane %v6400_v19, 1  ;;  %v3509_v11 = vmul.f32 %v5882_v35, %v6429_v31  ;;  %v6549_v5 = vld [vmem:[#allocation2 + $0xe8] sm:$0x3]  ;;  %v10286_v13 = vld [vmem:[#allocation13_spill] sm:$0xff] }
  0xde   : > { %v2283_v4 = vadd.f32 %v2077_v37, %v1784_v48  ;;  %v2720_v43 = vsel %vm1548_vm5, %v10282_v26, %v2719_v2  ;;  %v3660_v10 = vmul.f32 %v5900_v58, %v6537_v14  ;;  %v10284_v12 = vrot.slane %v6410_v40, 2 }
  0xdf   : > { %v2722_v30 = vsel %vm1548_vm5, %v10283_v38, %v2721_v56  ;;  %v2927_v62 = vadd.f32 %v2720_v43, %v2429_v6  ;;  %v10285_v54 = vrot.slane %v6419_v44, 2  ;;  %v3661_v21 = vmul.f32 %v10286_v13, %v6549_v5  ;;  %v10287_v56 = vld [vmem:[#allocation9_spill] sm:$0xff] }
  0xe0   : > { %v2430_v48 = vadd.f32 %v2366_v59, %v2283_v4  ;;  %v3218_v9 = vsel %vm2047_vm6, %v10284_v12, %v3217_v33  ;;  %v3862_v36 = vrot.slane %v3660_v10, 1  ;;  %v4158_v1 = vmul.f32 %v5910_v8, %v6537_v14  ;;  %v10288_v4 = vld [vmem:[#allocation11_spill] sm:$0xff] }
  0xe1   : > { %v3220_v19 = vsel %vm2047_vm6, %v10285_v54, %v3219_v0  ;;  %v4159_v37 = vmul.f32 %v5922_v16, %v6549_v5  ;;  %v3425_v2 = vadd.f32 %v3218_v9, %v2927_v62  ;;  %v1222_v40 = vmul.f32 %v5717_v52, %v10287_v56 }
  0xe2   : > { %v2928_v59 = vadd.f32 %v2722_v30, %v2430_v48  ;;  %v1223_v44 = vmul.f32 %v5720_v53, %v10288_v4  ;;  %v3863_v6 = vsel %vm1548_vm5, %v3857_v34, %v3862_v36  ;;  %v3864_v33 = vrot.slane %v3661_v21, 1 }
  0xe3   : > { %v4360_v0 = vrot.slane %v4158_v1, 2  ;;  %v4362_v26 = vrot.slane %v4159_v37, 2  ;;  %v3572_v38 = vadd.f32 %v3508_v41, %v3425_v2  ;;  %v1374_v10 = vmul.f32 %v5742_v18, %v10287_v56 }
  0xe4   : > { %v3426_v43 = vadd.f32 %v3220_v19, %v2928_v59  ;;  %v1375_v30 = vmul.f32 %v10254_v49, %v10288_v4  ;;  %v3865_v48 = vsel %vm1548_vm5, %v3860_v42, %v3864_v33  ;;  %v10289_v62 = vrot.slane %v6462_v60, 2 }
  0xe5   : > { %v10290_v34 = vrot.slane %v6466_v7, 2  ;;  %v6585_v41 = vmul.f32 %v6286_v27, %v5742_v18  ;;  %v4070_v54 = vadd.f32 %v3863_v6, %v3572_v38  ;;  %v6589_v19 = vmul.f32 %v10254_v49, %v6181_v22 }
  0xe6   : > { %v4361_v28 = vsel %vm2047_vm6, %v10289_v62, %v4360_v0  ;;  %v3573_v9 = vadd.f32 %v3509_v11, %v3426_v43  ;;  %v1579_v50 = vrot.slane %v1374_v10, 1  ;;  %v1582_v60 = vrot.slane %v1375_v30, 1 }
  0xe7   : > { %v4363_v12 = vsel %vm2047_vm6, %v10290_v34, %v4362_v26  ;;  %v9990_v42 = vrot.slane %v6585_v41, 1  ;;  %v1873_v21 = vmul.f32 %v5752_v25, %v10287_v56  ;;  %v1874_v7 = vmul.f32 %v5760_v29, %v10288_v4 }
  0xe8   : > { %v4071_v36 = vadd.f32 %v3865_v48, %v3573_v9  ;;  %v4568_v1 = vadd.f32 %v4361_v28, %v4070_v54  ;;  %v9989_v37 = vrot.slane %v6589_v19, 1  ;;  %v6599_v11 = vmul.f32 %v6286_v27, %v5752_v25 }
  0xe9   : > { %v1581_v59 = vsel %vm1548_vm5, %v1579_v50, %v9990_v42  ;;  %v6606_v2 = vmul.f32 %v5760_v29, %v6181_v22  ;;  %v2078_v56 = vrot.slane %v1873_v21, 2  ;;  %v2081_v6 = vrot.slane %v1874_v7, 2 }
  0xea   : > { %v4569_v33 = vadd.f32 %v4363_v12, %v4071_v36  ;;  %v6609_v4 = vadd.f32 %v6499_v46, %v4568_v1  ;;  %v4965_v0 = vmul.f32 %v4568_v1, %v4568_v1  ;;  %v1584_v26 = vsel %vm1548_vm5, %v1582_v60, %v9989_v37 }
  0xeb   : > { %v1785_v43 = vadd.f32 %v1581_v59, %v1222_v40  ;;  %v1786_v38 = vadd.f32 %v1584_v26, %v1223_v44  ;;  %v9988_v10 = vrot.slane %v6599_v11, 2  ;;  %v9985_v30 = vrot.slane %v6606_v2, 2 }
  0xec   : > { %v5276_v48 = vpack.c.bf16 %v4569_v33, %v4568_v1  ;;  %v4895_v62 = vsel %vm615_vm0, %v4569_v33, 0.0  ;;  %v4966_v28 = vmul.f32 %v4569_v33, %v4569_v33  ;;  %v6618_v34 = vadd.f32 %v6515_v61, %v4965_v0 }
  0xed   : > { %v6621_v46 = vadd.f32 %v4895_v62, %v6503_v45  ;;  %v2080_v12 = vsel %vm2047_vm6, %v2078_v56, %v9988_v10  ;;  %v2083_v40 = vsel %vm2047_vm6, %v2081_v6, %v9985_v30  ;;  %v2367_v44 = vmul.f32 %v10274_v55, %v6412_v17  ;;  %v10291_v45 = vld [vmem:[#allocation8_spill] sm:$0xff] }
  0xee   : > { %4822 = vst.msk [vmem:[%s5981_s12 + $0x28] sm:$0xff] %vm5985_vm9, %v5276_v48  ;;  %v5065_v61 = vsel %vm615_vm0, %v4966_v28, 0.0  ;;  %v2284_v9 = vadd.f32 %v2080_v12, %v1785_v43  ;;  %v2285_v54 = vadd.f32 %v2083_v40, %v1786_v38  ;;  %v2368_v50 = vmul.f32 %v5802_v51, %v10291_v45  ;;  %v6657_v43 = vld [vmem:[#allocation2 + $0xf0] sm:$0xff]  ;;  %v6659_v38 = vld [vmem:[#allocation2 + $0xf8] sm:$0xff] }
  0xef   : > { %v6638_v60 = vadd.f32 %v5065_v61, %v6526_v39  ;;  %v2519_v21 = vmul.f32 %v5822_v3, %v6412_v17  ;;  %v2520_v7 = vmul.f32 %v5829_v20, %v10291_v45  ;;  %v6646_v36 = vmul.f32 %v6441_v57, %v5822_v3  ;;  %10292 = vst [vmem:[#allocation14_spill] sm:$0xff] %v6657_v43 }
  0xf0   : > { %v2431_v1 = vadd.f32 %v2367_v44, %v2284_v9  ;;  %v2432_v59 = vadd.f32 %v2368_v50, %v2285_v54  ;;  %v6650_v56 = vmul.f32 %v5829_v20, %v6429_v31  ;;  %v3017_v39 = vmul.f32 %v5832_v23, %v6412_v17  ;;  %10293 = vst [vmem:[#allocation10_spill] sm:$0xff] %v6659_v38 }
  0xf1   : > { %v2723_v6 = vrot.slane %v2519_v21, 1  ;;  %v9986_v33 = vrot.slane %v6646_v36, 1  ;;  %v2726_v0 = vrot.slane %v2520_v7, 1  ;;  %v3018_v26 = vmul.f32 %v5843_v32, %v10291_v45 }
  0xf2   : > { %v9987_v48 = vrot.slane %v6650_v56, 1  ;;  %v6664_v62 = vmul.f32 %v6441_v57, %v5832_v23  ;;  %v6668_v28 = vmul.f32 %v5843_v32, %v6429_v31  ;;  %v3221_v12 = vrot.slane %v3017_v39, 2  ;;  %v6682_v39 = vld [vmem:[#allocation2 + $0x108] sm:$0xff] }
  0xf3   : > { %v2725_v40 = vsel %vm1548_vm5, %v2723_v6, %v9986_v33  ;;  %v3224_v44 = vrot.slane %v3018_v26, 2  ;;  %v3510_v61 = vmul.f32 %v5871_v63, %v6657_v43  ;;  %v3511_v9 = vmul.f32 %v5882_v35, %v6659_v38  ;;  %v6688_v33 = vld [vmem:[#allocation2 + $0x100] sm:$0xff] }
  0xf4   : > { %10294 = vst [vmem:[#allocation9_spill] sm:$0xff] %v6668_v28  ;;  %v2728_v54 = vsel %vm1548_vm5, %v2726_v0, %v9987_v48  ;;  %v2929_v50 = vadd.f32 %v2725_v40, %v2431_v1  ;;  %v9992_v21 = vrot.slane %v6664_v62, 2  ;;  %v9993_v7 = vrot.slane %v6668_v28, 2 }
  0xf5   : > { %v2930_v30 = vadd.f32 %v2728_v54, %v2432_v59  ;;  %v3662_v6 = vmul.f32 %v5900_v58, %v6657_v43  ;;  %v3663_v26 = vmul.f32 %v10286_v13, %v6659_v38  ;;  %v6692_v0 = vmul.f32 %v6688_v33, %v5900_v58 }
  0xf6   : > { %v3223_v1 = vsel %vm2047_vm6, %v3221_v12, %v9992_v21  ;;  %v3226_v59 = vsel %vm2047_vm6, %v3224_v44, %v9993_v7  ;;  %v6702_v40 = vmul.f32 %v10286_v13, %v6682_v39  ;;  %v4160_v54 = vmul.f32 %v5910_v8, %v6657_v43  ;;  %v258_v7 = vld [vmem:[%s5551_s28 + $0xa0] sm:$0xff] }
  0xf7   : > { %10295 = vst [vmem:[#allocation11_spill] sm:$0xff] %v6692_v0  ;;  %v3427_v48 = vadd.f32 %v3223_v1, %v2929_v50  ;;  %v3428_v10 = vadd.f32 %v3226_v59, %v2930_v30  ;;  %v3866_v37 = vrot.slane %v3662_v6, 1  ;;  %v10001_v42 = vrot.slane %v6692_v0, 1  ;;  %v259_v6 = vld [vmem:[%s5551_s28 + $0xa8] sm:$0xff] }
  0xf8   : > { %10296 = vst [vmem:[#allocation15_spill] sm:$0xff] %v6702_v40  ;;  %v3869_v45 = vrot.slane %v3663_v26, 1  ;;  %v10003_v12 = vrot.slane %v6702_v40, 1  ;;  %v4161_v21 = vmul.f32 %v5922_v16, %v6659_v38  ;;  %v6712_v44 = vmul.f32 %v6688_v33, %v5910_v8 }
  0xf9   : > { %v3574_v17 = vadd.f32 %v3510_v61, %v3427_v48  ;;  %v3575_v28 = vadd.f32 %v3511_v9, %v3428_v10  ;;  %v3868_v30 = vsel %vm1548_vm5, %v3866_v37, %v10001_v42  ;;  %v6720_v50 = vmul.f32 %v5922_v16, %v6682_v39 }
  0xfa   : > { %v3871_v26 = vsel %vm1548_vm5, %v3869_v45, %v10003_v12  ;;  %v4364_v1 = vrot.slane %v4160_v54, 2  ;;  %v10005_v59 = vrot.slane %v6712_v44, 2  ;;  %v4367_v38 = vrot.slane %v4161_v21, 2  ;;  %v10297_v12 = vld [vmem:[#allocation6_spill] sm:$0xff]  ;;  %v10298_v21 = vld [vmem:[#allocation4_spill] sm:$0xff] }
  0xfb   : > { %v4072_v43 = vadd.f32 %v3868_v30, %v3574_v17  ;;  %v4073_v48 = vadd.f32 %v3871_v26, %v3575_v28  ;;  %v10006_v10 = vrot.slane %v6720_v50, 2  ;;  %v310_v61 = vunpack.c.l.bf16 %v258_v7 }
  0xfc   : > { %v4366_v37 = vsel %vm2047_vm6, %v4364_v1, %v10005_v59  ;;  %v311_v9 = vunpack.c.h.bf16 %v258_v7  ;;  %v312_v42 = vunpack.c.l.bf16 %v259_v6  ;;  %v313_v0 = vunpack.c.h.bf16 %v259_v6  ;;  %v10299_v59 = vld [vmem:[#allocation7_spill] sm:$0xff] }
  0xfd   : > { %v4369_v45 = vsel %vm2047_vm6, %v4367_v38, %v10006_v10  ;;  %v4570_v54 = vadd.f32 %v4366_v37, %v4072_v43  ;;  %v386_v40 = vmul.f32 %v10297_v12, %v310_v61  ;;  %v1224_v17 = vmul.f32 %v6286_v27, %v5717_v52  ;;  %v10300_v37 = vld [vmem:[#allocation5_spill] sm:$0xff] }
  0xfe   : > { %v4571_v28 = vadd.f32 %v4369_v45, %v4073_v48  ;;  %v387_v30 = vmul.f32 %v10298_v21, %v311_v9  ;;  %v388_v26 = vmul.f32 %v10297_v12, %v312_v42  ;;  %v389_v7 = vmul.f32 %v10298_v21, %v313_v0 }
  0xff   : > { %v6741_v6 = vadd.f32 %v6609_v4, %v4570_v54  ;;  %v4967_v1 = vmul.f32 %v4570_v54, %v4570_v54  ;;  %v462_v38 = vadd.f32 %v10299_v59, %v386_v40  ;;  %v1225_v43 = vmul.f32 %v5720_v53, %v6181_v22 }
 0x100   : > { %v5277_v61 = vpack.c.bf16 %v4571_v28, %v4570_v54  ;;  %v4897_v27 = vsel %vm615_vm0, %v4571_v28, 0.0  ;;  %v4968_v48 = vmul.f32 %v4571_v28, %v4571_v28  ;;  %v463_v45 = vadd.f32 %v10300_v37, %v387_v30 }
 0x101   : > { %v6749_v9 = vadd.f32 %v4897_v27, %v6621_v46  ;;  %v6752_v42 = vadd.f32 %v6618_v34, %v4967_v1  ;;  %v526_v4 = vmax.f32 %v462_v38, 0.0  ;;  %v464_v0 = vadd.f32 %v10299_v59, %v388_v26 }
 0x102   : > { %4823 = vst.msk [vmem:[%s5981_s12 + $0x30] sm:$0xff] %vm5985_vm9, %v5277_v61  ;;  %v5067_v22 = vsel %vm615_vm0, %v4968_v48, 0.0  ;;  %v527_v40 = vmax.f32 %v463_v45, 0.0  ;;  %v465_v54 = vadd.f32 %v10300_v37, %v389_v7  ;;  %v1378_v28 = vmul.f32 %v5742_v18, %v6290_v47 }
 0x103   : > { %v6763_v46 = vadd.f32 %v5067_v22, %v6638_v60  ;;  %v590_v30 = vmin.f32 %v526_v4, 6.0  ;;  %v528_v34 = vmax.f32 %v464_v0, 0.0  ;;  %v1379_v1 = vmul.f32 %v10254_v49, %v6292_v15 }
 0x104   : > { %v591_v26 = vmin.f32 %v527_v40, 6.0  ;;  %v529_v38 = vmax.f32 %v465_v54, 0.0  ;;  %v1585_v27 = vrot.slane %v1378_v28, 1  ;;  %v1877_v61 = vmul.f32 %v5752_v25, %v6290_v47 }
 0x105   : > { %v849_v48 = vrot.slane %v590_v30, 7  ;;  %v592_v45 = vmin.f32 %v528_v34, 6.0  ;;  %v1587_v7 = vrot.slane %v1379_v1, 1  ;;  %v1878_v10 = vmul.f32 %v5760_v29, %v6292_v15 }
 0x106   : > { %v850_v37 = vrot.slane %v591_v26, 7  ;;  %v593_v60 = vmin.f32 %v529_v38, 6.0  ;;  %v10301_v4 = vrot.slane %v6585_v41, 1  ;;  %v2084_v22 = vrot.slane %v1877_v61, 2 }
 0x107   : > { %1044 = vst [vmem:[#allocation2 + $0x210] sm:$0xfe] %v849_v48  ;;  %v851_v40 = vrot.slane %v592_v45, 7  ;;  %v10302_v54 = vrot.slane %v6589_v19, 1  ;;  %v2086_v30 = vrot.slane %v1878_v10, 2  ;;  %v10303_v15 = vrot.slane %v6599_v11, 2 }
 0x108   : > { %v1586_v0 = vsel %vm1548_vm5, %v10301_v4, %v1585_v27  ;;  %1045 = vst.msk [vmem:[#allocation2 + $0x218] sm:$0xfe] %vm983_vm2, %v850_v37  ;;  %v853_v34 = vrot.slane %v593_v60, 7  ;;  %v2369_v41 = vmul.f32 %v6441_v57, %v10274_v55  ;;  %v10304_v19 = vrot.slane %v6606_v2, 2  ;;  %v6802_v60 = vld [vmem:[#allocation2 + $0x110] sm:$0x3] }
 0x109   : > { %v1588_v28 = vsel %vm1548_vm5, %v10302_v54, %v1587_v7  ;;  %v1787_v47 = vadd.f32 %v1586_v0, %v1224_v17  ;;  %v2085_v26 = vsel %vm2047_vm6, %v10303_v15, %v2084_v22  ;;  %v852_v38 = vsel %vm788_vm3, %v849_v48, %v851_v40  ;;  %1048 = vst [vmem:[#allocation2 + $0x230] sm:$0x1] %v851_v40  ;;  %v6804_v4 = vld [vmem:[#allocation2 + $0x118] sm:$0x3] }
 0x10a   : > { %v1788_v1 = vadd.f32 %v1588_v28, %v1225_v43  ;;  %v2087_v27 = vsel %vm2047_vm6, %v10304_v19, %v2086_v30  ;;  %v2370_v10 = vmul.f32 %v5802_v51, %v6429_v31  ;;  %1046 = vst [vmem:[#allocation2 + $0x220] sm:$0xff] %v852_v38  ;;  %v854_v43 = vsel %vm788_vm3, %v850_v37, %v853_v34 }
 0x10b   : > { %v2286_v17 = vadd.f32 %v2085_v26, %v1787_v47  ;;  %1049 = vst.msk [vmem:[#allocation2 + $0x238] sm:$0x1] %vm988_vm4, %v853_v34  ;;  %v2523_v61 = vmul.f32 %v5822_v3, %v6537_v14  ;;  %v2524_v48 = vmul.f32 %v5829_v20, %v6549_v5  ;;  %v3021_v45 = vmul.f32 %v5832_v23, %v6537_v14 }
 0x10c   : > { %v2287_v11 = vadd.f32 %v2087_v27, %v1788_v1  ;;  %1047 = vst.msk [vmem:[#allocation2 + $0x228] sm:$0xff] %vm615_vm0, %v854_v43  ;;  %v3022_v7 = vmul.f32 %v5843_v32, %v6549_v5  ;;  %v3512_v37 = vmul.f32 %v6688_v33, %v5871_v63  ;;  %10305 = vst [vmem:[#allocation16_spill] sm:$0xff] %v6804_v4  ;;  %v10306_v1 = vrot.slane %v6646_v36, 1 }
 0x10d   : > { %v2433_v2 = vadd.f32 %v2369_v41, %v2286_v17  ;;  %v2729_v22 = vrot.slane %v2523_v61, 1  ;;  %v2731_v40 = vrot.slane %v2524_v48, 1  ;;  %v3513_v54 = vmul.f32 %v5882_v35, %v6682_v39 }
 0x10e   : > { %v2434_v0 = vadd.f32 %v2370_v10, %v2287_v11  ;;  %v3227_v28 = vrot.slane %v3021_v45, 2  ;;  %v3229_v47 = vrot.slane %v3022_v7, 2  ;;  %v3666_v30 = vmul.f32 %v5900_v58, %v6802_v60  ;;  %v10309_v11 = vld [vmem:[#allocation9_spill] sm:$0xff] }
 0x10f   : > { %v3667_v34 = vmul.f32 %v10286_v13, %v6804_v4  ;;  %v2730_v15 = vsel %vm1548_vm5, %v10306_v1, %v2729_v22  ;;  %v10307_v26 = vrot.slane %v6650_v56, 1  ;;  %v4164_v38 = vmul.f32 %v5910_v8, %v6802_v60  ;;  %v10311_v1 = vld [vmem:[#allocation12_spill] sm:$0xff] }
 0x110   : > { %v4165_v19 = vmul.f32 %v5922_v16, %v6804_v4  ;;  %v2931_v27 = vadd.f32 %v2730_v15, %v2433_v2  ;;  %v10308_v10 = vrot.slane %v6664_v62, 2  ;;  %v10310_v36 = vrot.slane %v10309_v11, 2  ;;  %v10312_v4 = vld [vmem:[#allocation8_spill] sm:$0xff]  ;;  %v10315_v15 = vld [vmem:[#allocation15_spill] sm:$0xff] }
 0x111   : > { %v2732_v41 = vsel %vm1548_vm5, %v10307_v26, %v2731_v40  ;;  %v3872_v48 = vrot.slane %v3666_v30, 1  ;;  %v3874_v56 = vrot.slane %v3667_v34, 1  ;;  %v4370_v45 = vrot.slane %v4164_v38, 2 }
 0x112   : > { %v2932_v17 = vadd.f32 %v2732_v41, %v2434_v0  ;;  %v3228_v43 = vsel %vm2047_vm6, %v10308_v10, %v3227_v28  ;;  %v3230_v61 = vsel %vm2047_vm6, %v10310_v36, %v3229_v47  ;;  %v4372_v7 = vrot.slane %v4165_v19, 2  ;;  %v10313_v0 = vld [vmem:[#allocation11_spill] sm:$0xff] }
 0x113   : > { %v3429_v22 = vadd.f32 %v3228_v43, %v2931_v27  ;;  %v1226_v26 = vmul.f32 %v5717_v52, %v10311_v1  ;;  %v1227_v2 = vmul.f32 %v5720_v53, %v10312_v4  ;;  %v10314_v62 = vrot.slane %v10313_v0, 1 }
 0x114   : > { %v3430_v40 = vadd.f32 %v3230_v61, %v2932_v17  ;;  %v10316_v41 = vrot.slane %v10315_v15, 1  ;;  %v10317_v30 = vrot.slane %v6712_v44, 2  ;;  %v10318_v38 = vrot.slane %v6720_v50, 2 }
 0x115   : > { %v3873_v28 = vsel %vm1548_vm5, %v10314_v62, %v3872_v48  ;;  %v3576_v27 = vadd.f32 %v3512_v37, %v3429_v22  ;;  %v1380_v10 = vmul.f32 %v5742_v18, %v10311_v1  ;;  %v1381_v43 = vmul.f32 %v10254_v49, %v10312_v4 }
 0x116   : > { %v3875_v47 = vsel %vm1548_vm5, %v10316_v41, %v3874_v56  ;;  %v4371_v34 = vsel %vm2047_vm6, %v10317_v30, %v4370_v45  ;;  %v4373_v19 = vsel %vm2047_vm6, %v10318_v38, %v4372_v7  ;;  %v3577_v17 = vadd.f32 %v3513_v54, %v3430_v40 }
 0x117   : > { %v6850_v11 = vmul.f32 %v6441_v57, %v5742_v18  ;;  %v6854_v44 = vmul.f32 %v10254_v49, %v6429_v31  ;;  %v1879_v50 = vmul.f32 %v5752_v25, %v10311_v1  ;;  %v1880_v37 = vmul.f32 %v5760_v29, %v10312_v4 }
 0x118   : > { %v4074_v54 = vadd.f32 %v3873_v28, %v3576_v27  ;;  %v4075_v36 = vadd.f32 %v3875_v47, %v3577_v17  ;;  %v1589_v61 = vrot.slane %v1380_v10, 1  ;;  %v1592_v48 = vrot.slane %v1381_v43, 1 }
 0x119   : > { %v10015_v56 = vrot.slane %v6850_v11, 1  ;;  %v10012_v45 = vrot.slane %v6854_v44, 1  ;;  %v6864_v7 = vmul.f32 %v6441_v57, %v5752_v25  ;;  %v6868_v22 = vmul.f32 %v5760_v29, %v6429_v31 }
 0x11a   : > { %v4572_v40 = vadd.f32 %v4371_v34, %v4074_v54  ;;  %v4573_v1 = vadd.f32 %v4373_v19, %v4075_v36  ;;  %v2088_v4 = vrot.slane %v1879_v50, 2  ;;  %v2091_v0 = vrot.slane %v1880_v37, 2  ;;  %v10319_v37 = vld [vmem:[#allocation14_spill] sm:$0xff] }
 0x11b   : > { %v1591_v62 = vsel %vm1548_vm5, %v1589_v61, %v10015_v56  ;;  %v1594_v28 = vsel %vm1548_vm5, %v1592_v48, %v10012_v45  ;;  %v10011_v15 = vrot.slane %v6864_v7, 2  ;;  %v10010_v41 = vrot.slane %v6868_v22, 2  ;;  %v10320_v36 = vld [vmem:[#allocation10_spill] sm:$0xff] }
 0x11c   : > { %v5278_v47 = vpack.c.bf16 %v4573_v1, %v4572_v40  ;;  %v6879_v30 = vadd.f32 %v6741_v6, %v4572_v40  ;;  %v4899_v34 = vsel %vm615_vm0, %v4573_v1, 0.0  ;;  %v4969_v38 = vmul.f32 %v4572_v40, %v4572_v40 }
 0x11d   : > { %v6883_v19 = vadd.f32 %v4899_v34, %v6749_v9  ;;  %v4970_v27 = vmul.f32 %v4573_v1, %v4573_v1  ;;  %v1789_v17 = vadd.f32 %v1591_v62, %v1226_v26  ;;  %v1790_v10 = vadd.f32 %v1594_v28, %v1227_v2 }
 0x11e   : > { %4824 = vst.msk [vmem:[%s5981_s12 + $0x38] sm:$0xff] %vm5985_vm9, %v5278_v47  ;;  %v6889_v43 = vadd.f32 %v6752_v42, %v4969_v38  ;;  %v2090_v6 = vsel %vm2047_vm6, %v2088_v4, %v10011_v15  ;;  %v2093_v50 = vsel %vm2047_vm6, %v2091_v0, %v10010_v41  ;;  %v2371_v9 = vmul.f32 %v10274_v55, %v10319_v37  ;;  %v6947_v15 = vld [vmem:[#allocation2 + $0x138] sm:$0xff] }
 0x11f   : > { %v5069_v26 = vsel %vm615_vm0, %v4970_v27, 0.0  ;;  %v2288_v2 = vadd.f32 %v2090_v6, %v1789_v17  ;;  %v2289_v54 = vadd.f32 %v2093_v50, %v1790_v10  ;;  %v2372_v61 = vmul.f32 %v5802_v51, %v10320_v36  ;;  %v6922_v27 = vld [vmem:[#allocation2 + $0x120] sm:$0xff]  ;;  %v6924_v17 = vld [vmem:[#allocation2 + $0x128] sm:$0xff] }
 0x120   : > { %v6903_v42 = vadd.f32 %v5069_v26, %v6763_v46  ;;  %v2525_v48 = vmul.f32 %v5822_v3, %v10319_v37  ;;  %v2526_v40 = vmul.f32 %v5829_v20, %v10320_v36  ;;  %v6911_v1 = vmul.f32 %v6688_v33, %v5822_v3  ;;  %10322 = vst [vmem:[#allocation12_spill] sm:$0xff] %v6922_v27 }
 0x121   : > { %v2435_v4 = vadd.f32 %v2371_v9, %v2288_v2  ;;  %v2436_v0 = vadd.f32 %v2372_v61, %v2289_v54  ;;  %v6915_v62 = vmul.f32 %v5829_v20, %v6682_v39  ;;  %v3023_v46 = vmul.f32 %v5832_v23, %v10319_v37  ;;  %10323 = vst [vmem:[#allocation8_spill] sm:$0xff] %v6924_v17 }
 0x122   : > { %v2733_v28 = vrot.slane %v2525_v48, 1  ;;  %v10013_v47 = vrot.slane %v6911_v1, 1  ;;  %v2736_v34 = vrot.slane %v2526_v40, 1  ;;  %v3024_v38 = vmul.f32 %v5843_v32, %v10320_v36 }
 0x123   : > { %10321 = vst [vmem:[#allocation9_spill] sm:$0xff] %v6915_v62  ;;  %v10014_v10 = vrot.slane %v6915_v62, 1  ;;  %v6929_v6 = vmul.f32 %v6688_v33, %v5832_v23  ;;  %v6933_v50 = vmul.f32 %v5843_v32, %v6682_v39  ;;  %v3231_v9 = vrot.slane %v3023_v46, 2 }
 0x124   : > { %v2735_v26 = vsel %vm1548_vm5, %v2733_v28, %v10013_v47  ;;  %v3234_v2 = vrot.slane %v3024_v38, 2  ;;  %v3514_v54 = vmul.f32 %v5871_v63, %v6922_v27  ;;  %v3515_v61 = vmul.f32 %v5882_v35, %v6924_v17  ;;  %v6953_v47 = vld [vmem:[#allocation2 + $0x130] sm:$0xff] }
 0x125   : > { %10324 = vst [vmem:[#allocation11_spill] sm:$0xff] %v6929_v6  ;;  %10325 = vst [vmem:[#allocation15_spill] sm:$0xff] %v6933_v50  ;;  %v2738_v48 = vsel %vm1548_vm5, %v2736_v34, %v10014_v10  ;;  %v2933_v40 = vadd.f32 %v2735_v26, %v2435_v4  ;;  %v10019_v41 = vrot.slane %v6929_v6, 2  ;;  %v10020_v46 = vrot.slane %v6933_v50, 2 }
 0x126   : > { %v2934_v45 = vadd.f32 %v2738_v48, %v2436_v0  ;;  %v3668_v28 = vmul.f32 %v5900_v58, %v6922_v27  ;;  %v3669_v38 = vmul.f32 %v10286_v13, %v6924_v17  ;;  %v6957_v34 = vmul.f32 %v6953_v47, %v5900_v58 }
 0x127   : > { %v3233_v4 = vsel %vm2047_vm6, %v3231_v9, %v10019_v41  ;;  %v3236_v0 = vsel %vm2047_vm6, %v3234_v2, %v10020_v46  ;;  %v6967_v26 = vmul.f32 %v10286_v13, %v6947_v15  ;;  %v4166_v48 = vmul.f32 %v5910_v8, %v6922_v27  ;;  %v260_v46 = vld [vmem:[%s5551_s28 + $0xb0] sm:$0xff] }
 0x128   : > { %10326 = vst [vmem:[#allocation17_spill] sm:$0xff] %v6957_v34  ;;  %v3431_v10 = vadd.f32 %v3233_v4, %v2933_v40  ;;  %v3432_v56 = vadd.f32 %v3236_v0, %v2934_v45  ;;  %v3876_v36 = vrot.slane %v3668_v28, 1  ;;  %v10027_v37 = vrot.slane %v6957_v34, 1  ;;  %v261_v28 = vld [vmem:[%s5551_s28 + $0xb8] sm:$0xff] }
 0x129   : > { %v3879_v6 = vrot.slane %v3669_v38, 1  ;;  %v10029_v9 = vrot.slane %v6967_v26, 1  ;;  %v4167_v41 = vmul.f32 %v5922_v16, %v6924_v17  ;;  %v6977_v2 = vmul.f32 %v6953_v47, %v5910_v8 }
 0x12a   : > { %v3578_v50 = vadd.f32 %v3514_v54, %v3431_v10  ;;  %v3579_v62 = vadd.f32 %v3515_v61, %v3432_v56  ;;  %v3878_v45 = vsel %vm1548_vm5, %v3876_v36, %v10027_v37  ;;  %v6985_v40 = vmul.f32 %v5922_v16, %v6947_v15 }
 0x12b   : > { %v3881_v38 = vsel %vm1548_vm5, %v3879_v6, %v10029_v9  ;;  %v4374_v4 = vrot.slane %v4166_v48, 2  ;;  %v10031_v0 = vrot.slane %v6977_v2, 2  ;;  %v4377_v17 = vrot.slane %v4167_v41, 2 }
 0x12c   : > { %v4076_v27 = vadd.f32 %v3878_v45, %v3578_v50  ;;  %v4077_v10 = vadd.f32 %v3881_v38, %v3579_v62  ;;  %v10030_v56 = vrot.slane %v6985_v40, 2  ;;  %v314_v54 = vunpack.c.l.bf16 %v260_v46 }
 0x12d   : > { %v4376_v36 = vsel %vm2047_vm6, %v4374_v4, %v10031_v0  ;;  %v315_v61 = vunpack.c.h.bf16 %v260_v46  ;;  %v316_v37 = vunpack.c.l.bf16 %v261_v28  ;;  %v317_v34 = vunpack.c.h.bf16 %v261_v28 }
 0x12e   : > { %v4379_v6 = vsel %vm2047_vm6, %v4377_v17, %v10030_v56  ;;  %v4574_v48 = vadd.f32 %v4376_v36, %v4076_v27  ;;  %v390_v9 = vmul.f32 %v10297_v12, %v314_v54  ;;  %v1228_v41 = vmul.f32 %v6441_v57, %v5717_v52  ;;  %v10327_v54 = vld [vmem:[#allocation5_spill] sm:$0xff] }
 0x12f   : > { %v4575_v62 = vadd.f32 %v4379_v6, %v4077_v10  ;;  %v391_v50 = vmul.f32 %v10298_v21, %v315_v61  ;;  %v392_v45 = vmul.f32 %v10297_v12, %v316_v37  ;;  %v393_v46 = vmul.f32 %v10298_v21, %v317_v34 }
 0x130   : > { %v7006_v28 = vadd.f32 %v6879_v30, %v4574_v48  ;;  %v4971_v38 = vmul.f32 %v4574_v48, %v4574_v48  ;;  %v466_v17 = vadd.f32 %v10299_v59, %v390_v9  ;;  %v1229_v27 = vmul.f32 %v5720_v53, %v6429_v31 }
 0x131   : > { %v5279_v4 = vpack.c.bf16 %v4575_v62, %v4574_v48  ;;  %v4901_v57 = vsel %vm615_vm0, %v4575_v62, 0.0  ;;  %v4972_v10 = vmul.f32 %v4575_v62, %v4575_v62  ;;  %v467_v36 = vadd.f32 %v10327_v54, %v391_v50 }
 0x132   : > { %v7014_v61 = vadd.f32 %v4901_v57, %v6883_v19  ;;  %v7017_v37 = vadd.f32 %v6889_v43, %v4971_v38  ;;  %v530_v30 = vmax.f32 %v466_v17, 0.0  ;;  %v468_v34 = vadd.f32 %v10299_v59, %v392_v45 }
 0x133   : > { %4825 = vst.msk [vmem:[%s5981_s12 + $0x40] sm:$0xff] %vm5985_vm9, %v5279_v4  ;;  %v5071_v31 = vsel %vm615_vm0, %v4972_v10, 0.0  ;;  %v531_v9 = vmax.f32 %v467_v36, 0.0  ;;  %v469_v6 = vadd.f32 %v10327_v54, %v393_v46  ;;  %v1384_v48 = vmul.f32 %v5742_v18, %v6537_v14 }
 0x134   : > { %v7028_v19 = vadd.f32 %v5071_v31, %v6903_v42  ;;  %v594_v62 = vmin.f32 %v530_v30, 6.0  ;;  %v532_v43 = vmax.f32 %v468_v34, 0.0  ;;  %v1385_v50 = vmul.f32 %v10254_v49, %v6549_v5 }
 0x135   : > { %v595_v45 = vmin.f32 %v531_v9, 6.0  ;;  %v533_v38 = vmax.f32 %v469_v6, 0.0  ;;  %v1595_v17 = vrot.slane %v1384_v48, 1  ;;  %v1883_v4 = vmul.f32 %v5752_v25, %v6537_v14 }
 0x136   : > { %v855_v57 = vrot.slane %v594_v62, 7  ;;  %v596_v10 = vmin.f32 %v532_v43, 6.0  ;;  %v1597_v46 = vrot.slane %v1385_v50, 1  ;;  %v1884_v36 = vmul.f32 %v5760_v29, %v6549_v5 }
 0x137   : > { %v856_v56 = vrot.slane %v595_v45, 7  ;;  %v597_v42 = vmin.f32 %v533_v38, 6.0  ;;  %v10328_v30 = vrot.slane %v6850_v11, 1  ;;  %v2094_v31 = vrot.slane %v1883_v4, 2 }
 0x138   : > { %1050 = vst [vmem:[#allocation2 + $0x240] sm:$0xfe] %v855_v57  ;;  %v857_v9 = vrot.slane %v596_v10, 7  ;;  %v10329_v6 = vrot.slane %v6854_v44, 1  ;;  %v2096_v62 = vrot.slane %v1884_v36, 2  ;;  %v10330_v5 = vrot.slane %v6864_v7, 2 }
 0x139   : > { %v1596_v34 = vsel %vm1548_vm5, %v10328_v30, %v1595_v17  ;;  %1051 = vst.msk [vmem:[#allocation2 + $0x248] sm:$0xfe] %vm983_vm2, %v856_v56  ;;  %v859_v43 = vrot.slane %v597_v42, 7  ;;  %v2373_v11 = vmul.f32 %v6688_v33, %v10274_v55  ;;  %v10331_v44 = vrot.slane %v6868_v22, 2  ;;  %v7067_v30 = vld [vmem:[#allocation2 + $0x140] sm:$0x3] }
 0x13a   : > { %v1598_v48 = vsel %vm1548_vm5, %v10329_v6, %v1597_v46  ;;  %v1791_v14 = vadd.f32 %v1596_v34, %v1228_v41  ;;  %v2095_v45 = vsel %vm2047_vm6, %v10330_v5, %v2094_v31  ;;  %v858_v38 = vsel %vm788_vm3, %v855_v57, %v857_v9  ;;  %1054 = vst [vmem:[#allocation2 + $0x260] sm:$0x1] %v857_v9  ;;  %v10332_v46 = vld [vmem:[#allocation16_spill] sm:$0xff] }
 0x13b   : > { %v1792_v50 = vadd.f32 %v1598_v48, %v1229_v27  ;;  %v2097_v17 = vsel %vm2047_vm6, %v10331_v44, %v2096_v62  ;;  %v2374_v4 = vmul.f32 %v5802_v51, %v6682_v39  ;;  %1052 = vst [vmem:[#allocation2 + $0x250] sm:$0xff] %v858_v38  ;;  %v860_v27 = vsel %vm788_vm3, %v856_v56, %v859_v43  ;;  %v7069_v34 = vld [vmem:[#allocation2 + $0x148] sm:$0x3] }
 0x13c   : > { %v2290_v41 = vadd.f32 %v2095_v45, %v1791_v14  ;;  %1055 = vst.msk [vmem:[#allocation2 + $0x268] sm:$0x1] %vm988_vm4, %v859_v43  ;;  %v2529_v10 = vmul.f32 %v5822_v3, %v6802_v60  ;;  %v2530_v57 = vmul.f32 %v5829_v20, %v10332_v46  ;;  %v3027_v36 = vmul.f32 %v5832_v23, %v6802_v60 }
 0x13d   : > { %v2291_v7 = vadd.f32 %v2097_v17, %v1792_v50  ;;  %1053 = vst.msk [vmem:[#allocation2 + $0x258] sm:$0xff] %vm615_vm0, %v860_v27  ;;  %v3028_v42 = vmul.f32 %v5843_v32, %v10332_v46  ;;  %v3516_v56 = vmul.f32 %v6953_v47, %v5871_v63  ;;  %10333 = vst [vmem:[#allocation18_spill] sm:$0xff] %v7067_v30  ;;  %v10335_v5 = vrot.slane %v6911_v1, 1 }
 0x13e   : > { %v2437_v22 = vadd.f32 %v2373_v11, %v2290_v41  ;;  %10334 = vst [vmem:[#allocation19_spill] sm:$0xff] %v7069_v34  ;;  %v2739_v9 = vrot.slane %v2529_v10, 1  ;;  %v2741_v6 = vrot.slane %v2530_v57, 1  ;;  %v3517_v48 = vmul.f32 %v5882_v35, %v6947_v15  ;;  %v10336_v11 = vld [vmem:[#allocation9_spill] sm:$0xff] }
 0x13f   : > { %v2438_v31 = vadd.f32 %v2374_v4, %v2291_v7  ;;  %v3237_v14 = vrot.slane %v3027_v36, 2  ;;  %v3239_v62 = vrot.slane %v3028_v42, 2  ;;  %v3672_v43 = vmul.f32 %v5900_v58, %v7067_v30  ;;  %v10338_v7 = vld [vmem:[#allocation11_spill] sm:$0xff] }
 0x140   : > { %v3673_v50 = vmul.f32 %v10286_v13, %v7069_v34  ;;  %v2740_v45 = vsel %vm1548_vm5, %v10335_v5, %v2739_v9  ;;  %v10337_v38 = vrot.slane %v10336_v11, 1  ;;  %v4170_v17 = vmul.f32 %v5910_v8, %v7067_v30  ;;  %v10340_v36 = vld [vmem:[#allocation15_spill] sm:$0xff]  ;;  %v10342_v30 = vld [vmem:[#allocation14_spill] sm:$0xff] }
 0x141   : > { %v4171_v41 = vmul.f32 %v5922_v16, %v7069_v34  ;;  %v2935_v4 = vadd.f32 %v2740_v45, %v2437_v22  ;;  %v10339_v10 = vrot.slane %v10338_v7, 2  ;;  %v10341_v1 = vrot.slane %v10340_v36, 2  ;;  %v10343_v34 = vld [vmem:[#allocation10_spill] sm:$0xff] }
 0x142   : > { %v2742_v44 = vsel %vm1548_vm5, %v10337_v38, %v2741_v6  ;;  %v3882_v9 = vrot.slane %v3672_v43, 1  ;;  %v3884_v5 = vrot.slane %v3673_v50, 1  ;;  %v4380_v11 = vrot.slane %v4170_v17, 2 }
 0x143   : > { %v2936_v27 = vadd.f32 %v2742_v44, %v2438_v31  ;;  %v3238_v57 = vsel %vm2047_vm6, %v10339_v10, %v3237_v14  ;;  %v3240_v42 = vsel %vm2047_vm6, %v10341_v1, %v3239_v62  ;;  %v4382_v6 = vrot.slane %v4171_v41, 2  ;;  %v10344_v31 = vld [vmem:[#allocation17_spill] sm:$0xff] }
 0x144   : > { %v3433_v38 = vadd.f32 %v3238_v57, %v2935_v4  ;;  %v1230_v46 = vmul.f32 %v5717_v52, %v10342_v30  ;;  %v1231_v22 = vmul.f32 %v5720_v53, %v10343_v34  ;;  %v10345_v45 = vrot.slane %v10344_v31, 1 }
 0x145   : > { %v3434_v0 = vadd.f32 %v3240_v42, %v2936_v27  ;;  %v10346_v44 = vrot.slane %v6967_v26, 1  ;;  %v10347_v43 = vrot.slane %v6977_v2, 2  ;;  %v10348_v17 = vrot.slane %v6985_v40, 2 }
 0x146   : > { %v3883_v14 = vsel %vm1548_vm5, %v10345_v45, %v3882_v9  ;;  %v3580_v4 = vadd.f32 %v3516_v56, %v3433_v38  ;;  %v1386_v7 = vmul.f32 %v5742_v18, %v10342_v30  ;;  %v1387_v10 = vmul.f32 %v10254_v49, %v10343_v34 }
 0x147   : > { %v3885_v62 = vsel %vm1548_vm5, %v10346_v44, %v3884_v5  ;;  %v4381_v50 = vsel %vm2047_vm6, %v10347_v43, %v4380_v11  ;;  %v4383_v41 = vsel %vm2047_vm6, %v10348_v17, %v4382_v6  ;;  %v3581_v27 = vadd.f32 %v3517_v48, %v3434_v0 }
 0x148   : > { %v7115_v26 = vmul.f32 %v6688_v33, %v5742_v18  ;;  %v7119_v2 = vmul.f32 %v10254_v49, %v6682_v39  ;;  %v1885_v40 = vmul.f32 %v5752_v25, %v10342_v30  ;;  %v1886_v0 = vmul.f32 %v5760_v29, %v10343_v34 }
 0x149   : > { %v4078_v56 = vadd.f32 %v3883_v14, %v3580_v4  ;;  %v4079_v48 = vadd.f32 %v3885_v62, %v3581_v27  ;;  %v1599_v57 = vrot.slane %v1386_v7, 1  ;;  %v1602_v36 = vrot.slane %v1387_v10, 1 }
 0x14a   : > { %v10042_v1 = vrot.slane %v7115_v26, 1  ;;  %v10041_v42 = vrot.slane %v7119_v2, 1  ;;  %v7129_v9 = vmul.f32 %v6688_v33, %v5752_v25  ;;  %v7133_v5 = vmul.f32 %v5760_v29, %v6682_v39 }
 0x14b   : > { %v4576_v30 = vadd.f32 %v4381_v50, %v4078_v56  ;;  %v4577_v11 = vadd.f32 %v4383_v41, %v4079_v48  ;;  %v2098_v34 = vrot.slane %v1885_v40, 2  ;;  %v2101_v6 = vrot.slane %v1886_v0, 2  ;;  %v10349_v40 = vld [vmem:[#allocation12_spill] sm:$0xff] }
 0x14c   : > { %v1601_v38 = vsel %vm1548_vm5, %v1599_v57, %v10042_v1  ;;  %v1604_v31 = vsel %vm1548_vm5, %v1602_v36, %v10041_v42  ;;  %v10038_v45 = vrot.slane %v7129_v9, 2  ;;  %v10037_v14 = vrot.slane %v7133_v5, 2  ;;  %v10350_v56 = vld [vmem:[#allocation8_spill] sm:$0xff] }
 0x14d   : > { %v5280_v44 = vpack.c.bf16 %v4577_v11, %v4576_v30  ;;  %v7144_v62 = vadd.f32 %v7006_v28, %v4576_v30  ;;  %v4903_v43 = vsel %vm615_vm0, %v4577_v11, 0.0  ;;  %v4973_v50 = vmul.f32 %v4576_v30, %v4576_v30 }
 0x14e   : > { %v7148_v17 = vadd.f32 %v4903_v43, %v7014_v61  ;;  %v4974_v41 = vmul.f32 %v4577_v11, %v4577_v11  ;;  %v1793_v4 = vadd.f32 %v1601_v38, %v1230_v46  ;;  %v1794_v27 = vadd.f32 %v1604_v31, %v1231_v22 }
 0x14f   : > { %4826 = vst.msk [vmem:[%s5981_s12 + $0x48] sm:$0xff] %vm5985_vm9, %v5280_v44  ;;  %v7154_v7 = vadd.f32 %v7017_v37, %v4973_v50  ;;  %v2100_v28 = vsel %vm2047_vm6, %v2098_v34, %v10038_v45  ;;  %v2103_v10 = vsel %vm2047_vm6, %v2101_v6, %v10037_v14  ;;  %v2375_v61 = vmul.f32 %v10274_v55, %v10349_v40  ;;  %v7187_v50 = vld [vmem:[#allocation2 + $0x150] sm:$0xff]  ;;  %v7212_v14 = vld [vmem:[#allocation2 + $0x168] sm:$0xff] }
 0x150   : > { %v5073_v46 = vsel %vm615_vm0, %v4974_v41, 0.0  ;;  %v2292_v22 = vadd.f32 %v2100_v28, %v1793_v4  ;;  %v2293_v0 = vadd.f32 %v2103_v10, %v1794_v27  ;;  %v2376_v48 = vmul.f32 %v5802_v51, %v10350_v56  ;;  %10351 = vst [vmem:[#allocation9_spill] sm:$0xff] %v7187_v50  ;;  %v7189_v41 = vld [vmem:[#allocation2 + $0x158] sm:$0xff] }
 0x151   : > { %v7168_v37 = vadd.f32 %v5073_v46, %v7028_v19  ;;  %v2531_v57 = vmul.f32 %v5822_v3, %v10349_v40  ;;  %v2532_v36 = vmul.f32 %v5829_v20, %v10350_v56  ;;  %v7176_v30 = vmul.f32 %v6953_v47, %v5822_v3  ;;  %10352 = vst [vmem:[#allocation11_spill] sm:$0xff] %v7189_v41 }
 0x152   : > { %v2439_v11 = vadd.f32 %v2375_v61, %v2292_v22  ;;  %v2440_v34 = vadd.f32 %v2376_v48, %v2293_v0  ;;  %v7180_v6 = vmul.f32 %v5829_v20, %v6947_v15  ;;  %v3029_v19 = vmul.f32 %v5832_v23, %v10349_v40 }
 0x153   : > { %v2743_v38 = vrot.slane %v2531_v57, 1  ;;  %v10039_v31 = vrot.slane %v7176_v30, 1  ;;  %v2746_v44 = vrot.slane %v2532_v36, 1  ;;  %v3030_v43 = vmul.f32 %v5843_v32, %v10350_v56 }
 0x154   : > { %v10040_v4 = vrot.slane %v7180_v6, 1  ;;  %v7194_v27 = vmul.f32 %v6953_v47, %v5832_v23  ;;  %v7198_v28 = vmul.f32 %v5843_v32, %v6947_v15  ;;  %v3241_v10 = vrot.slane %v3029_v19, 2 }
 0x155   : > { %v2745_v61 = vsel %vm1548_vm5, %v2743_v38, %v10039_v31  ;;  %v3244_v46 = vrot.slane %v3030_v43, 2  ;;  %v3518_v22 = vmul.f32 %v5871_v63, %v7187_v50  ;;  %v3519_v0 = vmul.f32 %v5882_v35, %v7189_v41  ;;  %v7218_v31 = vld [vmem:[#allocation2 + $0x160] sm:$0xff] }
 0x156   : > { %10353 = vst [vmem:[#allocation15_spill] sm:$0xff] %v7194_v27  ;;  %10354 = vst [vmem:[#allocation14_spill] sm:$0xff] %v7198_v28  ;;  %v2748_v48 = vsel %vm1548_vm5, %v2746_v44, %v10040_v4  ;;  %v2937_v57 = vadd.f32 %v2745_v61, %v2439_v11  ;;  %v10045_v36 = vrot.slane %v7194_v27, 2  ;;  %v10046_v19 = vrot.slane %v7198_v28, 2 }
 0x157   : > { %v2938_v45 = vadd.f32 %v2748_v48, %v2440_v34  ;;  %v3674_v38 = vmul.f32 %v5900_v58, %v7187_v50  ;;  %v3675_v43 = vmul.f32 %v10286_v13, %v7189_v41  ;;  %v7222_v44 = vmul.f32 %v7218_v31, %v5900_v58 }
 0x158   : > { %v3243_v11 = vsel %vm2047_vm6, %v3241_v10, %v10045_v36  ;;  %v3246_v34 = vsel %vm2047_vm6, %v3244_v46, %v10046_v19  ;;  %v7232_v61 = vmul.f32 %v10286_v13, %v7212_v14  ;;  %v4172_v48 = vmul.f32 %v5910_v8, %v7187_v50  ;;  %v262_v19 = vld [vmem:[%s5551_s28 + $0xc0] sm:$0xff] }
 0x159   : > { %10355 = vst [vmem:[#allocation10_spill] sm:$0xff] %v7222_v44  ;;  %v3435_v4 = vadd.f32 %v3243_v11, %v2937_v57  ;;  %v3436_v42 = vadd.f32 %v3246_v34, %v2938_v45  ;;  %v3886_v1 = vrot.slane %v3674_v38, 1  ;;  %v10053_v56 = vrot.slane %v7222_v44, 1  ;;  %v263_v38 = vld [vmem:[%s5551_s28 + $0xc8] sm:$0xff] }
 0x15a   : > { %v3889_v40 = vrot.slane %v3675_v43, 1  ;;  %v10055_v10 = vrot.slane %v7232_v61, 1  ;;  %v4173_v36 = vmul.f32 %v5922_v16, %v7189_v41  ;;  %v7242_v46 = vmul.f32 %v7218_v31, %v5910_v8 }
 0x15b   : > { %v3582_v28 = vadd.f32 %v3518_v22, %v3435_v4  ;;  %v3583_v27 = vadd.f32 %v3519_v0, %v3436_v42  ;;  %v3888_v45 = vsel %vm1548_vm5, %v3886_v1, %v10053_v56  ;;  %v7250_v57 = vmul.f32 %v5922_v16, %v7212_v14 }
 0x15c   : > { %v3891_v43 = vsel %vm1548_vm5, %v3889_v40, %v10055_v10  ;;  %v4384_v11 = vrot.slane %v4172_v48, 2  ;;  %v10057_v34 = vrot.slane %v7242_v46, 2  ;;  %v4387_v41 = vrot.slane %v4173_v36, 2 }
 0x15d   : > { %v4080_v50 = vadd.f32 %v3888_v45, %v3582_v28  ;;  %v4081_v4 = vadd.f32 %v3891_v43, %v3583_v27  ;;  %v10056_v42 = vrot.slane %v7250_v57, 2  ;;  %v318_v22 = vunpack.c.l.bf16 %v262_v19 }
 0x15e   : > { %v4386_v1 = vsel %vm2047_vm6, %v4384_v11, %v10057_v34  ;;  %v319_v0 = vunpack.c.h.bf16 %v262_v19  ;;  %v320_v56 = vunpack.c.l.bf16 %v263_v38  ;;  %v321_v44 = vunpack.c.h.bf16 %v263_v38 }
 0x15f   : > { %v4389_v40 = vsel %vm2047_vm6, %v4387_v41, %v10056_v42  ;;  %v4578_v48 = vadd.f32 %v4386_v1, %v4080_v50  ;;  %v394_v10 = vmul.f32 %v10297_v12, %v318_v22  ;;  %v1232_v27 = vmul.f32 %v6688_v33, %v5717_v52 }
 0x160   : > { %v4579_v28 = vadd.f32 %v4389_v40, %v4081_v4  ;;  %v395_v36 = vmul.f32 %v10298_v21, %v319_v0  ;;  %v396_v45 = vmul.f32 %v10297_v12, %v320_v56  ;;  %v397_v19 = vmul.f32 %v10298_v21, %v321_v44  ;;  %v10370_v21 = vld [vmem:[#allocation8_spill] sm:$0xff] }
 0x161   : > { %v7271_v38 = vadd.f32 %v7144_v62, %v4578_v48  ;;  %v4975_v43 = vmul.f32 %v4578_v48, %v4578_v48  ;;  %v470_v41 = vadd.f32 %v10299_v59, %v394_v10  ;;  %v1233_v50 = vmul.f32 %v5720_v53, %v6682_v39 }
 0x162   : > { %v5281_v11 = vpack.c.bf16 %v4579_v28, %v4578_v48  ;;  %v4905_v33 = vsel %vm615_vm0, %v4579_v28, 0.0  ;;  %v4976_v4 = vmul.f32 %v4579_v28, %v4579_v28  ;;  %v471_v22 = vadd.f32 %v10327_v54, %v395_v36  ;;  %v10356_v28 = vld [vmem:[#allocation16_spill] sm:$0xff] }
 0x163   : > { %v7279_v1 = vadd.f32 %v4905_v33, %v7148_v17  ;;  %v7282_v56 = vadd.f32 %v7154_v7, %v4975_v43  ;;  %v534_v62 = vmax.f32 %v470_v41, 0.0  ;;  %v472_v44 = vadd.f32 %v10299_v59, %v396_v45 }
 0x164   : > { %4827 = vst.msk [vmem:[%s5981_s12 + $0x50] sm:$0xff] %vm5985_vm9, %v5281_v11  ;;  %v5075_v39 = vsel %vm615_vm0, %v4976_v4, 0.0  ;;  %v535_v10 = vmax.f32 %v471_v22, 0.0  ;;  %v473_v0 = vadd.f32 %v10327_v54, %v397_v19  ;;  %v1390_v40 = vmul.f32 %v5742_v18, %v6802_v60  ;;  %v10369_v54 = vld [vmem:[#allocation12_spill] sm:$0xff] }
 0x165   : > { %v7293_v17 = vadd.f32 %v5075_v39, %v7168_v37  ;;  %v598_v48 = vmin.f32 %v534_v62, 6.0  ;;  %v536_v7 = vmax.f32 %v472_v44, 0.0  ;;  %v1391_v36 = vmul.f32 %v10254_v49, %v10356_v28 }
 0x166   : > { %v599_v45 = vmin.f32 %v535_v10, 6.0  ;;  %v537_v43 = vmax.f32 %v473_v0, 0.0  ;;  %v1605_v41 = vrot.slane %v1390_v40, 1  ;;  %v1889_v11 = vmul.f32 %v5752_v25, %v6802_v60 }
 0x167   : > { %v861_v33 = vrot.slane %v598_v48, 7  ;;  %v600_v4 = vmin.f32 %v536_v7, 6.0  ;;  %v1607_v19 = vrot.slane %v1391_v36, 1  ;;  %v1890_v22 = vmul.f32 %v5760_v29, %v10356_v28 }
 0x168   : > { %v862_v42 = vrot.slane %v599_v45, 7  ;;  %v601_v37 = vmin.f32 %v537_v43, 6.0  ;;  %v10357_v62 = vrot.slane %v7115_v26, 1  ;;  %v2104_v39 = vrot.slane %v1889_v11, 2 }
 0x169   : > { %1056 = vst [vmem:[#allocation2 + $0x270] sm:$0xfe] %v861_v33  ;;  %v863_v10 = vrot.slane %v600_v4, 7  ;;  %v10358_v0 = vrot.slane %v7119_v2, 1  ;;  %v2106_v48 = vrot.slane %v1890_v22, 2  ;;  %v10359_v28 = vrot.slane %v7129_v9, 2 }
 0x16a   : > { %v1606_v44 = vsel %vm1548_vm5, %v10357_v62, %v1605_v41  ;;  %1057 = vst.msk [vmem:[#allocation2 + $0x278] sm:$0xfe] %vm983_vm2, %v862_v42  ;;  %v865_v7 = vrot.slane %v601_v37, 7  ;;  %v2377_v26 = vmul.f32 %v6953_v47, %v10274_v55  ;;  %v10360_v2 = vrot.slane %v7133_v5, 2  ;;  %v10361_v4 = vld [vmem:[#allocation18_spill] sm:$0xff]  ;;  %v10362_v22 = vld [vmem:[#allocation19_spill] sm:$0xff] }
 0x16b   : > { %v1608_v40 = vsel %vm1548_vm5, %v10358_v0, %v1607_v19  ;;  %v1795_v60 = vadd.f32 %v1606_v44, %v1232_v27  ;;  %v2105_v45 = vsel %vm2047_vm6, %v10359_v28, %v2104_v39  ;;  %v864_v43 = vsel %vm788_vm3, %v861_v33, %v863_v10  ;;  %1060 = vst [vmem:[#allocation2 + $0x290] sm:$0x1] %v863_v10  ;;  %v7332_v44 = vld [vmem:[#allocation2 + $0x170] sm:$0x3]  ;;  %v7334_v39 = vld [vmem:[#allocation2 + $0x178] sm:$0x3] }
 0x16c   : > { %v1796_v36 = vadd.f32 %v1608_v40, %v1233_v50  ;;  %v2107_v41 = vsel %vm2047_vm6, %v10360_v2, %v2106_v48  ;;  %v2378_v11 = vmul.f32 %v5802_v51, %v6947_v15  ;;  %1058 = vst [vmem:[#allocation2 + $0x280] sm:$0xff] %v864_v43  ;;  %v866_v50 = vsel %vm788_vm3, %v862_v42, %v865_v7 }
 0x16d   : > { %v2294_v27 = vadd.f32 %v2105_v45, %v1795_v60  ;;  %1061 = vst.msk [vmem:[#allocation2 + $0x298] sm:$0x1] %vm988_vm4, %v865_v7  ;;  %v2535_v19 = vmul.f32 %v5822_v3, %v10361_v4  ;;  %v2536_v33 = vmul.f32 %v5829_v20, %v10362_v22  ;;  %v3033_v37 = vmul.f32 %v5832_v23, %v10361_v4 }
 0x16e   : > { %v2295_v9 = vadd.f32 %v2107_v41, %v1796_v36  ;;  %1059 = vst.msk [vmem:[#allocation2 + $0x288] sm:$0xff] %vm615_vm0, %v866_v50  ;;  %v3034_v62 = vmul.f32 %v5843_v32, %v10362_v22  ;;  %v3520_v42 = vmul.f32 %v7218_v31, %v5871_v63  ;;  %v3521_v60 = vmul.f32 %v5882_v35, %v7212_v14 }
 0x16f   : > { %v2441_v5 = vadd.f32 %v2377_v26, %v2294_v27  ;;  %v2749_v0 = vrot.slane %v2535_v19, 1  ;;  %v2751_v40 = vrot.slane %v2536_v33, 1  ;;  %v3247_v48 = vrot.slane %v3033_v37, 2  ;;  %v10367_v37 = vld [vmem:[#allocation14_spill] sm:$0xff] }
 0x170   : > { %v2442_v10 = vadd.f32 %v2378_v11, %v2295_v9  ;;  %v3249_v7 = vrot.slane %v3034_v62, 2  ;;  %v3678_v36 = vmul.f32 %v5900_v58, %v7332_v44  ;;  %v3679_v28 = vmul.f32 %v10286_v13, %v7334_v39  ;;  %v10365_v9 = vld [vmem:[#allocation15_spill] sm:$0xff] }
 0x171   : > { %v10363_v45 = vrot.slane %v7176_v30, 1  ;;  %v10364_v43 = vrot.slane %v7180_v6, 1  ;;  %v4176_v41 = vmul.f32 %v5910_v8, %v7332_v44  ;;  %v4177_v27 = vmul.f32 %v5922_v16, %v7334_v39 }
 0x172   : > { %v10366_v19 = vrot.slane %v10365_v9, 2  ;;  %v10368_v30 = vrot.slane %v10367_v37, 2  ;;  %v3894_v6 = vrot.slane %v3679_v28, 1  ;;  %v1234_v59 = vmul.f32 %v5717_v52, %v10369_v54 }
 0x173   : > { %v2750_v26 = vsel %vm1548_vm5, %v10363_v45, %v2749_v0  ;;  %v2752_v2 = vsel %vm1548_vm5, %v10364_v43, %v2751_v40  ;;  %v3892_v0 = vrot.slane %v3678_v36, 1  ;;  %v4390_v45 = vrot.slane %v4176_v41, 2 }
 0x174   : > { %v2939_v11 = vadd.f32 %v2750_v26, %v2441_v5  ;;  %v2940_v50 = vadd.f32 %v2752_v2, %v2442_v10  ;;  %v3248_v33 = vsel %vm2047_vm6, %v10366_v19, %v3247_v48  ;;  %v3250_v62 = vsel %vm2047_vm6, %v10368_v30, %v3249_v7  ;;  %v10371_v10 = vld [vmem:[#allocation10_spill] sm:$0xff] }
 0x175   : > { %v4392_v40 = vrot.slane %v4177_v27, 2  ;;  %v1235_v5 = vmul.f32 %v5720_v53, %v10370_v21  ;;  %v10372_v26 = vrot.slane %v10371_v10, 1  ;;  %v10373_v2 = vrot.slane %v7232_v61, 1 }
 0x176   : > { %v3437_v43 = vadd.f32 %v3248_v33, %v2939_v11  ;;  %v3438_v34 = vadd.f32 %v3250_v62, %v2940_v50  ;;  %v10374_v36 = vrot.slane %v7242_v46, 2  ;;  %v10375_v41 = vrot.slane %v7250_v57, 2 }
 0x177   : > { %v3893_v48 = vsel %vm1548_vm5, %v10372_v26, %v3892_v0  ;;  %v3895_v7 = vsel %vm1548_vm5, %v10373_v2, %v3894_v6  ;;  %v1392_v9 = vmul.f32 %v5742_v18, %v10369_v54  ;;  %v1393_v19 = vmul.f32 %v10254_v49, %v10370_v21 }
 0x178   : > { %v4391_v28 = vsel %vm2047_vm6, %v10374_v36, %v4390_v45  ;;  %v4393_v27 = vsel %vm2047_vm6, %v10375_v41, %v4392_v40  ;;  %v3584_v11 = vadd.f32 %v3520_v42, %v3437_v43  ;;  %v3585_v50 = vadd.f32 %v3521_v60, %v3438_v34 }
 0x179   : > { %v7380_v61 = vmul.f32 %v6953_v47, %v5742_v18  ;;  %v7384_v46 = vmul.f32 %v10254_v49, %v6947_v15  ;;  %v1891_v57 = vmul.f32 %v5752_v25, %v10369_v54  ;;  %v1892_v34 = vmul.f32 %v5760_v29, %v10370_v21 }
 0x17a   : > { %v4082_v42 = vadd.f32 %v3893_v48, %v3584_v11  ;;  %v4083_v60 = vadd.f32 %v3895_v7, %v3585_v50  ;;  %v1609_v33 = vrot.slane %v1392_v9, 1  ;;  %v1612_v37 = vrot.slane %v1393_v19, 1 }
 0x17b   : > { %v10066_v30 = vrot.slane %v7380_v61, 1  ;;  %v10064_v62 = vrot.slane %v7384_v46, 1  ;;  %v7394_v0 = vmul.f32 %v6953_v47, %v5752_v25  ;;  %v7398_v6 = vmul.f32 %v5760_v29, %v6947_v15 }
 0x17c   : > { %v4580_v54 = vadd.f32 %v4391_v28, %v4082_v42  ;;  %v4581_v45 = vadd.f32 %v4393_v27, %v4083_v60  ;;  %v2108_v21 = vrot.slane %v1891_v57, 2  ;;  %v2111_v40 = vrot.slane %v1892_v34, 2  ;;  %v10376_v57 = vld [vmem:[#allocation9_spill] sm:$0xff]  ;;  %v10377_v42 = vld [vmem:[#allocation11_spill] sm:$0xff] }
 0x17d   : > { %v1611_v43 = vsel %vm1548_vm5, %v1609_v33, %v10066_v30  ;;  %v1614_v10 = vsel %vm1548_vm5, %v1612_v37, %v10064_v62  ;;  %v10062_v26 = vrot.slane %v7394_v0, 2  ;;  %v10061_v48 = vrot.slane %v7398_v6, 2 }
 0x17e   : > { %v5282_v2 = vpack.c.bf16 %v4581_v45, %v4580_v54  ;;  %v7409_v7 = vadd.f32 %v7271_v38, %v4580_v54  ;;  %v4907_v36 = vsel %vm615_vm0, %v4581_v45, 0.0  ;;  %v4977_v28 = vmul.f32 %v4580_v54, %v4580_v54 }
 0x17f   : > { %v7413_v41 = vadd.f32 %v4907_v36, %v7279_v1  ;;  %v4978_v27 = vmul.f32 %v4581_v45, %v4581_v45  ;;  %v1797_v11 = vadd.f32 %v1611_v43, %v1234_v59  ;;  %v1798_v50 = vadd.f32 %v1614_v10, %v1235_v5 }
 0x180   : > { %4828 = vst.msk [vmem:[%s5981_s12 + $0x58] sm:$0xff] %vm5985_vm9, %v5282_v2  ;;  %v7419_v9 = vadd.f32 %v7282_v56, %v4977_v28  ;;  %v2110_v38 = vsel %vm2047_vm6, %v2108_v21, %v10062_v26  ;;  %v2113_v19 = vsel %vm2047_vm6, %v2111_v40, %v10061_v48  ;;  %v2379_v1 = vmul.f32 %v10274_v55, %v10376_v57  ;;  %v7452_v28 = vld [vmem:[#allocation2 + $0x180] sm:$0xff]  ;;  %v7477_v48 = vld [vmem:[#allocation2 + $0x198] sm:$0xff] }
 0x181   : > { %v5077_v59 = vsel %vm615_vm0, %v4978_v27, 0.0  ;;  %v2296_v5 = vadd.f32 %v2110_v38, %v1797_v11  ;;  %v2297_v34 = vadd.f32 %v2113_v19, %v1798_v50  ;;  %v2380_v60 = vmul.f32 %v5802_v51, %v10377_v42  ;;  %10378 = vst [vmem:[#allocation17_spill] sm:$0xff] %v7452_v28  ;;  %v7454_v27 = vld [vmem:[#allocation2 + $0x188] sm:$0xff] }
 0x182   : > { %v7433_v56 = vadd.f32 %v5077_v59, %v7293_v17  ;;  %v2537_v33 = vmul.f32 %v5822_v3, %v10376_v57  ;;  %v2538_v37 = vmul.f32 %v5829_v20, %v10377_v42  ;;  %v7441_v54 = vmul.f32 %v7218_v31, %v5822_v3  ;;  %10379 = vst [vmem:[#allocation16_spill] sm:$0xff] %v7454_v27 }
 0x183   : > { %v2443_v45 = vadd.f32 %v2379_v1, %v2296_v5  ;;  %v2444_v21 = vadd.f32 %v2380_v60, %v2297_v34  ;;  %v7445_v40 = vmul.f32 %v5829_v20, %v7212_v14  ;;  %v3035_v17 = vmul.f32 %v5832_v23, %v10376_v57 }
 0x184   : > { %v2753_v43 = vrot.slane %v2537_v33, 1  ;;  %v10063_v10 = vrot.slane %v7441_v54, 1  ;;  %v2756_v2 = vrot.slane %v2538_v37, 1  ;;  %v3036_v36 = vmul.f32 %v5843_v32, %v10377_v42 }
 0x185   : > { %v10065_v11 = vrot.slane %v7445_v40, 1  ;;  %v7459_v50 = vmul.f32 %v7218_v31, %v5832_v23  ;;  %v7463_v38 = vmul.f32 %v5843_v32, %v7212_v14  ;;  %v3251_v19 = vrot.slane %v3035_v17, 2 }
 0x186   : > { %v2755_v1 = vsel %vm1548_vm5, %v2753_v43, %v10063_v10  ;;  %v3254_v59 = vrot.slane %v3036_v36, 2  ;;  %v3522_v5 = vmul.f32 %v5871_v63, %v7452_v28  ;;  %v3523_v34 = vmul.f32 %v5882_v35, %v7454_v27  ;;  %v7483_v10 = vld [vmem:[#allocation2 + $0x190] sm:$0xff] }
 0x187   : > { %v2758_v60 = vsel %vm1548_vm5, %v2756_v2, %v10065_v11  ;;  %v2941_v33 = vadd.f32 %v2755_v1, %v2443_v45  ;;  %v10071_v37 = vrot.slane %v7459_v50, 2  ;;  %v10070_v17 = vrot.slane %v7463_v38, 2 }
 0x188   : > { %v2942_v26 = vadd.f32 %v2758_v60, %v2444_v21  ;;  %v3680_v43 = vmul.f32 %v5900_v58, %v7452_v28  ;;  %v3681_v36 = vmul.f32 %v10286_v13, %v7454_v27  ;;  %v7487_v62 = vmul.f32 %v7483_v10, %v5900_v58 }
 0x189   : > { %v3253_v45 = vsel %vm2047_vm6, %v3251_v19, %v10071_v37  ;;  %v3256_v21 = vsel %vm2047_vm6, %v3254_v59, %v10070_v17  ;;  %v7497_v2 = vmul.f32 %v10286_v13, %v7477_v48  ;;  %v4178_v1 = vmul.f32 %v5910_v8, %v7452_v28 }
 0x18a   : > { %v3439_v60 = vadd.f32 %v3253_v45, %v2941_v33  ;;  %v3440_v11 = vadd.f32 %v3256_v21, %v2942_v26  ;;  %v3896_v30 = vrot.slane %v3680_v43, 1  ;;  %v10079_v42 = vrot.slane %v7487_v62, 1 }
 0x18b   : > { %v3899_v57 = vrot.slane %v3681_v36, 1  ;;  %v10077_v12 = vrot.slane %v7497_v2, 1  ;;  %v4179_v19 = vmul.f32 %v5922_v16, %v7454_v27  ;;  %v7507_v59 = vmul.f32 %v7483_v10, %v5910_v8 }
 0x18c   : > { %v3586_v17 = vadd.f32 %v3522_v5, %v3439_v60  ;;  %v3587_v37 = vadd.f32 %v3523_v34, %v3440_v11  ;;  %v3898_v33 = vsel %vm1548_vm5, %v3896_v30, %v10079_v42  ;;  %v7514_v26 = vmul.f32 %v5922_v16, %v7477_v48 }
 0x18d   : > { %v3901_v43 = vsel %vm1548_vm5, %v3899_v57, %v10077_v12  ;;  %v4394_v36 = vrot.slane %v4178_v1, 2  ;;  %v10076_v45 = vrot.slane %v7507_v59, 2  ;;  %v4397_v21 = vrot.slane %v4179_v19, 2 }
 0x18e   : > { %v4084_v27 = vadd.f32 %v3898_v33, %v3586_v17  ;;  %v4085_v28 = vadd.f32 %v3901_v43, %v3587_v37  ;;  %v10078_v11 = vrot.slane %v7514_v26, 2  ;;  %v1236_v5 = vmul.f32 %v6953_v47, %v5717_v52 }
 0x18f   : > { %v4396_v30 = vsel %vm2047_vm6, %v4394_v36, %v10076_v45  ;;  %v1237_v34 = vmul.f32 %v5720_v53, %v6947_v15  ;;  %v1396_v57 = vmul.f32 %v5742_v18, %v10361_v4  ;;  %v1397_v1 = vmul.f32 %v10254_v49, %v10362_v22 }
 0x190   : > { %v4399_v37 = vsel %vm2047_vm6, %v4397_v21, %v10078_v11  ;;  %v4582_v17 = vadd.f32 %v4396_v30, %v4084_v27  ;;  %v1895_v47 = vmul.f32 %v5752_v25, %v10361_v4  ;;  %v1896_v60 = vmul.f32 %v5760_v29, %v10362_v22 }
 0x191   : > { %v4583_v19 = vadd.f32 %v4399_v37, %v4085_v28  ;;  %v1615_v15 = vrot.slane %v1396_v57, 1  ;;  %v1617_v33 = vrot.slane %v1397_v1, 1  ;;  %v2381_v43 = vmul.f32 %v7218_v31, %v10274_v55 }
 0x192   : > { %v7542_v36 = vadd.f32 %v7409_v7, %v4582_v17  ;;  %v4979_v45 = vmul.f32 %v4582_v17, %v4582_v17  ;;  %v2114_v12 = vrot.slane %v1895_v47, 2  ;;  %v2116_v21 = vrot.slane %v1896_v60, 2 }
 0x193   : > { %v5283_v27 = vpack.c.bf16 %v4583_v19, %v4582_v17  ;;  %v4909_v30 = vsel %vm615_vm0, %v4583_v19, 0.0  ;;  %v4980_v4 = vmul.f32 %v4583_v19, %v4583_v19  ;;  %v10380_v11 = vrot.slane %v7380_v61, 1 }
 0x194   : > { %v7549_v28 = vadd.f32 %v4909_v30, %v7413_v41  ;;  %v7552_v57 = vadd.f32 %v7419_v9, %v4979_v45  ;;  %v10381_v7 = vrot.slane %v7384_v46, 1  ;;  %v10382_v61 = vrot.slane %v7394_v0, 2 }
 0x195   : > { %v1616_v22 = vsel %vm1548_vm5, %v10380_v11, %v1615_v15  ;;  %4829 = vst.msk [vmem:[%s5981_s12 + $0x60] sm:$0xff] %vm5985_vm9, %v5283_v27  ;;  %v5079_v17 = vsel %vm615_vm0, %v4980_v4, 0.0  ;;  %v10383_v41 = vrot.slane %v7398_v6, 2  ;;  %v2541_v60 = vmul.f32 %v5822_v3, %v7332_v44  ;;  %v7586_v27 = vld [vmem:[#allocation2 + $0x1a8] sm:$0x3] }
 0x196   : > { %v1618_v1 = vsel %vm1548_vm5, %v10381_v7, %v1617_v33  ;;  %v1799_v37 = vadd.f32 %v1616_v22, %v1236_v5  ;;  %v2115_v11 = vsel %vm2047_vm6, %v10382_v61, %v2114_v12  ;;  %v7568_v45 = vadd.f32 %v5079_v17, %v7433_v56  ;;  %v7580_v56 = vld [vmem:[#allocation2 + $0x1a0] sm:$0x3]  ;;  %v264_v61 = vld [vmem:[%s5551_s28 + $0xd0] sm:$0xff] }
 0x197   : > { %v1800_v47 = vadd.f32 %v1618_v1, %v1237_v34  ;;  %v2117_v9 = vsel %vm2047_vm6, %v10383_v41, %v2116_v21  ;;  %v2382_v5 = vmul.f32 %v5802_v51, %v7212_v14  ;;  %v2542_v0 = vmul.f32 %v5829_v20, %v7334_v39 }
 0x198   : > { %v2298_v46 = vadd.f32 %v2115_v11, %v1799_v37  ;;  %v3039_v12 = vmul.f32 %v5832_v23, %v7332_v44  ;;  %v3040_v6 = vmul.f32 %v5843_v32, %v7334_v39  ;;  %v2759_v15 = vrot.slane %v2541_v60, 1 }
 0x199   : > { %v2299_v19 = vadd.f32 %v2117_v9, %v1800_v47  ;;  %v3524_v33 = vmul.f32 %v7483_v10, %v5871_v63  ;;  %v3525_v21 = vmul.f32 %v5882_v35, %v7477_v48  ;;  %v2761_v4 = vrot.slane %v2542_v0, 1 }
 0x19a   : > { %v2445_v34 = vadd.f32 %v2381_v43, %v2298_v46  ;;  %v3257_v22 = vrot.slane %v3039_v12, 2  ;;  %v3259_v7 = vrot.slane %v3040_v6, 2  ;;  %v10384_v1 = vrot.slane %v7441_v54, 1 }
 0x19b   : > { %v2446_v30 = vadd.f32 %v2382_v5, %v2299_v19  ;;  %v3684_v43 = vmul.f32 %v5900_v58, %v7580_v56  ;;  %v3685_v17 = vmul.f32 %v10286_v13, %v7586_v27  ;;  %v4182_v47 = vmul.f32 %v5910_v8, %v7580_v56 }
 0x19c   : > { %v2760_v37 = vsel %vm1548_vm5, %v10384_v1, %v2759_v15  ;;  %v10385_v11 = vrot.slane %v7445_v40, 1  ;;  %v10386_v54 = vrot.slane %v7459_v50, 2  ;;  %v10387_v5 = vrot.slane %v7463_v38, 2 }
 0x19d   : > { %v2943_v9 = vadd.f32 %v2760_v37, %v2445_v34  ;;  %v3902_v0 = vrot.slane %v3684_v43, 1  ;;  %v3904_v12 = vrot.slane %v3685_v17, 1  ;;  %v4183_v6 = vmul.f32 %v5922_v16, %v7586_v27 }
 0x19e   : > { %v2762_v41 = vsel %vm1548_vm5, %v10385_v11, %v2761_v4  ;;  %v3258_v46 = vsel %vm2047_vm6, %v10386_v54, %v3257_v22  ;;  %v3260_v60 = vsel %vm2047_vm6, %v10387_v5, %v3259_v7  ;;  %v4400_v1 = vrot.slane %v4182_v47, 2  ;;  %v265_v4 = vld [vmem:[%s5551_s28 + $0xd8] sm:$0xff] }
 0x19f   : > { %v2944_v19 = vadd.f32 %v2762_v41, %v2446_v30  ;;  %v3441_v15 = vadd.f32 %v3258_v46, %v2943_v9  ;;  %v322_v40 = vunpack.c.l.bf16 %v264_v61  ;;  %v323_v42 = vunpack.c.h.bf16 %v264_v61  ;;  %v10391_v11 = vld [vmem:[#allocation6_spill] sm:$0xff]  ;;  %v10392_v41 = vld [vmem:[#allocation4_spill] sm:$0xff] }
 0x1a0   : > { %v10388_v50 = vrot.slane %v7487_v62, 1  ;;  %v10389_v38 = vrot.slane %v7497_v2, 1  ;;  %v4402_v30 = vrot.slane %v4183_v6, 2  ;;  %v10390_v43 = vrot.slane %v7507_v59, 2 }
 0x1a1   : > { %v3442_v34 = vadd.f32 %v3260_v60, %v2944_v19  ;;  %v3588_v37 = vadd.f32 %v3524_v33, %v3441_v15  ;;  %v398_v47 = vmul.f32 %v10391_v11, %v322_v40  ;;  %v399_v61 = vmul.f32 %v10392_v41, %v323_v42  ;;  %v10394_v60 = vld [vmem:[#allocation7_spill] sm:$0xff] }
 0x1a2   : > { %v3903_v22 = vsel %vm1548_vm5, %v10388_v50, %v3902_v0  ;;  %v3905_v7 = vsel %vm1548_vm5, %v10389_v38, %v3904_v12  ;;  %v4401_v17 = vsel %vm2047_vm6, %v10390_v43, %v4400_v1  ;;  %v10393_v54 = vrot.slane %v7514_v26, 2  ;;  %v10395_v0 = vld [vmem:[#allocation5_spill] sm:$0xff] }
 0x1a3   : > { %v3589_v9 = vadd.f32 %v3525_v21, %v3442_v34  ;;  %v324_v46 = vunpack.c.l.bf16 %v265_v4  ;;  %v325_v5 = vunpack.c.h.bf16 %v265_v4  ;;  %v4086_v2 = vadd.f32 %v3903_v22, %v3588_v37  ;;  %v10396_v12 = vld [vmem:[#allocation9_spill] sm:$0xff]  ;;  %v10397_v21 = vld [vmem:[#allocation11_spill] sm:$0xff] }
 0x1a4   : > { %v4403_v62 = vsel %vm2047_vm6, %v10393_v54, %v4402_v30  ;;  %v474_v19 = vadd.f32 %v10394_v60, %v398_v47  ;;  %v475_v33 = vadd.f32 %v10395_v0, %v399_v61  ;;  %v1238_v59 = vmul.f32 %v5717_v52, %v10396_v12 }
 0x1a5   : > { %v4087_v6 = vadd.f32 %v3905_v7, %v3589_v9  ;;  %v400_v15 = vmul.f32 %v10391_v11, %v324_v46  ;;  %v401_v42 = vmul.f32 %v10392_v41, %v325_v5  ;;  %v1239_v26 = vmul.f32 %v5720_v53, %v10397_v21 }
 0x1a6   : > { %v4584_v1 = vadd.f32 %v4401_v17, %v4086_v2  ;;  %v538_v40 = vmax.f32 %v474_v19, 0.0  ;;  %v539_v34 = vmax.f32 %v475_v33, 0.0  ;;  %v1398_v4 = vmul.f32 %v5742_v18, %v10396_v12 }
 0x1a7   : > { %v4585_v50 = vadd.f32 %v4403_v62, %v4087_v6  ;;  %v476_v22 = vadd.f32 %v10394_v60, %v400_v15  ;;  %v477_v38 = vadd.f32 %v10395_v0, %v401_v42  ;;  %v1399_v7 = vmul.f32 %v10254_v49, %v10397_v21 }
 0x1a8   : > { %v7639_v30 = vadd.f32 %v7542_v36, %v4584_v1  ;;  %v4981_v37 = vmul.f32 %v4584_v1, %v4584_v1  ;;  %v602_v43 = vmin.f32 %v538_v40, 6.0  ;;  %v603_v17 = vmin.f32 %v539_v34, 6.0 }
 0x1a9   : > { %v5284_v47 = vpack.c.bf16 %v4585_v50, %v4584_v1  ;;  %v4911_v61 = vsel %vm615_vm0, %v4585_v50, 0.0  ;;  %v4982_v9 = vmul.f32 %v4585_v50, %v4585_v50  ;;  %v540_v54 = vmax.f32 %v476_v22, 0.0 }
 0x1aa   : > { %v7643_v62 = vadd.f32 %v4911_v61, %v7549_v28  ;;  %v7646_v46 = vadd.f32 %v7552_v57, %v4981_v37  ;;  %v867_v5 = vrot.slane %v602_v43, 7  ;;  %v868_v2 = vrot.slane %v603_v17, 7 }
 0x1ab   : > { %4830 = vst.msk [vmem:[%s5981_s12 + $0x68] sm:$0xff] %vm5985_vm9, %v5284_v47  ;;  %v5081_v36 = vsel %vm615_vm0, %v4982_v9, 0.0  ;;  %v604_v19 = vmin.f32 %v540_v54, 6.0  ;;  %v541_v33 = vmax.f32 %v477_v38, 0.0  ;;  %v7654_v6 = vmul.f32 %v7218_v31, %v5742_v18 }
 0x1ac   : > { %v7657_v15 = vadd.f32 %v5081_v36, %v7568_v45  ;;  %1062 = vst [vmem:[#allocation2 + $0x2a0] sm:$0xfe] %v867_v5  ;;  %1063 = vst.msk [vmem:[#allocation2 + $0x2a8] sm:$0xfe] %vm983_vm2, %v868_v2  ;;  %v7662_v28 = vmul.f32 %v10254_v49, %v7212_v14  ;;  %v1619_v57 = vrot.slane %v1398_v4, 1  ;;  %v1622_v42 = vrot.slane %v1399_v7, 1 }
 0x1ad   : > { %v869_v1 = vrot.slane %v604_v19, 7  ;;  %v605_v40 = vmin.f32 %v541_v33, 6.0  ;;  %v10083_v34 = vrot.slane %v7654_v6, 1  ;;  %v1897_v50 = vmul.f32 %v5752_v25, %v10396_v12  ;;  %v10398_v36 = vld [vmem:[#allocation17_spill] sm:$0xff] }
 0x1ae   : > { %v10082_v22 = vrot.slane %v7662_v28, 1  ;;  %v1898_v45 = vmul.f32 %v5760_v29, %v10397_v21  ;;  %v7672_v38 = vmul.f32 %v7218_v31, %v5752_v25  ;;  %v7676_v4 = vmul.f32 %v5760_v29, %v7212_v14 }
 0x1af   : > { %v870_v7 = vsel %vm788_vm3, %v867_v5, %v869_v1  ;;  %1066 = vst [vmem:[#allocation2 + $0x2c0] sm:$0x1] %v869_v1  ;;  %v871_v37 = vrot.slane %v605_v40, 7  ;;  %v1621_v12 = vsel %vm1548_vm5, %v1619_v57, %v10083_v34  ;;  %v2118_v43 = vrot.slane %v1897_v50, 2  ;;  %v7740_v34 = vld [vmem:[#allocation2 + $0x1c8] sm:$0xff] }
 0x1b0   : > { %1064 = vst [vmem:[#allocation2 + $0x2b0] sm:$0xff] %v870_v7  ;;  %v1624_v21 = vsel %vm1548_vm5, %v1622_v42, %v10082_v22  ;;  %v1801_v17 = vadd.f32 %v1621_v12, %v1238_v59  ;;  %v10081_v47 = vrot.slane %v7672_v38, 2  ;;  %v2121_v61 = vrot.slane %v1898_v45, 2  ;;  %v10399_v59 = vld [vmem:[#allocation16_spill] sm:$0xff] }
 0x1b1   : > { %v872_v9 = vsel %vm788_vm3, %v868_v2, %v871_v37  ;;  %1067 = vst.msk [vmem:[#allocation2 + $0x2c8] sm:$0x1] %vm988_vm4, %v871_v37  ;;  %v1802_v54 = vadd.f32 %v1624_v21, %v1239_v26  ;;  %v10080_v5 = vrot.slane %v7676_v4, 2  ;;  %v2383_v19 = vmul.f32 %v10274_v55, %v10398_v36 }
 0x1b2   : > { %1065 = vst.msk [vmem:[#allocation2 + $0x2b8] sm:$0xff] %vm615_vm0, %v872_v9  ;;  %v2120_v33 = vsel %vm2047_vm6, %v2118_v43, %v10081_v47  ;;  %v2384_v57 = vmul.f32 %v5802_v51, %v10399_v59  ;;  %v2543_v2 = vmul.f32 %v5822_v3, %v10398_v36  ;;  %v2544_v26 = vmul.f32 %v5829_v20, %v10399_v59  ;;  %v7718_v9 = vld [vmem:[#allocation2 + $0x1b0] sm:$0xff] }
 0x1b3   : > { %v2123_v42 = vsel %vm2047_vm6, %v2121_v61, %v10080_v5  ;;  %v2300_v1 = vadd.f32 %v2120_v33, %v1801_v17  ;;  %v7706_v40 = vmul.f32 %v7483_v10, %v5822_v3  ;;  %v7710_v50 = vmul.f32 %v5829_v20, %v7477_v48  ;;  %10400 = vst [vmem:[#allocation18_spill] sm:$0xff] %v7718_v9 }
 0x1b4   : > { %v2301_v45 = vadd.f32 %v2123_v42, %v1802_v54  ;;  %v2763_v7 = vrot.slane %v2543_v2, 1  ;;  %v2766_v37 = vrot.slane %v2544_v26, 1  ;;  %v3041_v12 = vmul.f32 %v5832_v23, %v10398_v36 }
 0x1b5   : > { %v2447_v43 = vadd.f32 %v2383_v19, %v2300_v1  ;;  %v10085_v21 = vrot.slane %v7706_v40, 1  ;;  %v10084_v61 = vrot.slane %v7710_v50, 1  ;;  %v3042_v17 = vmul.f32 %v5843_v32, %v10399_v59  ;;  %v7736_v1 = vld [vmem:[#allocation2 + $0x1b8] sm:$0xff] }
 0x1b6   : > { %v2448_v33 = vadd.f32 %v2384_v57, %v2301_v45  ;;  %v7722_v5 = vmul.f32 %v7483_v10, %v5832_v23  ;;  %v7726_v54 = vmul.f32 %v5843_v32, %v7477_v48  ;;  %v3261_v2 = vrot.slane %v3041_v12, 2  ;;  %10401 = vst [vmem:[#allocation19_spill] sm:$0xff] %v7736_v1 }
 0x1b7   : > { %v2765_v19 = vsel %vm1548_vm5, %v2763_v7, %v10085_v21  ;;  %v2768_v26 = vsel %vm1548_vm5, %v2766_v37, %v10084_v61  ;;  %v3264_v42 = vrot.slane %v3042_v17, 2  ;;  %v3526_v57 = vmul.f32 %v5871_v63, %v7718_v9  ;;  %v7748_v61 = vld [vmem:[#allocation2 + $0x1c0] sm:$0xff] }
 0x1b8   : > { %v2945_v45 = vadd.f32 %v2765_v19, %v2447_v43  ;;  %v2946_v47 = vadd.f32 %v2768_v26, %v2448_v33  ;;  %v10093_v22 = vrot.slane %v7722_v5, 2  ;;  %v10092_v12 = vrot.slane %v7726_v54, 2 }
 0x1b9   : > { %v3527_v7 = vmul.f32 %v5882_v35, %v7736_v1  ;;  %v3686_v37 = vmul.f32 %v5900_v58, %v7718_v9  ;;  %v3687_v17 = vmul.f32 %v10286_v13, %v7736_v1  ;;  %v7752_v43 = vmul.f32 %v7748_v61, %v5900_v58 }
 0x1ba   : > { %v3263_v33 = vsel %vm2047_vm6, %v3261_v2, %v10093_v22  ;;  %v3266_v19 = vsel %vm2047_vm6, %v3264_v42, %v10092_v12  ;;  %v7762_v26 = vmul.f32 %v10286_v13, %v7740_v34  ;;  %v4184_v21 = vmul.f32 %v5910_v8, %v7718_v9 }
 0x1bb   : > { %v3443_v59 = vadd.f32 %v3263_v33, %v2945_v45  ;;  %v3444_v36 = vadd.f32 %v3266_v19, %v2946_v47  ;;  %v3906_v0 = vrot.slane %v3686_v37, 1  ;;  %v10101_v60 = vrot.slane %v7752_v43, 1 }
 0x1bc   : > { %v3909_v41 = vrot.slane %v3687_v17, 1  ;;  %v10099_v11 = vrot.slane %v7762_v26, 1  ;;  %v4185_v2 = vmul.f32 %v5922_v16, %v7736_v1  ;;  %v7772_v42 = vmul.f32 %v7748_v61, %v5910_v8 }
 0x1bd   : > { %v3590_v12 = vadd.f32 %v3526_v57, %v3443_v59  ;;  %v3591_v22 = vadd.f32 %v3527_v7, %v3444_v36  ;;  %v3908_v45 = vsel %vm1548_vm5, %v3906_v0, %v10101_v60  ;;  %v7779_v47 = vmul.f32 %v5922_v16, %v7740_v34 }
 0x1be   : > { %v3911_v37 = vsel %vm1548_vm5, %v3909_v41, %v10099_v11  ;;  %v4404_v17 = vrot.slane %v4184_v21, 2  ;;  %v10098_v33 = vrot.slane %v7772_v42, 2  ;;  %v4407_v19 = vrot.slane %v4185_v2, 2 }
 0x1bf   : > { %v4088_v1 = vadd.f32 %v3908_v45, %v3590_v12  ;;  %v4089_v9 = vadd.f32 %v3911_v37, %v3591_v22  ;;  %v10100_v36 = vrot.slane %v7779_v47, 2  ;;  %v1240_v59 = vmul.f32 %v7218_v31, %v5717_v52 }
 0x1c0   : > { %v4406_v0 = vsel %vm2047_vm6, %v4404_v17, %v10098_v33  ;;  %v1241_v57 = vmul.f32 %v5720_v53, %v7212_v14  ;;  %v1402_v41 = vmul.f32 %v5742_v18, %v7332_v44  ;;  %v1403_v21 = vmul.f32 %v10254_v49, %v7334_v39 }
 0x1c1   : > { %v4409_v22 = vsel %vm2047_vm6, %v4407_v19, %v10100_v36  ;;  %v4586_v12 = vadd.f32 %v4406_v0, %v4088_v1  ;;  %v1901_v31 = vmul.f32 %v5752_v25, %v7332_v44  ;;  %v1902_v7 = vmul.f32 %v5760_v29, %v7334_v39 }
 0x1c2   : > { %v4587_v2 = vadd.f32 %v4409_v22, %v4089_v9  ;;  %v1625_v14 = vrot.slane %v1402_v41, 1  ;;  %v1627_v45 = vrot.slane %v1403_v21, 1  ;;  %v2385_v37 = vmul.f32 %v7483_v10, %v10274_v55 }
 0x1c3   : > { %v7807_v17 = vadd.f32 %v7639_v30, %v4586_v12  ;;  %v4983_v33 = vmul.f32 %v4586_v12, %v4586_v12  ;;  %v2124_v11 = vrot.slane %v1901_v31, 2  ;;  %v2126_v19 = vrot.slane %v1902_v7, 2 }
 0x1c4   : > { %v5285_v1 = vpack.c.bf16 %v4587_v2, %v4586_v12  ;;  %v4913_v0 = vsel %vm615_vm0, %v4587_v2, 0.0  ;;  %v4984_v44 = vmul.f32 %v4587_v2, %v4587_v2  ;;  %v10402_v36 = vrot.slane %v7654_v6, 1 }
 0x1c5   : > { %v7814_v9 = vadd.f32 %v4913_v0, %v7643_v62  ;;  %v7817_v41 = vadd.f32 %v7646_v46, %v4983_v33  ;;  %v10403_v30 = vrot.slane %v7662_v28, 1  ;;  %v10404_v6 = vrot.slane %v7672_v38, 2 }
 0x1c6   : > { %v1626_v39 = vsel %vm1548_vm5, %v10402_v36, %v1625_v14  ;;  %4831 = vst.msk [vmem:[%s5981_s12 + $0x70] sm:$0xff] %vm5985_vm9, %v5285_v1  ;;  %v5083_v12 = vsel %vm615_vm0, %v4984_v44, 0.0  ;;  %v10405_v62 = vrot.slane %v7676_v4, 2  ;;  %v2547_v7 = vmul.f32 %v5822_v3, %v7580_v56  ;;  %v7851_v1 = vld [vmem:[#allocation2 + $0x1d8] sm:$0x3] }
 0x1c7   : > { %v1628_v21 = vsel %vm1548_vm5, %v10403_v30, %v1627_v45  ;;  %v1803_v22 = vadd.f32 %v1626_v39, %v1240_v59  ;;  %v2125_v36 = vsel %vm2047_vm6, %v10404_v6, %v2124_v11  ;;  %v7833_v33 = vadd.f32 %v5083_v12, %v7657_v15  ;;  %v7845_v15 = vld [vmem:[#allocation2 + $0x1d0] sm:$0x3]  ;;  %v266_v6 = vld [vmem:[%s5551_s28 + $0xe0] sm:$0xff] }
 0x1c8   : > { %v1804_v31 = vadd.f32 %v1628_v21, %v1241_v57  ;;  %v2127_v46 = vsel %vm2047_vm6, %v10405_v62, %v2126_v19  ;;  %v2386_v59 = vmul.f32 %v5802_v51, %v7477_v48  ;;  %v2548_v38 = vmul.f32 %v5829_v20, %v7586_v27 }
 0x1c9   : > { %v2302_v28 = vadd.f32 %v2125_v36, %v1803_v22  ;;  %v3045_v11 = vmul.f32 %v5832_v23, %v7580_v56  ;;  %v3046_v4 = vmul.f32 %v5843_v32, %v7586_v27  ;;  %v2769_v14 = vrot.slane %v2547_v7, 1 }
 0x1ca   : > { %v2303_v2 = vadd.f32 %v2127_v46, %v1804_v31  ;;  %v3528_v45 = vmul.f32 %v7748_v61, %v5871_v63  ;;  %v3529_v19 = vmul.f32 %v5882_v35, %v7740_v34  ;;  %v2771_v44 = vrot.slane %v2548_v38, 1 }
 0x1cb   : > { %v2449_v57 = vadd.f32 %v2385_v37, %v2302_v28  ;;  %v3267_v39 = vrot.slane %v3045_v11, 2  ;;  %v3269_v30 = vrot.slane %v3046_v4, 2  ;;  %v10406_v21 = vrot.slane %v7706_v40, 1 }
 0x1cc   : > { %v2450_v0 = vadd.f32 %v2386_v59, %v2303_v2  ;;  %v3690_v37 = vmul.f32 %v5900_v58, %v7845_v15  ;;  %v3691_v12 = vmul.f32 %v10286_v13, %v7851_v1  ;;  %v4188_v31 = vmul.f32 %v5910_v8, %v7845_v15 }
 0x1cd   : > { %v2770_v22 = vsel %vm1548_vm5, %v10406_v21, %v2769_v14  ;;  %v10407_v36 = vrot.slane %v7710_v50, 1  ;;  %v10408_v40 = vrot.slane %v7722_v5, 2  ;;  %v10409_v59 = vrot.slane %v7726_v54, 2 }
 0x1ce   : > { %v2947_v46 = vadd.f32 %v2770_v22, %v2449_v57  ;;  %v3912_v38 = vrot.slane %v3690_v37, 1  ;;  %v3914_v11 = vrot.slane %v3691_v12, 1  ;;  %v4189_v4 = vmul.f32 %v5922_v16, %v7851_v1 }
 0x1cf   : > { %v2772_v62 = vsel %vm1548_vm5, %v10407_v36, %v2771_v44  ;;  %v3268_v28 = vsel %vm2047_vm6, %v10408_v40, %v3267_v39  ;;  %v3270_v7 = vsel %vm2047_vm6, %v10409_v59, %v3269_v30  ;;  %v4410_v21 = vrot.slane %v4188_v31, 2  ;;  %v267_v44 = vld [vmem:[%s5551_s28 + $0xe8] sm:$0xff]  ;;  %v10413_v36 = vld [vmem:[#allocation6_spill] sm:$0xff] }
 0x1d0   : > { %v2948_v2 = vadd.f32 %v2772_v62, %v2450_v0  ;;  %v3445_v14 = vadd.f32 %v3268_v28, %v2947_v46  ;;  %v326_v50 = vunpack.c.l.bf16 %v266_v6  ;;  %v327_v60 = vunpack.c.h.bf16 %v266_v6  ;;  %v10414_v62 = vld [vmem:[#allocation4_spill] sm:$0xff] }
 0x1d1   : > { %v10410_v5 = vrot.slane %v7752_v43, 1  ;;  %v10411_v54 = vrot.slane %v7762_v26, 1  ;;  %v4412_v0 = vrot.slane %v4189_v4, 2  ;;  %v10412_v37 = vrot.slane %v7772_v42, 2 }
 0x1d2   : > { %v3446_v57 = vadd.f32 %v3270_v7, %v2948_v2  ;;  %v3592_v22 = vadd.f32 %v3528_v45, %v3445_v14  ;;  %v402_v31 = vmul.f32 %v10413_v36, %v326_v50  ;;  %v403_v6 = vmul.f32 %v10414_v62, %v327_v60  ;;  %v10416_v7 = vld [vmem:[#allocation7_spill] sm:$0xff] }
 0x1d3   : > { %v3913_v39 = vsel %vm1548_vm5, %v10410_v5, %v3912_v38  ;;  %v3915_v30 = vsel %vm1548_vm5, %v10411_v54, %v3914_v11  ;;  %v4411_v12 = vsel %vm2047_vm6, %v10412_v37, %v4410_v21  ;;  %v10415_v40 = vrot.slane %v7779_v47, 2  ;;  %v10417_v38 = vld [vmem:[#allocation5_spill] sm:$0xff] }
 0x1d4   : > { %v3593_v46 = vadd.f32 %v3529_v19, %v3446_v57  ;;  %v328_v28 = vunpack.c.l.bf16 %v267_v44  ;;  %v329_v59 = vunpack.c.h.bf16 %v267_v44  ;;  %v4090_v26 = vadd.f32 %v3913_v39, %v3592_v22  ;;  %v10418_v11 = vld [vmem:[#allocation17_spill] sm:$0xff]  ;;  %v10419_v19 = vld [vmem:[#allocation16_spill] sm:$0xff] }
 0x1d5   : > { %v4413_v43 = vsel %vm2047_vm6, %v10415_v40, %v4412_v0  ;;  %v478_v2 = vadd.f32 %v10416_v7, %v402_v31  ;;  %v479_v45 = vadd.f32 %v10417_v38, %v403_v6  ;;  %v1242_v42 = vmul.f32 %v5717_v52, %v10418_v11 }
 0x1d6   : > { %v4091_v4 = vadd.f32 %v3915_v30, %v3593_v46  ;;  %v404_v14 = vmul.f32 %v10413_v36, %v328_v28  ;;  %v405_v60 = vmul.f32 %v10414_v62, %v329_v59  ;;  %v1243_v47 = vmul.f32 %v5720_v53, %v10419_v19 }
 0x1d7   : > { %v4588_v21 = vadd.f32 %v4411_v12, %v4090_v26  ;;  %v542_v50 = vmax.f32 %v478_v2, 0.0  ;;  %v543_v57 = vmax.f32 %v479_v45, 0.0  ;;  %v1404_v44 = vmul.f32 %v5742_v18, %v10418_v11 }
 0x1d8   : > { %v4589_v5 = vadd.f32 %v4413_v43, %v4091_v4  ;;  %v480_v39 = vadd.f32 %v10416_v7, %v404_v14  ;;  %v481_v54 = vadd.f32 %v10417_v38, %v405_v60  ;;  %v1405_v30 = vmul.f32 %v10254_v49, %v10419_v19 }
 0x1d9   : > { %v7904_v0 = vadd.f32 %v7807_v17, %v4588_v21  ;;  %v4985_v22 = vmul.f32 %v4588_v21, %v4588_v21  ;;  %v606_v37 = vmin.f32 %v542_v50, 6.0  ;;  %v607_v12 = vmin.f32 %v543_v57, 6.0 }
 0x1da   : > { %v5286_v31 = vpack.c.bf16 %v4589_v5, %v4588_v21  ;;  %v4915_v6 = vsel %vm615_vm0, %v4589_v5, 0.0  ;;  %v4986_v46 = vmul.f32 %v4589_v5, %v4589_v5  ;;  %v544_v40 = vmax.f32 %v480_v39, 0.0 }
 0x1db   : > { %v7908_v43 = vadd.f32 %v4915_v6, %v7814_v9  ;;  %v7911_v28 = vadd.f32 %v7817_v41, %v4985_v22  ;;  %v873_v59 = vrot.slane %v606_v37, 7  ;;  %v874_v26 = vrot.slane %v607_v12, 7 }
 0x1dc   : > { %4832 = vst.msk [vmem:[%s5981_s12 + $0x78] sm:$0xff] %vm5985_vm9, %v5286_v31  ;;  %v5085_v17 = vsel %vm615_vm0, %v4986_v46, 0.0  ;;  %v608_v2 = vmin.f32 %v544_v40, 6.0  ;;  %v545_v45 = vmax.f32 %v481_v54, 0.0  ;;  %v7919_v4 = vmul.f32 %v7483_v10, %v5742_v18 }
 0x1dd   : > { %v7922_v14 = vadd.f32 %v5085_v17, %v7833_v33  ;;  %1068 = vst [vmem:[#allocation2 + $0x2d0] sm:$0xfe] %v873_v59  ;;  %1069 = vst.msk [vmem:[#allocation2 + $0x2d8] sm:$0xfe] %vm983_vm2, %v874_v26  ;;  %v7927_v9 = vmul.f32 %v10254_v49, %v7477_v48  ;;  %v1629_v41 = vrot.slane %v1404_v44, 1  ;;  %v1632_v60 = vrot.slane %v1405_v30, 1 }
 0x1de   : > { %v875_v21 = vrot.slane %v608_v2, 7  ;;  %v609_v50 = vmin.f32 %v545_v45, 6.0  ;;  %v10105_v57 = vrot.slane %v7919_v4, 1  ;;  %v1903_v5 = vmul.f32 %v5752_v25, %v10418_v11  ;;  %v10420_v17 = vld [vmem:[#allocation18_spill] sm:$0xff] }
 0x1df   : > { %v10104_v39 = vrot.slane %v7927_v9, 1  ;;  %v1904_v33 = vmul.f32 %v5760_v29, %v10419_v19  ;;  %v7937_v54 = vmul.f32 %v7483_v10, %v5752_v25  ;;  %v7941_v44 = vmul.f32 %v5760_v29, %v7477_v48 }
 0x1e0   : > { %v876_v30 = vsel %vm788_vm3, %v873_v59, %v875_v21  ;;  %1072 = vst [vmem:[#allocation2 + $0x2f0] sm:$0x1] %v875_v21  ;;  %v877_v22 = vrot.slane %v609_v50, 7  ;;  %v1631_v11 = vsel %vm1548_vm5, %v1629_v41, %v10105_v57  ;;  %v2128_v37 = vrot.slane %v1903_v5, 2  ;;  %v8005_v57 = vld [vmem:[#allocation2 + $0x1f8] sm:$0xff] }
 0x1e1   : > { %1070 = vst [vmem:[#allocation2 + $0x2e0] sm:$0xff] %v876_v30  ;;  %v1634_v19 = vsel %vm1548_vm5, %v1632_v60, %v10104_v39  ;;  %v1805_v12 = vadd.f32 %v1631_v11, %v1242_v42  ;;  %v10103_v31 = vrot.slane %v7937_v54, 2  ;;  %v2131_v6 = vrot.slane %v1904_v33, 2  ;;  %v10421_v42 = vld [vmem:[#allocation19_spill] sm:$0xff] }
 0x1e2   : > { %v878_v46 = vsel %vm788_vm3, %v874_v26, %v877_v22  ;;  %1073 = vst.msk [vmem:[#allocation2 + $0x2f8] sm:$0x1] %vm988_vm4, %v877_v22  ;;  %v1806_v40 = vadd.f32 %v1634_v19, %v1243_v47  ;;  %v10102_v59 = vrot.slane %v7941_v44, 2  ;;  %v2387_v2 = vmul.f32 %v10274_v55, %v10420_v17 }
 0x1e3   : > { %1071 = vst.msk [vmem:[#allocation2 + $0x2e8] sm:$0xff] %vm615_vm0, %v878_v46  ;;  %v2130_v45 = vsel %vm2047_vm6, %v2128_v37, %v10103_v31  ;;  %v2388_v41 = vmul.f32 %v5802_v51, %v10421_v42  ;;  %v2549_v26 = vmul.f32 %v5822_v3, %v10420_v17  ;;  %v2550_v47 = vmul.f32 %v5829_v20, %v10421_v42  ;;  %v7983_v46 = vld [vmem:[#allocation2 + $0x1e0] sm:$0xff] }
 0x1e4   : > { %v2133_v60 = vsel %vm2047_vm6, %v2131_v6, %v10102_v59  ;;  %v2304_v21 = vadd.f32 %v2130_v45, %v1805_v12  ;;  %v7971_v50 = vmul.f32 %v7748_v61, %v5822_v3  ;;  %v7975_v5 = vmul.f32 %v5829_v20, %v7740_v34  ;;  %10422 = vst [vmem:[#allocation15_spill] sm:$0xff] %v7983_v46 }
 0x1e5   : > { %v2305_v33 = vadd.f32 %v2133_v60, %v1806_v40  ;;  %v2773_v30 = vrot.slane %v2549_v26, 1  ;;  %v2776_v22 = vrot.slane %v2550_v47, 1  ;;  %v3047_v11 = vmul.f32 %v5832_v23, %v10420_v17 }
 0x1e6   : > { %v2451_v37 = vadd.f32 %v2387_v2, %v2304_v21  ;;  %v10107_v19 = vrot.slane %v7971_v50, 1  ;;  %v10106_v6 = vrot.slane %v7975_v5, 1  ;;  %v3048_v12 = vmul.f32 %v5843_v32, %v10421_v42  ;;  %v8001_v21 = vld [vmem:[#allocation2 + $0x1e8] sm:$0xff] }
 0x1e7   : > { %v2452_v45 = vadd.f32 %v2388_v41, %v2305_v33  ;;  %v7987_v59 = vmul.f32 %v7748_v61, %v5832_v23  ;;  %v7991_v40 = vmul.f32 %v5843_v32, %v7740_v34  ;;  %v3271_v26 = vrot.slane %v3047_v11, 2  ;;  %10423 = vst [vmem:[#allocation14_spill] sm:$0xff] %v8001_v21 }
 0x1e8   : > { %v2775_v2 = vsel %vm1548_vm5, %v2773_v30, %v10107_v19  ;;  %v2778_v47 = vsel %vm1548_vm5, %v2776_v22, %v10106_v6  ;;  %v3274_v60 = vrot.slane %v3048_v12, 2  ;;  %v3530_v41 = vmul.f32 %v5871_v63, %v7983_v46  ;;  %v8013_v6 = vld [vmem:[#allocation2 + $0x1f0] sm:$0xff] }
 0x1e9   : > { %v2949_v33 = vadd.f32 %v2775_v2, %v2451_v37  ;;  %v2950_v31 = vadd.f32 %v2778_v47, %v2452_v45  ;;  %v10115_v39 = vrot.slane %v7987_v59, 2  ;;  %v10114_v11 = vrot.slane %v7991_v40, 2 }
 0x1ea   : > { %v3531_v30 = vmul.f32 %v5882_v35, %v8001_v21  ;;  %v3692_v22 = vmul.f32 %v5900_v58, %v7983_v46  ;;  %v3693_v12 = vmul.f32 %v10286_v13, %v8001_v21  ;;  %v8017_v37 = vmul.f32 %v8013_v6, %v5900_v58 }
 0x1eb   : > { %v3273_v45 = vsel %vm2047_vm6, %v3271_v26, %v10115_v39  ;;  %v3276_v2 = vsel %vm2047_vm6, %v3274_v60, %v10114_v11  ;;  %v8027_v47 = vmul.f32 %v10286_v13, %v8005_v57  ;;  %v4190_v19 = vmul.f32 %v5910_v8, %v7983_v46 }
 0x1ec   : > { %v3447_v38 = vadd.f32 %v3273_v45, %v2949_v33  ;;  %v3448_v7 = vadd.f32 %v3276_v2, %v2950_v31  ;;  %v3916_v62 = vrot.slane %v3692_v22, 1  ;;  %v3917_v36 = vrot.slane %v8017_v37, 1 }
 0x1ed   : > { %v3919_v42 = vrot.slane %v3693_v12, 1  ;;  %v10121_v17 = vrot.slane %v8027_v47, 1  ;;  %v4191_v26 = vmul.f32 %v5922_v16, %v8001_v21  ;;  %v8037_v60 = vmul.f32 %v8013_v6, %v5910_v8 }
 0x1ee   : > { %v3594_v11 = vadd.f32 %v3530_v41, %v3447_v38  ;;  %v3595_v39 = vadd.f32 %v3531_v30, %v3448_v7  ;;  %v3918_v33 = vsel %vm1548_vm5, %v3916_v62, %v3917_v36  ;;  %v8044_v31 = vmul.f32 %v5922_v16, %v8005_v57 }
 0x1ef   : > { %v3921_v22 = vsel %vm1548_vm5, %v3919_v42, %v10121_v17  ;;  %v4414_v12 = vrot.slane %v4190_v19, 2  ;;  %v10120_v45 = vrot.slane %v8037_v60, 2  ;;  %v4417_v2 = vrot.slane %v4191_v26, 2 }
 0x1f0   : > { %v4092_v21 = vadd.f32 %v3918_v33, %v3594_v11  ;;  %v4093_v46 = vadd.f32 %v3921_v22, %v3595_v39  ;;  %v10122_v7 = vrot.slane %v8044_v31, 2  ;;  %v1244_v38 = vmul.f32 %v7483_v10, %v5717_v52 }
 0x1f1   : > { %v4416_v62 = vsel %vm2047_vm6, %v4414_v12, %v10120_v45  ;;  %v1245_v41 = vmul.f32 %v5720_v53, %v7477_v48  ;;  %v1408_v42 = vmul.f32 %v5742_v18, %v7580_v56  ;;  %v1409_v19 = vmul.f32 %v10254_v49, %v7586_v27 }
 0x1f2   : > { %v4419_v39 = vsel %vm2047_vm6, %v4417_v2, %v10122_v7  ;;  %v4590_v11 = vadd.f32 %v4416_v62, %v4092_v21  ;;  %v1907_v10 = vmul.f32 %v5752_v25, %v7580_v56  ;;  %v1908_v30 = vmul.f32 %v5760_v29, %v7586_v27 }
 0x1f3   : > { %v4591_v26 = vadd.f32 %v4419_v39, %v4093_v46  ;;  %v1635_v48 = vrot.slane %v1408_v42, 1  ;;  %v1637_v33 = vrot.slane %v1409_v19, 1  ;;  %v2389_v22 = vmul.f32 %v7748_v61, %v10274_v55 }
 0x1f4   : > { %v8072_v12 = vadd.f32 %v7904_v0, %v4590_v11  ;;  %v4987_v45 = vmul.f32 %v4590_v11, %v4590_v11  ;;  %v2134_v17 = vrot.slane %v1907_v10, 2  ;;  %v2136_v2 = vrot.slane %v1908_v30, 2 }
 0x1f5   : > { %v5287_v21 = vpack.c.bf16 %v4591_v26, %v4590_v11  ;;  %v4917_v62 = vsel %vm615_vm0, %v4591_v26, 0.0  ;;  %v4988_v56 = vmul.f32 %v4591_v26, %v4591_v26  ;;  %v10424_v7 = vrot.slane %v7919_v4, 1 }
 0x1f6   : > { %v8079_v46 = vadd.f32 %v4917_v62, %v7908_v43  ;;  %v8082_v42 = vadd.f32 %v7911_v28, %v4987_v45  ;;  %v10425_v0 = vrot.slane %v7927_v9, 1  ;;  %v10426_v4 = vrot.slane %v7937_v54, 2 }
 0x1f7   : > { %v1636_v27 = vsel %vm1548_vm5, %v10424_v7, %v1635_v48  ;;  %4833 = vst.msk [vmem:[%s5981_s12 + $0x80] sm:$0xff] %vm5985_vm9, %v5287_v21  ;;  %v5087_v11 = vsel %vm615_vm0, %v4988_v56, 0.0  ;;  %v10427_v43 = vrot.slane %v7941_v44, 2  ;;  %v2553_v30 = vmul.f32 %v5822_v3, %v7845_v15  ;;  %v8116_v21 = vld [vmem:[#allocation2 + $0x208] sm:$0x3] }
 0x1f8   : > { %v1638_v19 = vsel %vm1548_vm5, %v10425_v0, %v1637_v33  ;;  %v1807_v39 = vadd.f32 %v1636_v27, %v1244_v38  ;;  %v2135_v7 = vsel %vm2047_vm6, %v10426_v4, %v2134_v17  ;;  %v8098_v45 = vadd.f32 %v5087_v11, %v7922_v14 }
 0x1f9   : > { %v1808_v10 = vadd.f32 %v1638_v19, %v1245_v41  ;;  %v2137_v28 = vsel %vm2047_vm6, %v10427_v43, %v2136_v2  ;;  %v2390_v38 = vmul.f32 %v5802_v51, %v7740_v34  ;;  %v2554_v54 = vmul.f32 %v5829_v20, %v7851_v1  ;;  %v8110_v41 = vld [vmem:[#allocation2 + $0x200] sm:$0x3] }
 0x1fa   : > { %v2306_v9 = vadd.f32 %v2135_v7, %v1807_v39  ;;  %v3051_v17 = vmul.f32 %v5832_v23, %v7845_v15  ;;  %v3052_v44 = vmul.f32 %v5843_v32, %v7851_v1  ;;  %v2779_v48 = vrot.slane %v2553_v30, 1 }
 0x1fb   : > { %v2307_v26 = vadd.f32 %v2137_v28, %v1808_v10  ;;  %v3532_v33 = vmul.f32 %v8013_v6, %v5871_v63  ;;  %v3533_v2 = vmul.f32 %v5882_v35, %v8005_v57  ;;  %v2781_v56 = vrot.slane %v2554_v54, 1 }
 0x1fc   : > { %v2453_v14 = vadd.f32 %v2389_v22, %v2306_v9  ;;  %v3277_v27 = vrot.slane %v3051_v17, 2  ;;  %v3279_v0 = vrot.slane %v3052_v44, 2  ;;  %v10428_v19 = vrot.slane %v7971_v50, 1 }
 0x1fd   : > { %v2454_v62 = vadd.f32 %v2390_v38, %v2307_v26  ;;  %v3696_v22 = vmul.f32 %v5900_v58, %v8110_v41  ;;  %v3697_v11 = vmul.f32 %v10286_v13, %v8116_v21  ;;  %v4194_v10 = vmul.f32 %v5910_v8, %v8110_v41 }
 0x1fe   : > { %v2780_v39 = vsel %vm1548_vm5, %v10428_v19, %v2779_v48  ;;  %v10429_v4 = vrot.slane %v7975_v5, 1  ;;  %v10430_v28 = vrot.slane %v7987_v59, 2  ;;  %v10431_v9 = vrot.slane %v7991_v40, 2  ;;  %v10432_v5 = vld [vmem:[#allocation18_spill] sm:$0xff] }
 0x1ff   : > { %v2951_v43 = vadd.f32 %v2780_v39, %v2453_v14  ;;  %v3922_v26 = vrot.slane %v3696_v22, 1  ;;  %v3924_v54 = vrot.slane %v3697_v11, 1  ;;  %v4195_v17 = vmul.f32 %v5922_v16, %v8116_v21  ;;  %v10433_v14 = vld [vmem:[#allocation19_spill] sm:$0xff] }
 0x200   : > { %v2782_v7 = vsel %vm1548_vm5, %v10429_v4, %v2781_v56  ;;  %v3278_v50 = vsel %vm2047_vm6, %v10430_v28, %v3277_v27  ;;  %v3280_v38 = vsel %vm2047_vm6, %v10431_v9, %v3279_v0  ;;  %v4420_v48 = vrot.slane %v4194_v10, 2 }
 0x201   : > { %v2952_v30 = vadd.f32 %v2782_v7, %v2454_v62  ;;  %v3449_v44 = vadd.f32 %v3278_v50, %v2951_v43  ;;  %v1246_v56 = vmul.f32 %v5717_v52, %v10432_v5  ;;  %v1247_v59 = vmul.f32 %v5720_v53, %v10433_v14 }
 0x202   : > { %v3923_v40 = vsel %vm1548_vm5, %v3917_v36, %v3922_v26  ;;  %v10434_v62 = vrot.slane %v8027_v47, 1  ;;  %v4422_v0 = vrot.slane %v4195_v17, 2  ;;  %v10435_v22 = vrot.slane %v8037_v60, 2 }
 0x203   : > { %v3450_v19 = vadd.f32 %v3280_v38, %v2952_v30  ;;  %v3596_v39 = vadd.f32 %v3532_v33, %v3449_v44  ;;  %v1410_v10 = vmul.f32 %v5742_v18, %v10432_v5  ;;  %v1411_v4 = vmul.f32 %v10254_v49, %v10433_v14 }
 0x204   : > { %v3925_v27 = vsel %vm1548_vm5, %v10434_v62, %v3924_v54  ;;  %v4421_v11 = vsel %vm2047_vm6, %v10435_v22, %v4420_v48  ;;  %v10436_v37 = vrot.slane %v8044_v31, 2  ;;  %v8160_v47 = vmul.f32 %v7748_v61, %v5742_v18 }
 0x205   : > { %v3597_v7 = vadd.f32 %v3533_v2, %v3450_v19  ;;  %v8164_v60 = vmul.f32 %v10254_v49, %v7740_v34  ;;  %v4094_v33 = vadd.f32 %v3923_v40, %v3596_v39  ;;  %v1639_v43 = vrot.slane %v1410_v10, 1 }
 0x206   : > { %v4423_v36 = vsel %vm2047_vm6, %v10436_v37, %v4422_v0  ;;  %v1642_v28 = vrot.slane %v1411_v4, 1  ;;  %v1909_v50 = vmul.f32 %v5752_v25, %v10432_v5  ;;  %v10129_v2 = vrot.slane %v8160_v47, 1  ;;  %v10437_v37 = vld [vmem:[#allocation15_spill] sm:$0xff] }
 0x207   : > { %v4095_v9 = vadd.f32 %v3925_v27, %v3597_v7  ;;  %v10128_v31 = vrot.slane %v8164_v60, 1  ;;  %v1910_v38 = vmul.f32 %v5760_v29, %v10433_v14  ;;  %v4592_v30 = vadd.f32 %v4421_v11, %v4094_v33 }
 0x208   : > { %v8174_v26 = vmul.f32 %v7748_v61, %v5752_v25  ;;  %v8178_v54 = vmul.f32 %v5760_v29, %v7740_v34  ;;  %v2138_v17 = vrot.slane %v1909_v50, 2  ;;  %v1641_v48 = vsel %vm1548_vm5, %v1639_v43, %v10129_v2 }
 0x209   : > { %v4593_v44 = vadd.f32 %v4423_v36, %v4095_v9  ;;  %v1644_v5 = vsel %vm1548_vm5, %v1642_v28, %v10128_v31  ;;  %v2141_v14 = vrot.slane %v1910_v38, 2  ;;  %v8187_v19 = vadd.f32 %v8072_v12, %v4592_v30  ;;  %v10438_v36 = vld [vmem:[#allocation14_spill] sm:$0xff] }
 0x20a   : > { %v4989_v40 = vmul.f32 %v4592_v30, %v4592_v30  ;;  %v1809_v62 = vadd.f32 %v1641_v48, %v1246_v56  ;;  %v1810_v27 = vadd.f32 %v1644_v5, %v1247_v59  ;;  %v10127_v11 = vrot.slane %v8174_v26, 2 }
 0x20b   : > { %v5288_v0 = vpack.c.bf16 %v4593_v44, %v4592_v30  ;;  %v4919_v39 = vsel %vm615_vm0, %v4593_v44, 0.0  ;;  %v4990_v22 = vmul.f32 %v4593_v44, %v4593_v44  ;;  %v10123_v7 = vrot.slane %v8178_v54, 2 }
 0x20c   : > { %v8192_v10 = vadd.f32 %v4919_v39, %v8079_v46  ;;  %v8195_v4 = vadd.f32 %v8082_v42, %v4989_v40  ;;  %v2391_v12 = vmul.f32 %v10274_v55, %v10437_v37  ;;  %v2140_v59 = vsel %vm2047_vm6, %v2138_v17, %v10127_v11  ;;  %v8239_v39 = vld [vmem:[#allocation2 + $0x218] sm:$0xff] }
 0x20d   : > { %4834 = vst.msk [vmem:[%s5981_s12 + $0x88] sm:$0xff] %vm5985_vm9, %v5288_v0  ;;  %v5089_v56 = vsel %vm615_vm0, %v4990_v22, 0.0  ;;  %v2392_v46 = vmul.f32 %v5802_v51, %v10438_v36  ;;  %v2555_v42 = vmul.f32 %v5822_v3, %v10437_v37  ;;  %v2143_v43 = vsel %vm2047_vm6, %v2141_v14, %v10123_v7  ;;  %v8231_v14 = vld [vmem:[#allocation2 + $0x210] sm:$0xff]  ;;  %10440 = vst [vmem:[#allocation8_spill] sm:$0xff] %v8239_v39 }
 0x20e   : > { %v8212_v33 = vadd.f32 %v5089_v56, %v8098_v45  ;;  %v2308_v28 = vadd.f32 %v2140_v59, %v1809_v62  ;;  %v2556_v50 = vmul.f32 %v5829_v20, %v10438_v36  ;;  %v2309_v9 = vadd.f32 %v2143_v43, %v1810_v27  ;;  %10439 = vst [vmem:[#allocation12_spill] sm:$0xff] %v8231_v14 }
 0x20f   : > { %v8221_v38 = vmul.f32 %v8013_v6, %v5822_v3  ;;  %v8225_v30 = vmul.f32 %v5829_v20, %v8005_v57  ;;  %v2783_v17 = vrot.slane %v2555_v42, 1  ;;  %v3053_v48 = vmul.f32 %v5832_v23, %v10437_v37 }
 0x210   : > { %v2455_v45 = vadd.f32 %v2391_v12, %v2308_v28  ;;  %v2786_v44 = vrot.slane %v2556_v50, 1  ;;  %v3054_v5 = vmul.f32 %v5843_v32, %v10438_v36  ;;  %v2456_v40 = vadd.f32 %v2392_v46, %v2309_v9  ;;  %v8256_v50 = vld [vmem:[#allocation2 + $0x228] sm:$0xff] }
 0x211   : > { %v10125_v62 = vrot.slane %v8221_v38, 1  ;;  %v10124_v27 = vrot.slane %v8225_v30, 1  ;;  %v8237_v0 = vmul.f32 %v8013_v6, %v5832_v23  ;;  %v8243_v22 = vmul.f32 %v5843_v32, %v8005_v57 }
 0x212   : > { %v3281_v12 = vrot.slane %v3053_v48, 2  ;;  %v3284_v56 = vrot.slane %v3054_v5, 2  ;;  %v3534_v59 = vmul.f32 %v5871_v63, %v8231_v14  ;;  %v3535_v28 = vmul.f32 %v5882_v35, %v8239_v39 }
 0x213   : > { %v2785_v46 = vsel %vm1548_vm5, %v2783_v17, %v10125_v62  ;;  %v2788_v42 = vsel %vm1548_vm5, %v2786_v44, %v10124_v27  ;;  %v10126_v43 = vrot.slane %v8237_v0, 2  ;;  %v10133_v5 = vrot.slane %v8243_v22, 2  ;;  %v8266_v27 = vld [vmem:[#allocation2 + $0x220] sm:$0xff] }
 0x214   : > { %v2953_v9 = vadd.f32 %v2785_v46, %v2455_v45  ;;  %v2954_v48 = vadd.f32 %v2788_v42, %v2456_v40  ;;  %v3698_v7 = vmul.f32 %v5900_v58, %v8231_v14  ;;  %v3699_v44 = vmul.f32 %v10286_v13, %v8239_v39 }
 0x215   : > { %v3283_v17 = vsel %vm2047_vm6, %v3281_v12, %v10126_v43  ;;  %v8270_v62 = vmul.f32 %v8266_v27, %v5900_v58  ;;  %v8274_v45 = vmul.f32 %v10286_v13, %v8256_v50  ;;  %v3286_v40 = vsel %vm2047_vm6, %v3284_v56, %v10133_v5 }
 0x216   : > { %v3451_v46 = vadd.f32 %v3283_v17, %v2953_v9  ;;  %v3926_v42 = vrot.slane %v3698_v7, 1  ;;  %v4196_v12 = vmul.f32 %v5910_v8, %v8231_v14  ;;  %v3452_v43 = vadd.f32 %v3286_v40, %v2954_v48 }
 0x217   : > { %v3927_v11 = vrot.slane %v8270_v62, 1  ;;  %v3929_v31 = vrot.slane %v3699_v44, 1  ;;  %v10138_v2 = vrot.slane %v8274_v45, 1  ;;  %v4197_v37 = vmul.f32 %v5922_v16, %v8239_v39 }
 0x218   : > { %v3598_v36 = vadd.f32 %v3534_v59, %v3451_v46  ;;  %v8287_v13 = vmul.f32 %v8266_v27, %v5910_v8  ;;  %v8291_v7 = vmul.f32 %v5922_v16, %v8256_v50  ;;  %v3599_v56 = vadd.f32 %v3535_v28, %v3452_v43 }
 0x219   : > { %v3928_v9 = vsel %vm1548_vm5, %v3926_v42, %v3927_v11  ;;  %v3931_v59 = vsel %vm1548_vm5, %v3929_v31, %v10138_v2  ;;  %v4424_v48 = vrot.slane %v4196_v12, 2  ;;  %v4427_v40 = vrot.slane %v4197_v37, 2 }
 0x21a   : > { %v4096_v17 = vadd.f32 %v3928_v9, %v3598_v36  ;;  %v10137_v44 = vrot.slane %v8287_v13, 2  ;;  %v10136_v46 = vrot.slane %v8291_v7, 2  ;;  %v4097_v5 = vadd.f32 %v3931_v59, %v3599_v56 }
 0x21b   : > { %v1248_v39 = vmul.f32 %v7748_v61, %v5717_v52  ;;  %v1249_v43 = vmul.f32 %v5720_v53, %v7740_v34  ;;  %v1414_v28 = vmul.f32 %v5742_v18, %v7845_v15  ;;  %v1415_v36 = vmul.f32 %v10254_v49, %v7851_v1 }
 0x21c   : > { %v4426_v31 = vsel %vm2047_vm6, %v4424_v48, %v10137_v44  ;;  %v4429_v37 = vsel %vm2047_vm6, %v4427_v40, %v10136_v46  ;;  %v1913_v61 = vmul.f32 %v5752_v25, %v7845_v15  ;;  %v1914_v56 = vmul.f32 %v5760_v29, %v7851_v1 }
 0x21d   : > { %v4594_v42 = vadd.f32 %v4426_v31, %v4096_v17  ;;  %v4595_v34 = vadd.f32 %v4429_v37, %v4097_v5  ;;  %v1645_v12 = vrot.slane %v1414_v28, 1  ;;  %v1647_v9 = vrot.slane %v1415_v36, 1 }
 0x21e   : > { %v2144_v59 = vrot.slane %v1913_v61, 2  ;;  %v2393_v48 = vmul.f32 %v8013_v6, %v10274_v55  ;;  %v2394_v40 = vmul.f32 %v5802_v51, %v8005_v57  ;;  %v10441_v1 = vrot.slane %v8160_v47, 1 }
 0x21f   : > { %v5289_v46 = vpack.c.bf16 %v4595_v34, %v4594_v42  ;;  %v8324_v44 = vadd.f32 %v8187_v19, %v4594_v42  ;;  %v4921_v15 = vsel %vm615_vm0, %v4595_v34, 0.0  ;;  %v4991_v17 = vmul.f32 %v4594_v42, %v4594_v42 }
 0x220   : > { %v8328_v5 = vadd.f32 %v4921_v15, %v8192_v10  ;;  %v4992_v28 = vmul.f32 %v4595_v34, %v4595_v34  ;;  %v1646_v31 = vsel %vm1548_vm5, %v10441_v1, %v1645_v12  ;;  %v10442_v37 = vrot.slane %v8164_v60, 1 }
 0x221   : > { %4835 = vst.msk [vmem:[%s5981_s12 + $0x90] sm:$0xff] %vm5985_vm9, %v5289_v46  ;;  %v8340_v19 = vadd.f32 %v8195_v4, %v4991_v17  ;;  %v1811_v61 = vadd.f32 %v1646_v31, %v1248_v39  ;;  %v10443_v10 = vrot.slane %v8174_v26, 2  ;;  %v2146_v15 = vrot.slane %v1914_v56, 2 }
 0x222   : > { %v1648_v36 = vsel %vm1548_vm5, %v10442_v37, %v1647_v9  ;;  %v5091_v47 = vsel %vm615_vm0, %v4992_v28, 0.0  ;;  %v2559_v60 = vmul.f32 %v5822_v3, %v8110_v41  ;;  %v2560_v12 = vmul.f32 %v5829_v20, %v8116_v21  ;;  %v8362_v28 = vld [vmem:[#allocation2 + $0x230] sm:$0x3] }
 0x223   : > { %v1812_v42 = vadd.f32 %v1648_v36, %v1249_v43  ;;  %v2145_v34 = vsel %vm2047_vm6, %v10443_v10, %v2144_v59  ;;  %v8351_v46 = vadd.f32 %v5091_v47, %v8212_v33  ;;  %v3057_v39 = vmul.f32 %v5832_v23, %v8110_v41 }
 0x224   : > { %v2310_v4 = vadd.f32 %v2145_v34, %v1811_v61  ;;  %v3058_v26 = vmul.f32 %v5843_v32, %v8116_v21  ;;  %v10444_v43 = vrot.slane %v8178_v54, 2  ;;  %v2789_v9 = vrot.slane %v2559_v60, 1 }
 0x225   : > { %v2791_v59 = vrot.slane %v2560_v12, 1  ;;  %v3536_v17 = vmul.f32 %v8266_v27, %v5871_v63  ;;  %v3287_v31 = vrot.slane %v3057_v39, 2  ;;  %v10445_v36 = vrot.slane %v8221_v38, 1  ;;  %v10450_v39 = vld [vmem:[#allocation13_spill] sm:$0xff] }
 0x226   : > { %v2147_v56 = vsel %vm2047_vm6, %v10444_v43, %v2146_v15  ;;  %v2457_v1 = vadd.f32 %v2393_v48, %v2310_v4  ;;  %v3289_v37 = vrot.slane %v3058_v26, 2  ;;  %v10446_v10 = vrot.slane %v8225_v30, 1  ;;  %v268_v15 = vld [vmem:[%s5551_s28 + $0xf0] sm:$0xff] }
 0x227   : > { %v2311_v33 = vadd.f32 %v2147_v56, %v1812_v42  ;;  %v2790_v61 = vsel %vm1548_vm5, %v10445_v36, %v2789_v9  ;;  %v3537_v34 = vmul.f32 %v5882_v35, %v8256_v50  ;;  %v3702_v47 = vmul.f32 %v5900_v58, %v8362_v28  ;;  %v8375_v42 = vld [vmem:[#allocation2 + $0x238] sm:$0x3] }
 0x228   : > { %v2792_v54 = vsel %vm1548_vm5, %v10446_v10, %v2791_v59  ;;  %10447 = vst [vmem:[#allocation10_spill] sm:$0xff] %v8375_v42  ;;  %v2955_v60 = vadd.f32 %v2790_v61, %v2457_v1  ;;  %v10448_v38 = vrot.slane %v8237_v0, 2  ;;  %v10449_v30 = vrot.slane %v8243_v22, 2  ;;  %v269_v1 = vld [vmem:[%s5551_s28 + $0xf8] sm:$0xff] }
 0x229   : > { %v2458_v48 = vadd.f32 %v2394_v40, %v2311_v33  ;;  %v3703_v26 = vmul.f32 %v10450_v39, %v8375_v42  ;;  %v3932_v43 = vrot.slane %v3702_v47, 1  ;;  %v4200_v56 = vmul.f32 %v5910_v8, %v8362_v28  ;;  %v10451_v47 = vld [vmem:[#allocation6_spill] sm:$0xff] }
 0x22a   : > { %v3288_v12 = vsel %vm2047_vm6, %v10448_v38, %v3287_v31  ;;  %v3290_v4 = vsel %vm2047_vm6, %v10449_v30, %v3289_v37  ;;  %v4201_v9 = vmul.f32 %v5922_v16, %v8375_v42  ;;  %v330_v33 = vunpack.c.l.bf16 %v268_v15  ;;  %v10452_v30 = vld [vmem:[#allocation4_spill] sm:$0xff] }
 0x22b   : > { %v2956_v40 = vadd.f32 %v2792_v54, %v2458_v48  ;;  %v3453_v59 = vadd.f32 %v3288_v12, %v2955_v60  ;;  %v331_v0 = vunpack.c.h.bf16 %v268_v15  ;;  %v3933_v22 = vsel %vm1548_vm5, %v3927_v11, %v3932_v43  ;;  %v10457_v43 = vld [vmem:[#allocation5_spill] sm:$0xff] }
 0x22c   : > { %v3934_v31 = vrot.slane %v3703_v26, 1  ;;  %v4430_v37 = vrot.slane %v4200_v56, 2  ;;  %v4432_v36 = vrot.slane %v4201_v9, 2  ;;  %v406_v38 = vmul.f32 %v10451_v47, %v330_v33 }
 0x22d   : > { %v3454_v61 = vadd.f32 %v3290_v4, %v2956_v40  ;;  %v3600_v10 = vadd.f32 %v3536_v17, %v3453_v59  ;;  %v407_v2 = vmul.f32 %v10452_v30, %v331_v0  ;;  %v10453_v42 = vrot.slane %v8274_v45, 1  ;;  %v10456_v17 = vld [vmem:[#allocation7_spill] sm:$0xff] }
 0x22e   : > { %v10454_v15 = vrot.slane %v8287_v13, 2  ;;  %v10455_v62 = vrot.slane %v8291_v7, 2  ;;  %v332_v60 = vunpack.c.l.bf16 %v269_v1  ;;  %v482_v26 = vadd.f32 %v10456_v17, %v406_v38  ;;  %v10458_v40 = vld [vmem:[#allocation15_spill] sm:$0xff]  ;;  %v10459_v13 = vld [vmem:[#allocation14_spill] sm:$0xff] }
 0x22f   : > { %v3935_v54 = vsel %vm1548_vm5, %v10453_v42, %v3934_v31  ;;  %v3601_v12 = vadd.f32 %v3537_v34, %v3454_v61  ;;  %v4098_v4 = vadd.f32 %v3933_v22, %v3600_v10  ;;  %v483_v56 = vadd.f32 %v10457_v43, %v407_v2 }
 0x230   : > { %v4431_v48 = vsel %vm2047_vm6, %v10454_v15, %v4430_v37  ;;  %v4433_v11 = vsel %vm2047_vm6, %v10455_v62, %v4432_v36  ;;  %v408_v9 = vmul.f32 %v10451_v47, %v332_v60  ;;  %v333_v45 = vunpack.c.h.bf16 %v269_v1 }
 0x231   : > { %v1250_v42 = vmul.f32 %v5717_v52, %v10458_v40  ;;  %v1251_v59 = vmul.f32 %v5720_v53, %v10459_v13  ;;  %v4099_v33 = vadd.f32 %v3935_v54, %v3601_v12  ;;  %v4596_v7 = vadd.f32 %v4431_v48, %v4098_v4 }
 0x232   : > { %v546_v0 = vmax.f32 %v482_v26, 0.0  ;;  %v547_v31 = vmax.f32 %v483_v56, 0.0  ;;  %v484_v34 = vadd.f32 %v10456_v17, %v408_v9  ;;  %v409_v22 = vmul.f32 %v10452_v30, %v333_v45 }
 0x233   : > { %v1416_v2 = vmul.f32 %v5742_v18, %v10458_v40  ;;  %v1417_v1 = vmul.f32 %v10254_v49, %v10459_v13  ;;  %v4597_v37 = vadd.f32 %v4433_v11, %v4099_v33  ;;  %v8418_v36 = vadd.f32 %v8324_v44, %v4596_v7 }
 0x234   : > { %v4993_v61 = vmul.f32 %v4596_v7, %v4596_v7  ;;  %v610_v10 = vmin.f32 %v546_v0, 6.0  ;;  %v611_v47 = vmin.f32 %v547_v31, 6.0  ;;  %v548_v38 = vmax.f32 %v484_v34, 0.0 }
 0x235   : > { %v485_v54 = vadd.f32 %v10457_v43, %v409_v22  ;;  %v8423_v30 = vmul.f32 %v8013_v6, %v5742_v18  ;;  %v5290_v15 = vpack.c.bf16 %v4597_v37, %v4596_v7  ;;  %v4923_v48 = vsel %vm615_vm0, %v4597_v37, 0.0 }
 0x236   : > { %v4994_v62 = vmul.f32 %v4597_v37, %v4597_v37  ;;  %v8427_v11 = vadd.f32 %v8340_v19, %v4993_v61  ;;  %v8430_v44 = vadd.f32 %v4923_v48, %v8328_v5  ;;  %v879_v60 = vrot.slane %v610_v10, 7  ;;  %v10460_v48 = vld [vmem:[#allocation8_spill] sm:$0xff] }
 0x237   : > { %v880_v12 = vrot.slane %v611_v47, 7  ;;  %v612_v4 = vmin.f32 %v548_v38, 6.0  ;;  %4836 = vst.msk [vmem:[%s5981_s12 + $0x98] sm:$0xff] %vm5985_vm9, %v5290_v15  ;;  %v549_v26 = vmax.f32 %v485_v54, 0.0  ;;  %v8438_v43 = vmul.f32 %v10254_v49, %v8005_v57 }
 0x238   : > { %v5093_v17 = vsel %vm615_vm0, %v4994_v62, 0.0  ;;  %v1649_v56 = vrot.slane %v1416_v2, 1  ;;  %1074 = vst [vmem:[#allocation2 + $0x300] sm:$0xfe] %v879_v60  ;;  %v10147_v9 = vrot.slane %v8423_v30, 1  ;;  %v1652_v45 = vrot.slane %v1417_v1, 1 }
 0x239   : > { %v8441_v19 = vadd.f32 %v5093_v17, %v8351_v46  ;;  %1075 = vst.msk [vmem:[#allocation2 + $0x308] sm:$0xfe] %vm983_vm2, %v880_v12  ;;  %v881_v5 = vrot.slane %v612_v4, 7  ;;  %v613_v33 = vmin.f32 %v549_v26, 6.0  ;;  %v10146_v7 = vrot.slane %v8438_v43, 1 }
 0x23a   : > { %v1915_v0 = vmul.f32 %v5752_v25, %v10458_v40  ;;  %v1916_v31 = vmul.f32 %v5760_v29, %v10459_v13  ;;  %v1651_v46 = vsel %vm1548_vm5, %v1649_v56, %v10147_v9  ;;  %v8456_v22 = vmul.f32 %v8013_v6, %v5752_v25 }
 0x23b   : > { %v882_v34 = vsel %vm788_vm3, %v879_v60, %v881_v5  ;;  %1078 = vst [vmem:[#allocation2 + $0x320] sm:$0x1] %v881_v5  ;;  %v8460_v2 = vmul.f32 %v5760_v29, %v8005_v57  ;;  %v883_v40 = vrot.slane %v613_v33, 7  ;;  %v1654_v13 = vsel %vm1548_vm5, %v1652_v45, %v10146_v7 }
 0x23c   : > { %1076 = vst [vmem:[#allocation2 + $0x310] sm:$0xff] %v882_v34  ;;  %v1813_v1 = vadd.f32 %v1651_v46, %v1250_v42  ;;  %v2148_v37 = vrot.slane %v1915_v0, 2  ;;  %v1814_v61 = vadd.f32 %v1654_v13, %v1251_v59  ;;  %v10145_v10 = vrot.slane %v8456_v22, 2 }
 0x23d   : > { %v2151_v47 = vrot.slane %v1916_v31, 2  ;;  %v10144_v38 = vrot.slane %v8460_v2, 2  ;;  %v884_v54 = vsel %vm788_vm3, %v880_v12, %v883_v40  ;;  %1079 = vst.msk [vmem:[#allocation2 + $0x328] sm:$0x1] %vm988_vm4, %v883_v40  ;;  %v2395_v15 = vmul.f32 %v10274_v55, %v8231_v14 }
 0x23e   : > { %v2396_v62 = vmul.f32 %v5802_v51, %v10460_v48  ;;  %v2561_v42 = vmul.f32 %v5822_v3, %v8231_v14  ;;  %1077 = vst.msk [vmem:[#allocation2 + $0x318] sm:$0xff] %vm615_vm0, %v884_v54  ;;  %v2150_v59 = vsel %vm2047_vm6, %v2148_v37, %v10145_v10  ;;  %v2562_v12 = vmul.f32 %v5829_v20, %v10460_v48 }
 0x23f   : > { %v2153_v60 = vsel %vm2047_vm6, %v2151_v47, %v10144_v38  ;;  %v8486_v4 = vmul.f32 %v8266_v27, %v5822_v3  ;;  %v2312_v17 = vadd.f32 %v2150_v59, %v1813_v1  ;;  %v8490_v56 = vmul.f32 %v5829_v20, %v8256_v50  ;;  %v8502_v1 = vld [vmem:[#allocation2 + $0x240] sm:$0xff] }
 0x240   : > { %v2313_v26 = vadd.f32 %v2153_v60, %v1814_v61  ;;  %v2793_v5 = vrot.slane %v2561_v42, 1  ;;  %v2796_v33 = vrot.slane %v2562_v12, 1  ;;  %v3059_v0 = vmul.f32 %v5832_v23, %v8231_v14  ;;  %10461 = vst [vmem:[#allocation9_spill] sm:$0xff] %v8502_v1  ;;  %v8519_v12 = vld [vmem:[#allocation2 + $0x258] sm:$0xff] }
 0x241   : > { %v10142_v45 = vrot.slane %v8486_v4, 1  ;;  %v3060_v31 = vmul.f32 %v5843_v32, %v10460_v48  ;;  %v2459_v34 = vadd.f32 %v2395_v15, %v2312_v17  ;;  %v10141_v40 = vrot.slane %v8490_v56, 1  ;;  %v8511_v15 = vld [vmem:[#allocation2 + $0x248] sm:$0xff] }
 0x242   : > { %v2460_v46 = vadd.f32 %v2396_v62, %v2313_v26  ;;  %v8500_v13 = vmul.f32 %v8266_v27, %v5832_v23  ;;  %v8509_v61 = vmul.f32 %v5843_v32, %v8256_v50  ;;  %v3291_v47 = vrot.slane %v3059_v0, 2  ;;  %10462 = vst [vmem:[#allocation11_spill] sm:$0xff] %v8511_v15 }
 0x243   : > { %v2795_v37 = vsel %vm1548_vm5, %v2793_v5, %v10142_v45  ;;  %v3294_v54 = vrot.slane %v3060_v31, 2  ;;  %v2798_v62 = vsel %vm1548_vm5, %v2796_v33, %v10141_v40  ;;  %v3538_v60 = vmul.f32 %v5871_v63, %v8502_v1 }
 0x244   : > { %v2957_v42 = vadd.f32 %v2795_v37, %v2459_v34  ;;  %v10143_v59 = vrot.slane %v8500_v13, 2  ;;  %v2958_v17 = vadd.f32 %v2798_v62, %v2460_v46  ;;  %v10151_v26 = vrot.slane %v8509_v61, 2  ;;  %v8531_v34 = vld [vmem:[#allocation2 + $0x250] sm:$0xff] }
 0x245   : > { %v3539_v5 = vmul.f32 %v5882_v35, %v8511_v15  ;;  %v3704_v0 = vmul.f32 %v5900_v58, %v8502_v1  ;;  %v3705_v31 = vmul.f32 %v10450_v39, %v8511_v15  ;;  %v8535_v46 = vmul.f32 %v8531_v34, %v5900_v58 }
 0x246   : > { %v3293_v33 = vsel %vm2047_vm6, %v3291_v47, %v10143_v59  ;;  %v8539_v37 = vmul.f32 %v10450_v39, %v8519_v12  ;;  %v3296_v62 = vsel %vm2047_vm6, %v3294_v54, %v10151_v26  ;;  %v4202_v47 = vmul.f32 %v5910_v8, %v8502_v1 }
 0x247   : > { %v3455_v40 = vadd.f32 %v3293_v33, %v2957_v42  ;;  %v3936_v45 = vrot.slane %v3704_v0, 1  ;;  %v3456_v59 = vadd.f32 %v3296_v62, %v2958_v17  ;;  %v3937_v38 = vrot.slane %v8535_v46, 1 }
 0x248   : > { %v3939_v10 = vrot.slane %v3705_v31, 1  ;;  %v3940_v7 = vrot.slane %v8539_v37, 1  ;;  %v4203_v48 = vmul.f32 %v5922_v16, %v8511_v15  ;;  %v8552_v14 = vmul.f32 %v8531_v34, %v5910_v8 }
 0x249   : > { %v3602_v9 = vadd.f32 %v3538_v60, %v3455_v40  ;;  %v8556_v54 = vmul.f32 %v5922_v16, %v8519_v12  ;;  %v3603_v42 = vadd.f32 %v3539_v5, %v3456_v59  ;;  %v3938_v17 = vsel %vm1548_vm5, %v3936_v45, %v3937_v38 }
 0x24a   : > { %v3941_v40 = vsel %vm1548_vm5, %v3939_v10, %v3940_v7  ;;  %v4434_v60 = vrot.slane %v4202_v47, 2  ;;  %v10155_v33 = vrot.slane %v8552_v14, 2  ;;  %v4437_v31 = vrot.slane %v4203_v48, 2 }
 0x24b   : > { %v4100_v0 = vadd.f32 %v3938_v17, %v3602_v9  ;;  %v10154_v62 = vrot.slane %v8556_v54, 2  ;;  %v4101_v26 = vadd.f32 %v3941_v40, %v3603_v42  ;;  %v1252_v15 = vmul.f32 %v8013_v6, %v5717_v52 }
 0x24c   : > { %v1253_v59 = vmul.f32 %v5720_v53, %v8005_v57  ;;  %v1420_v45 = vmul.f32 %v5742_v18, %v8110_v41  ;;  %v4436_v10 = vsel %vm2047_vm6, %v4434_v60, %v10155_v33  ;;  %v1421_v48 = vmul.f32 %v10254_v49, %v8116_v21 }
 0x24d   : > { %v4439_v9 = vsel %vm2047_vm6, %v4437_v31, %v10154_v62  ;;  %v1919_v6 = vmul.f32 %v5752_v25, %v8110_v41  ;;  %v4598_v5 = vadd.f32 %v4436_v10, %v4100_v0  ;;  %v1920_v42 = vmul.f32 %v5760_v29, %v8116_v21 }
 0x24e   : > { %v4599_v57 = vadd.f32 %v4439_v9, %v4101_v26  ;;  %v1655_v47 = vrot.slane %v1420_v45, 1  ;;  %v1657_v17 = vrot.slane %v1421_v48, 1  ;;  %v2397_v60 = vmul.f32 %v8266_v27, %v10274_v55 }
 0x24f   : > { %v2154_v40 = vrot.slane %v1919_v6, 2  ;;  %v2398_v31 = vmul.f32 %v5802_v51, %v8256_v50  ;;  %v8589_v33 = vadd.f32 %v8418_v36, %v4598_v5  ;;  %v4995_v0 = vmul.f32 %v4598_v5, %v4598_v5 }
 0x250   : > { %v5291_v62 = vpack.c.bf16 %v4599_v57, %v4598_v5  ;;  %v4925_v41 = vsel %vm615_vm0, %v4599_v57, 0.0  ;;  %v4996_v45 = vmul.f32 %v4599_v57, %v4599_v57  ;;  %v10463_v21 = vrot.slane %v8423_v30, 1 }
 0x251   : > { %v8593_v26 = vadd.f32 %v4925_v41, %v8430_v44  ;;  %v10464_v9 = vrot.slane %v8438_v43, 1  ;;  %v8605_v36 = vadd.f32 %v8427_v11, %v4995_v0  ;;  %v10465_v44 = vrot.slane %v8456_v22, 2 }
 0x252   : > { %v1656_v10 = vsel %vm1548_vm5, %v10463_v21, %v1655_v47  ;;  %4837 = vst.msk [vmem:[%s5981_s12 + $0xa0] sm:$0xff] %vm5985_vm9, %v5291_v62  ;;  %v5095_v30 = vsel %vm615_vm0, %v4996_v45, 0.0  ;;  %v2156_v41 = vrot.slane %v1920_v42, 2  ;;  %v2565_v43 = vmul.f32 %v5822_v3, %v8362_v28  ;;  %v10466_v47 = vld [vmem:[#allocation10_spill] sm:$0xff]  ;;  %v8627_v21 = vld [vmem:[#allocation2 + $0x260] sm:$0x3] }
 0x253   : > { %v1658_v48 = vsel %vm1548_vm5, %v10464_v9, %v1657_v17  ;;  %v1815_v6 = vadd.f32 %v1656_v10, %v1252_v15  ;;  %v2155_v57 = vsel %vm2047_vm6, %v10465_v44, %v2154_v40  ;;  %v2566_v17 = vmul.f32 %v5829_v20, %v10466_v47 }
 0x254   : > { %v1816_v5 = vadd.f32 %v1658_v48, %v1253_v59  ;;  %v8616_v62 = vadd.f32 %v5095_v30, %v8441_v19  ;;  %v3063_v15 = vmul.f32 %v5832_v23, %v8362_v28  ;;  %v3064_v22 = vmul.f32 %v5843_v32, %v10466_v47 }
 0x255   : > { %v2314_v11 = vadd.f32 %v2155_v57, %v1815_v6  ;;  %v10467_v59 = vrot.slane %v8460_v2, 2  ;;  %v2799_v40 = vrot.slane %v2565_v43, 1  ;;  %v2801_v0 = vrot.slane %v2566_v17, 1  ;;  %v8639_v43 = vld [vmem:[#allocation2 + $0x268] sm:$0x3] }
 0x256   : > { %v3540_v45 = vmul.f32 %v8531_v34, %v5871_v63  ;;  %v3297_v9 = vrot.slane %v3063_v15, 2  ;;  %v3299_v48 = vrot.slane %v3064_v22, 2  ;;  %v10468_v6 = vrot.slane %v8486_v4, 1 }
 0x257   : > { %v2157_v42 = vsel %vm2047_vm6, %v10467_v59, %v2156_v41  ;;  %v2461_v10 = vadd.f32 %v2397_v60, %v2314_v11  ;;  %v10469_v57 = vrot.slane %v8490_v56, 1  ;;  %v3541_v30 = vmul.f32 %v5882_v35, %v8519_v12 }
 0x258   : > { %v2315_v19 = vadd.f32 %v2157_v42, %v1816_v5  ;;  %v2800_v44 = vsel %vm1548_vm5, %v10468_v6, %v2799_v40  ;;  %v3708_v41 = vmul.f32 %v5900_v58, %v8627_v21  ;;  %v10470_v17 = vrot.slane %v8500_v13, 2 }
 0x259   : > { %v2802_v2 = vsel %vm1548_vm5, %v10469_v57, %v2801_v0  ;;  %v2959_v60 = vadd.f32 %v2800_v44, %v2461_v10  ;;  %v10471_v11 = vrot.slane %v8509_v61, 2  ;;  %v3709_v15 = vmul.f32 %v10450_v39, %v8639_v43  ;;  %v10472_v0 = vld [vmem:[#allocation12_spill] sm:$0xff] }
 0x25a   : > { %v2462_v5 = vadd.f32 %v2398_v31, %v2315_v19  ;;  %v3298_v4 = vsel %vm2047_vm6, %v10470_v17, %v3297_v9  ;;  %v3942_v22 = vrot.slane %v3708_v41, 1  ;;  %v4206_v59 = vmul.f32 %v5910_v8, %v8627_v21  ;;  %v10473_v19 = vld [vmem:[#allocation8_spill] sm:$0xff] }
 0x25b   : > { %v3300_v56 = vsel %vm2047_vm6, %v10471_v11, %v3299_v48  ;;  %v4207_v42 = vmul.f32 %v5922_v16, %v8639_v43  ;;  %v3457_v40 = vadd.f32 %v3298_v4, %v2959_v60  ;;  %v1254_v13 = vmul.f32 %v5717_v52, %v10472_v0 }
 0x25c   : > { %v2960_v31 = vadd.f32 %v2802_v2, %v2462_v5  ;;  %v1255_v61 = vmul.f32 %v5720_v53, %v10473_v19  ;;  %v3943_v10 = vsel %vm1548_vm5, %v3937_v38, %v3942_v22  ;;  %v3944_v9 = vrot.slane %v3709_v15, 1 }
 0x25d   : > { %v4440_v48 = vrot.slane %v4206_v59, 2  ;;  %v4442_v6 = vrot.slane %v4207_v42, 2  ;;  %v3604_v57 = vadd.f32 %v3540_v45, %v3457_v40  ;;  %v1422_v41 = vmul.f32 %v5742_v18, %v10472_v0 }
 0x25e   : > { %v3458_v44 = vadd.f32 %v3300_v56, %v2960_v31  ;;  %v1423_v2 = vmul.f32 %v10254_v49, %v10473_v19  ;;  %v3945_v5 = vsel %vm1548_vm5, %v3940_v7, %v3944_v9  ;;  %v10474_v60 = vrot.slane %v8552_v14, 2 }
 0x25f   : > { %v10475_v38 = vrot.slane %v8556_v54, 2  ;;  %v8675_v45 = vmul.f32 %v8266_v27, %v5742_v18  ;;  %v4102_v11 = vadd.f32 %v3943_v10, %v3604_v57  ;;  %v8679_v56 = vmul.f32 %v10254_v49, %v8256_v50 }
 0x260   : > { %v4441_v46 = vsel %vm2047_vm6, %v10474_v60, %v4440_v48  ;;  %v3605_v4 = vadd.f32 %v3541_v30, %v3458_v44  ;;  %v1659_v37 = vrot.slane %v1422_v41, 1  ;;  %v1662_v14 = vrot.slane %v1423_v2, 1 }
 0x261   : > { %v4443_v17 = vsel %vm2047_vm6, %v10475_v38, %v4442_v6  ;;  %v10161_v7 = vrot.slane %v8675_v45, 1  ;;  %v1921_v15 = vmul.f32 %v5752_v25, %v10472_v0  ;;  %v1922_v54 = vmul.f32 %v5760_v29, %v10473_v19 }
 0x262   : > { %v4103_v22 = vadd.f32 %v3945_v5, %v3605_v4  ;;  %v4600_v59 = vadd.f32 %v4441_v46, %v4102_v11  ;;  %v10160_v42 = vrot.slane %v8679_v56, 1  ;;  %v8689_v30 = vmul.f32 %v8266_v27, %v5752_v25 }
 0x263   : > { %v1661_v31 = vsel %vm1548_vm5, %v1659_v37, %v10161_v7  ;;  %v8696_v40 = vmul.f32 %v5760_v29, %v8256_v50  ;;  %v2158_v0 = vrot.slane %v1921_v15, 2  ;;  %v2161_v10 = vrot.slane %v1922_v54, 2 }
 0x264   : > { %v4601_v9 = vadd.f32 %v4443_v17, %v4103_v22  ;;  %v8699_v19 = vadd.f32 %v8589_v33, %v4600_v59  ;;  %v4997_v48 = vmul.f32 %v4600_v59, %v4600_v59  ;;  %v1664_v6 = vsel %vm1548_vm5, %v1662_v14, %v10160_v42 }
 0x265   : > { %v1817_v44 = vadd.f32 %v1661_v31, %v1254_v13  ;;  %v1818_v57 = vadd.f32 %v1664_v6, %v1255_v61  ;;  %v10158_v41 = vrot.slane %v8689_v30, 2  ;;  %v10156_v2 = vrot.slane %v8696_v40, 2 }
 0x266   : > { %v5292_v5 = vpack.c.bf16 %v4601_v9, %v4600_v59  ;;  %v4927_v60 = vsel %vm615_vm0, %v4601_v9, 0.0  ;;  %v4998_v46 = vmul.f32 %v4601_v9, %v4601_v9  ;;  %v8708_v38 = vadd.f32 %v8605_v36, %v4997_v48 }
 0x267   : > { %v8711_v33 = vadd.f32 %v4927_v60, %v8593_v26  ;;  %v2160_v17 = vsel %vm2047_vm6, %v2158_v0, %v10158_v41  ;;  %v2163_v13 = vsel %vm2047_vm6, %v2161_v10, %v10156_v2  ;;  %v2399_v61 = vmul.f32 %v10274_v55, %v8502_v1  ;;  %v10476_v26 = vld [vmem:[#allocation11_spill] sm:$0xff] }
 0x268   : > { %4838 = vst.msk [vmem:[%s5981_s12 + $0xa8] sm:$0xff] %vm5985_vm9, %v5292_v5  ;;  %v5097_v36 = vsel %vm615_vm0, %v4998_v46, 0.0  ;;  %v2316_v4 = vadd.f32 %v2160_v17, %v1817_v44  ;;  %v2317_v11 = vadd.f32 %v2163_v13, %v1818_v57  ;;  %v2400_v37 = vmul.f32 %v5802_v51, %v10476_v26  ;;  %v8747_v44 = vld [vmem:[#allocation2 + $0x270] sm:$0xff]  ;;  %v8749_v57 = vld [vmem:[#allocation2 + $0x278] sm:$0xff] }
 0x269   : > { %v8728_v14 = vadd.f32 %v5097_v36, %v8616_v62  ;;  %v2567_v15 = vmul.f32 %v5822_v3, %v8502_v1  ;;  %v2568_v54 = vmul.f32 %v5829_v20, %v10476_v26  ;;  %v8736_v22 = vmul.f32 %v8531_v34, %v5822_v3  ;;  %10477 = vst [vmem:[#allocation17_spill] sm:$0xff] %v8747_v44 }
 0x26a   : > { %v2463_v59 = vadd.f32 %v2399_v61, %v2316_v4  ;;  %v2464_v31 = vadd.f32 %v2400_v37, %v2317_v11  ;;  %v8740_v0 = vmul.f32 %v5829_v20, %v8519_v12  ;;  %v3065_v62 = vmul.f32 %v5832_v23, %v8502_v1  ;;  %10478 = vst [vmem:[#allocation16_spill] sm:$0xff] %v8749_v57 }
 0x26b   : > { %v2803_v10 = vrot.slane %v2567_v15, 1  ;;  %v10157_v9 = vrot.slane %v8736_v22, 1  ;;  %v2806_v48 = vrot.slane %v2568_v54, 1  ;;  %v3066_v6 = vmul.f32 %v5843_v32, %v10476_v26 }
 0x26c   : > { %v10159_v5 = vrot.slane %v8740_v0, 1  ;;  %v8754_v60 = vmul.f32 %v8531_v34, %v5832_v23  ;;  %v8758_v46 = vmul.f32 %v5843_v32, %v8519_v12  ;;  %v3301_v17 = vrot.slane %v3065_v62, 2  ;;  %v8772_v62 = vld [vmem:[#allocation2 + $0x288] sm:$0xff] }
 0x26d   : > { %v2805_v13 = vsel %vm1548_vm5, %v2803_v10, %v10157_v9  ;;  %v3304_v61 = vrot.slane %v3066_v6, 2  ;;  %v3542_v36 = vmul.f32 %v5871_v63, %v8747_v44  ;;  %v3543_v4 = vmul.f32 %v5882_v35, %v8749_v57  ;;  %v8778_v9 = vld [vmem:[#allocation2 + $0x280] sm:$0xff] }
 0x26e   : > { %v2808_v11 = vsel %vm1548_vm5, %v2806_v48, %v10159_v5  ;;  %v2961_v37 = vadd.f32 %v2805_v13, %v2463_v59  ;;  %v10166_v15 = vrot.slane %v8754_v60, 2  ;;  %v10165_v54 = vrot.slane %v8758_v46, 2 }
 0x26f   : > { %v2962_v2 = vadd.f32 %v2808_v11, %v2464_v31  ;;  %v3710_v10 = vmul.f32 %v5900_v58, %v8747_v44  ;;  %v3711_v6 = vmul.f32 %v10450_v39, %v8749_v57  ;;  %v8782_v41 = vmul.f32 %v8778_v9, %v5900_v58 }
 0x270   : > { %v3303_v59 = vsel %vm2047_vm6, %v3301_v17, %v10166_v15  ;;  %v3306_v31 = vsel %vm2047_vm6, %v3304_v61, %v10165_v54  ;;  %v8792_v48 = vmul.f32 %v10450_v39, %v8772_v62  ;;  %v4208_v13 = vmul.f32 %v5910_v8, %v8747_v44 }
 0x271   : > { %v3459_v11 = vadd.f32 %v3303_v59, %v2961_v37  ;;  %v3460_v5 = vadd.f32 %v3306_v31, %v2962_v2  ;;  %v3946_v42 = vrot.slane %v3710_v10, 1  ;;  %v3947_v7 = vrot.slane %v8782_v41, 1 }
 0x272   : > { %v3949_v26 = vrot.slane %v3711_v6, 1  ;;  %v10172_v1 = vrot.slane %v8792_v48, 1  ;;  %v4209_v17 = vmul.f32 %v5922_v16, %v8749_v57  ;;  %v8802_v61 = vmul.f32 %v8778_v9, %v5910_v8 }
 0x273   : > { %v3606_v54 = vadd.f32 %v3542_v36, %v3459_v11  ;;  %v3607_v15 = vadd.f32 %v3543_v4, %v3460_v5  ;;  %v3948_v37 = vsel %vm1548_vm5, %v3946_v42, %v3947_v7  ;;  %v8809_v2 = vmul.f32 %v5922_v16, %v8772_v62 }
 0x274   : > { %v3951_v10 = vsel %vm1548_vm5, %v3949_v26, %v10172_v1  ;;  %v4444_v6 = vrot.slane %v4208_v13, 2  ;;  %v10171_v59 = vrot.slane %v8802_v61, 2  ;;  %v4447_v31 = vrot.slane %v4209_v17, 2 }
 0x275   : > { %v4104_v57 = vadd.f32 %v3948_v37, %v3606_v54  ;;  %v4105_v44 = vadd.f32 %v3951_v10, %v3607_v15  ;;  %v10173_v5 = vrot.slane %v8809_v2, 2  ;;  %v1256_v36 = vmul.f32 %v8266_v27, %v5717_v52 }
 0x276   : > { %v4446_v42 = vsel %vm2047_vm6, %v4444_v6, %v10171_v59  ;;  %v1257_v4 = vmul.f32 %v5720_v53, %v8256_v50  ;;  %v1426_v26 = vmul.f32 %v5742_v18, %v8362_v28  ;;  %v1427_v13 = vmul.f32 %v10254_v49, %v10466_v47 }
 0x277   : > { %v4449_v15 = vsel %vm2047_vm6, %v4447_v31, %v10173_v5  ;;  %v4602_v54 = vadd.f32 %v4446_v42, %v4104_v57  ;;  %v1925_v27 = vmul.f32 %v5752_v25, %v8362_v28  ;;  %v1926_v11 = vmul.f32 %v5760_v29, %v10466_v47 }
 0x278   : > { %v4603_v17 = vadd.f32 %v4449_v15, %v4105_v44  ;;  %v1665_v50 = vrot.slane %v1426_v26, 1  ;;  %v1667_v37 = vrot.slane %v1427_v13, 1  ;;  %v2401_v10 = vmul.f32 %v8531_v34, %v10274_v55 }
 0x279   : > { %v8837_v6 = vadd.f32 %v8699_v19, %v4602_v54  ;;  %v4999_v59 = vmul.f32 %v4602_v54, %v4602_v54  ;;  %v2164_v1 = vrot.slane %v1925_v27, 2  ;;  %v2166_v31 = vrot.slane %v1926_v11, 2 }
 0x27a   : > { %v5293_v57 = vpack.c.bf16 %v4603_v17, %v4602_v54  ;;  %v4929_v42 = vsel %vm615_vm0, %v4603_v17, 0.0  ;;  %v5000_v28 = vmul.f32 %v4603_v17, %v4603_v17  ;;  %v10479_v5 = vrot.slane %v8675_v45, 1 }
 0x27b   : > { %v8844_v44 = vadd.f32 %v4929_v42, %v8711_v33  ;;  %v8847_v26 = vadd.f32 %v8708_v38, %v4999_v59  ;;  %v10480_v19 = vrot.slane %v8679_v56, 1  ;;  %v10481_v45 = vrot.slane %v8689_v30, 2 }
 0x27c   : > { %v1666_v47 = vsel %vm1548_vm5, %v10479_v5, %v1665_v50  ;;  %4839 = vst.msk [vmem:[%s5981_s12 + $0xb0] sm:$0xff] %vm5985_vm9, %v5293_v57  ;;  %v5099_v54 = vsel %vm615_vm0, %v5000_v28, 0.0  ;;  %v10482_v33 = vrot.slane %v8696_v40, 2  ;;  %v2571_v11 = vmul.f32 %v5822_v3, %v8627_v21  ;;  %v8881_v57 = vld [vmem:[#allocation2 + $0x298] sm:$0x3] }
 0x27d   : > { %v1668_v13 = vsel %vm1548_vm5, %v10480_v19, %v1667_v37  ;;  %v1819_v15 = vadd.f32 %v1666_v47, %v1256_v36  ;;  %v2165_v5 = vsel %vm2047_vm6, %v10481_v45, %v2164_v1  ;;  %v8863_v59 = vadd.f32 %v5099_v54, %v8728_v14 }
 0x27e   : > { %v1820_v27 = vadd.f32 %v1668_v13, %v1257_v4  ;;  %v2167_v38 = vsel %vm2047_vm6, %v10482_v33, %v2166_v31  ;;  %v2402_v36 = vmul.f32 %v5802_v51, %v8519_v12  ;;  %v2572_v30 = vmul.f32 %v5829_v20, %v8639_v43  ;;  %v8875_v4 = vld [vmem:[#allocation2 + $0x290] sm:$0x3] }
 0x27f   : > { %v2318_v56 = vadd.f32 %v2165_v5, %v1819_v15  ;;  %v3069_v1 = vmul.f32 %v5832_v23, %v8627_v21  ;;  %v3070_v40 = vmul.f32 %v5843_v32, %v8639_v43  ;;  %v2809_v50 = vrot.slane %v2571_v11, 1 }
 0x280   : > { %v2319_v17 = vadd.f32 %v2167_v38, %v1820_v27  ;;  %v3544_v37 = vmul.f32 %v8778_v9, %v5871_v63  ;;  %v3545_v31 = vmul.f32 %v5882_v35, %v8772_v62  ;;  %v2811_v28 = vrot.slane %v2572_v30, 1 }
 0x281   : > { %v2465_v14 = vadd.f32 %v2401_v10, %v2318_v56  ;;  %v3307_v47 = vrot.slane %v3069_v1, 2  ;;  %v3309_v19 = vrot.slane %v3070_v40, 2  ;;  %v10483_v13 = vrot.slane %v8736_v22, 1 }
 0x282   : > { %v2466_v42 = vadd.f32 %v2402_v36, %v2319_v17  ;;  %v3714_v10 = vmul.f32 %v5900_v58, %v8875_v4  ;;  %v3715_v54 = vmul.f32 %v10450_v39, %v8881_v57  ;;  %v4212_v27 = vmul.f32 %v5910_v8, %v8875_v4 }
 0x283   : > { %v2810_v15 = vsel %vm1548_vm5, %v10483_v13, %v2809_v50  ;;  %v10484_v45 = vrot.slane %v8740_v0, 1  ;;  %v10485_v38 = vrot.slane %v8754_v60, 2  ;;  %v10486_v56 = vrot.slane %v8758_v46, 2  ;;  %v10487_v0 = vld [vmem:[#allocation9_spill] sm:$0xff] }
 0x284   : > { %v2963_v33 = vadd.f32 %v2810_v15, %v2465_v14  ;;  %v3952_v17 = vrot.slane %v3714_v10, 1  ;;  %v3954_v30 = vrot.slane %v3715_v54, 1  ;;  %v4213_v1 = vmul.f32 %v5922_v16, %v8881_v57  ;;  %v10488_v14 = vld [vmem:[#allocation11_spill] sm:$0xff] }
 0x285   : > { %v2812_v5 = vsel %vm1548_vm5, %v10484_v45, %v2811_v28  ;;  %v3308_v22 = vsel %vm2047_vm6, %v10485_v38, %v3307_v47  ;;  %v3310_v36 = vsel %vm2047_vm6, %v10486_v56, %v3309_v19  ;;  %v4450_v50 = vrot.slane %v4212_v27, 2 }
 0x286   : > { %v2964_v11 = vadd.f32 %v2812_v5, %v2466_v42  ;;  %v3461_v40 = vadd.f32 %v3308_v22, %v2963_v33  ;;  %v1258_v28 = vmul.f32 %v5717_v52, %v10487_v0  ;;  %v1259_v60 = vmul.f32 %v5720_v53, %v10488_v14 }
 0x287   : > { %v3953_v46 = vsel %vm1548_vm5, %v3947_v7, %v3952_v17  ;;  %v10489_v42 = vrot.slane %v8792_v48, 1  ;;  %v4452_v19 = vrot.slane %v4213_v1, 2  ;;  %v10490_v10 = vrot.slane %v8802_v61, 2 }
 0x288   : > { %v3462_v13 = vadd.f32 %v3310_v36, %v2964_v11  ;;  %v3608_v15 = vadd.f32 %v3544_v37, %v3461_v40  ;;  %v1428_v27 = vmul.f32 %v5742_v18, %v10487_v0  ;;  %v1429_v45 = vmul.f32 %v10254_v49, %v10488_v14 }
 0x289   : > { %v3955_v47 = vsel %vm1548_vm5, %v10489_v42, %v3954_v30  ;;  %v4451_v54 = vsel %vm2047_vm6, %v10490_v10, %v4450_v50  ;;  %v10491_v41 = vrot.slane %v8809_v2, 2  ;;  %v8925_v48 = vmul.f32 %v8531_v34, %v5742_v18 }
 0x28a   : > { %v3609_v5 = vadd.f32 %v3545_v31, %v3462_v13  ;;  %v8929_v61 = vmul.f32 %v10254_v49, %v8519_v12  ;;  %v4106_v37 = vadd.f32 %v3953_v46, %v3608_v15  ;;  %v1669_v33 = vrot.slane %v1428_v27, 1 }
 0x28b   : > { %v4453_v7 = vsel %vm2047_vm6, %v10491_v41, %v4452_v19  ;;  %v1672_v38 = vrot.slane %v1429_v45, 1  ;;  %v1927_v22 = vmul.f32 %v5752_v25, %v10487_v0  ;;  %v10180_v31 = vrot.slane %v8925_v48, 1  ;;  %v10492_v41 = vld [vmem:[#allocation17_spill] sm:$0xff] }
 0x28c   : > { %v4107_v56 = vadd.f32 %v3955_v47, %v3609_v5  ;;  %v10179_v2 = vrot.slane %v8929_v61, 1  ;;  %v1928_v36 = vmul.f32 %v5760_v29, %v10488_v14  ;;  %v4604_v11 = vadd.f32 %v4451_v54, %v4106_v37 }
 0x28d   : > { %v8939_v17 = vmul.f32 %v8531_v34, %v5752_v25  ;;  %v8943_v30 = vmul.f32 %v5760_v29, %v8519_v12  ;;  %v2168_v1 = vrot.slane %v1927_v22, 2  ;;  %v1671_v50 = vsel %vm1548_vm5, %v1669_v33, %v10180_v31 }
 0x28e   : > { %v4605_v40 = vadd.f32 %v4453_v7, %v4107_v56  ;;  %v1674_v0 = vsel %vm1548_vm5, %v1672_v38, %v10179_v2  ;;  %v2171_v14 = vrot.slane %v1928_v36, 2  ;;  %v8952_v13 = vadd.f32 %v8837_v6, %v4604_v11  ;;  %v10493_v7 = vld [vmem:[#allocation16_spill] sm:$0xff] }
 0x28f   : > { %v5001_v46 = vmul.f32 %v4604_v11, %v4604_v11  ;;  %v1821_v42 = vadd.f32 %v1671_v50, %v1258_v28  ;;  %v1822_v47 = vadd.f32 %v1674_v0, %v1259_v60  ;;  %v10178_v54 = vrot.slane %v8939_v17, 2 }
 0x290   : > { %v5294_v19 = vpack.c.bf16 %v4605_v40, %v4604_v11  ;;  %v4931_v15 = vsel %vm615_vm0, %v4605_v40, 0.0  ;;  %v5002_v10 = vmul.f32 %v4605_v40, %v4605_v40  ;;  %v10174_v5 = vrot.slane %v8943_v30, 2 }
 0x291   : > { %v8957_v27 = vadd.f32 %v4931_v15, %v8844_v44  ;;  %v8960_v45 = vadd.f32 %v8847_v26, %v5001_v46  ;;  %v2403_v6 = vmul.f32 %v10274_v55, %v10492_v41  ;;  %v2170_v60 = vsel %vm2047_vm6, %v2168_v1, %v10178_v54  ;;  %v9004_v15 = vld [vmem:[#allocation2 + $0x2a8] sm:$0xff] }
 0x292   : > { %4840 = vst.msk [vmem:[%s5981_s12 + $0xb8] sm:$0xff] %vm5985_vm9, %v5294_v19  ;;  %v5101_v28 = vsel %vm615_vm0, %v5002_v10, 0.0  ;;  %v2404_v44 = vmul.f32 %v5802_v51, %v10493_v7  ;;  %v2573_v26 = vmul.f32 %v5822_v3, %v10492_v41  ;;  %v2173_v33 = vsel %vm2047_vm6, %v2171_v14, %v10174_v5  ;;  %v8996_v14 = vld [vmem:[#allocation2 + $0x2a0] sm:$0xff]  ;;  %10495 = vst [vmem:[#allocation19_spill] sm:$0xff] %v9004_v15 }
 0x293   : > { %v8977_v37 = vadd.f32 %v5101_v28, %v8863_v59  ;;  %v2320_v38 = vadd.f32 %v2170_v60, %v1821_v42  ;;  %v2574_v22 = vmul.f32 %v5829_v20, %v10493_v7  ;;  %v2321_v56 = vadd.f32 %v2173_v33, %v1822_v47  ;;  %10494 = vst [vmem:[#allocation18_spill] sm:$0xff] %v8996_v14 }
 0x294   : > { %v8986_v36 = vmul.f32 %v8778_v9, %v5822_v3  ;;  %v8990_v11 = vmul.f32 %v5829_v20, %v8772_v62  ;;  %v2813_v1 = vrot.slane %v2573_v26, 1  ;;  %v3071_v50 = vmul.f32 %v5832_v23, %v10492_v41 }
 0x295   : > { %v2467_v59 = vadd.f32 %v2403_v6, %v2320_v38  ;;  %v2816_v40 = vrot.slane %v2574_v22, 1  ;;  %v3072_v0 = vmul.f32 %v5843_v32, %v10493_v7  ;;  %v2468_v46 = vadd.f32 %v2404_v44, %v2321_v56  ;;  %v9021_v22 = vld [vmem:[#allocation2 + $0x2b8] sm:$0xff] }
 0x296   : > { %v10176_v42 = vrot.slane %v8986_v36, 1  ;;  %v10175_v47 = vrot.slane %v8990_v11, 1  ;;  %v9002_v19 = vmul.f32 %v8778_v9, %v5832_v23  ;;  %v9008_v10 = vmul.f32 %v5843_v32, %v8772_v62 }
 0x297   : > { %v3311_v6 = vrot.slane %v3071_v50, 2  ;;  %v3314_v28 = vrot.slane %v3072_v0, 2  ;;  %v3546_v60 = vmul.f32 %v5871_v63, %v8996_v14  ;;  %v3547_v38 = vmul.f32 %v5882_v35, %v9004_v15 }
 0x298   : > { %v2815_v44 = vsel %vm1548_vm5, %v2813_v1, %v10176_v42  ;;  %v2818_v26 = vsel %vm1548_vm5, %v2816_v40, %v10175_v47  ;;  %v10177_v33 = vrot.slane %v9002_v19, 2  ;;  %v10184_v0 = vrot.slane %v9008_v10, 2  ;;  %v9031_v47 = vld [vmem:[#allocation2 + $0x2b0] sm:$0xff] }
 0x299   : > { %v2965_v56 = vadd.f32 %v2815_v44, %v2467_v59  ;;  %v2966_v50 = vadd.f32 %v2818_v26, %v2468_v46  ;;  %v3716_v5 = vmul.f32 %v5900_v58, %v8996_v14  ;;  %v3717_v40 = vmul.f32 %v10450_v39, %v9004_v15 }
 0x29a   : > { %v3313_v1 = vsel %vm2047_vm6, %v3311_v6, %v10177_v33  ;;  %v9035_v42 = vmul.f32 %v9031_v47, %v5900_v58  ;;  %v9039_v59 = vmul.f32 %v10450_v39, %v9021_v22  ;;  %v3316_v46 = vsel %vm2047_vm6, %v3314_v28, %v10184_v0 }
 0x29b   : > { %v3463_v44 = vadd.f32 %v3313_v1, %v2965_v56  ;;  %v3956_v26 = vrot.slane %v3716_v5, 1  ;;  %v4214_v6 = vmul.f32 %v5910_v8, %v8996_v14  ;;  %v3464_v33 = vadd.f32 %v3316_v46, %v2966_v50 }
 0x29c   : > { %v3957_v54 = vrot.slane %v9035_v42, 1  ;;  %v3959_v2 = vrot.slane %v3717_v40, 1  ;;  %v3960_v31 = vrot.slane %v9039_v59, 1  ;;  %v4215_v41 = vmul.f32 %v5922_v16, %v9004_v15 }
 0x29d   : > { %v3610_v7 = vadd.f32 %v3546_v60, %v3463_v44  ;;  %v9052_v39 = vmul.f32 %v9031_v47, %v5910_v8  ;;  %v9056_v5 = vmul.f32 %v5922_v16, %v9021_v22  ;;  %v3611_v28 = vadd.f32 %v3547_v38, %v3464_v33 }
 0x29e   : > { %v3958_v56 = vsel %vm1548_vm5, %v3956_v26, %v3957_v54  ;;  %v3961_v60 = vsel %vm1548_vm5, %v3959_v2, %v3960_v31  ;;  %v4454_v50 = vrot.slane %v4214_v6, 2  ;;  %v4457_v46 = vrot.slane %v4215_v41, 2 }
 0x29f   : > { %v4108_v1 = vadd.f32 %v3958_v56, %v3610_v7  ;;  %v10188_v40 = vrot.slane %v9052_v39, 2  ;;  %v10187_v44 = vrot.slane %v9056_v5, 2  ;;  %v4109_v0 = vadd.f32 %v3961_v60, %v3611_v28 }
 0x2a0   : > { %v1260_v15 = vmul.f32 %v8531_v34, %v5717_v52  ;;  %v1261_v33 = vmul.f32 %v5720_v53, %v8519_v12  ;;  %v1432_v38 = vmul.f32 %v5742_v18, %v8627_v21  ;;  %v1433_v7 = vmul.f32 %v10254_v49, %v8639_v43 }
 0x2a1   : > { %v4456_v2 = vsel %vm2047_vm6, %v4454_v50, %v10188_v40  ;;  %v4459_v41 = vsel %vm2047_vm6, %v4457_v46, %v10187_v44  ;;  %v1931_v34 = vmul.f32 %v5752_v25, %v8627_v21  ;;  %v1932_v28 = vmul.f32 %v5760_v29, %v8639_v43 }
 0x2a2   : > { %v4606_v26 = vadd.f32 %v4456_v2, %v4108_v1  ;;  %v4607_v12 = vadd.f32 %v4459_v41, %v4109_v0  ;;  %v1675_v6 = vrot.slane %v1432_v38, 1  ;;  %v1677_v56 = vrot.slane %v1433_v7, 1 }
 0x2a3   : > { %v2174_v60 = vrot.slane %v1931_v34, 2  ;;  %v2405_v50 = vmul.f32 %v8778_v9, %v10274_v55  ;;  %v2406_v46 = vmul.f32 %v5802_v51, %v8772_v62  ;;  %v10496_v43 = vrot.slane %v8925_v48, 1 }
 0x2a4   : > { %v5295_v44 = vpack.c.bf16 %v4607_v12, %v4606_v26  ;;  %v9089_v40 = vadd.f32 %v8952_v13, %v4606_v26  ;;  %v4933_v21 = vsel %vm615_vm0, %v4607_v12, 0.0  ;;  %v5003_v1 = vmul.f32 %v4606_v26, %v4606_v26 }
 0x2a5   : > { %v9093_v0 = vadd.f32 %v4933_v21, %v8957_v27  ;;  %v5004_v38 = vmul.f32 %v4607_v12, %v4607_v12  ;;  %v1676_v2 = vsel %vm1548_vm5, %v10496_v43, %v1675_v6  ;;  %v10497_v41 = vrot.slane %v8929_v61, 1 }
 0x2a6   : > { %4841 = vst.msk [vmem:[%s5981_s12 + $0xc0] sm:$0xff] %vm5985_vm9, %v5295_v44  ;;  %v9105_v13 = vadd.f32 %v8960_v45, %v5003_v1  ;;  %v1823_v34 = vadd.f32 %v1676_v2, %v1260_v15  ;;  %v10498_v27 = vrot.slane %v8939_v17, 2  ;;  %v2176_v21 = vrot.slane %v1932_v28, 2 }
 0x2a7   : > { %v1678_v7 = vsel %vm1548_vm5, %v10497_v41, %v1677_v56  ;;  %v5103_v48 = vsel %vm615_vm0, %v5004_v38, 0.0  ;;  %v2577_v61 = vmul.f32 %v5822_v3, %v8875_v4  ;;  %v2578_v6 = vmul.f32 %v5829_v20, %v8881_v57  ;;  %v9127_v38 = vld [vmem:[#allocation2 + $0x2c0] sm:$0x3] }
 0x2a8   : > { %v1824_v26 = vadd.f32 %v1678_v7, %v1261_v33  ;;  %v2175_v12 = vsel %vm2047_vm6, %v10498_v27, %v2174_v60  ;;  %v9116_v44 = vadd.f32 %v5103_v48, %v8977_v37  ;;  %v3075_v15 = vmul.f32 %v5832_v23, %v8875_v4 }
 0x2a9   : > { %v2322_v45 = vadd.f32 %v2175_v12, %v1823_v34  ;;  %v3076_v17 = vmul.f32 %v5843_v32, %v8881_v57  ;;  %v10499_v33 = vrot.slane %v8943_v30, 2  ;;  %v2819_v56 = vrot.slane %v2577_v61, 1 }
 0x2aa   : > { %v2821_v60 = vrot.slane %v2578_v6, 1  ;;  %v3548_v1 = vmul.f32 %v9031_v47, %v5871_v63  ;;  %v3317_v2 = vrot.slane %v3075_v15, 2  ;;  %v10500_v7 = vrot.slane %v8986_v36, 1 }
 0x2ab   : > { %v2177_v28 = vsel %vm2047_vm6, %v10499_v33, %v2176_v21  ;;  %v2469_v43 = vadd.f32 %v2405_v50, %v2322_v45  ;;  %v3319_v41 = vrot.slane %v3076_v17, 2  ;;  %v10501_v27 = vrot.slane %v8990_v11, 1  ;;  %v9139_v21 = vld [vmem:[#allocation2 + $0x2c8] sm:$0x3]  ;;  %v10504_v45 = vld [vmem:[#allocation13_spill] sm:$0xff] }
 0x2ac   : > { %v2323_v37 = vadd.f32 %v2177_v28, %v1824_v26  ;;  %v2820_v34 = vsel %vm1548_vm5, %v10500_v7, %v2819_v56  ;;  %v3549_v12 = vmul.f32 %v5882_v35, %v9021_v22  ;;  %v3720_v48 = vmul.f32 %v5900_v58, %v9127_v38 }
 0x2ad   : > { %v2822_v30 = vsel %vm1548_vm5, %v10501_v27, %v2821_v60  ;;  %v2967_v50 = vadd.f32 %v2820_v34, %v2469_v43  ;;  %v10502_v61 = vrot.slane %v9002_v19, 2  ;;  %v10503_v6 = vrot.slane %v9008_v10, 2  ;;  %v10505_v60 = vld [vmem:[#allocation17_spill] sm:$0xff] }
 0x2ae   : > { %v2470_v26 = vadd.f32 %v2406_v46, %v2323_v37  ;;  %v3721_v15 = vmul.f32 %v10504_v45, %v9139_v21  ;;  %v3962_v17 = vrot.slane %v3720_v48, 1  ;;  %v4218_v33 = vmul.f32 %v5910_v8, %v9127_v38  ;;  %v10506_v37 = vld [vmem:[#allocation16_spill] sm:$0xff] }
 0x2af   : > { %v3318_v36 = vsel %vm2047_vm6, %v10502_v61, %v3317_v2  ;;  %v3320_v11 = vsel %vm2047_vm6, %v10503_v6, %v3319_v41  ;;  %v4219_v28 = vmul.f32 %v5922_v16, %v9139_v21  ;;  %v1262_v19 = vmul.f32 %v5717_v52, %v10505_v60 }
 0x2b0   : > { %v2968_v46 = vadd.f32 %v2822_v30, %v2470_v26  ;;  %v3465_v56 = vadd.f32 %v3318_v36, %v2967_v50  ;;  %v1263_v10 = vmul.f32 %v5720_v53, %v10506_v37  ;;  %v3963_v43 = vsel %vm1548_vm5, %v3957_v54, %v3962_v17 }
 0x2b1   : > { %v3964_v2 = vrot.slane %v3721_v15, 1  ;;  %v4460_v41 = vrot.slane %v4218_v33, 2  ;;  %v4462_v7 = vrot.slane %v4219_v28, 2  ;;  %v1434_v48 = vmul.f32 %v5742_v18, %v10505_v60 }
 0x2b2   : > { %v3466_v34 = vadd.f32 %v3320_v11, %v2968_v46  ;;  %v3612_v27 = vadd.f32 %v3548_v1, %v3465_v56  ;;  %v1435_v30 = vmul.f32 %v10254_v49, %v10506_v37  ;;  %v10507_v50 = vrot.slane %v9052_v39, 2 }
 0x2b3   : > { %v3965_v26 = vsel %vm1548_vm5, %v3960_v31, %v3964_v2  ;;  %v10508_v54 = vrot.slane %v9056_v5, 2  ;;  %v9175_v1 = vmul.f32 %v8778_v9, %v5742_v18  ;;  %v9179_v11 = vmul.f32 %v10254_v49, %v8772_v62 }
 0x2b4   : > { %v4461_v42 = vsel %vm2047_vm6, %v10507_v50, %v4460_v41  ;;  %v3613_v36 = vadd.f32 %v3549_v12, %v3466_v34  ;;  %v4110_v6 = vadd.f32 %v3963_v43, %v3612_v27  ;;  %v1679_v59 = vrot.slane %v1434_v48, 1 }
 0x2b5   : > { %v4463_v61 = vsel %vm2047_vm6, %v10508_v54, %v4462_v7  ;;  %v10194_v31 = vrot.slane %v9175_v1, 1  ;;  %v1682_v39 = vrot.slane %v1435_v30, 1  ;;  %v1933_v15 = vmul.f32 %v5752_v25, %v10505_v60 }
 0x2b6   : > { %v1934_v5 = vmul.f32 %v5760_v29, %v10506_v37  ;;  %v4111_v17 = vadd.f32 %v3965_v26, %v3613_v36  ;;  %v4608_v33 = vadd.f32 %v4461_v42, %v4110_v6  ;;  %v10193_v28 = vrot.slane %v9179_v11, 1 }
 0x2b7   : > { %v9189_v12 = vmul.f32 %v8778_v9, %v5752_v25  ;;  %v1681_v46 = vsel %vm1548_vm5, %v1679_v59, %v10194_v31  ;;  %v9196_v56 = vmul.f32 %v5760_v29, %v8772_v62  ;;  %v2178_v60 = vrot.slane %v1933_v15, 2 }
 0x2b8   : > { %v2181_v43 = vrot.slane %v1934_v5, 2  ;;  %v4609_v2 = vadd.f32 %v4463_v61, %v4111_v17  ;;  %v9199_v37 = vadd.f32 %v9089_v40, %v4608_v33  ;;  %v5005_v41 = vmul.f32 %v4608_v33, %v4608_v33 }
 0x2b9   : > { %v1684_v7 = vsel %vm1548_vm5, %v1682_v39, %v10193_v28  ;;  %v1825_v34 = vadd.f32 %v1681_v46, %v1262_v19  ;;  %v10191_v48 = vrot.slane %v9189_v12, 2  ;;  %v10189_v30 = vrot.slane %v9196_v56, 2 }
 0x2ba   : > { %v1826_v27 = vadd.f32 %v1684_v7, %v1263_v10  ;;  %v5296_v26 = vpack.c.bf16 %v4609_v2, %v4608_v33  ;;  %v4935_v50 = vsel %vm615_vm0, %v4609_v2, 0.0  ;;  %v5006_v42 = vmul.f32 %v4609_v2, %v4609_v2 }
 0x2bb   : > { %v9208_v54 = vadd.f32 %v9105_v13, %v5005_v41  ;;  %v9211_v40 = vadd.f32 %v4935_v50, %v9093_v0  ;;  %v2180_v61 = vsel %vm2047_vm6, %v2178_v60, %v10191_v48  ;;  %v2183_v19 = vsel %vm2047_vm6, %v2181_v43, %v10189_v30  ;;  %v10509_v0 = vld [vmem:[#allocation19_spill] sm:$0xff] }
 0x2bc   : > { %v2407_v10 = vmul.f32 %v10274_v55, %v8996_v14  ;;  %4842 = vst.msk [vmem:[%s5981_s12 + $0xc8] sm:$0xff] %vm5985_vm9, %v5296_v26  ;;  %v5105_v13 = vsel %vm615_vm0, %v5006_v42, 0.0  ;;  %v2324_v36 = vadd.f32 %v2180_v61, %v1825_v34  ;;  %v2325_v6 = vadd.f32 %v2183_v19, %v1826_v27  ;;  %v9247_v34 = vld [vmem:[#allocation2 + $0x2d0] sm:$0xff]  ;;  %v9249_v27 = vld [vmem:[#allocation2 + $0x2d8] sm:$0xff]  ;;  %v9260_v19 = vld [vmem:[#allocation2 + $0x2e8] sm:$0xff] }
 0x2bd   : > { %v2408_v59 = vmul.f32 %v5802_v51, %v10509_v0  ;;  %v9228_v39 = vadd.f32 %v5105_v13, %v9116_v44  ;;  %v2579_v15 = vmul.f32 %v5822_v3, %v8996_v14  ;;  %v2580_v5 = vmul.f32 %v5829_v20, %v10509_v0  ;;  %10510 = vst [vmem:[#allocation6_spill] sm:$0xff] %v9247_v34 }
 0x2be   : > { %v9236_v17 = vmul.f32 %v9031_v47, %v5822_v3  ;;  %v2471_v33 = vadd.f32 %v2407_v10, %v2324_v36  ;;  %v9240_v60 = vmul.f32 %v5829_v20, %v9021_v22  ;;  %v3077_v44 = vmul.f32 %v5832_v23, %v8996_v14  ;;  %10511 = vst [vmem:[#allocation4_spill] sm:$0xff] %v9249_v27 }
 0x2bf   : > { %v2472_v46 = vadd.f32 %v2408_v59, %v2325_v6  ;;  %v2823_v43 = vrot.slane %v2579_v15, 1  ;;  %v2826_v41 = vrot.slane %v2580_v5, 1  ;;  %v3078_v7 = vmul.f32 %v5843_v32, %v10509_v0 }
 0x2c0   : > { %v10190_v2 = vrot.slane %v9236_v17, 1  ;;  %v10192_v26 = vrot.slane %v9240_v60, 1  ;;  %v9254_v50 = vmul.f32 %v9031_v47, %v5832_v23  ;;  %v9258_v42 = vmul.f32 %v5843_v32, %v9021_v22 }
 0x2c1   : > { %v3321_v61 = vrot.slane %v3077_v44, 2  ;;  %v3324_v13 = vrot.slane %v3078_v7, 2  ;;  %v3550_v36 = vmul.f32 %v5871_v63, %v9247_v34  ;;  %v3551_v6 = vmul.f32 %v5882_v35, %v9249_v27 }
 0x2c2   : > { %v2825_v10 = vsel %vm1548_vm5, %v2823_v43, %v10190_v2  ;;  %v2828_v59 = vsel %vm1548_vm5, %v2826_v41, %v10192_v26  ;;  %v10199_v5 = vrot.slane %v9254_v50, 2  ;;  %v10198_v44 = vrot.slane %v9258_v42, 2  ;;  %v9278_v2 = vld [vmem:[#allocation2 + $0x2e0] sm:$0xff] }
 0x2c3   : > { %v2969_v15 = vadd.f32 %v2825_v10, %v2471_v33  ;;  %v2970_v30 = vadd.f32 %v2828_v59, %v2472_v46  ;;  %v3722_v43 = vmul.f32 %v5900_v58, %v9247_v34  ;;  %v3723_v7 = vmul.f32 %v10504_v45, %v9249_v27 }
 0x2c4   : > { %v9282_v48 = vmul.f32 %v9278_v2, %v5900_v58  ;;  %v3323_v33 = vsel %vm2047_vm6, %v3321_v61, %v10199_v5  ;;  %v3326_v46 = vsel %vm2047_vm6, %v3324_v13, %v10198_v44  ;;  %v9292_v41 = vmul.f32 %v10504_v45, %v9260_v19 }
 0x2c5   : > { %v4220_v10 = vmul.f32 %v5910_v8, %v9247_v34  ;;  %v3467_v59 = vadd.f32 %v3323_v33, %v2969_v15  ;;  %v3468_v26 = vadd.f32 %v3326_v46, %v2970_v30  ;;  %v3966_v28 = vrot.slane %v3722_v43, 1 }
 0x2c6   : > { %v3967_v31 = vrot.slane %v9282_v48, 1  ;;  %v3969_v0 = vrot.slane %v3723_v7, 1  ;;  %v10205_v14 = vrot.slane %v9292_v41, 1  ;;  %v4221_v61 = vmul.f32 %v5922_v16, %v9249_v27 }
 0x2c7   : > { %v9302_v13 = vmul.f32 %v9278_v2, %v5910_v8  ;;  %v3614_v44 = vadd.f32 %v3550_v36, %v3467_v59  ;;  %v3615_v5 = vadd.f32 %v3551_v6, %v3468_v26  ;;  %v9309_v30 = vmul.f32 %v5922_v16, %v9260_v19 }
 0x2c8   : > { %v3968_v15 = vsel %vm1548_vm5, %v3966_v28, %v3967_v31  ;;  %v3971_v43 = vsel %vm1548_vm5, %v3969_v0, %v10205_v14  ;;  %v4464_v7 = vrot.slane %v4220_v10, 2  ;;  %v4467_v46 = vrot.slane %v4221_v61, 2 }
 0x2c9   : > { %v10204_v33 = vrot.slane %v9302_v13, 2  ;;  %v4112_v27 = vadd.f32 %v3968_v15, %v3614_v44  ;;  %v4113_v34 = vadd.f32 %v3971_v43, %v3615_v5  ;;  %v10206_v26 = vrot.slane %v9309_v30, 2 }
 0x2ca   : > { %v1264_v36 = vmul.f32 %v8778_v9, %v5717_v52  ;;  %v1265_v6 = vmul.f32 %v5720_v53, %v8772_v62  ;;  %v1438_v0 = vmul.f32 %v5742_v18, %v8875_v4  ;;  %v1439_v10 = vmul.f32 %v10254_v49, %v8881_v57 }
 0x2cb   : > { %v4466_v28 = vsel %vm2047_vm6, %v4464_v7, %v10204_v33  ;;  %v4469_v5 = vsel %vm2047_vm6, %v4467_v46, %v10206_v26  ;;  %v1937_v9 = vmul.f32 %v5752_v25, %v8875_v4  ;;  %v1938_v59 = vmul.f32 %v5760_v29, %v8881_v57 }
 0x2cc   : > { %v4610_v44 = vadd.f32 %v4466_v28, %v4112_v27  ;;  %v4611_v61 = vadd.f32 %v4469_v5, %v4113_v34  ;;  %v1685_v62 = vrot.slane %v1438_v0, 1  ;;  %v1687_v15 = vrot.slane %v1439_v10, 1 }
 0x2cd   : > { %v2409_v43 = vmul.f32 %v9031_v47, %v10274_v55  ;;  %v2184_v14 = vrot.slane %v1937_v9, 2  ;;  %v2186_v46 = vrot.slane %v1938_v59, 2  ;;  %v10512_v26 = vrot.slane %v9175_v1, 1 }
 0x2ce   : > { %v9337_v7 = vadd.f32 %v9199_v37, %v4610_v44  ;;  %v5007_v33 = vmul.f32 %v4610_v44, %v4610_v44  ;;  %v5297_v27 = vpack.c.bf16 %v4611_v61, %v4610_v44  ;;  %v4937_v28 = vsel %vm615_vm0, %v4611_v61, 0.0 }
 0x2cf   : > { %v5008_v4 = vmul.f32 %v4611_v61, %v4611_v61  ;;  %v1686_v57 = vsel %vm1548_vm5, %v10512_v26, %v1685_v62  ;;  %v9344_v34 = vadd.f32 %v4937_v28, %v9211_v40  ;;  %v10513_v37 = vrot.slane %v9179_v11, 1  ;;  %v9369_v61 = vld [vmem:[#allocation2 + $0x2f0] sm:$0x3] }
 0x2d0   : > { %v9347_v0 = vadd.f32 %v9208_v54, %v5007_v33  ;;  %v1827_v5 = vadd.f32 %v1686_v57, %v1264_v36  ;;  %4843 = vst.msk [vmem:[%s5981_s12 + $0xd0] sm:$0xff] %vm5985_vm9, %v5297_v27  ;;  %v10514_v1 = vrot.slane %v9189_v12, 2  ;;  %v10515_v40 = vrot.slane %v9196_v56, 2 }
 0x2d1   : > { %v1688_v10 = vsel %vm1548_vm5, %v10513_v37, %v1687_v15  ;;  %v5107_v44 = vsel %vm615_vm0, %v5008_v4, 0.0  ;;  %v2410_v36 = vmul.f32 %v5802_v51, %v9021_v22  ;;  %v2583_v59 = vmul.f32 %v5822_v3, %v9127_v38 }
 0x2d2   : > { %v1828_v9 = vadd.f32 %v1688_v10, %v1265_v6  ;;  %v2185_v26 = vsel %vm2047_vm6, %v10514_v1, %v2184_v14  ;;  %v2187_v54 = vsel %vm2047_vm6, %v10515_v40, %v2186_v46  ;;  %v9363_v33 = vadd.f32 %v5107_v44, %v9228_v39  ;;  %v9371_v6 = vld [vmem:[#allocation2 + $0x2f8] sm:$0x3] }
 0x2d3   : > { %v2326_v11 = vadd.f32 %v2185_v26, %v1827_v5  ;;  %v2584_v14 = vmul.f32 %v5829_v20, %v9139_v21  ;;  %v3081_v56 = vmul.f32 %v5832_v23, %v9127_v38  ;;  %v3082_v39 = vmul.f32 %v5843_v32, %v9139_v21 }
 0x2d4   : > { %v2327_v12 = vadd.f32 %v2187_v54, %v1828_v9  ;;  %v2829_v15 = vrot.slane %v2583_v59, 1  ;;  %v3552_v46 = vmul.f32 %v9278_v2, %v5871_v63  ;;  %v3553_v27 = vmul.f32 %v5882_v35, %v9260_v19 }
 0x2d5   : > { %v2473_v62 = vadd.f32 %v2409_v43, %v2326_v11  ;;  %v2831_v4 = vrot.slane %v2584_v14, 1  ;;  %v3327_v57 = vrot.slane %v3081_v56, 2  ;;  %v3329_v37 = vrot.slane %v3082_v39, 2 }
 0x2d6   : > { %v2474_v28 = vadd.f32 %v2410_v36, %v2327_v12  ;;  %v10516_v10 = vrot.slane %v9236_v17, 1  ;;  %v3726_v44 = vmul.f32 %v5900_v58, %v9369_v61  ;;  %v3727_v43 = vmul.f32 %v10504_v45, %v9371_v6 }
 0x2d7   : > { %v4224_v9 = vmul.f32 %v5910_v8, %v9369_v61  ;;  %v10517_v1 = vrot.slane %v9240_v60, 1  ;;  %v10518_v54 = vrot.slane %v9254_v50, 2  ;;  %v10519_v11 = vrot.slane %v9258_v42, 2  ;;  %v10520_v60 = vld [vmem:[#allocation18_spill] sm:$0xff] }
 0x2d8   : > { %v2830_v5 = vsel %vm1548_vm5, %v10516_v10, %v2829_v15  ;;  %v3972_v12 = vrot.slane %v3726_v44, 1  ;;  %v3974_v14 = vrot.slane %v3727_v43, 1  ;;  %v4225_v56 = vmul.f32 %v5922_v16, %v9371_v6 }
 0x2d9   : > { %v2832_v26 = vsel %vm1548_vm5, %v10517_v1, %v2831_v4  ;;  %v2971_v40 = vadd.f32 %v2830_v5, %v2473_v62  ;;  %v3328_v17 = vsel %vm2047_vm6, %v10518_v54, %v3327_v57  ;;  %v3330_v36 = vsel %vm2047_vm6, %v10519_v11, %v3329_v37  ;;  %v10521_v62 = vld [vmem:[#allocation19_spill] sm:$0xff] }
 0x2da   : > { %v2972_v59 = vadd.f32 %v2832_v26, %v2474_v28  ;;  %v4470_v15 = vrot.slane %v4224_v9, 2  ;;  %v1266_v4 = vmul.f32 %v5717_v52, %v10520_v60  ;;  %v1267_v50 = vmul.f32 %v5720_v53, %v10521_v62 }
 0x2db   : > { %v3469_v39 = vadd.f32 %v3328_v17, %v2971_v40  ;;  %v3973_v42 = vsel %vm1548_vm5, %v3967_v31, %v3972_v12  ;;  %v10522_v28 = vrot.slane %v9292_v41, 1  ;;  %v4472_v37 = vrot.slane %v4225_v56, 2 }
 0x2dc   : > { %v3470_v10 = vadd.f32 %v3330_v36, %v2972_v59  ;;  %v10523_v44 = vrot.slane %v9302_v13, 2  ;;  %v1440_v9 = vmul.f32 %v5742_v18, %v10520_v60  ;;  %v1441_v1 = vmul.f32 %v10254_v49, %v10521_v62 }
 0x2dd   : > { %v3975_v57 = vsel %vm1548_vm5, %v10522_v28, %v3974_v14  ;;  %v3616_v5 = vadd.f32 %v3552_v46, %v3469_v39  ;;  %v10524_v48 = vrot.slane %v9309_v30, 2  ;;  %v9425_v41 = vmul.f32 %v9031_v47, %v5742_v18 }
 0x2de   : > { %v4471_v43 = vsel %vm2047_vm6, %v10523_v44, %v4470_v15  ;;  %v3617_v26 = vadd.f32 %v3553_v27, %v3470_v10  ;;  %v9429_v13 = vmul.f32 %v10254_v49, %v9021_v22  ;;  %v1689_v40 = vrot.slane %v1440_v9, 1 }
 0x2df   : > { %v4473_v31 = vsel %vm2047_vm6, %v10524_v48, %v4472_v37  ;;  %v4114_v46 = vadd.f32 %v3973_v42, %v3616_v5  ;;  %v1692_v54 = vrot.slane %v1441_v1, 1  ;;  %v1939_v17 = vmul.f32 %v5752_v25, %v10520_v60  ;;  %v10527_v48 = vld [vmem:[#allocation6_spill] sm:$0xff] }
 0x2e0   : > { %v4115_v11 = vadd.f32 %v3975_v57, %v3617_v26  ;;  %v10213_v27 = vrot.slane %v9425_v41, 1  ;;  %v10212_v30 = vrot.slane %v9429_v13, 1  ;;  %v1940_v36 = vmul.f32 %v5760_v29, %v10521_v62 }
 0x2e1   : > { %v4612_v59 = vadd.f32 %v4471_v43, %v4114_v46  ;;  %v9439_v12 = vmul.f32 %v9031_v47, %v5752_v25  ;;  %v9443_v14 = vmul.f32 %v5760_v29, %v9021_v22  ;;  %v2188_v56 = vrot.slane %v1939_v17, 2 }
 0x2e2   : > { %v4613_v39 = vadd.f32 %v4473_v31, %v4115_v11  ;;  %v1691_v15 = vsel %vm1548_vm5, %v1689_v40, %v10213_v27  ;;  %v1694_v60 = vsel %vm1548_vm5, %v1692_v54, %v10212_v30  ;;  %v2191_v62 = vrot.slane %v1940_v36, 2  ;;  %v10528_v31 = vld [vmem:[#allocation4_spill] sm:$0xff] }
 0x2e3   : > { %v9452_v10 = vadd.f32 %v9337_v7, %v4612_v59  ;;  %v5009_v42 = vmul.f32 %v4612_v59, %v4612_v59  ;;  %v1829_v28 = vadd.f32 %v1691_v15, %v1266_v4  ;;  %v1830_v57 = vadd.f32 %v1694_v60, %v1267_v50 }
 0x2e4   : > { %v5298_v37 = vpack.c.bf16 %v4613_v39, %v4612_v59  ;;  %v4939_v5 = vsel %vm615_vm0, %v4613_v39, 0.0  ;;  %v5010_v44 = vmul.f32 %v4613_v39, %v4613_v39  ;;  %v10208_v43 = vrot.slane %v9439_v12, 2 }
 0x2e5   : > { %v9457_v9 = vadd.f32 %v4939_v5, %v9344_v34  ;;  %v9460_v1 = vadd.f32 %v9347_v0, %v5009_v42  ;;  %v10207_v26 = vrot.slane %v9443_v14, 2  ;;  %v2411_v7 = vmul.f32 %v10274_v55, %v10527_v48  ;;  %v9504_v5 = vld [vmem:[#allocation2 + $0x308] sm:$0xff] }
 0x2e6   : > { %4844 = vst.msk [vmem:[%s5981_s12 + $0xd8] sm:$0xff] %vm5985_vm9, %v5298_v37  ;;  %v5109_v4 = vsel %vm615_vm0, %v5010_v44, 0.0  ;;  %v2190_v50 = vsel %vm2047_vm6, %v2188_v56, %v10208_v43  ;;  %v2412_v34 = vmul.f32 %v5802_v51, %v10528_v31  ;;  %v2585_v0 = vmul.f32 %v5822_v3, %v10527_v48  ;;  %10530 = vst [vmem:[#allocation14_spill] sm:$0xff] %v9504_v5  ;;  %v9506_v44 = vld [vmem:[#allocation2 + $0x310] sm:$0xff] }
 0x2e7   : > { %10525 = vst [vmem:[#allocation7_spill] sm:$0xff] %v9457_v9  ;;  %10526 = vst [vmem:[#allocation5_spill] sm:$0xff] %v9460_v1  ;;  %v9477_v46 = vadd.f32 %v5109_v4, %v9363_v33  ;;  %v2193_v40 = vsel %vm2047_vm6, %v2191_v62, %v10207_v26  ;;  %v2328_v54 = vadd.f32 %v2190_v50, %v1829_v28  ;;  %v9496_v62 = vld [vmem:[#allocation2 + $0x300] sm:$0xff] }
 0x2e8   : > { %v2586_v17 = vmul.f32 %v5829_v20, %v10528_v31  ;;  %v2329_v11 = vadd.f32 %v2193_v40, %v1830_v57  ;;  %v9486_v36 = vmul.f32 %v9278_v2, %v5822_v3  ;;  %v9490_v59 = vmul.f32 %v5829_v20, %v9260_v19 }
 0x2e9   : > { %10529 = vst [vmem:[#allocation15_spill] sm:$0xff] %v9477_v46  ;;  %v2833_v56 = vrot.slane %v2585_v0, 1  ;;  %v2475_v33 = vadd.f32 %v2411_v7, %v2328_v54  ;;  %v3083_v15 = vmul.f32 %v5832_v23, %v10527_v48  ;;  %v3084_v60 = vmul.f32 %v5843_v32, %v10528_v31  ;;  %v9508_v7 = vld [vmem:[#allocation2 + $0x318] sm:$0xff] }
 0x2ea   : > { %v2836_v39 = vrot.slane %v2586_v17, 1  ;;  %v2476_v42 = vadd.f32 %v2412_v34, %v2329_v11  ;;  %v10209_v28 = vrot.slane %v9486_v36, 1  ;;  %v10211_v57 = vrot.slane %v9490_v59, 1 }
 0x2eb   : > { %v9502_v37 = vmul.f32 %v9278_v2, %v5832_v23  ;;  %v9512_v4 = vmul.f32 %v5843_v32, %v9260_v19  ;;  %v3331_v50 = vrot.slane %v3083_v15, 2  ;;  %v3334_v34 = vrot.slane %v3084_v60, 2 }
 0x2ec   : > { %v3554_v0 = vmul.f32 %v5871_v63, %v9496_v62  ;;  %v2835_v40 = vsel %vm1548_vm5, %v2833_v56, %v10209_v28  ;;  %v2838_v54 = vsel %vm1548_vm5, %v2836_v39, %v10211_v57  ;;  %v3555_v11 = vmul.f32 %v5882_v35, %v9504_v5 }
 0x2ed   : > { %v10210_v17 = vrot.slane %v9502_v37, 2  ;;  %v2973_v26 = vadd.f32 %v2835_v40, %v2475_v33  ;;  %v2974_v43 = vadd.f32 %v2838_v54, %v2476_v42  ;;  %v10214_v15 = vrot.slane %v9512_v4, 2 }
 0x2ee   : > { %v3728_v60 = vmul.f32 %v5900_v58, %v9496_v62  ;;  %v3729_v28 = vmul.f32 %v10504_v45, %v9504_v5  ;;  %v9535_v39 = vmul.f32 %v5900_v58, %v9506_v44  ;;  %v9539_v33 = vmul.f32 %v10504_v45, %v9508_v7 }
 0x2ef   : > { %v3333_v56 = vsel %vm2047_vm6, %v3331_v50, %v10210_v17  ;;  %v3336_v42 = vsel %vm2047_vm6, %v3334_v34, %v10214_v15  ;;  %v4226_v50 = vmul.f32 %v5910_v8, %v9496_v62  ;;  %v4227_v1 = vmul.f32 %v5922_v16, %v9504_v5 }
 0x2f0   : > { %v3471_v40 = vadd.f32 %v3333_v56, %v2973_v26  ;;  %v3976_v54 = vrot.slane %v3728_v60, 1  ;;  %v3472_v17 = vadd.f32 %v3336_v42, %v2974_v43  ;;  %v3977_v57 = vrot.slane %v9535_v39, 1 }
 0x2f1   : > { %v3979_v30 = vrot.slane %v3729_v28, 1  ;;  %v10219_v27 = vrot.slane %v9539_v33, 1  ;;  %v9552_v9 = vmul.f32 %v5910_v8, %v9506_v44  ;;  %v9556_v26 = vmul.f32 %v5922_v16, %v9508_v7 }
 0x2f2   : > { %v3618_v46 = vadd.f32 %v3554_v0, %v3471_v40  ;;  %v3619_v34 = vadd.f32 %v3555_v11, %v3472_v17  ;;  %v3978_v43 = vsel %vm1548_vm5, %v3976_v54, %v3977_v57  ;;  %v4474_v0 = vrot.slane %v4226_v50, 2 }
 0x2f3   : > { %v3981_v28 = vsel %vm1548_vm5, %v3979_v30, %v10219_v27  ;;  %v10218_v56 = vrot.slane %v9552_v9, 2  ;;  %v4477_v42 = vrot.slane %v4227_v1, 2  ;;  %v10217_v40 = vrot.slane %v9556_v26, 2 }
 0x2f4   : > { %v4116_v60 = vadd.f32 %v3978_v43, %v3618_v46  ;;  %v4117_v15 = vadd.f32 %v3981_v28, %v3619_v34  ;;  %v1268_v5 = vmul.f32 %v9031_v47, %v5717_v52  ;;  %v1444_v17 = vmul.f32 %v5742_v18, %v9127_v38 }
 0x2f5   : > { %v4476_v11 = vsel %vm2047_vm6, %v4474_v0, %v10218_v56  ;;  %v4479_v30 = vsel %vm2047_vm6, %v4477_v42, %v10217_v40  ;;  %v1445_v1 = vmul.f32 %v10254_v49, %v9139_v21  ;;  %v1943_v46 = vmul.f32 %v5752_v25, %v9127_v38 }
 0x2f6   : > { %v9580_v54 = vadd.f32 %v4476_v11, %v4116_v60  ;;  %v9582_v47 = vadd.f32 %v4479_v30, %v4117_v15  ;;  %v1269_v50 = vmul.f32 %v5720_v53, %v9021_v22  ;;  %v1695_v34 = vrot.slane %v1444_v17, 1 }
 0x2f7   : > { %v1697_v43 = vrot.slane %v1445_v1, 1  ;;  %v1944_v28 = vmul.f32 %v5760_v29, %v9139_v21  ;;  %v2194_v0 = vrot.slane %v1943_v46, 2  ;;  %v10531_v40 = vrot.slane %v9425_v41, 1 }
 0x2f8   : > { %v5299_v42 = vpack.c.bf16 %v9582_v47, %v9580_v54  ;;  %v10532_v60 = vrot.slane %v9429_v13, 1  ;;  %v10533_v11 = vrot.slane %v9439_v12, 2  ;;  %v2413_v30 = vmul.f32 %v9278_v2, %v10274_v55 }
 0x2f9   : > { %v1696_v38 = vsel %vm1548_vm5, %v10531_v40, %v1695_v34  ;;  %v2196_v1 = vrot.slane %v1944_v28, 2  ;;  %v2589_v41 = vmul.f32 %v5822_v3, %v9369_v61  ;;  %v2590_v13 = vmul.f32 %v5829_v20, %v9371_v6  ;;  %v9608_v40 = vld [vmem:[#allocation2 + $0x320] sm:$0x3] }
 0x2fa   : > { %v1698_v15 = vsel %vm1548_vm5, %v10532_v60, %v1697_v43  ;;  %4845 = vst.msk [vmem:[%s5981_s12 + $0xe0] sm:$0xff] %vm5985_vm9, %v5299_v42  ;;  %v1831_v22 = vadd.f32 %v1696_v38, %v1268_v5  ;;  %v2195_v21 = vsel %vm2047_vm6, %v10533_v11, %v2194_v0  ;;  %v2414_v5 = vmul.f32 %v5802_v51, %v9260_v19  ;;  %v9621_v38 = vld [vmem:[#allocation2 + $0x328] sm:$0x3] }
 0x2fb   : > { %v1832_v17 = vadd.f32 %v1698_v15, %v1269_v50  ;;  %v3087_v12 = vmul.f32 %v5832_v23, %v9369_v61  ;;  %v3088_v50 = vmul.f32 %v5843_v32, %v9371_v6  ;;  %v10534_v34 = vrot.slane %v9443_v14, 2 }
 0x2fc   : > { %v2330_v46 = vadd.f32 %v2195_v21, %v1831_v22  ;;  %v2839_v28 = vrot.slane %v2589_v41, 1  ;;  %v2841_v0 = vrot.slane %v2590_v13, 1  ;;  %v3556_v42 = vmul.f32 %v5871_v63, %v9506_v44 }
 0x2fd   : > { %v2197_v43 = vsel %vm2047_vm6, %v10534_v34, %v2196_v1  ;;  %v3337_v22 = vrot.slane %v3087_v12, 2  ;;  %v3339_v11 = vrot.slane %v3088_v50, 2  ;;  %v10535_v21 = vrot.slane %v9486_v36, 1 }
 0x2fe   : > { %v2331_v60 = vadd.f32 %v2197_v43, %v1832_v17  ;;  %v2477_v15 = vadd.f32 %v2413_v30, %v2330_v46  ;;  %v10536_v27 = vrot.slane %v9490_v59, 1  ;;  %v3557_v1 = vmul.f32 %v5882_v35, %v9508_v7 }
 0x2ff   : > { %v2840_v56 = vsel %vm1548_vm5, %v10535_v21, %v2839_v28  ;;  %v3732_v41 = vmul.f32 %v5900_v58, %v9608_v40  ;;  %v10537_v17 = vrot.slane %v9502_v37, 2  ;;  %v10538_v36 = vrot.slane %v9512_v4, 2 }
 0x300   : > { %v2842_v14 = vsel %vm1548_vm5, %v10536_v27, %v2841_v0  ;;  %v2478_v13 = vadd.f32 %v2414_v5, %v2331_v60  ;;  %v2975_v34 = vadd.f32 %v2840_v56, %v2477_v15  ;;  %v3733_v59 = vmul.f32 %v10504_v45, %v9621_v38 }
 0x301   : > { %v3338_v30 = vsel %vm2047_vm6, %v10537_v17, %v3337_v22  ;;  %v3340_v46 = vsel %vm2047_vm6, %v10538_v36, %v3339_v11  ;;  %v3982_v27 = vrot.slane %v3732_v41, 1  ;;  %v4230_v12 = vmul.f32 %v5910_v8, %v9608_v40 }
 0x302   : > { %v4231_v50 = vmul.f32 %v5922_v16, %v9621_v38  ;;  %v2976_v5 = vadd.f32 %v2842_v14, %v2478_v13  ;;  %v3473_v56 = vadd.f32 %v3338_v30, %v2975_v34  ;;  %v1270_v37 = vmul.f32 %v5717_v52, %v10527_v48 }
 0x303   : > { %v1271_v4 = vmul.f32 %v5720_v53, %v10528_v31  ;;  %v3983_v43 = vsel %vm1548_vm5, %v3977_v57, %v3982_v27  ;;  %v3984_v28 = vrot.slane %v3733_v59, 1  ;;  %v4480_v0 = vrot.slane %v4230_v12, 2 }
 0x304   : > { %v4482_v60 = vrot.slane %v4231_v50, 2  ;;  %v3474_v15 = vadd.f32 %v3340_v46, %v2976_v5  ;;  %v3620_v22 = vadd.f32 %v3556_v42, %v3473_v56  ;;  %v1446_v11 = vmul.f32 %v5742_v18, %v10527_v48 }
 0x305   : > { %v1447_v21 = vmul.f32 %v10254_v49, %v10528_v31  ;;  %v10539_v14 = vrot.slane %v9539_v33, 1  ;;  %v10540_v13 = vrot.slane %v9552_v9, 2  ;;  %v10541_v57 = vrot.slane %v9556_v26, 2 }
 0x306   : > { %v9667_v42 = vmul.f32 %v9278_v2, %v5742_v18  ;;  %v3621_v17 = vadd.f32 %v3557_v1, %v3474_v15  ;;  %v4118_v30 = vadd.f32 %v3983_v43, %v3620_v22  ;;  %v9671_v36 = vmul.f32 %v10254_v49, %v9260_v19 }
 0x307   : > { %v3985_v41 = vsel %vm1548_vm5, %v10539_v14, %v3984_v28  ;;  %v4481_v39 = vsel %vm2047_vm6, %v10540_v13, %v4480_v0  ;;  %v4483_v34 = vsel %vm2047_vm6, %v10541_v57, %v4482_v60  ;;  %v1699_v33 = vrot.slane %v1446_v11, 1  ;;  %v10542_v13 = vld [vmem:[#allocation14_spill] sm:$0xff]  ;;  %v10543_v57 = vld [vmem:[#allocation7_spill] sm:$0xff] }
 0x308   : > { %v10226_v46 = vrot.slane %v9667_v42, 1  ;;  %v1702_v9 = vrot.slane %v1447_v21, 1  ;;  %v1945_v59 = vmul.f32 %v5752_v25, %v10527_v48  ;;  %v1946_v26 = vmul.f32 %v5760_v29, %v10528_v31 }
 0x309   : > { %v4119_v27 = vadd.f32 %v3985_v41, %v3621_v17  ;;  %v9678_v12 = vadd.f32 %v4481_v39, %v4118_v30  ;;  %v10225_v1 = vrot.slane %v9671_v36, 1  ;;  %v9683_v50 = vmul.f32 %v9278_v2, %v5752_v25 }
 0x30a   : > { %v1701_v5 = vsel %vm1548_vm5, %v1699_v33, %v10226_v46  ;;  %v9690_v56 = vmul.f32 %v5760_v29, %v9260_v19  ;;  %v2198_v48 = vrot.slane %v1945_v59, 2  ;;  %v2201_v43 = vrot.slane %v1946_v26, 2 }
 0x30b   : > { %v9692_v31 = vadd.f32 %v4483_v34, %v4119_v27  ;;  %v1704_v28 = vsel %vm1548_vm5, %v1702_v9, %v10225_v1  ;;  %v1833_v0 = vadd.f32 %v1701_v5, %v1270_v37  ;;  %v10224_v15 = vrot.slane %v9683_v50, 2  ;;  %v1183_v27 = vld [vmem:[#allocation2 + $0x338] sm:$0xff] }
 0x30c   : > { %v1834_v60 = vadd.f32 %v1704_v28, %v1271_v4  ;;  %v10220_v22 = vrot.slane %v9690_v56, 2  ;;  %v9701_v11 = vadd.f32 %v9452_v10, %v9580_v54  ;;  %v4941_v21 = vsel %vm615_vm0, %v9582_v47, 0.0 }
 0x30d   : > { %v5300_v14 = vpack.c.bf16 %v9692_v31, %v9678_v12  ;;  %v2415_v41 = vmul.f32 %v10274_v55, %v9496_v62  ;;  %v9711_v37 = vmul.f32 %v9580_v54, %v9580_v54  ;;  %v2200_v4 = vsel %vm2047_vm6, %v2198_v48, %v10224_v15 }
 0x30e   : > { %v2203_v10 = vsel %vm2047_vm6, %v2201_v43, %v10220_v22  ;;  %v2416_v39 = vmul.f32 %v5802_v51, %v10542_v13  ;;  %v9722_v34 = vadd.f32 %v4941_v21, %v10543_v57  ;;  %v2332_v17 = vadd.f32 %v2200_v4, %v1833_v0  ;;  %v9749_v4 = vld [vmem:[#allocation2 + $0x348] sm:$0xff] }
 0x30f   : > { %4846 = vst.msk [vmem:[%s5981_s12 + $0xe8] sm:$0xff] %vm5985_vm9, %v5300_v14  ;;  %v2333_v54 = vadd.f32 %v2203_v10, %v1834_v60  ;;  %v2591_v30 = vmul.f32 %v5822_v3, %v9496_v62  ;;  %v2592_v33 = vmul.f32 %v5829_v20, %v10542_v13  ;;  %v9733_v9 = vmul.f32 %v5822_v3, %v9506_v44 }
 0x310   : > { %v9737_v59 = vmul.f32 %v5829_v20, %v9508_v7  ;;  %v3089_v26 = vmul.f32 %v5832_v23, %v9496_v62  ;;  %v2479_v5 = vadd.f32 %v2415_v41, %v2332_v17  ;;  %v3090_v28 = vmul.f32 %v5843_v32, %v10542_v13 }
 0x311   : > { %v2480_v48 = vadd.f32 %v2416_v39, %v2333_v54  ;;  %v2843_v43 = vrot.slane %v2591_v30, 1  ;;  %v10222_v0 = vrot.slane %v9733_v9, 1  ;;  %v2846_v60 = vrot.slane %v2592_v33, 1  ;;  %v5327_v39 = vld [vmem:[#allocation2] sm:$0xff] }
 0x312   : > { %v10221_v21 = vrot.slane %v9737_v59, 1  ;;  %v9747_v14 = vmul.f32 %v5832_v23, %v9506_v44  ;;  %v9753_v62 = vmul.f32 %v5843_v32, %v9508_v7  ;;  %v3341_v41 = vrot.slane %v3089_v26, 2 }
 0x313   : > { %v3344_v10 = vrot.slane %v3090_v28, 2  ;;  %v9756_v13 = vmul.f32 %v5327_v39, %v5871_v63  ;;  %v2845_v57 = vsel %vm1548_vm5, %v2843_v43, %v10222_v0  ;;  %v3559_v30 = vmul.f32 %v5882_v35, %v1183_v27 }
 0x314   : > { %v2848_v17 = vsel %vm1548_vm5, %v2846_v60, %v10221_v21  ;;  %v10223_v54 = vrot.slane %v9747_v14, 2  ;;  %v2977_v33 = vadd.f32 %v2845_v57, %v2479_v5  ;;  %v3345_v26 = vrot.slane %v9753_v62, 2 }
 0x315   : > { %v2978_v22 = vadd.f32 %v2848_v17, %v2480_v48  ;;  %v9768_v28 = vmul.f32 %v5327_v39, %v5900_v58  ;;  %v3735_v43 = vmul.f32 %v10504_v45, %v1183_v27  ;;  %v9776_v60 = vmul.f32 %v10504_v45, %v9749_v4 }
 0x316   : > { %v3343_v63 = vsel %vm2047_vm6, %v3341_v41, %v10223_v54  ;;  %v9779_v21 = vmul.f32 %v5327_v39, %v5910_v8  ;;  %v3346_v5 = vsel %vm2047_vm6, %v3344_v10, %v3345_v26  ;;  %v4233_v17 = vmul.f32 %v5922_v16, %v1183_v27 }
 0x317   : > { %v3475_v48 = vadd.f32 %v3343_v63, %v2977_v33  ;;  %v3986_v57 = vrot.slane %v9768_v28, 1  ;;  %v3476_v0 = vadd.f32 %v3346_v5, %v2978_v22  ;;  %v3989_v41 = vrot.slane %v3735_v43, 1 }
 0x318   : > { %v3990_v54 = vrot.slane %v9776_v60, 1  ;;  %v9789_v15 = vmul.f32 %v5922_v16, %v9749_v4  ;;  %v4484_v1 = vrot.slane %v9779_v21, 2  ;;  %v4487_v46 = vrot.slane %v4233_v17, 2 }
 0x319   : > { %v3622_v39 = vadd.f32 %v9756_v13, %v3475_v48  ;;  %v5012_v10 = vmul.f32 %v9582_v47, %v9582_v47  ;;  %v3623_v33 = vadd.f32 %v3559_v30, %v3476_v0  ;;  %v1272_v43 = vmul.f32 %v9278_v2, %v5717_v52 }
 0x31a   : > { %v3991_v22 = vsel %vm1548_vm5, %v3989_v41, %v3990_v54  ;;  %v4488_v27 = vrot.slane %v9789_v15, 2  ;;  %v1450_v5 = vmul.f32 %v5742_v18, %v9369_v61  ;;  %v1451_v0 = vmul.f32 %v10254_v49, %v9371_v6  ;;  %v10544_v41 = vld [vmem:[#allocation5_spill] sm:$0xff] }
 0x31b   : > { %v4120_v63 = vadd.f32 %v3986_v57, %v3622_v39  ;;  %v4121_v48 = vadd.f32 %v3991_v22, %v3623_v33  ;;  %v1949_v30 = vmul.f32 %v5752_v25, %v9369_v61  ;;  %v1273_v52 = vmul.f32 %v5720_v53, %v9260_v19 }
 0x31c   : > { %v4489_v47 = vsel %vm2047_vm6, %v4487_v46, %v4488_v27  ;;  %v1705_v2 = vrot.slane %v1450_v5, 1  ;;  %v1950_v18 = vmul.f32 %v5760_v29, %v9371_v6  ;;  %v5046_v46 = vadd.f32 %v10544_v41, %v9711_v37  ;;  %v1186_v5 = vld [vmem:[#allocation2 + $0x350] sm:$0x3] }
 0x31d   : > { %v9814_v17 = vadd.f32 %v4484_v1, %v4120_v63  ;;  %v4619_v39 = vadd.f32 %v4489_v47, %v4121_v48  ;;  %v1707_v49 = vrot.slane %v1451_v0, 1  ;;  %v2204_v33 = vrot.slane %v1949_v30, 2  ;;  %v1187_v30 = vld [vmem:[#allocation2 + $0x358] sm:$0x3] }
 0x31e   : > { %v5111_v25 = vsel %vm615_vm0, %v5012_v10, 0.0  ;;  %v10545_v61 = vrot.slane %v9667_v42, 1  ;;  %v2206_v63 = vrot.slane %v1950_v18, 2  ;;  %v2595_v53 = vmul.f32 %v5822_v3, %v9608_v40 }
 0x31f   : > { %v5014_v29 = vmul.f32 %v9692_v31, %v9692_v31  ;;  %v5301_v19 = vpack.c.bf16 %v4619_v39, %v9814_v17  ;;  %v10546_v6 = vrot.slane %v9671_v36, 1  ;;  %v2417_v10 = vmul.f32 %v10274_v55, %v9506_v44 }
 0x320   : > { %v1706_v22 = vsel %vm1548_vm5, %v10545_v61, %v1705_v2  ;;  %v10547_v47 = vrot.slane %v9683_v50, 2  ;;  %v2418_v3 = vmul.f32 %v5802_v51, %v9508_v7  ;;  %v10548_v36 = vrot.slane %v9690_v56, 2 }
 0x321   : > { %v1708_v37 = vsel %vm1548_vm5, %v10546_v6, %v1707_v49  ;;  %v1835_v42 = vadd.f32 %v1706_v22, %v1272_v43  ;;  %4847 = vst.msk [vmem:[%s5981_s12 + $0xf0] sm:$0xff] %vm5985_vm9, %v5301_v19  ;;  %v2596_v55 = vmul.f32 %v5829_v20, %v9621_v38  ;;  %v2849_v44 = vrot.slane %v2595_v53, 1  ;;  %v10552_v6 = vld [vmem:[#allocation15_spill] sm:$0xff] }
 0x322   : > { %v1836_v48 = vadd.f32 %v1708_v37, %v1273_v52  ;;  %v2205_v0 = vsel %vm2047_vm6, %v10547_v47, %v2204_v33  ;;  %v2207_v2 = vsel %vm2047_vm6, %v10548_v36, %v2206_v63  ;;  %v3093_v50 = vmul.f32 %v5832_v23, %v9608_v40 }
 0x323   : > { %v2334_v43 = vadd.f32 %v2205_v0, %v1835_v42  ;;  %v3094_v51 = vmul.f32 %v5843_v32, %v9621_v38  ;;  %v3561_v7 = vmul.f32 %v5882_v35, %v9749_v4  ;;  %v10549_v18 = vrot.slane %v9733_v9, 1 }
 0x324   : > { %v2335_v52 = vadd.f32 %v2207_v2, %v1836_v48  ;;  %v2851_v41 = vrot.slane %v2596_v55, 1  ;;  %v3347_v49 = vrot.slane %v3093_v50, 2  ;;  %v3738_v20 = vmul.f32 %v5900_v58, %v1186_v5 }
 0x325   : > { %v2850_v56 = vsel %vm1548_vm5, %v10549_v18, %v2849_v44  ;;  %v2481_v33 = vadd.f32 %v2417_v10, %v2334_v43  ;;  %v3349_v22 = vrot.slane %v3094_v51, 2  ;;  %v3739_v23 = vmul.f32 %v10504_v45, %v1187_v30 }
 0x326   : > { %v2482_v61 = vadd.f32 %v2418_v3, %v2335_v52  ;;  %v10550_v40 = vrot.slane %v9737_v59, 1  ;;  %v10551_v38 = vrot.slane %v9747_v14, 2  ;;  %v3992_v9 = vrot.slane %v3738_v20, 1 }
 0x327   : > { %v4236_v4 = vmul.f32 %v5910_v8, %v1186_v5  ;;  %v2979_v63 = vadd.f32 %v2850_v56, %v2481_v33  ;;  %v3350_v58 = vsel %vm2047_vm6, %v3345_v26, %v3349_v22  ;;  %v3994_v19 = vrot.slane %v3739_v23, 1 }
 0x328   : > { %v2852_v32 = vsel %vm1548_vm5, %v10550_v40, %v2851_v41  ;;  %v3348_v35 = vsel %vm2047_vm6, %v10551_v38, %v3347_v49  ;;  %v5112_v45 = vadd.f32 %v5111_v25, %v10552_v6  ;;  %v4877_v59 = vadd.f32 %v9701_v11, %v9678_v12 }
 0x329   : > { %v2980_v53 = vadd.f32 %v2852_v32, %v2482_v61  ;;  %v4237_v37 = vmul.f32 %v5922_v16, %v1187_v30  ;;  %v4490_v14 = vrot.slane %v4236_v4, 2  ;;  %v4943_v10 = vsel %vm615_vm0, %v9692_v31, 0.0 }
 0x32a   : > { %v5013_v8 = vmul.f32 %v9678_v12, %v9678_v12  ;;  %v3477_v5 = vadd.f32 %v3348_v35, %v2979_v63  ;;  %v4944_v62 = vadd.f32 %v4943_v10, %v9722_v34  ;;  %v3993_v26 = vsel %vm1548_vm5, %v3986_v57, %v3992_v9 }
 0x32b   : > { %v3478_v42 = vadd.f32 %v3350_v58, %v2980_v53  ;;  %v3995_v11 = vsel %vm1548_vm5, %v3990_v54, %v3994_v19  ;;  %v4492_v16 = vrot.slane %v4237_v37, 2  ;;  %v5113_v25 = vsel %vm615_vm0, %v5014_v29, 0.0  ;;  %v10553_v53 = vld [vmem:[#allocation3_spill] sm:$0xff] }
 0x32c   : > { %v5016_v48 = vmul.f32 %v4619_v39, %v4619_v39  ;;  %v3624_v31 = vadd.f32 %v9756_v13, %v3477_v5  ;;  %v4491_v12 = vsel %vm2047_vm6, %v4484_v1, %v4490_v14  ;;  %v5047_v28 = vadd.f32 %v5046_v46, %v5013_v8 }
 0x32d   : > { %v3625_v47 = vadd.f32 %v3561_v7, %v3478_v42  ;;  %v4493_v34 = vsel %vm2047_vm6, %v4488_v27, %v4492_v16  ;;  %v5114_v57 = vadd.f32 %v5113_v25, %v5112_v45  ;;  %v4945_v60 = vsel %vm615_vm0, %v4619_v39, 0.0 }
 0x32e   : > { %v4122_v54 = vadd.f32 %v3993_v26, %v3624_v31  ;;  %v4878_v29 = vadd.f32 %v4877_v59, %v9814_v17  ;;  %v4946_v3 = vadd.f32 %v4945_v60, %v4944_v62  ;;  %v5015_v13 = vmul.f32 %v9814_v17, %v9814_v17 }
 0x32f   : > { %v4123_v0 = vadd.f32 %v3995_v11, %v3625_v47  ;;  %v5115_v1 = vsel %vm615_vm0, %v5016_v48, 0.0  ;;  %vm5128_vm10 = vcmp.eq.s32.totalorder %v10553_v53, 1  ;;  %vm5127_vm11 = vcmp.eq.s32.totalorder %v10553_v53, 0 }
 0x330   : > { %v4620_v21 = vadd.f32 %v4491_v12, %v4122_v54  ;;  %v5048_v15 = vadd.f32 %v5047_v28, %v5015_v13  ;;  %v5116_v36 = vadd.f32 %v5115_v1, %v5114_v57 }
 0x331   : > { %v4621_v30 = vadd.f32 %v4493_v34, %v4123_v0 }
 0x332   : > { %v4879_v39 = vadd.f32 %v4878_v29, %v4620_v21  ;;  %v5017_v55 = vmul.f32 %v4620_v21, %v4620_v21 }
 0x333   : > { %v5302_v27 = vpack.c.bf16 %v4621_v30, %v4620_v21  ;;  %v4947_v46 = vsel %vm615_vm0, %v4621_v30, 0.0  ;;  %v5018_v2 = vmul.f32 %v4621_v30, %v4621_v30 }
 0x334   : > { %v4948_v44 = vadd.f32 %v4947_v46, %v4946_v3  ;;  %v4880_v50 = vrot.slane %v4879_v39, 4  ;;  %v5049_v17 = vadd.f32 %v5048_v15, %v5017_v55 }
 0x335   : > { %4848 = vst.msk [vmem:[%s5981_s12 + $0xf8] sm:$0xff] %vm5985_vm9, %v5302_v27  ;;  %v5117_v43 = vsel %vm615_vm0, %v5018_v2, 0.0 }
 0x336   : > { %v4949_v52 = vrot.slane %v4948_v44, 4  ;;  %v5118_v51 = vadd.f32 %v5117_v43, %v5116_v36  ;;  %v4881_v7 = vadd.f32 %v4880_v50, %v4879_v39  ;;  %v5050_v18 = vrot.slane %v5049_v17, 4 }
 0x338   : > { %v4950_v56 = vadd.f32 %v4949_v52, %v4948_v44  ;;  %v5119_v41 = vrot.slane %v5118_v51, 4  ;;  %v4882_v49 = vrot.slane %v4881_v7, 2  ;;  %v5051_v20 = vadd.f32 %v5050_v18, %v5049_v17 }
 0x33a   : > { %v4951_v33 = vrot.slane %v4950_v56, 2  ;;  %v5120_v61 = vadd.f32 %v5119_v41, %v5118_v51  ;;  %v4883_v22 = vadd.f32 %v4882_v49, %v4881_v7  ;;  %v5052_v23 = vrot.slane %v5051_v20, 2 }
 0x33c   : > { %v4952_v40 = vadd.f32 %v4951_v33, %v4950_v56  ;;  %v5121_v24 = vrot.slane %v5120_v61, 2  ;;  %v5053_v32 = vadd.f32 %v5052_v23, %v5051_v20  ;;  %v4884_v35 = vrot.slane %v4883_v22, 1 }
 0x33e   : > { %v5122_v38 = vadd.f32 %v5121_v24, %v5120_v61  ;;  %v4953_v9 = vrot.slane %v4952_v40, 1  ;;  %v5054_v4 = vrot.slane %v5053_v32, 1  ;;  %v4885_v6 = vadd.f32 %v4884_v35, %v4883_v22 }
 0x340   : > { %v5123_v63 = vrot.slane %v5122_v38, 1  ;;  %v5055_v58 = vadd.f32 %v5054_v4, %v5053_v32  ;;  %v4954_v45 = vadd.f32 %v4953_v9, %v4952_v40 }
 0x342   : > { %v5124_v19 = vadd.f32 %v5123_v63, %v5122_v38  ;;  %v5129_v59 = vsel %vm5128_vm10, %v5055_v58, 0.0 }
 0x343   : > { %v5131_v14 = vsel %vm5127_vm11, %v4885_v6, %v5129_v59 }
 0x344   : > { %v5130_v37 = vsel %vm5128_vm10, %v5124_v19, 0.0  ;;  %5133 = vst [vmem:[%s237_s16] sm:$0xff] %v5131_v14 }
 0x345   : > { %v5132_v10 = vsel %vm5127_vm11, %v4954_v45, %v5130_v37 }
 0x346   : > { %5134 = vst.msk [vmem:[%s237_s16 + $0x8] sm:$0xff] %vm615_vm0, %v5132_v10 }
 0x347 PF: > { %s16_s18 = sadd.s32 1, %s5334_s18  }
 0x348   : > { %p13_p4 = scmp.ge.s32.totalorder %s16_s18, 4  }
 0x34a   :  { %15 = sbr.rel (!%p13_p4) target bundleno = 1 (0x1), region = 79 }

</bundles_post_ra>
